<compile_context>
chip_gen: v7x
topology: tpu7x:2x2x1
jax: 0.10.0
libtpu: 0.0.40
codegen_flags: <defaults>
</compile_context>

<pallas_src>
import functools

import jax
import jax.numpy as jnp
from jax.experimental import pallas as pl
from jax.experimental.pallas import tpu as pltpu


LANES = 128                                   # class dim padded to a full lane width
_RESIDENT_BUDGET_BYTES = 16 * 1024 * 1024     # conservative resident-A threshold
_RESIDENT_VMEM_LIMIT = 48 * 1024 * 1024       # safe on v7x (64 MiB physical)
_STREAMED_VMEM_LIMIT = 40 * 1024 * 1024


def _round_up(n, m):
    return ((n + m - 1) // m) * m


# ----------------------------------------------------------------------------
# Path A: adjacency resident in VMEM, single grid step, pl.loop over the K hops
# ----------------------------------------------------------------------------
def _resident_gprgnn_kernel(temp_ref, x_ref, w1_ref, b1_ref, w2_ref, b2_ref,
                            adj_ref, out_ref, z_scr, hid_scr, *, K, C):
    # ---- fused 2-layer MLP (bf16 MXU inputs, f32 accumulation) --------------
    h = jnp.dot(x_ref[...], w1_ref[...], preferred_element_type=jnp.float32)
    h = jnp.maximum(h + b1_ref[...], 0.0)
    z = jnp.dot(h.astype(jnp.bfloat16), w2_ref[...],
                preferred_element_type=jnp.float32) + b2_ref[...]
    z_scr[...] = z                                  # f32 state, never hits HBM
    hid_scr[...] = temp_ref[0] * z

    # ---- K GPR hops with the full normalized adjacency resident in VMEM -----
    @pl.loop(0, K, unroll=True)
    def _(k):
        z_new = jnp.dot(adj_ref[...], z_scr[...].astype(jnp.bfloat16),
                        preferred_element_type=jnp.float32)
        hid_scr[...] = hid_scr[...] + temp_ref[k + 1] * z_new
        z_scr[...] = z_new

    # ---- masked log_softmax over the real C classes (lane padding excluded) -
    hid = hid_scr[...]
    lane = jax.lax.broadcasted_iota(jnp.int32, hid.shape, 1)
    valid = lane < C
    masked = jnp.where(valid, hid, -jnp.inf)
    m = jnp.max(masked, axis=1, keepdims=True)
    s = masked - m
    e = jnp.where(valid, jnp.exp(s), 0.0)
    lse = jnp.log(jnp.sum(e, axis=1, keepdims=True))
    out_ref[...] = jnp.where(valid, s - lse, 0.0).astype(out_ref.dtype)


def _run_resident(temp, x_p, w1, b1, w2, b2, adj_p, *, N_pad, F, H, CP, K, C):
    kernel = functools.partial(_resident_gprgnn_kernel, K=K, C=C)
    return pl.pallas_call(
        kernel,
        out_shape=jax.ShapeDtypeStruct((N_pad, CP), jnp.float32),
        grid_spec=pltpu.PrefetchScalarGridSpec(
            num_scalar_prefetch=0,
            grid=(1,),
            in_specs=[
                pl.BlockSpec(memory_space=pltpu.MemorySpace.SMEM),   # gammas
                pl.BlockSpec((N_pad, F), lambda i: (0, 0)),          # x (full)
                pl.BlockSpec((F, H), lambda i: (0, 0)),              # w1
                pl.BlockSpec((1, H), lambda i: (0, 0)),              # b1
                pl.BlockSpec((H, CP), lambda i: (0, 0)),             # w2 (lane-padded)
                pl.BlockSpec((1, CP), lambda i: (0, 0)),             # b2 (lane-padded)
                pl.BlockSpec((N_pad, N_pad), lambda i: (0, 0)),      # A (resident)
            ],
            out_specs=pl.BlockSpec((N_pad, CP), lambda i: (0, 0)),
            scratch_shapes=[
                pltpu.VMEM((N_pad, CP), jnp.float32),   # z^(k) (f32)
                pltpu.VMEM((N_pad, CP), jnp.float32),   # hidden accumulator
            ],
        ),
        compiler_params=pltpu.CompilerParams(
            dimension_semantics=("arbitrary",),
            vmem_limit_bytes=_RESIDENT_VMEM_LIMIT,
        ),
    )(temp, x_p, w1, b1, w2, b2, adj_p)


# ----------------------------------------------------------------------------
# Path B: streamed adjacency, grid = (K+1, n_row_tiles), gated index_maps
# ----------------------------------------------------------------------------
def _streamed_gprgnn_kernel(temp_ref, x_ref, w1_ref, b1_ref, w2_ref, b2_ref,
                            adj_ref, out_ref, z_scr, hid_scr, *, K, C, TR, N_pad):
    k = pl.program_id(0)                 # GPR step: 0 = MLP, 1..K = propagation
    i = pl.program_id(1)                 # node row tile
    row0 = pl.multiple_of(i * TR, TR)

    # ---- step 0: fused 2-layer MLP; z^(0) kept in VMEM scratch (slot 0) -----
    @pl.when(k == 0)
    def _mlp():
        h = jnp.dot(x_ref[...], w1_ref[...], preferred_element_type=jnp.float32)
        h = jnp.maximum(h + b1_ref[...], 0.0)
        z = jnp.dot(h.astype(jnp.bfloat16), w2_ref[...],
                    preferred_element_type=jnp.float32) + b2_ref[...]
        z_scr[pl.ds(row0, TR), :] = z
        hid_scr[pl.ds(row0, TR), :] = temp_ref[0] * z

    # ---- steps 1..K: z <- A_norm @ z ; hidden += temp[k] * z ----------------
    @pl.when(k > 0)
    def _prop():
        cur = jax.lax.rem(k, 2)
        prev = 1 - cur
        z_prev = z_scr[pl.ds(pl.multiple_of(prev * N_pad, TR), N_pad), :]
        z_new = jnp.dot(adj_ref[...], z_prev.astype(jnp.bfloat16),
                        preferred_element_type=jnp.float32)
        hid_scr[pl.ds(row0, TR), :] = (hid_scr[pl.ds(row0, TR), :]
                                       + temp_ref[k] * z_new)
        z_scr[pl.ds(pl.multiple_of(cur * N_pad + row0, TR), TR), :] = z_new

    # ---- final step: log_softmax over the real C classes (mask lane padding)
    @pl.when(k == K)
    def _finalize():
        hid = hid_scr[pl.ds(row0, TR), :]
        lane = jax.lax.broadcasted_iota(jnp.int32, hid.shape, 1)
        valid = lane < C
        masked = jnp.where(valid, hid, -jnp.inf)
        m = jnp.max(masked, axis=1, keepdims=True)
        s = masked - m
        e = jnp.where(valid, jnp.exp(s), 0.0)
        lse = jnp.log(jnp.sum(e, axis=1, keepdims=True))
        out_ref[...] = jnp.where(valid, s - lse, 0.0).astype(out_ref.dtype)


def _run_streamed(temp, x_p, w1, b1, w2, b2, adj_p, *, N_pad, F, H, CP, K, C, TR):
    n_tiles = N_pad // TR
    kernel = functools.partial(_streamed_gprgnn_kernel, K=K, C=C, TR=TR, N_pad=N_pad)
    return pl.pallas_call(
        kernel,
        out_shape=jax.ShapeDtypeStruct((N_pad, CP), jnp.float32),
        grid_spec=pltpu.PrefetchScalarGridSpec(
            num_scalar_prefetch=0,
            grid=(K + 1, n_tiles),
            in_specs=[
                pl.BlockSpec(memory_space=pltpu.MemorySpace.SMEM),    # gammas
                # x row tiles: only fetched during the k==0 MLP sweep
                pl.BlockSpec((TR, F), lambda k, i: (i * (k == 0), 0)),
                pl.BlockSpec((F, H), lambda k, i: (0, 0)),            # w1
                pl.BlockSpec((1, H), lambda k, i: (0, 0)),            # b1
                pl.BlockSpec((H, CP), lambda k, i: (0, 0)),           # w2
                pl.BlockSpec((1, CP), lambda k, i: (0, 0)),           # b2
                # adjacency row tiles: NOT streamed during the k==0 MLP sweep
                pl.BlockSpec((TR, N_pad), lambda k, i: (i * (k > 0), 0)),
            ],
            # output blocks: only written back during the final k==K sweep
            out_specs=pl.BlockSpec((TR, CP), lambda k, i: (i * (k == K), 0)),
            scratch_shapes=[
                pltpu.VMEM((2 * N_pad, CP), jnp.float32),   # ping-pong z (f32)
                pltpu.VMEM((N_pad, CP), jnp.float32),       # hidden accumulator
            ],
        ),
        compiler_params=pltpu.CompilerParams(
            # Step k needs ALL row tiles of z^(k-1) (shared VMEM scratch), so
            # both axes must stay sequential.
            dimension_semantics=("arbitrary", "arbitrary"),
            vmem_limit_bytes=_STREAMED_VMEM_LIMIT,
        ),
    )(temp, x_p, w1, b1, w2, b2, adj_p)


# ----------------------------------------------------------------------------
# Wrapper: pad / cast, choose resident vs streamed path, slice off padding
# ----------------------------------------------------------------------------
def gprgnn_forward(x, adj_norm, params, K, *, tile_rows=256, force_streamed=False):
    """Eval-mode GPRGNN forward: log_softmax(GPR_prop(lin2(relu(lin1(x)))))."""
    N, F = x.shape
    H = params["w1"].shape[1]
    C = params["w2"].shape[1]
    CP = LANES
    f32, bf16 = jnp.float32, jnp.bfloat16

    # Can the whole bf16 adjacency (+ x, output, z/hidden scratch) stay in VMEM?
    n_res = _round_up(N, 128)
    resident_bytes = (n_res * n_res * 2            # adjacency (bf16)
                      + n_res * F * 2              # x (bf16)
                      + n_res * CP * 4             # output (f32)
                      + 2 * n_res * CP * 4)        # z + hidden scratch (f32)
    use_resident = (not force_streamed) and resident_bytes <= _RESIDENT_BUDGET_BYTES

    N_pad = n_res if use_resident else _round_up(N, tile_rows)

    # bf16 operands for the MXU; f32 biases / gammas for the VPU path.
    x_p = jnp.zeros((N_pad, F), bf16).at[:N].set(x.astype(bf16))
    adj_p = jnp.zeros((N_pad, N_pad), bf16).at[:N, :N].set(adj_norm.astype(bf16))
    w1 = params["w1"].astype(bf16)
    b1 = params["b1"].astype(f32).reshape(1, H)
    w2 = jnp.zeros((H, CP), bf16).at[:, :C].set(params["w2"].astype(bf16))
    b2 = jnp.zeros((1, CP), f32).at[0, :C].set(params["b2"].astype(f32))
    temp = params["temp"].astype(f32)

    if use_resident:
        out = _run_resident(temp, x_p, w1, b1, w2, b2, adj_p,
                            N_pad=N_pad, F=F, H=H, CP=CP, K=K, C=C)
    else:
        out = _run_streamed(temp, x_p, w1, b1, w2, b2, adj_p,
                            N_pad=N_pad, F=F, H=H, CP=CP, K=K, C=C, TR=tile_rows)
    return out[:N, :C]


# ----------------------------------------------------------------------------
# Glue: symmetrically-normalized dense adjacency (gcn_norm with self-loops)
# ----------------------------------------------------------------------------
def build_gcn_norm_adj(edge_index, num_nodes):
    row, col = edge_index
    a = jnp.zeros((num_nodes, num_nodes), jnp.float32)
    a = a.at[row, col].set(1.0)
    a = jnp.maximum(a, a.T)                        # symmetrize
    a = a + jnp.eye(num_nodes, dtype=jnp.float32)  # add self-loops
    deg = jnp.sum(a, axis=1)
    dinv = jax.lax.rsqrt(deg)
    return dinv[:, None] * a * dinv[None, :]


if __name__ == "__main__":
    # Small, deterministic problem sizes
    N = 512            # num graph nodes
    IN_FEATS = 64      # in_features
    NHIDDEN = 32       # args.nhidden
    NCLASS = 8         # class_num
    K = 4              # args.nlayers
    ALPHA = 0.1        # args.alpha, Init='PPR'

    key = jax.random.PRNGKey(0)
    kx, ke, kw1, kb1, kw2, kb2 = jax.random.split(key, 6)

    # Node features
    x = jax.random.normal(kx, (N, IN_FEATS), jnp.float32)

    # Random edge_index (source, target); symmetrized when building the adjacency
    num_edges = 2048
    edge_index = jax.random.randint(ke, (2, num_edges), 0, N, jnp.int32)
    adj_norm = build_gcn_norm_adj(edge_index, N)

    # Deterministic parameter init (Linear weights stored as [in, out] = W^T)
    params = {
        "w1": jax.random.normal(kw1, (IN_FEATS, NHIDDEN), jnp.float32) * 0.1,
        "b1": jax.random.normal(kb1, (NHIDDEN,), jnp.float32) * 0.1,
        "w2": jax.random.normal(kw2, (NHIDDEN, NCLASS), jnp.float32) * 0.1,
        "b2": jax.random.normal(kb2, (NCLASS,), jnp.float32) * 0.1,
        # PPR init for GPR gammas: temp[k] = alpha*(1-alpha)^k, temp[K] = (1-alpha)^K
        "temp": jnp.concatenate(
            [
                ALPHA * (1.0 - ALPHA) ** jnp.arange(K, dtype=jnp.float32),
                jnp.array([(1.0 - ALPHA) ** K], jnp.float32),
            ]
        ),
    }

    # TODO(synk): training-time dropout (F.dropout with p=dropout/dprate) is a no-op
    # in eval mode and is intentionally not implemented in the kernel.

    # Resident-adjacency path (auto-selected at this size)
    out_res = jax.block_until_ready(gprgnn_forward(x, adj_norm, params, K))
    # Streamed fallback path (forced, TR=256) — exercised for correctness too
    out_str = jax.block_until_ready(
        gprgnn_forward(x, adj_norm, params, K, tile_rows=256, force_streamed=True))

    # Pure-JAX reference mirroring the kernel numerics
    # (bf16 MXU inputs, f32 accumulation, f32 z between hops)
    bf16 = jnp.bfloat16
    xb = x.astype(bf16)
    w1b = params["w1"].astype(bf16)
    w2b = params["w2"].astype(bf16)
    adjb = adj_norm.astype(bf16)
    h_ref = jnp.maximum(
        jnp.dot(xb, w1b, preferred_element_type=jnp.float32) + params["b1"], 0.0)
    z_ref = jnp.dot(h_ref.astype(bf16), w2b,
                    preferred_element_type=jnp.float32) + params["b2"]
    hid = params["temp"][0] * z_ref
    zk = z_ref
    for k in range(K):
        zk = jnp.dot(adjb, zk.astype(bf16), preferred_element_type=jnp.float32)
        hid = hid + params["temp"][k + 1] * zk
    ref = jax.nn.log_softmax(hid, axis=1)

    assert out_res.shape == (N, NCLASS)
    assert out_str.shape == (N, NCLASS)
    assert jnp.allclose(out_res, ref, atol=1e-3, rtol=1e-3), "resident path mismatch"
    assert jnp.allclose(out_str, ref, atol=1e-3, rtol=1e-3), "streamed path mismatch"
    print("KERNEL_OK")
</pallas_src>

<mosaic_0001>
module attributes {stable_mosaic.version = 11 : i64} {
  func.func @_resident_gprgnn_kernel(%arg0: i32, %arg1: memref<5xf32, #tpu.memory_space<smem>>, %arg2: memref<512x64xbf16, #tpu.memory_space<vmem>>, %arg3: memref<64x32xbf16, #tpu.memory_space<vmem>>, %arg4: memref<1x32xf32, #tpu.memory_space<vmem>>, %arg5: memref<32x128xbf16, #tpu.memory_space<vmem>>, %arg6: memref<1x128xf32, #tpu.memory_space<vmem>>, %arg7: memref<512x512xbf16, #tpu.memory_space<vmem>>, %arg8: memref<512x128xf32, #tpu.memory_space<vmem>>, %arg9: memref<512x128xf32, #tpu.memory_space<vmem>>, %arg10: memref<512x128xf32, #tpu.memory_space<vmem>>) attributes {dimension_semantics = [#tpu.dimension_semantics<arbitrary>], iteration_bounds = array<i64: 1>, scalar_prefetch = 0 : i64, scratch_operands = 2 : i64, tpu.core_type = #tpu.core_type<tc>, window_params = [{transform_indices = @transform_0, window_bounds = array<i64: 5>}, {pipeline_mode = #tpu.pipeline_mode<synchronous>, transform_indices = @transform_1, window_bounds = array<i64: 512, 64>}, {pipeline_mode = #tpu.pipeline_mode<synchronous>, transform_indices = @transform_2, window_bounds = array<i64: 64, 32>}, {pipeline_mode = #tpu.pipeline_mode<synchronous>, transform_indices = @transform_3, window_bounds = array<i64: 1, 32>}, {pipeline_mode = #tpu.pipeline_mode<synchronous>, transform_indices = @transform_4, window_bounds = array<i64: 32, 128>}, {pipeline_mode = #tpu.pipeline_mode<synchronous>, transform_indices = @transform_5, window_bounds = array<i64: 1, 128>}, {pipeline_mode = #tpu.pipeline_mode<synchronous>, transform_indices = @transform_6, window_bounds = array<i64: 512, 512>}, {pipeline_mode = #tpu.pipeline_mode<synchronous>, transform_indices = @transform_7, window_bounds = array<i64: 512, 128>}]} {
    %c0 = arith.constant 0 : index
    %c0_0 = arith.constant 0 : index
    %0 = vector.load %arg2[%c0, %c0_0] : memref<512x64xbf16, #tpu.memory_space<vmem>>, vector<512x64xbf16>
    %c0_1 = arith.constant 0 : index
    %c0_2 = arith.constant 0 : index
    %1 = vector.load %arg3[%c0_1, %c0_2] : memref<64x32xbf16, #tpu.memory_space<vmem>>, vector<64x32xbf16>
    %cst = arith.constant dense<0.000000e+00> : vector<512x32xf32>
    %2 = tpu.matmul %0, %1, %cst {dimension_numbers = #tpu.dot_dimension_numbers<[1], [0], [0], [1], [0, 0, 1, 1], [], []>} : vector<512x64xbf16>, vector<64x32xbf16>, vector<512x32xf32> -> vector<512x32xf32>
    %c0_3 = arith.constant 0 : index
    %c0_4 = arith.constant 0 : index
    %3 = vector.load %arg4[%c0_3, %c0_4] : memref<1x32xf32, #tpu.memory_space<vmem>>, vector<1x32xf32>
    %4 = vector.broadcast %3 : vector<1x32xf32> to vector<512x32xf32>
    %5 = arith.addf %2, %4 : vector<512x32xf32>
    %cst_5 = arith.constant 0.000000e+00 : f32
    %6 = vector.broadcast %cst_5 : f32 to vector<512x32xf32>
    %7 = arith.maximumf %5, %6 : vector<512x32xf32>
    %8 = arith.truncf %7 : vector<512x32xf32> to vector<512x32xbf16>
    %c0_6 = arith.constant 0 : index
    %c0_7 = arith.constant 0 : index
    %9 = vector.load %arg5[%c0_6, %c0_7] : memref<32x128xbf16, #tpu.memory_space<vmem>>, vector<32x128xbf16>
    %cst_8 = arith.constant dense<0.000000e+00> : vector<512x128xf32>
    %10 = tpu.matmul %8, %9, %cst_8 {dimension_numbers = #tpu.dot_dimension_numbers<[1], [0], [0], [1], [0, 0, 1, 1], [], []>} : vector<512x32xbf16>, vector<32x128xbf16>, vector<512x128xf32> -> vector<512x128xf32>
    %c0_9 = arith.constant 0 : index
    %c0_10 = arith.constant 0 : index
    %11 = vector.load %arg6[%c0_9, %c0_10] : memref<1x128xf32, #tpu.memory_space<vmem>>, vector<1x128xf32>
    %12 = vector.broadcast %11 : vector<1x128xf32> to vector<512x128xf32>
    %13 = arith.addf %10, %12 : vector<512x128xf32>
    %c0_11 = arith.constant 0 : index
    %c0_12 = arith.constant 0 : index
    %14 = vector.load %arg9[%c0_11, %c0_12] : memref<512x128xf32, #tpu.memory_space<vmem>>, vector<512x128xf32>
    tpu.vector_store %arg9[%c0_11, %c0_12], %13 {strides = array<i32>} : memref<512x128xf32, #tpu.memory_space<vmem>>, vector<512x128xf32>,
    %c0_13 = arith.constant 0 : index
    %15 = memref.load %arg1[%c0_13] : memref<5xf32, #tpu.memory_space<smem>>
    %16 = vector.broadcast %15 : f32 to vector<512x128xf32>
    %17 = arith.mulf %16, %13 : vector<512x128xf32>
    %c0_14 = arith.constant 0 : index
    %c0_15 = arith.constant 0 : index
    %18 = vector.load %arg10[%c0_14, %c0_15] : memref<512x128xf32, #tpu.memory_space<vmem>>, vector<512x128xf32>
    tpu.vector_store %arg10[%c0_14, %c0_15], %17 {strides = array<i32>} : memref<512x128xf32, #tpu.memory_space<vmem>>, vector<512x128xf32>,
    %c0_i32 = arith.constant 0 : i32
    %c1_i32 = arith.constant 1 : i32
    %19 = arith.muli %c0_i32, %c1_i32 : i32
    %c0_i32_16 = arith.constant 0 : i32
    %20 = arith.addi %c0_i32_16, %19 : i32
    %c0_17 = arith.constant 0 : index
    %c0_18 = arith.constant 0 : index
    %21 = vector.load %arg7[%c0_17, %c0_18] : memref<512x512xbf16, #tpu.memory_space<vmem>>, vector<512x512xbf16>
    %c0_19 = arith.constant 0 : index
    %c0_20 = arith.constant 0 : index
    %22 = vector.load %arg9[%c0_19, %c0_20] : memref<512x128xf32, #tpu.memory_space<vmem>>, vector<512x128xf32>
    %23 = arith.truncf %22 : vector<512x128xf32> to vector<512x128xbf16>
    %cst_21 = arith.constant dense<0.000000e+00> : vector<512x128xf32>
    %24 = tpu.matmul %21, %23, %cst_21 {dimension_numbers = #tpu.dot_dimension_numbers<[1], [0], [0], [1], [0, 0, 1, 1], [], []>} : vector<512x512xbf16>, vector<512x128xbf16>, vector<512x128xf32> -> vector<512x128xf32>
    %c0_22 = arith.constant 0 : index
    %c0_23 = arith.constant 0 : index
    %25 = vector.load %arg10[%c0_22, %c0_23] : memref<512x128xf32, #tpu.memory_space<vmem>>, vector<512x128xf32>
    %c1_i32_24 = arith.constant 1 : i32
    %26 = arith.addi %20, %c1_i32_24 : i32
    %27 = arith.index_cast %26 : i32 to index
    %28 = memref.load %arg1[%27] : memref<5xf32, #tpu.memory_space<smem>>
    %29 = vector.broadcast %28 : f32 to vector<512x128xf32>
    %30 = arith.mulf %29, %24 : vector<512x128xf32>
    %31 = arith.addf %25, %30 : vector<512x128xf32>
    %c0_25 = arith.constant 0 : index
    %c0_26 = arith.constant 0 : index
    %32 = vector.load %arg10[%c0_25, %c0_26] : memref<512x128xf32, #tpu.memory_space<vmem>>, vector<512x128xf32>
    tpu.vector_store %arg10[%c0_25, %c0_26], %31 {strides = array<i32>} : memref<512x128xf32, #tpu.memory_space<vmem>>, vector<512x128xf32>,
    %c0_27 = arith.constant 0 : index
    %c0_28 = arith.constant 0 : index
    %33 = vector.load %arg9[%c0_27, %c0_28] : memref<512x128xf32, #tpu.memory_space<vmem>>, vector<512x128xf32>
    tpu.vector_store %arg9[%c0_27, %c0_28], %24 {strides = array<i32>} : memref<512x128xf32, #tpu.memory_space<vmem>>, vector<512x128xf32>,
    %c1_i32_29 = arith.constant 1 : i32
    %c1_i32_30 = arith.constant 1 : i32
    %34 = arith.muli %c1_i32_29, %c1_i32_30 : i32
    %c0_i32_31 = arith.constant 0 : i32
    %35 = arith.addi %c0_i32_31, %34 : i32
    %c0_32 = arith.constant 0 : index
    %c0_33 = arith.constant 0 : index
    %36 = vector.load %arg7[%c0_32, %c0_33] : memref<512x512xbf16, #tpu.memory_space<vmem>>, vector<512x512xbf16>
    %c0_34 = arith.constant 0 : index
    %c0_35 = arith.constant 0 : index
    %37 = vector.load %arg9[%c0_34, %c0_35] : memref<512x128xf32, #tpu.memory_space<vmem>>, vector<512x128xf32>
    %38 = arith.truncf %37 : vector<512x128xf32> to vector<512x128xbf16>
    %cst_36 = arith.constant dense<0.000000e+00> : vector<512x128xf32>
    %39 = tpu.matmul %36, %38, %cst_36 {dimension_numbers = #tpu.dot_dimension_numbers<[1], [0], [0], [1], [0, 0, 1, 1], [], []>} : vector<512x512xbf16>, vector<512x128xbf16>, vector<512x128xf32> -> vector<512x128xf32>
    %c0_37 = arith.constant 0 : index
    %c0_38 = arith.constant 0 : index
    %40 = vector.load %arg10[%c0_37, %c0_38] : memref<512x128xf32, #tpu.memory_space<vmem>>, vector<512x128xf32>
    %c1_i32_39 = arith.constant 1 : i32
    %41 = arith.addi %35, %c1_i32_39 : i32
    %42 = arith.index_cast %41 : i32 to index
    %43 = memref.load %arg1[%42] : memref<5xf32, #tpu.memory_space<smem>>
    %44 = vector.broadcast %43 : f32 to vector<512x128xf32>
    %45 = arith.mulf %44, %39 : vector<512x128xf32>
    %46 = arith.addf %40, %45 : vector<512x128xf32>
    %c0_40 = arith.constant 0 : index
    %c0_41 = arith.constant 0 : index
    %47 = vector.load %arg10[%c0_40, %c0_41] : memref<512x128xf32, #tpu.memory_space<vmem>>, vector<512x128xf32>
    tpu.vector_store %arg10[%c0_40, %c0_41], %46 {strides = array<i32>} : memref<512x128xf32, #tpu.memory_space<vmem>>, vector<512x128xf32>,
    %c0_42 = arith.constant 0 : index
    %c0_43 = arith.constant 0 : index
    %48 = vector.load %arg9[%c0_42, %c0_43] : memref<512x128xf32, #tpu.memory_space<vmem>>, vector<512x128xf32>
    tpu.vector_store %arg9[%c0_42, %c0_43], %39 {strides = array<i32>} : memref<512x128xf32, #tpu.memory_space<vmem>>, vector<512x128xf32>,
    %c2_i32 = arith.constant 2 : i32
    %c1_i32_44 = arith.constant 1 : i32
    %49 = arith.muli %c2_i32, %c1_i32_44 : i32
    %c0_i32_45 = arith.constant 0 : i32
    %50 = arith.addi %c0_i32_45, %49 : i32
    %c0_46 = arith.constant 0 : index
    %c0_47 = arith.constant 0 : index
    %51 = vector.load %arg7[%c0_46, %c0_47] : memref<512x512xbf16, #tpu.memory_space<vmem>>, vector<512x512xbf16>
    %c0_48 = arith.constant 0 : index
    %c0_49 = arith.constant 0 : index
    %52 = vector.load %arg9[%c0_48, %c0_49] : memref<512x128xf32, #tpu.memory_space<vmem>>, vector<512x128xf32>
    %53 = arith.truncf %52 : vector<512x128xf32> to vector<512x128xbf16>
    %cst_50 = arith.constant dense<0.000000e+00> : vector<512x128xf32>
    %54 = tpu.matmul %51, %53, %cst_50 {dimension_numbers = #tpu.dot_dimension_numbers<[1], [0], [0], [1], [0, 0, 1, 1], [], []>} : vector<512x512xbf16>, vector<512x128xbf16>, vector<512x128xf32> -> vector<512x128xf32>
    %c0_51 = arith.constant 0 : index
    %c0_52 = arith.constant 0 : index
    %55 = vector.load %arg10[%c0_51, %c0_52] : memref<512x128xf32, #tpu.memory_space<vmem>>, vector<512x128xf32>
    %c1_i32_53 = arith.constant 1 : i32
    %56 = arith.addi %50, %c1_i32_53 : i32
    %57 = arith.index_cast %56 : i32 to index
    %58 = memref.load %arg1[%57] : memref<5xf32, #tpu.memory_space<smem>>
    %59 = vector.broadcast %58 : f32 to vector<512x128xf32>
    %60 = arith.mulf %59, %54 : vector<512x128xf32>
    %61 = arith.addf %55, %60 : vector<512x128xf32>
    %c0_54 = arith.constant 0 : index
    %c0_55 = arith.constant 0 : index
    %62 = vector.load %arg10[%c0_54, %c0_55] : memref<512x128xf32, #tpu.memory_space<vmem>>, vector<512x128xf32>
    tpu.vector_store %arg10[%c0_54, %c0_55], %61 {strides = array<i32>} : memref<512x128xf32, #tpu.memory_space<vmem>>, vector<512x128xf32>,
    %c0_56 = arith.constant 0 : index
    %c0_57 = arith.constant 0 : index
    %63 = vector.load %arg9[%c0_56, %c0_57] : memref<512x128xf32, #tpu.memory_space<vmem>>, vector<512x128xf32>
    tpu.vector_store %arg9[%c0_56, %c0_57], %54 {strides = array<i32>} : memref<512x128xf32, #tpu.memory_space<vmem>>, vector<512x128xf32>,
    %c3_i32 = arith.constant 3 : i32
    %c1_i32_58 = arith.constant 1 : i32
    %64 = arith.muli %c3_i32, %c1_i32_58 : i32
    %c0_i32_59 = arith.constant 0 : i32
    %65 = arith.addi %c0_i32_59, %64 : i32
    %c0_60 = arith.constant 0 : index
    %c0_61 = arith.constant 0 : index
    %66 = vector.load %arg7[%c0_60, %c0_61] : memref<512x512xbf16, #tpu.memory_space<vmem>>, vector<512x512xbf16>
    %c0_62 = arith.constant 0 : index
    %c0_63 = arith.constant 0 : index
    %67 = vector.load %arg9[%c0_62, %c0_63] : memref<512x128xf32, #tpu.memory_space<vmem>>, vector<512x128xf32>
    %68 = arith.truncf %67 : vector<512x128xf32> to vector<512x128xbf16>
    %cst_64 = arith.constant dense<0.000000e+00> : vector<512x128xf32>
    %69 = tpu.matmul %66, %68, %cst_64 {dimension_numbers = #tpu.dot_dimension_numbers<[1], [0], [0], [1], [0, 0, 1, 1], [], []>} : vector<512x512xbf16>, vector<512x128xbf16>, vector<512x128xf32> -> vector<512x128xf32>
    %c0_65 = arith.constant 0 : index
    %c0_66 = arith.constant 0 : index
    %70 = vector.load %arg10[%c0_65, %c0_66] : memref<512x128xf32, #tpu.memory_space<vmem>>, vector<512x128xf32>
    %c1_i32_67 = arith.constant 1 : i32
    %71 = arith.addi %65, %c1_i32_67 : i32
    %72 = arith.index_cast %71 : i32 to index
    %73 = memref.load %arg1[%72] : memref<5xf32, #tpu.memory_space<smem>>
    %74 = vector.broadcast %73 : f32 to vector<512x128xf32>
    %75 = arith.mulf %74, %69 : vector<512x128xf32>
    %76 = arith.addf %70, %75 : vector<512x128xf32>
    %c0_68 = arith.constant 0 : index
    %c0_69 = arith.constant 0 : index
    %77 = vector.load %arg10[%c0_68, %c0_69] : memref<512x128xf32, #tpu.memory_space<vmem>>, vector<512x128xf32>
    tpu.vector_store %arg10[%c0_68, %c0_69], %76 {strides = array<i32>} : memref<512x128xf32, #tpu.memory_space<vmem>>, vector<512x128xf32>,
    %c0_70 = arith.constant 0 : index
    %c0_71 = arith.constant 0 : index
    %78 = vector.load %arg9[%c0_70, %c0_71] : memref<512x128xf32, #tpu.memory_space<vmem>>, vector<512x128xf32>
    tpu.vector_store %arg9[%c0_70, %c0_71], %69 {strides = array<i32>} : memref<512x128xf32, #tpu.memory_space<vmem>>, vector<512x128xf32>,
    %c4_i32 = arith.constant 4 : i32
    %c0_72 = arith.constant 0 : index
    %c0_73 = arith.constant 0 : index
    %79 = vector.load %arg10[%c0_72, %c0_73] : memref<512x128xf32, #tpu.memory_space<vmem>>, vector<512x128xf32>
    %80 = tpu.iota {dimensions = array<i32: 1>} : vector<512x128xi32>
    %c8_i32 = arith.constant 8 : i32
    %81 = vector.broadcast %c8_i32 : i32 to vector<512x128xi32>
    %82 = arith.cmpi slt, %80, %81 : vector<512x128xi32>
    %cst_74 = arith.constant 0xFF800000 : f32
    %83 = vector.broadcast %cst_74 : f32 to vector<512x128xf32>
    %84 = arith.select %82, %79, %83 : vector<512x128xi1>, vector<512x128xf32>
    %cst_75 = arith.constant dense<0xFF800000> : vector<512xf32>
    %85 = vector.multi_reduction <maximumf>, %84, %cst_75 [1] : vector<512x128xf32> to vector<512xf32>
    %86 = vector.shape_cast %85 : vector<512xf32> to vector<512x1xf32>
    %87 = vector.broadcast %86 : vector<512x1xf32> to vector<512x128xf32>
    %88 = arith.subf %84, %87 : vector<512x128xf32>
    %89 = math.exp %88 : vector<512x128xf32>
    %cst_76 = arith.constant 0.000000e+00 : f32
    %90 = vector.broadcast %cst_76 : f32 to vector<512x128xf32>
    %91 = arith.select %82, %89, %90 : vector<512x128xi1>, vector<512x128xf32>
    %cst_77 = arith.constant dense<0.000000e+00> : vector<512xf32>
    %92 = vector.multi_reduction <add>, %91, %cst_77 [1] : vector<512x128xf32> to vector<512xf32>
    %93 = vector.shape_cast %92 : vector<512xf32> to vector<512x1xf32>
    %94 = math.log %93 : vector<512x1xf32>
    %95 = vector.broadcast %94 : vector<512x1xf32> to vector<512x128xf32>
    %96 = arith.subf %88, %95 : vector<512x128xf32>
    %cst_78 = arith.constant 0.000000e+00 : f32
    %97 = vector.broadcast %cst_78 : f32 to vector<512x128xf32>
    %98 = arith.select %82, %96, %97 : vector<512x128xi1>, vector<512x128xf32>
    %c0_79 = arith.constant 0 : index
    %c0_80 = arith.constant 0 : index
    %99 = vector.load %arg8[%c0_79, %c0_80] : memref<512x128xf32, #tpu.memory_space<vmem>>, vector<512x128xf32>
    tpu.vector_store %arg8[%c0_79, %c0_80], %98 {strides = array<i32>} : memref<512x128xf32, #tpu.memory_space<vmem>>, vector<512x128xf32>,
    return
  }
  func.func @transform_0(%arg0: i32) -> i32 {
    %c0_i32 = arith.constant 0 : i32
    %c0_i32_0 = arith.constant 0 : i32
    return %c0_i32 : i32
  }
  func.func @transform_1(%arg0: i32) -> (i32, i32) {
    %c0_i32 = arith.constant 0 : i32
    %c0_i32_0 = arith.constant 0 : i32
    %c0_i32_1 = arith.constant 0 : i32
    return %c0_i32, %c0_i32_0 : i32, i32
  }
  func.func @transform_2(%arg0: i32) -> (i32, i32) {
    %c0_i32 = arith.constant 0 : i32
    %c0_i32_0 = arith.constant 0 : i32
    %c0_i32_1 = arith.constant 0 : i32
    return %c0_i32, %c0_i32_0 : i32, i32
  }
  func.func @transform_3(%arg0: i32) -> (i32, i32) {
    %c0_i32 = arith.constant 0 : i32
    %c0_i32_0 = arith.constant 0 : i32
    %c0_i32_1 = arith.constant 0 : i32
    return %c0_i32, %c0_i32_0 : i32, i32
  }
  func.func @transform_4(%arg0: i32) -> (i32, i32) {
    %c0_i32 = arith.constant 0 : i32
    %c0_i32_0 = arith.constant 0 : i32
    %c0_i32_1 = arith.constant 0 : i32
    return %c0_i32, %c0_i32_0 : i32, i32
  }
  func.func @transform_5(%arg0: i32) -> (i32, i32) {
    %c0_i32 = arith.constant 0 : i32
    %c0_i32_0 = arith.constant 0 : i32
    %c0_i32_1 = arith.constant 0 : i32
    return %c0_i32, %c0_i32_0 : i32, i32
  }
  func.func @transform_6(%arg0: i32) -> (i32, i32) {
    %c0_i32 = arith.constant 0 : i32
    %c0_i32_0 = arith.constant 0 : i32
    %c0_i32_1 = arith.constant 0 : i32
    return %c0_i32, %c0_i32_0 : i32, i32
  }
  func.func @transform_7(%arg0: i32) -> (i32, i32) {
    %c0_i32 = arith.constant 0 : i32
    %c0_i32_0 = arith.constant 0 : i32
    %c0_i32_1 = arith.constant 0 : i32
    return %c0_i32, %c0_i32_0 : i32, i32
  }
}

</mosaic_0001>

<bundles_post_ra>
// kernel: tpu_custom_call.1
= control target key start
LH: loop header
LB: loop body
LE: loop exit
PB: predicated region body
PF: predicated region fallthrough
CT: control target
= control target key end

     0   :  { %12 = vsyncpa [#allocation7], 0  ;;  %s14494_s0 = inlined_call_operand.vmem [shape: f32[5], index: 0, kind: input, shape index: {}]   ;;  %s14495_s1 = inlined_call_operand.vmem [shape: bf16[512,64], index: 1, kind: input, shape index: {}]   ;;  %s14496_s2 = inlined_call_operand.vmem [shape: bf16[64,32], index: 2, kind: input, shape index: {}]   ;;  %s14497_s3 = inlined_call_operand.vmem [shape: f32[1,32], index: 3, kind: input, shape index: {}]   ;;  %s14498_s4 = inlined_call_operand.vmem [shape: bf16[32,128], index: 4, kind: input, shape index: {}]   ;;  %s14499_s5 = inlined_call_operand.vmem [shape: f32[1,128], index: 5, kind: input, shape index: {}]   ;;  %s14500_s6 = inlined_call_operand.hbm [shape: bf16[512,512], index: 6, kind: input, shape index: {}]   ;;  %s14501_s7 = inlined_call_operand.hbm [shape: f32[512,128], index: 7, kind: output, shape index: {}]  }
   0x1   :  { %13 = vsyncpa [#allocation5], 0 }
   0x2   :  { %14 = vsyncpa [#allocation6], 0  ;;  %s21_s26 = sshll.u32 %s14494_s0, 4  ;;  %s22_s26 = int_to_ptr.vmem [resolvable:$true] %s21_s26 }
   0x3   :  { %s11852_s27 = scalar_lea.vmem %s22_s26, 16  ;;  %p11857_p1 = scmp.lt.s32.totalorder %s22_s26, %s22_s26 }
   0x4   :  { %p11853_p0 = scmp.ne.s32.totalorder %s22_s26, %s11852_s27  ;;  %p11858_p2 = scmp.lt.s32.totalorder %s11852_s27, %s11852_s27 }
   0x6   :  { %p11859_p3 = por %p11858_p2, %p11857_p1 }
   0x8   :  { %p11860_p4 = pnand %p11859_p3, %p11853_p0 }
   0xa   :  { %11863 = shalt.err (!%p11860_p4)
}
   0xb   :  { %s11914_s28 = smov [#allocation4]   ;;  %s11915_s29 = smov [#allocation8]  }
   0xc   :  { %24 = dma.vmem_to_smem %s22_s26, 16, %s11914_s28, [#allocation7]  }
   0xd   :  { %s40_s30 = sshll.u32 %s11915_s29, 4  ;;  %s11864_s10 = scalar_lea.hbm %s14500_s6, 16384  ;;  %s41_s30 = int_to_ptr.vmem [resolvable:$true] %s40_s30 }
   0xe   :  { %p11865_p5 = scmp.ne.s32.totalorder %s14500_s6, %s11864_s10  ;;  %p11868_p6 = scmp.lt.u32.totalorder %s11864_s10, %s14500_s6 }
  0x10   :  { %p11870_p7 = pnand %p11868_p6, %p11865_p5 }
  0x12   :  { %11873 = shalt.err (!%p11870_p7)
}
  0x13   :  { %s11874_s14 = scalar_lea.vmem %s41_s30, 16384  ;;  %p11879_p9 = scmp.lt.s32.totalorder %s41_s30, %s41_s30 }
  0x14   :  { %p11875_p8 = scmp.ne.s32.totalorder %s41_s30, %s11874_s14  ;;  %p11880_p10 = scmp.lt.s32.totalorder %s11874_s14, %s11874_s14 }
  0x16   :  { %p11881_p11 = por %p11880_p10, %p11879_p9 }
  0x18   :  { %p11882_p12 = pnand %p11881_p11, %p11875_p8 }
  0x1a   :  { %11885 = shalt.err (!%p11882_p12)
}
  0x1b   :  { %s11916_s15 = smov 256   ;;  %s11917_s16 = smov 16  }
  0x1c   :  { %46 = dma.hbm_to_vmem [thread:$0]  %s14500_s6, 16384, %s41_s30, [#allocation5], %s11916_s15, %s11916_s15, %s11917_s16  }
  0x1d   :  { %11908 = dma.done.wait [#allocation7], 16  }
  0x1e   :  { %11909 = vsyncadd [#allocation7], 4294967280 }
  0x1f   :  { %11910 = dma.done.wait [#allocation5], 16384  }
  0x20   :  { %11911 = vsyncadd [#allocation5], 4294950912 }
  0x21   :  { %53 = sfence }
  0x22   :  { %v10790_v0 = vld [vmem:[%s14496_s2] sm:$0xff]   ;;  %v10791_v1 = vld [vmem:[%s14496_s2 + $0x8] sm:$0xff]   ;;  %v10792_v2 = vld [vmem:[%s14496_s2 + $0x10] sm:$0xff]   ;;  %vm318_vm0 = vcmask 523264   ;;  %vm823_vm1 = vcmask 261120   ;;  %s9672_s18 = sld [smem:[#allocation4 + $0x1]] }
  0x23   :  { %10130 = vmatprep.subr.bf16.mxu0 %v10790_v0  ;;  %v10794_v3 = vld [vmem:[%s14495_s1] sm:$0xff]   ;;  %v10793_v4 = vld [vmem:[%s14496_s2 + $0x18] sm:$0xff]   ;;  %v10795_v5 = vld [vmem:[%s14495_s1 + $0x8] sm:$0xff]   ;;  %s9801_s19 = sld [smem:[#allocation4 + $0x2]]  ;;  %s9930_s20 = sld [smem:[#allocation4 + $0x3]] }
  0x24   :  { %10131 = vmatpush3.bf16.msra.mxu0 %v10790_v0  ;;  %10138 = vmatprep.mubr.msk.bf16.mxu0 %vm318_vm0, %v10794_v3  ;;  %v10796_v6 = vld [vmem:[%s14495_s1 + $0x10] sm:$0xff]   ;;  %v10797_v7 = vld [vmem:[%s14495_s1 + $0x18] sm:$0xff]   ;;  %v10798_v8 = vld [vmem:[%s14495_s1 + $0x20] sm:$0xff]   ;;  %s10059_s21 = sld [smem:[#allocation4 + $0x4]]  ;;  %s11919_s22 = smov [#allocation9]  }
  0x25   :  { %10132 = vmatprep.subr.bf16.mxu0 %v10791_v1  ;;  %v10799_v9 = vld [vmem:[%s14495_s1 + $0x28] sm:$0xff]   ;;  %v10800_v10 = vld [vmem:[%s14495_s1 + $0x30] sm:$0xff]   ;;  %v10801_v11 = vld [vmem:[%s14495_s1 + $0x38] sm:$0xff]   ;;  %s9427_s23 = sshll.u32 %s11919_s22, 4  ;;  %s9428_s23 = int_to_ptr.vmem [resolvable:$true] %s9427_s23 }
  0x26   :  { %v10802_v12 = vld [vmem:[%s14495_s1 + $0x40] sm:$0xff]   ;;  %v10803_v13 = vld [vmem:[%s14495_s1 + $0x48] sm:$0xff]   ;;  %v10804_v14 = vld [vmem:[%s14495_s1 + $0x50] sm:$0xff]   ;;  %s11886_s24 = scalar_lea.vmem %s9428_s23, 8192  ;;  %p11891_p0 = scmp.lt.s32.totalorder %s9428_s23, %s9428_s23 }
  0x27   :  { %v10805_v15 = vld [vmem:[%s14495_s1 + $0x58] sm:$0xff]   ;;  %v10806_v16 = vld [vmem:[%s14495_s1 + $0x60] sm:$0xff]   ;;  %v10807_v17 = vld [vmem:[%s14495_s1 + $0x68] sm:$0xff]   ;;  %p11887_p13 = scmp.ne.s32.totalorder %s9428_s23, %s11886_s24  ;;  %p11892_p1 = scmp.lt.s32.totalorder %s11886_s24, %s11886_s24 }
  0x28   :  { %10133 = vmatpush3.bf16.msra.mxu0 %v10791_v1  ;;  %v10808_v18 = vld [vmem:[%s14495_s1 + $0x70] sm:$0xff]   ;;  %v10809_v19 = vld [vmem:[%s14495_s1 + $0x78] sm:$0xff]   ;;  %v10810_v20 = vld [vmem:[%s14495_s1 + $0x80] sm:$0xff]  }
  0x29   :  { %10134 = vmatprep.subr.bf16.mxu0 %v10792_v2  ;;  %v10811_v21 = vld [vmem:[%s14495_s1 + $0x88] sm:$0xff]   ;;  %v10812_v22 = vld [vmem:[%s14495_s1 + $0x90] sm:$0xff]   ;;  %v10813_v23 = vld [vmem:[%s14498_s4] sm:$0xff]   ;;  %p11893_p2 = por %p11892_p1, %p11891_p0 }
  0x2a   :  { %v10814_v24 = vld [vmem:[%s14495_s1 + $0x98] sm:$0xff]   ;;  %10202 = vmatprep.subr.bf16.mxu1 %v10813_v23  ;;  %v10815_v25 = vld [vmem:[%s14498_s4 + $0x8] sm:$0xff]   ;;  %v10816_v26 = vld [vmem:[%s14495_s1 + $0xa0] sm:$0xff]  }
  0x2b   :  { %10203 = vmatpush3.bf16.msra.mxu1 %v10813_v23  ;;  %v10817_v27 = vld [vmem:[%s14495_s1 + $0xa8] sm:$0xff]   ;;  %v10818_v28 = vld [vmem:[%s14495_s1 + $0xb0] sm:$0xff]   ;;  %v10819_v29 = vld [vmem:[%s14495_s1 + $0xb8] sm:$0xff]   ;;  %p11894_p3 = pnand %p11893_p2, %p11887_p13 }
  0x2c   :  { %10135 = vmatpush3.bf16.msra.mxu0 %v10792_v2  ;;  %10204 = vmatprep.subr.bf16.mxu1 %v10815_v25  ;;  %v10820_v30 = vld [vmem:[%s14495_s1 + $0xc0] sm:$0xff]   ;;  %v10821_v31 = vld [vmem:[%s14495_s1 + $0xc8] sm:$0xff]   ;;  %v10822_v32 = vld [vmem:[%s14495_s1 + $0xd0] sm:$0xff]  }
  0x2d   :  { %10136 = vmatprep.subr.bf16.mxu0 %v10793_v4  ;;  %v10823_v33 = vld [vmem:[%s14495_s1 + $0xd8] sm:$0xff]   ;;  %v10824_v34 = vld [vmem:[%s14495_s1 + $0xe0] sm:$0xff]   ;;  %v10825_v35 = vld [vmem:[%s14495_s1 + $0xe8] sm:$0xff]  }
  0x2e   :  { %v10826_v36 = vld [vmem:[%s14495_s1 + $0xf0] sm:$0xff]   ;;  %v10827_v37 = vld [vmem:[%s14495_s1 + $0xf8] sm:$0xff]   ;;  %v12126_v38 = vld [vmem:[%s14497_s3] ss:$0 sm:$0xff] }
  0x2f   :  { %10205 = vmatpush3.bf16.msra.mxu1 %v10815_v25 }
  0x30   :  { %10137 = vmatpush3.bf16.msra.mxu0 %v10793_v4 }
  0x33   :  { %10139 = vmatmul.mubr.msk.bf16.vlgmr.msra.gmra.mrb[0].mxu0 %vm318_vm0, %v10795_v5 }
  0x34   :  { %10142 = vmatprep.mubr.msk.bf16.mxu0 %vm318_vm0, %v10796_v6 }
  0x3b   :  { %10143 = vmatmul.mubr.msk.bf16.gmra.mrb[4].mxu0 %vm318_vm0, %v10797_v7 }
  0x3c   :  { %10146 = vmatprep.mubr.msk.bf16.mxu0 %vm318_vm0, %v10798_v8 }
  0x43   :  { %10147 = vmatmul.mubr.msk.bf16.gmra.mrb[8].mxu0 %vm318_vm0, %v10799_v9 }
  0x44   :  { %10150 = vmatprep.mubr.msk.bf16.mxu0 %vm318_vm0, %v10800_v10 }
  0x4b   :  { %10151 = vmatmul.mubr.msk.bf16.gmra.mrb[12].mxu0 %vm318_vm0, %v10801_v11 }
  0x4c   :  { %10154 = vmatprep.mubr.msk.bf16.mxu0 %vm318_vm0, %v10802_v12 }
  0x53   :  { %10155 = vmatmul.mubr.msk.bf16.gmra.mrb[16].mxu0 %vm318_vm0, %v10803_v13 }
  0x54   :  { %10158 = vmatprep.mubr.msk.bf16.mxu0 %vm318_vm0, %v10804_v14 }
  0x5b   :  { %10159 = vmatmul.mubr.msk.bf16.gmra.mrb[20].mxu0 %vm318_vm0, %v10805_v15 }
  0x5c   :  { %10162 = vmatprep.mubr.msk.bf16.mxu0 %vm318_vm0, %v10806_v16 }
  0x63   :  { %10163 = vmatmul.mubr.msk.bf16.gmra.mrb[24].mxu0 %vm318_vm0, %v10807_v17 }
  0x64   :  { %10166 = vmatprep.mubr.msk.bf16.mxu0 %vm318_vm0, %v10808_v18 }
  0x6b   :  { %10167 = vmatmul.mubr.msk.bf16.gmra.mrb[28].mxu0 %vm318_vm0, %v10809_v19 }
  0x6c   :  { %10170 = vmatprep.mubr.msk.bf16.mxu0 %vm318_vm0, %v10810_v20 }
  0x73   :  { %10171 = vmatmul.mubr.msk.bf16.gmra.mrb[32].mxu0 %vm318_vm0, %v10811_v21 }
  0x74   :  { %10174 = vmatprep.mubr.msk.bf16.mxu0 %vm318_vm0, %v10812_v22 }
  0x7b   :  { %10175 = vmatmul.mubr.msk.bf16.gmra.mrb[36].mxu0 %vm318_vm0, %v10814_v24 }
  0x7c   :  { %10178 = vmatprep.mubr.msk.bf16.mxu0 %vm318_vm0, %v10816_v26 }
  0x83   :  { %10179 = vmatmul.mubr.msk.bf16.gmra.mrb[40].mxu0 %vm318_vm0, %v10817_v27 }
  0x84   :  { %10182 = vmatprep.mubr.msk.bf16.mxu0 %vm318_vm0, %v10818_v28 }
  0x8b   :  { %10183 = vmatmul.mubr.msk.bf16.gmra.mrb[44].mxu0 %vm318_vm0, %v10819_v29 }
  0x8c   :  { %10186 = vmatprep.mubr.msk.bf16.mxu0 %vm318_vm0, %v10820_v30 }
  0x93   :  { %10187 = vmatmul.mubr.msk.bf16.gmra.mrb[48].mxu0 %vm318_vm0, %v10821_v31 }
  0x94   :  { %10190 = vmatprep.mubr.msk.bf16.mxu0 %vm318_vm0, %v10822_v32 }
  0x9b   :  { %10191 = vmatmul.mubr.msk.bf16.gmra.mrb[52].mxu0 %vm318_vm0, %v10823_v33 }
  0x9c   :  { %10194 = vmatprep.mubr.msk.bf16.mxu0 %vm318_vm0, %v10824_v34 }
  0xa3   :  { %10195 = vmatmul.mubr.msk.bf16.gmra.mrb[56].mxu0 %vm318_vm0, %v10825_v35 }
  0xa4   :  { %10198 = vmatprep.mubr.msk.bf16.mxu0 %vm318_vm0, %v10826_v36 }
  0xab   :  { %10199 = vmatmul.mubr.msk.bf16.gmra.mrb[60].mxu0 %vm318_vm0, %v10827_v37 }
 0x106   :  { %v10140_v39 = vpop.f32.mrb[0].mxu0 }
 0x107   :  { %v458_v40 = vadd.f32 %v10140_v39, %v12126_v38  ;;  %v449_v41 = vpop.f32.mrb[1].mxu0 }
 0x108   :  { %v10141_v42 = vpop.f32.mrb[2].mxu0  ;;  %v450_v43 = vadd.f32 %v12126_v38, %v449_v41 }
 0x109   :  { %v461_v44 = vadd.f32 %v10141_v42, %v12126_v38  ;;  %v452_v45 = vpop.f32.mrb[3].mxu0  ;;  %v706_v47 = vmax.f32 %v458_v40, 0.0 }
 0x10a   :  { %v453_v46 = vadd.f32 %v12126_v38, %v452_v45  ;;  %v704_v49 = vmax.f32 %v450_v43, 0.0 }
 0x10b   :  { %v707_v48 = vmax.f32 %v461_v44, 0.0 }
 0x10c   :  { %v705_v50 = vmax.f32 %v453_v46, 0.0 }
 0x10d   :  { %v769_v51 = vpack.c.bf16 %v707_v48, %v706_v47 }
 0x10e   :  { %v10144_v52 = vpop.f32.mrb[4].mxu0  ;;  %v768_v53 = vpack.c.bf16 %v705_v50, %v704_v49 }
 0x10f   :  { %v474_v54 = vadd.f32 %v10144_v52, %v12126_v38  ;;  %v465_v55 = vpop.f32.mrb[5].mxu0 }
 0x110   :  { %v466_v56 = vadd.f32 %v12126_v38, %v465_v55  ;;  %v10145_v57 = vpop.f32.mrb[6].mxu0  ;;  %10206 = vmatprep.mubr.msk.bf16.mxu1 %vm823_vm1, %v768_v53 }
 0x111   :  { %v477_v58 = vadd.f32 %v10145_v57, %v12126_v38  ;;  %v468_v59 = vpop.f32.mrb[7].mxu0  ;;  %10207 = vmatmul.mubr.msk.bf16.vlgmr.msra.gmra.mrb[0].mxu1 %vm823_vm1, %v769_v51  ;;  %v710_v61 = vmax.f32 %v474_v54, 0.0 }
 0x112   :  { %v469_v60 = vadd.f32 %v12126_v38, %v468_v59  ;;  %v708_v63 = vmax.f32 %v466_v56, 0.0 }
 0x113   :  { %v711_v62 = vmax.f32 %v477_v58, 0.0 }
 0x114   :  { %v709_v0 = vmax.f32 %v469_v60, 0.0 }
 0x115   :  { %v771_v1 = vpack.c.bf16 %v711_v62, %v710_v61 }
 0x116   :  { %v10148_v2 = vpop.f32.mrb[8].mxu0  ;;  %v770_v3 = vpack.c.bf16 %v709_v0, %v708_v63 }
 0x117   :  { %v490_v4 = vadd.f32 %v10148_v2, %v12126_v38  ;;  %v481_v5 = vpop.f32.mrb[9].mxu0 }
 0x118   :  { %v482_v6 = vadd.f32 %v12126_v38, %v481_v5  ;;  %v10149_v7 = vpop.f32.mrb[10].mxu0  ;;  %10210 = vmatprep.mubr.msk.bf16.mxu1 %vm823_vm1, %v770_v3 }
 0x119   :  { %v493_v8 = vadd.f32 %v10149_v7, %v12126_v38  ;;  %v484_v9 = vpop.f32.mrb[11].mxu0  ;;  %10211 = vmatmul.mubr.msk.bf16.gmra.mrb[4].mxu1 %vm823_vm1, %v771_v1  ;;  %v714_v11 = vmax.f32 %v490_v4, 0.0 }
 0x11a   :  { %v485_v10 = vadd.f32 %v12126_v38, %v484_v9  ;;  %v712_v13 = vmax.f32 %v482_v6, 0.0 }
 0x11b   :  { %v715_v12 = vmax.f32 %v493_v8, 0.0 }
 0x11c   :  { %v713_v14 = vmax.f32 %v485_v10, 0.0 }
 0x11d   :  { %v773_v15 = vpack.c.bf16 %v715_v12, %v714_v11 }
 0x11e   :  { %v10152_v16 = vpop.f32.mrb[12].mxu0  ;;  %v772_v17 = vpack.c.bf16 %v713_v14, %v712_v13 }
 0x11f   :  { %v506_v18 = vadd.f32 %v10152_v16, %v12126_v38  ;;  %v497_v19 = vpop.f32.mrb[13].mxu0 }
 0x120   :  { %v498_v20 = vadd.f32 %v12126_v38, %v497_v19  ;;  %v10153_v21 = vpop.f32.mrb[14].mxu0  ;;  %10214 = vmatprep.mubr.msk.bf16.mxu1 %vm823_vm1, %v772_v17 }
 0x121   :  { %v509_v22 = vadd.f32 %v10153_v21, %v12126_v38  ;;  %v500_v23 = vpop.f32.mrb[15].mxu0  ;;  %10215 = vmatmul.mubr.msk.bf16.gmra.mrb[8].mxu1 %vm823_vm1, %v773_v15  ;;  %v718_v25 = vmax.f32 %v506_v18, 0.0 }
 0x122   :  { %v501_v24 = vadd.f32 %v12126_v38, %v500_v23  ;;  %v716_v27 = vmax.f32 %v498_v20, 0.0 }
 0x123   :  { %v719_v26 = vmax.f32 %v509_v22, 0.0 }
 0x124   :  { %v717_v28 = vmax.f32 %v501_v24, 0.0 }
 0x125   :  { %v775_v29 = vpack.c.bf16 %v719_v26, %v718_v25 }
 0x126   :  { %v10156_v30 = vpop.f32.mrb[16].mxu0  ;;  %v774_v31 = vpack.c.bf16 %v717_v28, %v716_v27 }
 0x127   :  { %v522_v32 = vadd.f32 %v10156_v30, %v12126_v38  ;;  %v513_v33 = vpop.f32.mrb[17].mxu0 }
 0x128   :  { %v514_v34 = vadd.f32 %v12126_v38, %v513_v33  ;;  %v10157_v35 = vpop.f32.mrb[18].mxu0  ;;  %10218 = vmatprep.mubr.msk.bf16.mxu1 %vm823_vm1, %v774_v31 }
 0x129   :  { %v525_v36 = vadd.f32 %v10157_v35, %v12126_v38  ;;  %v516_v37 = vpop.f32.mrb[19].mxu0  ;;  %10219 = vmatmul.mubr.msk.bf16.gmra.mrb[12].mxu1 %vm823_vm1, %v775_v29  ;;  %v722_v40 = vmax.f32 %v522_v32, 0.0 }
 0x12a   :  { %v517_v39 = vadd.f32 %v12126_v38, %v516_v37  ;;  %v720_v42 = vmax.f32 %v514_v34, 0.0 }
 0x12b   :  { %v723_v41 = vmax.f32 %v525_v36, 0.0 }
 0x12c   :  { %v721_v43 = vmax.f32 %v517_v39, 0.0 }
 0x12d   :  { %v777_v44 = vpack.c.bf16 %v723_v41, %v722_v40 }
 0x12e   :  { %v10160_v45 = vpop.f32.mrb[20].mxu0  ;;  %v776_v46 = vpack.c.bf16 %v721_v43, %v720_v42 }
 0x12f   :  { %v538_v47 = vadd.f32 %v10160_v45, %v12126_v38  ;;  %v529_v48 = vpop.f32.mrb[21].mxu0 }
 0x130   :  { %v530_v49 = vadd.f32 %v12126_v38, %v529_v48  ;;  %v10161_v50 = vpop.f32.mrb[22].mxu0  ;;  %10222 = vmatprep.mubr.msk.bf16.mxu1 %vm823_vm1, %v776_v46 }
 0x131   :  { %v541_v51 = vadd.f32 %v10161_v50, %v12126_v38  ;;  %v532_v52 = vpop.f32.mrb[23].mxu0  ;;  %10223 = vmatmul.mubr.msk.bf16.gmra.mrb[16].mxu1 %vm823_vm1, %v777_v44  ;;  %v726_v54 = vmax.f32 %v538_v47, 0.0 }
 0x132   :  { %v533_v53 = vadd.f32 %v12126_v38, %v532_v52  ;;  %v724_v56 = vmax.f32 %v530_v49, 0.0 }
 0x133   :  { %v727_v55 = vmax.f32 %v541_v51, 0.0 }
 0x134   :  { %v725_v57 = vmax.f32 %v533_v53, 0.0 }
 0x135   :  { %v779_v58 = vpack.c.bf16 %v727_v55, %v726_v54 }
 0x136   :  { %v10164_v59 = vpop.f32.mrb[24].mxu0  ;;  %v778_v60 = vpack.c.bf16 %v725_v57, %v724_v56 }
 0x137   :  { %v554_v61 = vadd.f32 %v10164_v59, %v12126_v38  ;;  %v545_v62 = vpop.f32.mrb[25].mxu0 }
 0x138   :  { %v546_v63 = vadd.f32 %v12126_v38, %v545_v62  ;;  %v10165_v0 = vpop.f32.mrb[26].mxu0  ;;  %10226 = vmatprep.mubr.msk.bf16.mxu1 %vm823_vm1, %v778_v60  ;;  %v14514_v62 = vmov 0  }
 0x139   :  { %v557_v1 = vadd.f32 %v10165_v0, %v12126_v38  ;;  %v548_v2 = vpop.f32.mrb[27].mxu0  ;;  %10227 = vmatmul.mubr.msk.bf16.gmra.mrb[20].mxu1 %vm823_vm1, %v779_v58  ;;  %v730_v4 = vmax.f32 %v554_v61, 0.0  ;;  %2267 = vmatprep.subr.bf16.mxu1 %v14514_v62 }
 0x13a   :  { %v549_v3 = vadd.f32 %v12126_v38, %v548_v2  ;;  %v728_v6 = vmax.f32 %v546_v63, 0.0  ;;  %4031 = vmatprep.subr.bf16.mxu0 %v14514_v62 }
 0x13b   :  { %v731_v5 = vmax.f32 %v557_v1, 0.0 }
 0x13c   :  { %v729_v7 = vmax.f32 %v549_v3, 0.0 }
 0x13d   :  { %v781_v8 = vpack.c.bf16 %v731_v5, %v730_v4 }
 0x13e   :  { %v10168_v9 = vpop.f32.mrb[28].mxu0  ;;  %v780_v10 = vpack.c.bf16 %v729_v7, %v728_v6 }
 0x13f   :  { %v570_v11 = vadd.f32 %v10168_v9, %v12126_v38  ;;  %v561_v12 = vpop.f32.mrb[29].mxu0 }
 0x140   :  { %v562_v13 = vadd.f32 %v12126_v38, %v561_v12  ;;  %v10169_v14 = vpop.f32.mrb[30].mxu0  ;;  %10230 = vmatprep.mubr.msk.bf16.mxu1 %vm823_vm1, %v780_v10 }
 0x141   :  { %v573_v15 = vadd.f32 %v10169_v14, %v12126_v38  ;;  %v564_v16 = vpop.f32.mrb[31].mxu0  ;;  %10231 = vmatmul.mubr.msk.bf16.gmra.mrb[24].mxu1 %vm823_vm1, %v781_v8  ;;  %v734_v18 = vmax.f32 %v570_v11, 0.0 }
 0x142   :  { %v565_v17 = vadd.f32 %v12126_v38, %v564_v16  ;;  %v732_v20 = vmax.f32 %v562_v13, 0.0 }
 0x143   :  { %v735_v19 = vmax.f32 %v573_v15, 0.0 }
 0x144   :  { %v733_v21 = vmax.f32 %v565_v17, 0.0 }
 0x145   :  { %v783_v22 = vpack.c.bf16 %v735_v19, %v734_v18 }
 0x146   :  { %v782_v23 = vpack.c.bf16 %v733_v21, %v732_v20  ;;  %v10172_v24 = vpop.f32.mrb[32].mxu0 }
 0x147   :  { %v586_v25 = vadd.f32 %v10172_v24, %v12126_v38  ;;  %v577_v26 = vpop.f32.mrb[33].mxu0 }
 0x148   :  { %10234 = vmatprep.mubr.msk.bf16.mxu1 %vm823_vm1, %v782_v23  ;;  %v578_v27 = vadd.f32 %v12126_v38, %v577_v26  ;;  %v10173_v28 = vpop.f32.mrb[34].mxu0 }
 0x149   :  { %10235 = vmatmul.mubr.msk.bf16.gmra.mrb[28].mxu1 %vm823_vm1, %v783_v22  ;;  %v738_v29 = vmax.f32 %v586_v25, 0.0  ;;  %v589_v30 = vadd.f32 %v10173_v28, %v12126_v38  ;;  %v580_v31 = vpop.f32.mrb[35].mxu0 }
 0x14a   :  { %v736_v32 = vmax.f32 %v578_v27, 0.0  ;;  %v581_v33 = vadd.f32 %v12126_v38, %v580_v31 }
 0x14b   :  { %v739_v34 = vmax.f32 %v589_v30, 0.0 }
 0x14c   :  { %v737_v35 = vmax.f32 %v581_v33, 0.0 }
 0x14d   :  { %v785_v36 = vpack.c.bf16 %v739_v34, %v738_v29 }
 0x14e   :  { %v784_v37 = vpack.c.bf16 %v737_v35, %v736_v32  ;;  %v10176_v39 = vpop.f32.mrb[36].mxu0 }
 0x14f   :  { %v602_v40 = vadd.f32 %v10176_v39, %v12126_v38  ;;  %v593_v41 = vpop.f32.mrb[37].mxu0 }
 0x150   :  { %10238 = vmatprep.mubr.msk.bf16.mxu1 %vm823_vm1, %v784_v37  ;;  %v594_v42 = vadd.f32 %v12126_v38, %v593_v41  ;;  %v10177_v43 = vpop.f32.mrb[38].mxu0 }
 0x151   :  { %10239 = vmatmul.mubr.msk.bf16.gmra.mrb[32].mxu1 %vm823_vm1, %v785_v36  ;;  %v605_v44 = vadd.f32 %v10177_v43, %v12126_v38  ;;  %v596_v45 = vpop.f32.mrb[39].mxu0  ;;  %v742_v48 = vmax.f32 %v602_v40, 0.0 }
 0x152   :  { %v740_v46 = vmax.f32 %v594_v42, 0.0  ;;  %v597_v47 = vadd.f32 %v12126_v38, %v596_v45 }
 0x153   :  { %v743_v49 = vmax.f32 %v605_v44, 0.0 }
 0x154   :  { %v741_v50 = vmax.f32 %v597_v47, 0.0 }
 0x155   :  { %v787_v55 = vpack.c.bf16 %v743_v49, %v742_v48 }
 0x156   :  { %v10180_v51 = vpop.f32.mrb[40].mxu0  ;;  %v786_v52 = vpack.c.bf16 %v741_v50, %v740_v46 }
 0x157   :  { %v618_v53 = vadd.f32 %v10180_v51, %v12126_v38  ;;  %v609_v54 = vpop.f32.mrb[41].mxu0 }
 0x158   :  { %v610_v56 = vadd.f32 %v12126_v38, %v609_v54  ;;  %v10181_v57 = vpop.f32.mrb[42].mxu0  ;;  %10242 = vmatprep.mubr.msk.bf16.mxu1 %vm823_vm1, %v786_v52 }
 0x159   :  { %v621_v58 = vadd.f32 %v10181_v57, %v12126_v38  ;;  %v612_v59 = vpop.f32.mrb[43].mxu0  ;;  %10243 = vmatmul.mubr.msk.bf16.gmra.mrb[36].mxu1 %vm823_vm1, %v787_v55  ;;  %v746_v63 = vmax.f32 %v618_v53, 0.0 }
 0x15a   :  { %v744_v60 = vmax.f32 %v610_v56, 0.0  ;;  %v613_v61 = vadd.f32 %v12126_v38, %v612_v59 }
 0x15b   :  { %v747_v0 = vmax.f32 %v621_v58, 0.0 }
 0x15c   :  { %v745_v1 = vmax.f32 %v613_v61, 0.0 }
 0x15d   :  { %v789_v6 = vpack.c.bf16 %v747_v0, %v746_v63 }
 0x15e   :  { %v10184_v2 = vpop.f32.mrb[44].mxu0  ;;  %v788_v3 = vpack.c.bf16 %v745_v1, %v744_v60 }
 0x15f   :  { %v634_v4 = vadd.f32 %v10184_v2, %v12126_v38  ;;  %v625_v5 = vpop.f32.mrb[45].mxu0 }
 0x160   :  { %v626_v7 = vadd.f32 %v12126_v38, %v625_v5  ;;  %v10185_v8 = vpop.f32.mrb[46].mxu0  ;;  %10246 = vmatprep.mubr.msk.bf16.mxu1 %vm823_vm1, %v788_v3 }
 0x161   :  { %v637_v9 = vadd.f32 %v10185_v8, %v12126_v38  ;;  %v628_v10 = vpop.f32.mrb[47].mxu0  ;;  %10247 = vmatmul.mubr.msk.bf16.gmra.mrb[40].mxu1 %vm823_vm1, %v789_v6  ;;  %v750_v13 = vmax.f32 %v634_v4, 0.0 }
 0x162   :  { %v748_v11 = vmax.f32 %v626_v7, 0.0  ;;  %v629_v12 = vadd.f32 %v12126_v38, %v628_v10 }
 0x163   :  { %v751_v14 = vmax.f32 %v637_v9, 0.0 }
 0x164   :  { %v749_v15 = vmax.f32 %v629_v12, 0.0  ;;  %v10830_v12 = vld [vmem:[#allocation8 + $0x4] ss:$16 sps:$4 sm:$0xff]  }
 0x165   :  { %v791_v20 = vpack.c.bf16 %v751_v14, %v750_v13  ;;  %v12229_v14 = vld [vmem:[%s14499_s5] ss:$0 sm:$0xff]  ;;  %s1273_s5 = sld [smem:[#allocation4]] }
 0x166   :  { %v10188_v16 = vpop.f32.mrb[48].mxu0  ;;  %v790_v17 = vpack.c.bf16 %v749_v15, %v748_v11 }
 0x167   :  { %v650_v18 = vadd.f32 %v10188_v16, %v12126_v38  ;;  %v641_v19 = vpop.f32.mrb[49].mxu0 }
 0x168   :  { %v642_v21 = vadd.f32 %v12126_v38, %v641_v19  ;;  %v10189_v22 = vpop.f32.mrb[50].mxu0  ;;  %10250 = vmatprep.mubr.msk.bf16.mxu1 %vm823_vm1, %v790_v17 }
 0x169   :  { %v653_v23 = vadd.f32 %v10189_v22, %v12126_v38  ;;  %v644_v24 = vpop.f32.mrb[51].mxu0  ;;  %10251 = vmatmul.mubr.msk.bf16.gmra.mrb[44].mxu1 %vm823_vm1, %v791_v20  ;;  %v754_v27 = vmax.f32 %v650_v18, 0.0 }
 0x16a   :  { %v752_v25 = vmax.f32 %v642_v21, 0.0  ;;  %v645_v26 = vadd.f32 %v12126_v38, %v644_v24 }
 0x16b   :  { %v755_v28 = vmax.f32 %v653_v23, 0.0 }
 0x16c   :  { %v753_v29 = vmax.f32 %v645_v26, 0.0 }
 0x16d   :  { %v793_v34 = vpack.c.bf16 %v755_v28, %v754_v27 }
 0x16e   :  { %v10192_v30 = vpop.f32.mrb[52].mxu0  ;;  %v792_v31 = vpack.c.bf16 %v753_v29, %v752_v25 }
 0x16f   :  { %v666_v32 = vadd.f32 %v10192_v30, %v12126_v38  ;;  %v657_v33 = vpop.f32.mrb[53].mxu0 }
 0x170   :  { %v658_v35 = vadd.f32 %v12126_v38, %v657_v33  ;;  %v10193_v36 = vpop.f32.mrb[54].mxu0  ;;  %10254 = vmatprep.mubr.msk.bf16.mxu1 %vm823_vm1, %v792_v31 }
 0x171   :  { %v669_v37 = vadd.f32 %v10193_v36, %v12126_v38  ;;  %v660_v39 = vpop.f32.mrb[55].mxu0  ;;  %10255 = vmatmul.mubr.msk.bf16.gmra.mrb[48].mxu1 %vm823_vm1, %v793_v34  ;;  %v758_v42 = vmax.f32 %v666_v32, 0.0 }
 0x172   :  { %v756_v40 = vmax.f32 %v658_v35, 0.0  ;;  %v661_v41 = vadd.f32 %v12126_v38, %v660_v39 }
 0x173   :  { %v759_v43 = vmax.f32 %v669_v37, 0.0 }
 0x174   :  { %v757_v44 = vmax.f32 %v661_v41, 0.0 }
 0x175   :  { %v795_v49 = vpack.c.bf16 %v759_v43, %v758_v42 }
 0x176   :  { %v10196_v45 = vpop.f32.mrb[56].mxu0  ;;  %v794_v46 = vpack.c.bf16 %v757_v44, %v756_v40 }
 0x177   :  { %v682_v47 = vadd.f32 %v10196_v45, %v12126_v38  ;;  %v673_v48 = vpop.f32.mrb[57].mxu0 }
 0x178   :  { %v674_v50 = vadd.f32 %v12126_v38, %v673_v48  ;;  %v10197_v51 = vpop.f32.mrb[58].mxu0  ;;  %10258 = vmatprep.mubr.msk.bf16.mxu1 %vm823_vm1, %v794_v46 }
 0x179   :  { %v685_v52 = vadd.f32 %v10197_v51, %v12126_v38  ;;  %v676_v53 = vpop.f32.mrb[59].mxu0  ;;  %10259 = vmatmul.mubr.msk.bf16.gmra.mrb[52].mxu1 %vm823_vm1, %v795_v49  ;;  %v762_v56 = vmax.f32 %v682_v47, 0.0 }
 0x17a   :  { %v760_v54 = vmax.f32 %v674_v50, 0.0  ;;  %v677_v55 = vadd.f32 %v12126_v38, %v676_v53 }
 0x17b   :  { %v763_v57 = vmax.f32 %v685_v52, 0.0 }
 0x17c   :  { %v761_v58 = vmax.f32 %v677_v55, 0.0 }
 0x17d   :  { %v797_v0 = vpack.c.bf16 %v763_v57, %v762_v56 }
 0x17e   :  { %v10200_v59 = vpop.f32.mrb[60].mxu0  ;;  %v796_v60 = vpack.c.bf16 %v761_v58, %v760_v54 }
 0x17f   :  { %v698_v61 = vadd.f32 %v10200_v59, %v12126_v38  ;;  %v689_v63 = vpop.f32.mrb[61].mxu0 }
 0x180   :  { %v690_v1 = vadd.f32 %v12126_v38, %v689_v63  ;;  %v10201_v2 = vpop.f32.mrb[62].mxu0  ;;  %10262 = vmatprep.mubr.msk.bf16.mxu1 %vm823_vm1, %v796_v60 }
 0x181   :  { %v701_v3 = vadd.f32 %v10201_v2, %v12126_v38  ;;  %v692_v4 = vpop.f32.mrb[63].mxu0  ;;  %10263 = vmatmul.mubr.msk.bf16.gmra.mrb[56].mxu1 %vm823_vm1, %v797_v0  ;;  %v766_v7 = vmax.f32 %v698_v61, 0.0 }
 0x182   :  { %v764_v5 = vmax.f32 %v690_v1, 0.0  ;;  %v693_v6 = vadd.f32 %v12126_v38, %v692_v4 }
 0x183   :  { %v767_v8 = vmax.f32 %v701_v3, 0.0 }
 0x184   :  { %v765_v9 = vmax.f32 %v693_v6, 0.0 }
 0x185   :  { %v799_v11 = vpack.c.bf16 %v767_v8, %v766_v7 }
 0x186   :  { %v798_v10 = vpack.c.bf16 %v765_v9, %v764_v5 }
 0x188   :  { %10266 = vmatprep.mubr.msk.bf16.mxu1 %vm823_vm1, %v798_v10 }
 0x189   :  { %10267 = vmatmul.mubr.msk.bf16.gmra.mrb[60].mxu1 %vm823_vm1, %v799_v11 }
 0x18a   :  { %2299 = vmatprep.mubr.bf16.mxu1 %v10830_v12 }
 0x1e4   :  { %v10208_v13 = vpop.f32.mrb[0].mxu1 }
 0x1e5   :  { %v954_v15 = vpop.f32.mrb[1].mxu1  ;;  %v12232_v38 = vadd.f32 %v10208_v13, %v12229_v14 }
 0x1e6   :  { %v10209_v16 = vpop.f32.mrb[2].mxu1  ;;  %v12238_v19 = vadd.f32 %v12229_v14, %v954_v15 }
 0x1e7   :  { %v12235_v17 = vadd.f32 %v10209_v16, %v12229_v14  ;;  %v957_v18 = vpop.f32.mrb[3].mxu1 }
 0x1e8   :  { %v12241_v20 = vadd.f32 %v12229_v14, %v957_v18 }
 0x1e9   :  { %v1596_v21 = vpack.c.bf16 %v12235_v17, %v12232_v38 }
 0x1ea   :  { %v1595_v22 = vpack.c.bf16 %v12241_v20, %v12238_v19 }
 0x1ec   :  { %v10212_v23 = vpop.f32.mrb[4].mxu1  ;;  %2268 = vmatpush1.bf16.msra.mxu1 %v1595_v22 }
 0x1ed   :  { %v970_v24 = vpop.f32.mrb[5].mxu1  ;;  %2269 = vmatprep.subr.bf16.mxu1 %v14514_v62  ;;  %v12249_v26 = vadd.f32 %v10212_v23, %v12229_v14 }
 0x1ee   :  { %v10213_v25 = vpop.f32.mrb[6].mxu1  ;;  %v12255_v29 = vadd.f32 %v12229_v14, %v970_v24 }
 0x1ef   :  { %v12252_v27 = vadd.f32 %v10213_v25, %v12229_v14  ;;  %v973_v28 = vpop.f32.mrb[7].mxu1 }
 0x1f0   :  { %v12258_v30 = vadd.f32 %v12229_v14, %v973_v28  ;;  %2270 = vmatpush1.bf16.msra.mxu1 %v1596_v21 }
 0x1f1   :  { %2271 = vmatprep.subr.bf16.mxu1 %v14514_v62  ;;  %v1598_v31 = vpack.c.bf16 %v12252_v27, %v12249_v26 }
 0x1f2   :  { %v1597_v32 = vpack.c.bf16 %v12258_v30, %v12255_v29 }
 0x1f4   :  { %v10216_v33 = vpop.f32.mrb[8].mxu1  ;;  %2272 = vmatpush1.bf16.msra.mxu1 %v1597_v32 }
 0x1f5   :  { %v986_v34 = vpop.f32.mrb[9].mxu1  ;;  %2273 = vmatprep.subr.bf16.mxu1 %v14514_v62  ;;  %v12267_v36 = vadd.f32 %v10216_v33, %v12229_v14 }
 0x1f6   :  { %v10217_v35 = vpop.f32.mrb[10].mxu1  ;;  %v12273_v40 = vadd.f32 %v12229_v14, %v986_v34 }
 0x1f7   :  { %v12270_v37 = vadd.f32 %v10217_v35, %v12229_v14  ;;  %v989_v39 = vpop.f32.mrb[11].mxu1 }
 0x1f8   :  { %v12276_v41 = vadd.f32 %v12229_v14, %v989_v39  ;;  %2274 = vmatpush1.bf16.msra.mxu1 %v1598_v31 }
 0x1f9   :  { %2275 = vmatprep.subr.bf16.mxu1 %v14514_v62  ;;  %v1600_v42 = vpack.c.bf16 %v12270_v37, %v12267_v36 }
 0x1fa   :  { %v1599_v43 = vpack.c.bf16 %v12276_v41, %v12273_v40 }
 0x1fc   :  { %v10220_v44 = vpop.f32.mrb[12].mxu1  ;;  %2276 = vmatpush1.bf16.msra.mxu1 %v1599_v43 }
 0x1fd   :  { %v1002_v45 = vpop.f32.mrb[13].mxu1  ;;  %2277 = vmatprep.subr.bf16.mxu1 %v14514_v62  ;;  %v12285_v47 = vadd.f32 %v10220_v44, %v12229_v14 }
 0x1fe   :  { %v10221_v46 = vpop.f32.mrb[14].mxu1  ;;  %v12291_v50 = vadd.f32 %v12229_v14, %v1002_v45 }
 0x1ff   :  { %v12288_v48 = vadd.f32 %v10221_v46, %v12229_v14  ;;  %v1005_v49 = vpop.f32.mrb[15].mxu1 }
 0x200   :  { %v12294_v51 = vadd.f32 %v12229_v14, %v1005_v49  ;;  %2278 = vmatpush1.bf16.msra.mxu1 %v1600_v42 }
 0x201   :  { %2279 = vmatprep.subr.bf16.mxu1 %v14514_v62  ;;  %v1602_v52 = vpack.c.bf16 %v12288_v48, %v12285_v47 }
 0x202   :  { %v1601_v53 = vpack.c.bf16 %v12294_v51, %v12291_v50 }
 0x204   :  { %v10224_v54 = vpop.f32.mrb[16].mxu1  ;;  %2280 = vmatpush1.bf16.msra.mxu1 %v1601_v53  ;;  %v10828_v53 = vld [vmem:[#allocation8] ss:$16 sps:$4 sm:$0xff]  }
 0x205   :  { %v1018_v55 = vpop.f32.mrb[17].mxu1  ;;  %2281 = vmatprep.subr.bf16.mxu1 %v14514_v62  ;;  %v12303_v57 = vadd.f32 %v10224_v54, %v12229_v14 }
 0x206   :  { %v10225_v56 = vpop.f32.mrb[18].mxu1  ;;  %v12309_v60 = vadd.f32 %v12229_v14, %v1018_v55 }
 0x207   :  { %v12306_v58 = vadd.f32 %v10225_v56, %v12229_v14  ;;  %v1021_v59 = vpop.f32.mrb[19].mxu1  ;;  %v10831_v56 = vld [vmem:[#allocation8 + $0x24] ss:$16 sps:$4 sm:$0xff]  }
 0x208   :  { %v12312_v61 = vadd.f32 %v12229_v14, %v1021_v59  ;;  %2282 = vmatpush1.bf16.msra.mxu1 %v1602_v52 }
 0x209   :  { %2283 = vmatprep.subr.bf16.mxu1 %v14514_v62  ;;  %v1604_v63 = vpack.c.bf16 %v12306_v58, %v12303_v57 }
 0x20a   :  { %v1603_v0 = vpack.c.bf16 %v12312_v61, %v12309_v60 }
 0x20c   :  { %v10228_v1 = vpop.f32.mrb[20].mxu1  ;;  %2284 = vmatpush1.bf16.msra.mxu1 %v1603_v0 }
 0x20d   :  { %v1034_v2 = vpop.f32.mrb[21].mxu1  ;;  %2285 = vmatprep.subr.bf16.mxu1 %v14514_v62  ;;  %v12321_v4 = vadd.f32 %v10228_v1, %v12229_v14  ;;  %v10833_v1 = vld [vmem:[#allocation8 + $0x20] ss:$16 sps:$4 sm:$0xff]  }
 0x20e   :  { %v10229_v3 = vpop.f32.mrb[22].mxu1  ;;  %v12327_v7 = vadd.f32 %v12229_v14, %v1034_v2  ;;  %v10834_v2 = vld [vmem:[#allocation8 + $0x44] ss:$16 sps:$4 sm:$0xff]  }
 0x20f   :  { %v12324_v5 = vadd.f32 %v10229_v3, %v12229_v14  ;;  %v1037_v6 = vpop.f32.mrb[23].mxu1  ;;  %v10836_v3 = vld [vmem:[#allocation8 + $0x40] ss:$16 sps:$4 sm:$0xff]  }
 0x210   :  { %v12330_v8 = vadd.f32 %v12229_v14, %v1037_v6  ;;  %2286 = vmatpush1.bf16.msra.mxu1 %v1604_v63  ;;  %v10837_v6 = vld [vmem:[#allocation8 + $0x64] ss:$16 sps:$4 sm:$0xff]  }
 0x211   :  { %2287 = vmatprep.subr.bf16.mxu1 %v14514_v62  ;;  %v1606_v9 = vpack.c.bf16 %v12324_v5, %v12321_v4 }
 0x212   :  { %v1605_v10 = vpack.c.bf16 %v12330_v8, %v12327_v7 }
 0x214   :  { %v10232_v11 = vpop.f32.mrb[24].mxu1  ;;  %2288 = vmatpush1.bf16.msra.mxu1 %v1605_v10 }
 0x215   :  { %v1050_v12 = vpop.f32.mrb[25].mxu1  ;;  %2289 = vmatprep.subr.bf16.mxu1 %v14514_v62  ;;  %v12339_v15 = vadd.f32 %v10232_v11, %v12229_v14 }
 0x216   :  { %v10233_v13 = vpop.f32.mrb[26].mxu1  ;;  %v12345_v21 = vadd.f32 %v12229_v14, %v1050_v12 }
 0x217   :  { %v12342_v16 = vadd.f32 %v10233_v13, %v12229_v14  ;;  %v1053_v18 = vpop.f32.mrb[27].mxu1 }
 0x218   :  { %v12348_v22 = vadd.f32 %v12229_v14, %v1053_v18  ;;  %2290 = vmatpush1.bf16.msra.mxu1 %v1606_v9  ;;  %v10839_v18 = vld [vmem:[#allocation8 + $0x60] ss:$16 sps:$4 sm:$0xff]  }
 0x219   :  { %2291 = vmatprep.subr.bf16.mxu1 %v14514_v62  ;;  %v1608_v23 = vpack.c.bf16 %v12342_v16, %v12339_v15 }
 0x21a   :  { %v1607_v24 = vpack.c.bf16 %v12348_v22, %v12345_v21 }
 0x21c   :  { %v10236_v25 = vpop.f32.mrb[28].mxu1  ;;  %2292 = vmatpush1.bf16.msra.mxu1 %v1607_v24 }
 0x21d   :  { %v1066_v28 = vpop.f32.mrb[29].mxu1  ;;  %2293 = vmatprep.subr.bf16.mxu1 %v14514_v62  ;;  %v12357_v32 = vadd.f32 %v10236_v25, %v12229_v14 }
 0x21e   :  { %v10237_v31 = vpop.f32.mrb[30].mxu1  ;;  %v12363_v35 = vadd.f32 %v12229_v14, %v1066_v28  ;;  %v10840_v28 = vld [vmem:[#allocation8 + $0x84] ss:$16 sps:$4 sm:$0xff]  }
 0x21f   :  { %v12360_v33 = vadd.f32 %v10237_v31, %v12229_v14  ;;  %v1069_v34 = vpop.f32.mrb[31].mxu1 }
 0x220   :  { %v12366_v39 = vadd.f32 %v12229_v14, %v1069_v34  ;;  %2294 = vmatpush1.bf16.msra.mxu1 %v1608_v23 }
 0x221   :  { %2295 = vmatprep.subr.bf16.mxu1 %v14514_v62  ;;  %v1610_v42 = vpack.c.bf16 %v12360_v33, %v12357_v32 }
 0x222   :  { %v1609_v43 = vpack.c.bf16 %v12366_v39, %v12363_v35 }
 0x224   :  { %2296 = vmatpush1.bf16.msra.mxu1 %v1609_v43  ;;  %v10240_v44 = vpop.f32.mrb[32].mxu1 }
 0x225   :  { %2297 = vmatprep.subr.bf16.mxu1 %v14514_v62  ;;  %v12375_v45 = vadd.f32 %v10240_v44, %v12229_v14  ;;  %v1082_v46 = vpop.f32.mrb[33].mxu1 }
 0x226   :  { %v12378_v49 = vadd.f32 %v12229_v14, %v1082_v46  ;;  %v10241_v52 = vpop.f32.mrb[34].mxu1 }
 0x227   :  { %v12381_v54 = vadd.f32 %v10241_v52, %v12229_v14  ;;  %v1085_v55 = vpop.f32.mrb[35].mxu1 }
 0x228   :  { %2298 = vmatpush1.bf16.msra.mxu1 %v1610_v42  ;;  %v12384_v59 = vadd.f32 %v12229_v14, %v1085_v55 }
 0x229   :  { %2556 = vmatprep.subr.bf16.mxu1 %v14514_v62  ;;  %v1612_v63 = vpack.c.bf16 %v12381_v54, %v12375_v45 }
 0x22a   :  { %v1611_v0 = vpack.c.bf16 %v12384_v59, %v12378_v49 }
 0x22b   :  { %2300 = vmatmul.mubr.bf16.vlgmr.msra.gmra.mrb[64].mxu1 %v10828_v53  ;;  %v10842_v53 = vld [vmem:[#allocation8 + $0x80] ss:$16 sps:$4 sm:$0xff]  }
 0x22c   :  { %2307 = vmatprep.mubr.bf16.mxu1 %v10831_v56  ;;  %2557 = vmatpush1.bf16.msra.mxu1 %v1611_v0  ;;  %v10244_v9 = vpop.f32.mrb[36].mxu1  ;;  %v10843_v0 = vld [vmem:[#allocation8 + $0xa4] ss:$16 sps:$4 sm:$0xff]  }
 0x22d   :  { %2558 = vmatprep.subr.bf16.mxu1 %v14514_v62  ;;  %v1098_v10 = vpop.f32.mrb[37].mxu1  ;;  %v12397_v23 = vadd.f32 %v10244_v9, %v12229_v14 }
 0x22e   :  { %v12394_v11 = vadd.f32 %v12229_v14, %v1098_v10  ;;  %v10245_v12 = vpop.f32.mrb[38].mxu1 }
 0x22f   :  { %v1101_v13 = vpop.f32.mrb[39].mxu1  ;;  %v12400_v24 = vadd.f32 %v10245_v12, %v12229_v14 }
 0x230   :  { %2559 = vmatpush1.bf16.msra.mxu1 %v1612_v63  ;;  %v12403_v25 = vadd.f32 %v12229_v14, %v1101_v13  ;;  %v10845_v13 = vld [vmem:[#allocation8 + $0xa0] ss:$16 sps:$4 sm:$0xff]  }
 0x231   :  { %2560 = vmatprep.subr.bf16.mxu1 %v14514_v62  ;;  %v1614_v42 = vpack.c.bf16 %v12400_v24, %v12397_v23 }
 0x232   :  { %v1613_v31 = vpack.c.bf16 %v12403_v25, %v12394_v11 }
 0x233   :  { %2308 = vmatmul.mubr.bf16.gmra.mrb[68].mxu1 %v10833_v1 }
 0x234   :  { %2315 = vmatprep.mubr.bf16.mxu1 %v10834_v2  ;;  %v10248_v34 = vpop.f32.mrb[40].mxu1  ;;  %2561 = vmatpush1.bf16.msra.mxu1 %v1613_v31 }
 0x235   :  { %v1114_v43 = vpop.f32.mrb[41].mxu1  ;;  %2562 = vmatprep.subr.bf16.mxu1 %v14514_v62  ;;  %v12414_v55 = vadd.f32 %v10248_v34, %v12229_v14  ;;  %v10846_v34 = vld [vmem:[#allocation8 + $0xc4] ss:$16 sps:$4 sm:$0xff]  }
 0x236   :  { %v12410_v44 = vadd.f32 %v12229_v14, %v1114_v43  ;;  %v10249_v46 = vpop.f32.mrb[42].mxu1 }
 0x237   :  { %v1117_v52 = vpop.f32.mrb[43].mxu1  ;;  %v12417_v56 = vadd.f32 %v10249_v46, %v12229_v14 }
 0x238   :  { %v12420_v63 = vadd.f32 %v12229_v14, %v1117_v52  ;;  %2563 = vmatpush1.bf16.msra.mxu1 %v1614_v42 }
 0x239   :  { %2564 = vmatprep.subr.bf16.mxu1 %v14514_v62 }
 0x23a   :  { %v1615_v1 = vpack.c.bf16 %v12420_v63, %v12410_v44 }
 0x23b   :  { %2316 = vmatmul.mubr.bf16.gmra.mrb[72].mxu1 %v10836_v3  ;;  %v1616_v3 = vpack.c.bf16 %v12417_v56, %v12414_v55 }
 0x23c   :  { %2323 = vmatprep.mubr.bf16.mxu1 %v10837_v6  ;;  %v10252_v2 = vpop.f32.mrb[44].mxu1  ;;  %2565 = vmatpush1.bf16.msra.mxu1 %v1615_v1 }
 0x23d   :  { %v1130_v6 = vpop.f32.mrb[45].mxu1  ;;  %2566 = vmatprep.subr.bf16.mxu1 %v14514_v62 }
 0x23e   :  { %v12428_v9 = vadd.f32 %v12229_v14, %v1130_v6  ;;  %v10253_v10 = vpop.f32.mrb[46].mxu1 }
 0x23f   :  { %v1133_v12 = vpop.f32.mrb[47].mxu1 }
 0x240   :  { %v12438_v31 = vadd.f32 %v12229_v14, %v1133_v12  ;;  %2567 = vmatpush1.bf16.msra.mxu1 %v1616_v3  ;;  %v10849_v12 = vld [vmem:[#allocation8 + $0xe4] ss:$16 sps:$4 sm:$0xff]  }
 0x241   :  { %2568 = vmatprep.subr.bf16.mxu1 %v14514_v62 }
 0x242   :  { %v1617_v42 = vpack.c.bf16 %v12438_v31, %v12428_v9 }
 0x243   :  { %2324 = vmatmul.mubr.bf16.gmra.mrb[76].mxu1 %v10839_v18  ;;  %v12432_v18 = vadd.f32 %v10252_v2, %v12229_v14  ;;  %v10848_v2 = vld [vmem:[#allocation8 + $0xc0] ss:$16 sps:$4 sm:$0xff]  }
 0x244   :  { %2331 = vmatprep.mubr.bf16.mxu1 %v10840_v28  ;;  %v12435_v28 = vadd.f32 %v10253_v10, %v12229_v14  ;;  %v10256_v43 = vpop.f32.mrb[48].mxu1  ;;  %2569 = vmatpush1.bf16.msra.mxu1 %v1617_v42 }
 0x245   :  { %14538 = vst [vmem:[#allocation13_spill] sm:$0xff] %v12432_v18  ;;  %v1146_v52 = vpop.f32.mrb[49].mxu1  ;;  %2570 = vmatprep.subr.bf16.mxu1 %v14514_v62  ;;  %v12450_v3 = vadd.f32 %v10256_v43, %v12229_v14 }
 0x246   :  { %14539 = vst [vmem:[#allocation14_spill] sm:$0xff] %v12435_v28  ;;  %v1618_v46 = vpack.c.bf16 %v12435_v28, %v12432_v18 }
 0x247   :  { %14541 = vst [vmem:[#allocation16_spill] sm:$0xff] %v12450_v3 }
 0x248   :  { %2571 = vmatpush1.bf16.msra.mxu1 %v1618_v46 }
 0x249   :  { %2572 = vmatprep.subr.bf16.mxu1 %v14514_v62 }
 0x24b   :  { %2332 = vmatmul.mubr.bf16.gmra.mrb[80].mxu1 %v10842_v53  ;;  %v12446_v53 = vadd.f32 %v12229_v14, %v1146_v52 }
 0x24c   :  { %2339 = vmatprep.mubr.bf16.mxu1 %v10843_v0  ;;  %v10257_v0 = vpop.f32.mrb[50].mxu1 }
 0x24d   :  { %14540 = vst [vmem:[#allocation15_spill] sm:$0xff] %v12446_v53  ;;  %v1149_v1 = vpop.f32.mrb[51].mxu1  ;;  %v12453_v6 = vadd.f32 %v10257_v0, %v12229_v14 }
 0x24e   :  { %v12456_v10 = vadd.f32 %v12229_v14, %v1149_v1  ;;  %v10851_v1 = vld [vmem:[#allocation8 + $0xe0] ss:$16 sps:$4 sm:$0xff]  }
 0x24f   :  { %14542 = vst [vmem:[#allocation17_spill] sm:$0xff] %v12453_v6  ;;  %v1620_v42 = vpack.c.bf16 %v12453_v6, %v12450_v3  ;;  %v10854_v3 = vld [vmem:[#allocation8 + $0x100] ss:$16 sps:$4 sm:$0xff]  }
 0x250   :  { %14543 = vst [vmem:[#allocation18_spill] sm:$0xff] %v12456_v10 }
 0x253   :  { %2340 = vmatmul.mubr.bf16.gmra.mrb[84].mxu1 %v10845_v13  ;;  %v1619_v13 = vpack.c.bf16 %v12456_v10, %v12446_v53 }
 0x254   :  { %2347 = vmatprep.mubr.bf16.mxu1 %v10846_v34  ;;  %v10260_v34 = vpop.f32.mrb[52].mxu1 }
 0x255   :  { %2573 = vmatpush1.bf16.msra.mxu1 %v1619_v13  ;;  %v1162_v43 = vpop.f32.mrb[53].mxu1  ;;  %v12468_v28 = vadd.f32 %v10260_v34, %v12229_v14 }
 0x256   :  { %v12464_v52 = vadd.f32 %v12229_v14, %v1162_v43  ;;  %v10261_v0 = vpop.f32.mrb[54].mxu1  ;;  %2574 = vmatprep.subr.bf16.mxu1 %v14514_v62 }
 0x257   :  { %v1165_v46 = vpop.f32.mrb[55].mxu1  ;;  %14545 = vst [vmem:[#allocation20_spill] sm:$0xff] %v12468_v28 }
 0x258   :  { %14544 = vst [vmem:[#allocation19_spill] sm:$0xff] %v12464_v52  ;;  %v12474_v10 = vadd.f32 %v12229_v14, %v1165_v46  ;;  %v10264_v43 = vpop.f32.mrb[56].mxu1 }
 0x259   :  { %2575 = vmatpush1.bf16.msra.mxu1 %v1620_v42  ;;  %v1178_v34 = vpop.f32.mrb[57].mxu1  ;;  %v12486_v53 = vadd.f32 %v10264_v43, %v12229_v14 }
 0x25a   :  { %14547 = vst [vmem:[#allocation22_spill] sm:$0xff] %v12474_v10  ;;  %2576 = vmatprep.subr.bf16.mxu1 %v14514_v62  ;;  %v1621_v13 = vpack.c.bf16 %v12474_v10, %v12464_v52  ;;  %v10265_v46 = vpop.f32.mrb[58].mxu1 }
 0x25b   :  { %2348 = vmatmul.mubr.bf16.gmra.mrb[88].mxu1 %v10848_v2  ;;  %v12471_v2 = vadd.f32 %v10261_v0, %v12229_v14  ;;  %v12482_v0 = vadd.f32 %v12229_v14, %v1178_v34  ;;  %v1181_v42 = vpop.f32.mrb[59].mxu1  ;;  %14549 = vst [vmem:[#allocation24_spill] sm:$0xff] %v12486_v53 }
 0x25c   :  { %2355 = vmatprep.mubr.bf16.mxu1 %v10849_v12  ;;  %v10852_v12 = vld [vmem:[#allocation8 + $0x104] ss:$16 sps:$4 sm:$0xff]   ;;  %v12492_v10 = vadd.f32 %v12229_v14, %v1181_v42  ;;  %v10268_v34 = vpop.f32.mrb[60].mxu1 }
 0x25d   :  { %14546 = vst [vmem:[#allocation21_spill] sm:$0xff] %v12471_v2  ;;  %v1622_v6 = vpack.c.bf16 %v12471_v2, %v12468_v28  ;;  %2577 = vmatpush1.bf16.msra.mxu1 %v1621_v13  ;;  %14548 = vst [vmem:[#allocation23_spill] sm:$0xff] %v12482_v0  ;;  %v1194_v43 = vpop.f32.mrb[61].mxu1  ;;  %v10857_v28 = vld [vmem:[#allocation8 + $0x120] ss:$16 sps:$4 sm:$0xff]   ;;  %v12504_v52 = vadd.f32 %v10268_v34, %v12229_v14 }
 0x25e   :  { %2578 = vmatprep.subr.bf16.mxu1 %v14514_v62  ;;  %14551 = vst [vmem:[#allocation26_spill] sm:$0xff] %v12492_v10  ;;  %v1623_v13 = vpack.c.bf16 %v12492_v10, %v12482_v0  ;;  %v10269_v42 = vpop.f32.mrb[62].mxu1  ;;  %v10860_v34 = vld [vmem:[#allocation8 + $0x140] ss:$16 sps:$4 sm:$0xff]   ;;  %v11011_v0 = vld [vmem:[#allocation8 + $0x3ac] ss:$16 sps:$4 sm:$0xff]  }
 0x25f   :  { %14553 = vst [vmem:[#allocation28_spill] sm:$0xff] %v12504_v52 }
 0x261   :  { %2579 = vmatpush1.bf16.msra.mxu1 %v1622_v6  ;;  %v1197_v6 = vpop.f32.mrb[63].mxu1 }
 0x262   :  { %2580 = vmatprep.subr.bf16.mxu1 %v14514_v62  ;;  %v12510_v10 = vadd.f32 %v12229_v14, %v1197_v6  ;;  %v10866_v6 = vld [vmem:[#allocation8 + $0x180] ss:$16 sps:$4 sm:$0xff]  }
 0x263   :  { %2356 = vmatmul.mubr.bf16.gmra.mrb[92].mxu1 %v10851_v1  ;;  %v12489_v1 = vadd.f32 %v10265_v46, %v12229_v14  ;;  %v12500_v46 = vadd.f32 %v12229_v14, %v1194_v43 }
 0x264   :  { %2363 = vmatprep.mubr.bf16.mxu1 %v10852_v12  ;;  %v10855_v12 = vld [vmem:[#allocation8 + $0x124] ss:$16 sps:$4 sm:$0xff]   ;;  %14555 = vst [vmem:[#allocation30_spill] sm:$0xff] %v12510_v10 }
 0x265   :  { %14550 = vst [vmem:[#allocation25_spill] sm:$0xff] %v12489_v1  ;;  %v1624_v2 = vpack.c.bf16 %v12489_v1, %v12486_v53  ;;  %2581 = vmatpush1.bf16.msra.mxu1 %v1623_v13  ;;  %14552 = vst [vmem:[#allocation27_spill] sm:$0xff] %v12500_v46  ;;  %v1625_v13 = vpack.c.bf16 %v12510_v10, %v12500_v46 }
 0x266   :  { %2582 = vmatprep.subr.bf16.mxu1 %v14514_v62 }
 0x269   :  { %2583 = vmatpush1.bf16.msra.mxu1 %v1624_v2  ;;  %v10864_v2 = vld [vmem:[#allocation8 + $0x184] ss:$16 sps:$4 sm:$0xff]  }
 0x26a   :  { %2584 = vmatprep.subr.bf16.mxu1 %v14514_v62 }
 0x26b   :  { %2364 = vmatmul.mubr.bf16.gmra.mrb[96].mxu1 %v10854_v3  ;;  %v12507_v3 = vadd.f32 %v10269_v42, %v12229_v14  ;;  %v10861_v42 = vld [vmem:[#allocation8 + $0x164] ss:$16 sps:$4 sm:$0xff]   ;;  %v10863_v14 = vld [vmem:[#allocation8 + $0x160] ss:$16 sps:$4 sm:$0xff]  }
 0x26c   :  { %2371 = vmatprep.mubr.bf16.mxu1 %v10855_v12  ;;  %v10858_v12 = vld [vmem:[#allocation8 + $0x144] ss:$16 sps:$4 sm:$0xff]  }
 0x26d   :  { %14554 = vst [vmem:[#allocation29_spill] sm:$0xff] %v12507_v3  ;;  %v1626_v43 = vpack.c.bf16 %v12507_v3, %v12504_v52  ;;  %2585 = vmatpush1.bf16.msra.mxu1 %v1625_v13  ;;  %v10869_v3 = vld [vmem:[#allocation8 + $0x1a0] ss:$16 sps:$4 sm:$0xff]   ;;  %v10873_v52 = vld [vmem:[#allocation8 + $0x1e4] ss:$16 sps:$4 sm:$0xff]  }
 0x26e   :  { %2586 = vmatprep.subr.bf16.mxu1 %v14514_v62  ;;  %v10872_v13 = vld [vmem:[#allocation8 + $0x1c0] ss:$16 sps:$4 sm:$0xff]  }
 0x271   :  { %2587 = vmatpush1.bf16.msra.mxu1 %v1626_v43  ;;  %v10875_v43 = vld [vmem:[#allocation8 + $0x1e0] ss:$16 sps:$4 sm:$0xff]  }
 0x272   :  { %5795 = vmatprep.subr.bf16.mxu1 %v14514_v62  ;;  %v10876_v62 = vld [vmem:[#allocation8 + $0x204] ss:$16 sps:$4 sm:$0xff]  }
 0x273   :  { %2372 = vmatmul.mubr.bf16.gmra.mrb[100].mxu1 %v10857_v28  ;;  %v10867_v28 = vld [vmem:[#allocation8 + $0x1a4] ss:$16 sps:$4 sm:$0xff]  }
 0x274   :  { %2379 = vmatprep.mubr.bf16.mxu1 %v10858_v12  ;;  %v10870_v12 = vld [vmem:[#allocation8 + $0x1c4] ss:$16 sps:$4 sm:$0xff]  }
 0x27b   :  { %2380 = vmatmul.mubr.bf16.gmra.mrb[104].mxu1 %v10860_v34  ;;  %v10878_v34 = vld [vmem:[#allocation8 + $0x200] ss:$16 sps:$4 sm:$0xff]  }
 0x27c   :  { %2387 = vmatprep.mubr.bf16.mxu1 %v10861_v42  ;;  %v10879_v42 = vld [vmem:[#allocation8 + $0x224] ss:$16 sps:$4 sm:$0xff]  }
 0x283   :  { %2388 = vmatmul.mubr.bf16.gmra.mrb[108].mxu1 %v10863_v14  ;;  %v10881_v14 = vld [vmem:[#allocation8 + $0x220] ss:$16 sps:$4 sm:$0xff]  }
 0x284   :  { %2395 = vmatprep.mubr.bf16.mxu1 %v10864_v2  ;;  %v10882_v2 = vld [vmem:[#allocation8 + $0x244] ss:$16 sps:$4 sm:$0xff]  }
 0x28b   :  { %2396 = vmatmul.mubr.bf16.gmra.mrb[112].mxu1 %v10866_v6  ;;  %v10884_v6 = vld [vmem:[#allocation8 + $0x240] ss:$16 sps:$4 sm:$0xff]  }
 0x28c   :  { %2403 = vmatprep.mubr.bf16.mxu1 %v10867_v28  ;;  %v10885_v28 = vld [vmem:[#allocation8 + $0x264] ss:$16 sps:$4 sm:$0xff]  }
 0x293   :  { %2404 = vmatmul.mubr.bf16.gmra.mrb[116].mxu1 %v10869_v3  ;;  %v10887_v3 = vld [vmem:[#allocation8 + $0x260] ss:$16 sps:$4 sm:$0xff]  }
 0x294   :  { %2411 = vmatprep.mubr.bf16.mxu1 %v10870_v12  ;;  %v10888_v12 = vld [vmem:[#allocation8 + $0x284] ss:$16 sps:$4 sm:$0xff]  }
 0x29b   :  { %2412 = vmatmul.mubr.bf16.gmra.mrb[120].mxu1 %v10872_v13  ;;  %v10891_v13 = vld [vmem:[#allocation8 + $0x2a4] ss:$16 sps:$4 sm:$0xff]  }
 0x29c   :  { %2419 = vmatprep.mubr.bf16.mxu1 %v10873_v52  ;;  %v10890_v52 = vld [vmem:[#allocation8 + $0x280] ss:$16 sps:$4 sm:$0xff]  }
 0x2a3   :  { %2420 = vmatmul.mubr.bf16.gmra.mrb[124].mxu1 %v10875_v43  ;;  %v10894_v43 = vld [vmem:[#allocation8 + $0x2c4] ss:$16 sps:$4 sm:$0xff]  }
 0x2a4   :  { %2427 = vmatprep.mubr.bf16.mxu1 %v10876_v62  ;;  %v10893_v62 = vld [vmem:[#allocation8 + $0x2a0] ss:$16 sps:$4 sm:$0xff]  }
 0x2ab   :  { %2428 = vmatmul.mubr.bf16.gmra.mrb[128].mxu1 %v10878_v34  ;;  %v10896_v34 = vld [vmem:[#allocation8 + $0x2c0] ss:$16 sps:$4 sm:$0xff]  }
 0x2ac   :  { %2435 = vmatprep.mubr.bf16.mxu1 %v10879_v42  ;;  %v10897_v42 = vld [vmem:[#allocation8 + $0x2e4] ss:$16 sps:$4 sm:$0xff]  }
 0x2b3   :  { %2436 = vmatmul.mubr.bf16.gmra.mrb[132].mxu1 %v10881_v14  ;;  %v10899_v14 = vld [vmem:[#allocation8 + $0x2e0] ss:$16 sps:$4 sm:$0xff]  }
 0x2b4   :  { %2443 = vmatprep.mubr.bf16.mxu1 %v10882_v2  ;;  %v10900_v2 = vld [vmem:[#allocation8 + $0x304] ss:$16 sps:$4 sm:$0xff]  }
 0x2bb   :  { %2444 = vmatmul.mubr.bf16.gmra.mrb[136].mxu1 %v10884_v6  ;;  %v10902_v6 = vld [vmem:[#allocation8 + $0x300] ss:$16 sps:$4 sm:$0xff]  }
 0x2bc   :  { %2451 = vmatprep.mubr.bf16.mxu1 %v10885_v28  ;;  %v10903_v28 = vld [vmem:[#allocation8 + $0x324] ss:$16 sps:$4 sm:$0xff]  }
 0x2c3   :  { %2452 = vmatmul.mubr.bf16.gmra.mrb[140].mxu1 %v10887_v3  ;;  %v10905_v3 = vld [vmem:[#allocation8 + $0x320] ss:$16 sps:$4 sm:$0xff]  }
 0x2c4   :  { %2459 = vmatprep.mubr.bf16.mxu1 %v10888_v12  ;;  %v10906_v12 = vld [vmem:[#allocation8 + $0x344] ss:$16 sps:$4 sm:$0xff]  }
 0x2cb   :  { %2460 = vmatmul.mubr.bf16.gmra.mrb[144].mxu1 %v10890_v52  ;;  %v10908_v52 = vld [vmem:[#allocation8 + $0x340] ss:$16 sps:$4 sm:$0xff]  }
 0x2cc   :  { %2467 = vmatprep.mubr.bf16.mxu1 %v10891_v13  ;;  %v10909_v13 = vld [vmem:[#allocation8 + $0x364] ss:$16 sps:$4 sm:$0xff]  }
 0x2d3   :  { %2468 = vmatmul.mubr.bf16.gmra.mrb[148].mxu1 %v10893_v62  ;;  %v10911_v62 = vld [vmem:[#allocation8 + $0x360] ss:$16 sps:$4 sm:$0xff]  }
 0x2d4   :  { %2475 = vmatprep.mubr.bf16.mxu1 %v10894_v43  ;;  %v10912_v43 = vld [vmem:[#allocation8 + $0x384] ss:$16 sps:$4 sm:$0xff]  }
 0x2db   :  { %2476 = vmatmul.mubr.bf16.gmra.mrb[152].mxu1 %v10896_v34  ;;  %v10914_v34 = vld [vmem:[#allocation8 + $0x380] ss:$16 sps:$4 sm:$0xff]  }
 0x2dc   :  { %2483 = vmatprep.mubr.bf16.mxu1 %v10897_v42  ;;  %v10915_v42 = vld [vmem:[#allocation8 + $0x3a4] ss:$16 sps:$4 sm:$0xff]  }
 0x2e3   :  { %2484 = vmatmul.mubr.bf16.gmra.mrb[156].mxu1 %v10899_v14  ;;  %v10917_v14 = vld [vmem:[#allocation8 + $0x3a0] ss:$16 sps:$4 sm:$0xff]  }
 0x2e4   :  { %2491 = vmatprep.mubr.bf16.mxu1 %v10900_v2  ;;  %v10918_v2 = vld [vmem:[#allocation8 + $0x3c4] ss:$16 sps:$4 sm:$0xff]  }
 0x2eb   :  { %2492 = vmatmul.mubr.bf16.gmra.mrb[160].mxu1 %v10902_v6  ;;  %v10920_v6 = vld [vmem:[#allocation8 + $0x3c0] ss:$16 sps:$4 sm:$0xff]  }
 0x2ec   :  { %2499 = vmatprep.mubr.bf16.mxu1 %v10903_v28  ;;  %v10921_v28 = vld [vmem:[#allocation8 + $0x3e4] ss:$16 sps:$4 sm:$0xff]  }
 0x2f3   :  { %2500 = vmatmul.mubr.bf16.gmra.mrb[164].mxu1 %v10905_v3  ;;  %v10923_v3 = vld [vmem:[#allocation8 + $0x3e0] ss:$16 sps:$4 sm:$0xff]  }
 0x2f4   :  { %2507 = vmatprep.mubr.bf16.mxu1 %v10906_v12  ;;  %v10926_v12 = vld [vmem:[#allocation8 + $0xc] ss:$16 sps:$4 sm:$0xff]  }
 0x2fb   :  { %2508 = vmatmul.mubr.bf16.gmra.mrb[168].mxu1 %v10908_v52  ;;  %v10924_v52 = vld [vmem:[#allocation8 + $0x8] ss:$16 sps:$4 sm:$0xff]  }
 0x2fc   :  { %2515 = vmatprep.mubr.bf16.mxu1 %v10909_v13  ;;  %v10927_v13 = vld [vmem:[#allocation8 + $0x2c] ss:$16 sps:$4 sm:$0xff]  }
 0x303   :  { %2516 = vmatmul.mubr.bf16.gmra.mrb[172].mxu1 %v10911_v62  ;;  %v10929_v62 = vld [vmem:[#allocation8 + $0x28] ss:$16 sps:$4 sm:$0xff]  }
 0x304   :  { %2523 = vmatprep.mubr.bf16.mxu1 %v10912_v43  ;;  %v10930_v43 = vld [vmem:[#allocation8 + $0x4c] ss:$16 sps:$4 sm:$0xff]  }
 0x30b   :  { %2524 = vmatmul.mubr.bf16.gmra.mrb[176].mxu1 %v10914_v34  ;;  %v10932_v34 = vld [vmem:[#allocation8 + $0x48] ss:$16 sps:$4 sm:$0xff]  }
 0x30c   :  { %2531 = vmatprep.mubr.bf16.mxu1 %v10915_v42  ;;  %v10933_v42 = vld [vmem:[#allocation8 + $0x6c] ss:$16 sps:$4 sm:$0xff]  }
 0x313   :  { %2532 = vmatmul.mubr.bf16.gmra.mrb[180].mxu1 %v10917_v14  ;;  %v10935_v14 = vld [vmem:[#allocation8 + $0x68] ss:$16 sps:$4 sm:$0xff]  }
 0x314   :  { %2539 = vmatprep.mubr.bf16.mxu1 %v10918_v2  ;;  %v10936_v2 = vld [vmem:[#allocation8 + $0x8c] ss:$16 sps:$4 sm:$0xff]  }
 0x31b   :  { %2540 = vmatmul.mubr.bf16.gmra.mrb[184].mxu1 %v10920_v6  ;;  %v10938_v6 = vld [vmem:[#allocation8 + $0x88] ss:$16 sps:$4 sm:$0xff]  }
 0x31c   :  { %2547 = vmatprep.mubr.bf16.mxu1 %v10921_v28  ;;  %v10939_v28 = vld [vmem:[#allocation8 + $0xac] ss:$16 sps:$4 sm:$0xff]  }
 0x323   :  { %2548 = vmatmul.mubr.bf16.gmra.mrb[188].mxu1 %v10923_v3  ;;  %v10941_v3 = vld [vmem:[#allocation8 + $0xa8] ss:$16 sps:$4 sm:$0xff]  }
 0x324   :  { %2588 = vmatprep.mubr.bf16.mxu1 %v10926_v12  ;;  %v10942_v12 = vld [vmem:[#allocation8 + $0xcc] ss:$16 sps:$4 sm:$0xff]  }
 0x32b   :  { %2589 = vmatmul.mubr.bf16.vlgmr.msra.gmra.mrb[64].mxu1 %v10924_v52  ;;  %v10944_v52 = vld [vmem:[#allocation8 + $0xc8] ss:$16 sps:$4 sm:$0xff]  }
 0x32c   :  { %2596 = vmatprep.mubr.bf16.mxu1 %v10927_v13  ;;  %v10945_v13 = vld [vmem:[#allocation8 + $0xec] ss:$16 sps:$4 sm:$0xff]  }
 0x333   :  { %2597 = vmatmul.mubr.bf16.gmra.mrb[68].mxu1 %v10929_v62  ;;  %v10947_v62 = vld [vmem:[#allocation8 + $0xe8] ss:$16 sps:$4 sm:$0xff]  }
 0x334   :  { %2604 = vmatprep.mubr.bf16.mxu1 %v10930_v43  ;;  %v10948_v43 = vld [vmem:[#allocation8 + $0x10c] ss:$16 sps:$4 sm:$0xff]  }
 0x33b   :  { %2605 = vmatmul.mubr.bf16.gmra.mrb[72].mxu1 %v10932_v34  ;;  %v10950_v34 = vld [vmem:[#allocation8 + $0x108] ss:$16 sps:$4 sm:$0xff]  }
 0x33c   :  { %2612 = vmatprep.mubr.bf16.mxu1 %v10933_v42  ;;  %v10951_v42 = vld [vmem:[#allocation8 + $0x12c] ss:$16 sps:$4 sm:$0xff]  }
 0x343   :  { %2613 = vmatmul.mubr.bf16.gmra.mrb[76].mxu1 %v10935_v14  ;;  %v10953_v14 = vld [vmem:[#allocation8 + $0x128] ss:$16 sps:$4 sm:$0xff]  }
 0x344   :  { %2620 = vmatprep.mubr.bf16.mxu1 %v10936_v2  ;;  %v10954_v2 = vld [vmem:[#allocation8 + $0x14c] ss:$16 sps:$4 sm:$0xff]  }
 0x34b   :  { %2621 = vmatmul.mubr.bf16.gmra.mrb[80].mxu1 %v10938_v6  ;;  %v10956_v6 = vld [vmem:[#allocation8 + $0x148] ss:$16 sps:$4 sm:$0xff]  }
 0x34c   :  { %2628 = vmatprep.mubr.bf16.mxu1 %v10939_v28  ;;  %v10957_v28 = vld [vmem:[#allocation8 + $0x16c] ss:$16 sps:$4 sm:$0xff]  }
 0x353   :  { %2629 = vmatmul.mubr.bf16.gmra.mrb[84].mxu1 %v10941_v3  ;;  %v10959_v3 = vld [vmem:[#allocation8 + $0x168] ss:$16 sps:$4 sm:$0xff]  }
 0x354   :  { %2636 = vmatprep.mubr.bf16.mxu1 %v10942_v12  ;;  %v10960_v12 = vld [vmem:[#allocation8 + $0x18c] ss:$16 sps:$4 sm:$0xff]  }
 0x35b   :  { %2637 = vmatmul.mubr.bf16.gmra.mrb[88].mxu1 %v10944_v52  ;;  %v10962_v52 = vld [vmem:[#allocation8 + $0x188] ss:$16 sps:$4 sm:$0xff]  }
 0x35c   :  { %2644 = vmatprep.mubr.bf16.mxu1 %v10945_v13  ;;  %v10963_v13 = vld [vmem:[#allocation8 + $0x1ac] ss:$16 sps:$4 sm:$0xff]  }
 0x363   :  { %2645 = vmatmul.mubr.bf16.gmra.mrb[92].mxu1 %v10947_v62  ;;  %v10965_v62 = vld [vmem:[#allocation8 + $0x1a8] ss:$16 sps:$4 sm:$0xff]  }
 0x364   :  { %2652 = vmatprep.mubr.bf16.mxu1 %v10948_v43  ;;  %v10966_v43 = vld [vmem:[#allocation8 + $0x1cc] ss:$16 sps:$4 sm:$0xff]  }
 0x36b   :  { %2653 = vmatmul.mubr.bf16.gmra.mrb[96].mxu1 %v10950_v34  ;;  %v10968_v34 = vld [vmem:[#allocation8 + $0x1c8] ss:$16 sps:$4 sm:$0xff]  }
 0x36c   :  { %2660 = vmatprep.mubr.bf16.mxu1 %v10951_v42  ;;  %v10969_v42 = vld [vmem:[#allocation8 + $0x1ec] ss:$16 sps:$4 sm:$0xff]  }
 0x373   :  { %2661 = vmatmul.mubr.bf16.gmra.mrb[100].mxu1 %v10953_v14  ;;  %v10971_v14 = vld [vmem:[#allocation8 + $0x1e8] ss:$16 sps:$4 sm:$0xff]  }
 0x374   :  { %2668 = vmatprep.mubr.bf16.mxu1 %v10954_v2  ;;  %v10972_v2 = vld [vmem:[#allocation8 + $0x20c] ss:$16 sps:$4 sm:$0xff]  }
 0x37b   :  { %2669 = vmatmul.mubr.bf16.gmra.mrb[104].mxu1 %v10956_v6  ;;  %v10974_v6 = vld [vmem:[#allocation8 + $0x208] ss:$16 sps:$4 sm:$0xff]  }
 0x37c   :  { %2676 = vmatprep.mubr.bf16.mxu1 %v10957_v28  ;;  %v10975_v28 = vld [vmem:[#allocation8 + $0x22c] ss:$16 sps:$4 sm:$0xff]  }
 0x383   :  { %2677 = vmatmul.mubr.bf16.gmra.mrb[108].mxu1 %v10959_v3  ;;  %v10977_v3 = vld [vmem:[#allocation8 + $0x228] ss:$16 sps:$4 sm:$0xff]  }
 0x384   :  { %2684 = vmatprep.mubr.bf16.mxu1 %v10960_v12  ;;  %v10978_v12 = vld [vmem:[#allocation8 + $0x24c] ss:$16 sps:$4 sm:$0xff]  }
 0x38b   :  { %2685 = vmatmul.mubr.bf16.gmra.mrb[112].mxu1 %v10962_v52  ;;  %v10980_v52 = vld [vmem:[#allocation8 + $0x248] ss:$16 sps:$4 sm:$0xff]  }
 0x38c   :  { %2692 = vmatprep.mubr.bf16.mxu1 %v10963_v13  ;;  %v10981_v13 = vld [vmem:[#allocation8 + $0x26c] ss:$16 sps:$4 sm:$0xff]  }
 0x393   :  { %2693 = vmatmul.mubr.bf16.gmra.mrb[116].mxu1 %v10965_v62  ;;  %v10983_v62 = vld [vmem:[#allocation8 + $0x268] ss:$16 sps:$4 sm:$0xff]  }
 0x394   :  { %2700 = vmatprep.mubr.bf16.mxu1 %v10966_v43  ;;  %v10984_v43 = vld [vmem:[#allocation8 + $0x28c] ss:$16 sps:$4 sm:$0xff]  }
 0x39b   :  { %2701 = vmatmul.mubr.bf16.gmra.mrb[120].mxu1 %v10968_v34  ;;  %v10986_v34 = vld [vmem:[#allocation8 + $0x288] ss:$16 sps:$4 sm:$0xff]  }
 0x39c   :  { %2708 = vmatprep.mubr.bf16.mxu1 %v10969_v42  ;;  %v10987_v42 = vld [vmem:[#allocation8 + $0x2ac] ss:$16 sps:$4 sm:$0xff]  }
 0x3a3   :  { %2709 = vmatmul.mubr.bf16.gmra.mrb[124].mxu1 %v10971_v14  ;;  %v10989_v14 = vld [vmem:[#allocation8 + $0x2a8] ss:$16 sps:$4 sm:$0xff]  }
 0x3a4   :  { %2716 = vmatprep.mubr.bf16.mxu1 %v10972_v2  ;;  %v10990_v2 = vld [vmem:[#allocation8 + $0x2cc] ss:$16 sps:$4 sm:$0xff]  }
 0x3ab   :  { %2717 = vmatmul.mubr.bf16.gmra.mrb[128].mxu1 %v10974_v6  ;;  %v10992_v6 = vld [vmem:[#allocation8 + $0x2c8] ss:$16 sps:$4 sm:$0xff]  }
 0x3ac   :  { %2724 = vmatprep.mubr.bf16.mxu1 %v10975_v28  ;;  %v10993_v28 = vld [vmem:[#allocation8 + $0x2ec] ss:$16 sps:$4 sm:$0xff]  }
 0x3b3   :  { %2725 = vmatmul.mubr.bf16.gmra.mrb[132].mxu1 %v10977_v3  ;;  %v10995_v3 = vld [vmem:[#allocation8 + $0x2e8] ss:$16 sps:$4 sm:$0xff]  }
 0x3b4   :  { %2732 = vmatprep.mubr.bf16.mxu1 %v10978_v12  ;;  %v10996_v12 = vld [vmem:[#allocation8 + $0x30c] ss:$16 sps:$4 sm:$0xff]  }
 0x3bb   :  { %2733 = vmatmul.mubr.bf16.gmra.mrb[136].mxu1 %v10980_v52  ;;  %v10998_v52 = vld [vmem:[#allocation8 + $0x308] ss:$16 sps:$4 sm:$0xff]  }
 0x3bc   :  { %2740 = vmatprep.mubr.bf16.mxu1 %v10981_v13  ;;  %v10999_v13 = vld [vmem:[#allocation8 + $0x32c] ss:$16 sps:$4 sm:$0xff]  }
 0x3c3   :  { %2741 = vmatmul.mubr.bf16.gmra.mrb[140].mxu1 %v10983_v62  ;;  %v11001_v62 = vld [vmem:[#allocation8 + $0x328] ss:$16 sps:$4 sm:$0xff]  }
 0x3c4   :  { %2748 = vmatprep.mubr.bf16.mxu1 %v10984_v43  ;;  %v11002_v43 = vld [vmem:[#allocation8 + $0x34c] ss:$16 sps:$4 sm:$0xff]  }
 0x3cb   :  { %2749 = vmatmul.mubr.bf16.gmra.mrb[144].mxu1 %v10986_v34  ;;  %v11004_v34 = vld [vmem:[#allocation8 + $0x348] ss:$16 sps:$4 sm:$0xff]  }
 0x3cc   :  { %2756 = vmatprep.mubr.bf16.mxu1 %v10987_v42  ;;  %v11005_v42 = vld [vmem:[#allocation8 + $0x36c] ss:$16 sps:$4 sm:$0xff]  }
 0x3d3   :  { %2757 = vmatmul.mubr.bf16.gmra.mrb[148].mxu1 %v10989_v14  ;;  %v11022_v14 = vld [vmem:[#allocation8 + $0x4] ss:$16 sps:$4 sm:$0xff]  }
 0x3d4   :  { %2764 = vmatprep.mubr.bf16.mxu1 %v10990_v2  ;;  %v12519_v2 = vstv %s1273_s5  ;;  %4063 = vmatprep.mubr.bf16.mxu0 %v11022_v14 }
 0x3d5   :  { %v1277_v53 = vmul.f32 %v12519_v2, %v12232_v38 }
 0x3db   :  { %2765 = vmatmul.mubr.bf16.gmra.mrb[152].mxu1 %v10992_v6  ;;  %v12521_v6 = vstv %s9672_s18 }
 0x3dc   :  { %2772 = vmatprep.mubr.bf16.mxu1 %v10993_v28 }
 0x3e3   :  { %2773 = vmatmul.mubr.bf16.gmra.mrb[156].mxu1 %v10995_v3  ;;  %v1275_v3 = vmul.f32 %v12519_v2, %v12238_v19  ;;  %v14557_v19 = vmov 0  }
 0x3e4   :  { %2780 = vmatprep.mubr.bf16.mxu1 %v10996_v12 }
 0x3eb   :  { %2781 = vmatmul.mubr.bf16.gmra.mrb[160].mxu1 %v10998_v52 }
 0x3ec   :  { %2788 = vmatprep.mubr.bf16.mxu1 %v10999_v13  ;;  %v11007_v13 = vld [vmem:[#allocation8 + $0x368] ss:$16 sps:$4 sm:$0xff]  }
 0x3f3   :  { %2789 = vmatmul.mubr.bf16.gmra.mrb[164].mxu1 %v11001_v62 }
 0x3f4   :  { %2796 = vmatprep.mubr.bf16.mxu1 %v11002_v43  ;;  %v11008_v43 = vld [vmem:[#allocation8 + $0x38c] ss:$16 sps:$4 sm:$0xff]  }
 0x3fb   :  { %2797 = vmatmul.mubr.bf16.gmra.mrb[168].mxu1 %v11004_v34  ;;  %v1276_v34 = vmul.f32 %v12519_v2, %v12241_v20 }
 0x3fc   :  { %2804 = vmatprep.mubr.bf16.mxu1 %v11005_v42 }
 0x3fe   :  { %v2590_v28 = vpop.f32.mrb[64].mxu1 }
 0x3ff   :  { %v2911_v12 = vmul.f32 %v12521_v6, %v2590_v28  ;;  %v2592_v52 = vpop.f32.mrb[65].mxu1 }
 0x400   :  { %v2593_v62 = vpop.f32.mrb[66].mxu1 }
 0x401   :  { %v12526_v10 = vadd.f32 %v2911_v12, %v1275_v3  ;;  %v2912_v46 = vmul.f32 %v12521_v6, %v2593_v62  ;;  %v3359_v1 = vpack.c.bf16 %v2593_v62, %v2590_v28  ;;  %v2595_v42 = vpop.f32.mrb[67].mxu1 }
 0x402   :  { %v11013_v42 = vld [vmem:[#allocation8 + $0x3a8] ss:$16 sps:$4 sm:$0xff]  }
 0x403   :  { %14556 = vst [vmem:[#allocation31_spill] sm:$0xff] %v12526_v10  ;;  %v12531_v14 = vadd.f32 %v2912_v46, %v1276_v34  ;;  %2805 = vmatmul.mubr.bf16.gmra.mrb[172].mxu1 %v11007_v13  ;;  %4032 = vmatpush1.bf16.msra.mxu0 %v3359_v1  ;;  %v11010_v10 = vld [vmem:[#allocation8 + $0x388] ss:$16 sps:$4 sm:$0xff]   ;;  %v1278_v46 = vmul.f32 %v12519_v2, %v12235_v17 }
 0x404   :  { %2812 = vmatprep.mubr.bf16.mxu1 %v11008_v43  ;;  %4033 = vmatprep.subr.bf16.mxu0 %v14557_v19  ;;  %v1279_v43 = vmul.f32 %v12519_v2, %v12255_v29 }
 0x406   :  { %v2598_v52 = vpop.f32.mrb[68].mxu1 }
 0x407   :  { %v2913_v3 = vmul.f32 %v12521_v6, %v2598_v52  ;;  %v2600_v12 = vpop.f32.mrb[69].mxu1 }
 0x408   :  { %v2601_v20 = vpop.f32.mrb[70].mxu1 }
 0x409   :  { %v12537_v18 = vadd.f32 %v2913_v3, %v1277_v53  ;;  %v2914_v1 = vmul.f32 %v12521_v6, %v2601_v20  ;;  %v3360_v28 = vpack.c.bf16 %v2601_v20, %v2598_v52  ;;  %v2603_v13 = vpop.f32.mrb[71].mxu1  ;;  %v11014_v3 = vld [vmem:[#allocation8 + $0x3cc] ss:$16 sps:$4 sm:$0xff]   ;;  %v1280_v52 = vmul.f32 %v12519_v2, %v12258_v30 }
 0x40b   :  { %v12542_v62 = vadd.f32 %v2914_v1, %v1278_v46  ;;  %2813 = vmatmul.mubr.bf16.gmra.mrb[176].mxu1 %v11010_v10  ;;  %4034 = vmatpush1.bf16.msra.mxu0 %v3360_v28  ;;  %v1281_v1 = vmul.f32 %v12519_v2, %v12249_v26 }
 0x40c   :  { %2820 = vmatprep.mubr.bf16.mxu1 %v11011_v0  ;;  %4035 = vmatprep.subr.bf16.mxu0 %v14557_v19 }
 0x40e   :  { %v2606_v38 = vpop.f32.mrb[72].mxu1 }
 0x40f   :  { %v2915_v53 = vmul.f32 %v12521_v6, %v2606_v38  ;;  %v2608_v34 = vpop.f32.mrb[73].mxu1 }
 0x410   :  { %v2609_v17 = vpop.f32.mrb[74].mxu1 }
 0x411   :  { %v12548_v12 = vadd.f32 %v2915_v53, %v1279_v43  ;;  %v2916_v10 = vmul.f32 %v12521_v6, %v2609_v17  ;;  %v3361_v0 = vpack.c.bf16 %v2609_v17, %v2606_v38  ;;  %v2611_v20 = vpop.f32.mrb[75].mxu1  ;;  %v11016_v43 = vld [vmem:[#allocation8 + $0x3c8] ss:$16 sps:$4 sm:$0xff]   ;;  %v11017_v53 = vld [vmem:[#allocation8 + $0x3ec] ss:$16 sps:$4 sm:$0xff]   ;;  %v1282_v38 = vmul.f32 %v12519_v2, %v12252_v27 }
 0x413   :  { %v12553_v46 = vadd.f32 %v2916_v10, %v1280_v52  ;;  %2821 = vmatmul.mubr.bf16.gmra.mrb[180].mxu1 %v11013_v42  ;;  %4036 = vmatpush1.bf16.msra.mxu0 %v3361_v0  ;;  %v1283_v10 = vmul.f32 %v12519_v2, %v12273_v40 }
 0x414   :  { %2828 = vmatprep.mubr.bf16.mxu1 %v11014_v3  ;;  %4037 = vmatprep.subr.bf16.mxu0 %v14557_v19 }
 0x416   :  { %v2614_v29 = vpop.f32.mrb[76].mxu1 }
 0x417   :  { %v2917_v28 = vmul.f32 %v12521_v6, %v2614_v29  ;;  %v2616_v13 = vpop.f32.mrb[77].mxu1 }
 0x418   :  { %v2617_v30 = vpop.f32.mrb[78].mxu1 }
 0x419   :  { %v12559_v34 = vadd.f32 %v2917_v28, %v1281_v1  ;;  %v2918_v42 = vmul.f32 %v12521_v6, %v2617_v30  ;;  %v3362_v17 = vpack.c.bf16 %v2617_v30, %v2614_v29  ;;  %v2619_v3 = vpop.f32.mrb[79].mxu1  ;;  %v11019_v1 = vld [vmem:[#allocation8 + $0x3e8] ss:$16 sps:$4 sm:$0xff]   ;;  %v1284_v29 = vmul.f32 %v12519_v2, %v12276_v41 }
 0x41a   :  { %v1286_v41 = vmul.f32 %v12519_v2, %v12270_v37  ;;  %v1288_v37 = vmul.f32 %v12519_v2, %v12294_v51  ;;  %v1290_v51 = vmul.f32 %v12519_v2, %v12288_v48  ;;  %v1292_v48 = vmul.f32 %v12519_v2, %v12312_v61 }
 0x41b   :  { %v12564_v52 = vadd.f32 %v2918_v42, %v1282_v38  ;;  %2829 = vmatmul.mubr.bf16.gmra.mrb[184].mxu1 %v11016_v43  ;;  %4038 = vmatpush1.bf16.msra.mxu0 %v3362_v17  ;;  %v1285_v38 = vmul.f32 %v12519_v2, %v12267_v36  ;;  %v1287_v36 = vmul.f32 %v12519_v2, %v12291_v50 }
 0x41c   :  { %2836 = vmatprep.mubr.bf16.mxu1 %v11017_v53  ;;  %4039 = vmatprep.subr.bf16.mxu0 %v14557_v19  ;;  %v1289_v50 = vmul.f32 %v12519_v2, %v12285_v47  ;;  %v1291_v47 = vmul.f32 %v12519_v2, %v12309_v60  ;;  %v1293_v60 = vmul.f32 %v12519_v2, %v12303_v57 }
 0x41d   :  { %v1294_v61 = vmul.f32 %v12519_v2, %v12306_v58  ;;  %v1295_v57 = vmul.f32 %v12519_v2, %v12327_v7  ;;  %v1296_v58 = vmul.f32 %v12519_v2, %v12330_v8  ;;  %v1297_v7 = vmul.f32 %v12519_v2, %v12321_v4 }
 0x41e   :  { %v2622_v26 = vpop.f32.mrb[80].mxu1  ;;  %v1298_v8 = vmul.f32 %v12519_v2, %v12324_v5  ;;  %v1299_v4 = vmul.f32 %v12519_v2, %v12345_v21  ;;  %v1300_v5 = vmul.f32 %v12519_v2, %v12348_v22  ;;  %v1301_v21 = vmul.f32 %v12519_v2, %v12339_v15 }
 0x41f   :  { %v2919_v0 = vmul.f32 %v12521_v6, %v2622_v26  ;;  %v2624_v20 = vpop.f32.mrb[81].mxu1  ;;  %v1302_v22 = vmul.f32 %v12519_v2, %v12342_v16  ;;  %v1303_v15 = vmul.f32 %v12519_v2, %v12363_v35  ;;  %v1304_v16 = vmul.f32 %v12519_v2, %v12366_v39 }
 0x420   :  { %v2625_v27 = vpop.f32.mrb[82].mxu1  ;;  %v1305_v35 = vmul.f32 %v12519_v2, %v12357_v32  ;;  %v1306_v39 = vmul.f32 %v12519_v2, %v12360_v33 }
 0x421   :  { %v12570_v28 = vadd.f32 %v2919_v0, %v1283_v10  ;;  %v2920_v13 = vmul.f32 %v12521_v6, %v2625_v27  ;;  %v3363_v43 = vpack.c.bf16 %v2625_v27, %v2622_v26  ;;  %v2627_v30 = vpop.f32.mrb[83].mxu1 }
 0x423   :  { %v12575_v53 = vadd.f32 %v2920_v13, %v1284_v29  ;;  %2837 = vmatmul.mubr.bf16.gmra.mrb[188].mxu1 %v11019_v1  ;;  %4040 = vmatpush1.bf16.msra.mxu0 %v3363_v43 }
 0x424   :  { %4041 = vmatprep.subr.bf16.mxu0 %v14557_v19 }
 0x426   :  { %v2630_v40 = vpop.f32.mrb[84].mxu1 }
 0x427   :  { %v2921_v42 = vmul.f32 %v12521_v6, %v2630_v40  ;;  %v2632_v17 = vpop.f32.mrb[85].mxu1 }
 0x428   :  { %v2633_v3 = vpop.f32.mrb[86].mxu1 }
 0x429   :  { %v12581_v10 = vadd.f32 %v2921_v42, %v1285_v38  ;;  %v2922_v26 = vmul.f32 %v12521_v6, %v2633_v3  ;;  %v3364_v0 = vpack.c.bf16 %v2633_v3, %v2630_v40  ;;  %v2635_v20 = vpop.f32.mrb[87].mxu1 }
 0x42b   :  { %v12586_v1 = vadd.f32 %v2922_v26, %v1286_v41  ;;  %4042 = vmatpush1.bf16.msra.mxu0 %v3364_v0 }
 0x42c   :  { %4043 = vmatprep.subr.bf16.mxu0 %v14557_v19 }
 0x42e   :  { %v2638_v27 = vpop.f32.mrb[88].mxu1 }
 0x42f   :  { %v2923_v29 = vmul.f32 %v12521_v6, %v2638_v27  ;;  %v2640_v13 = vpop.f32.mrb[89].mxu1 }
 0x430   :  { %v2641_v43 = vpop.f32.mrb[90].mxu1 }
 0x431   :  { %v12592_v30 = vadd.f32 %v2923_v29, %v1287_v36  ;;  %v2924_v40 = vmul.f32 %v12521_v6, %v2641_v43  ;;  %v3365_v38 = vpack.c.bf16 %v2641_v43, %v2638_v27  ;;  %v2643_v42 = vpop.f32.mrb[91].mxu1 }
 0x433   :  { %v12597_v17 = vadd.f32 %v2924_v40, %v1288_v37  ;;  %4044 = vmatpush1.bf16.msra.mxu0 %v3365_v38 }
 0x434   :  { %4045 = vmatprep.subr.bf16.mxu0 %v14557_v19 }
 0x436   :  { %v2646_v3 = vpop.f32.mrb[92].mxu1 }
 0x437   :  { %v2925_v41 = vmul.f32 %v12521_v6, %v2646_v3  ;;  %v2648_v26 = vpop.f32.mrb[93].mxu1 }
 0x438   :  { %v2649_v0 = vpop.f32.mrb[94].mxu1 }
 0x439   :  { %v12603_v20 = vadd.f32 %v2925_v41, %v1289_v50  ;;  %v2926_v27 = vmul.f32 %v12521_v6, %v2649_v0  ;;  %v3366_v36 = vpack.c.bf16 %v2649_v0, %v2646_v3  ;;  %v2651_v29 = vpop.f32.mrb[95].mxu1 }
 0x43b   :  { %v12608_v13 = vadd.f32 %v2926_v27, %v1290_v51  ;;  %4046 = vmatpush1.bf16.msra.mxu0 %v3366_v36 }
 0x43c   :  { %4047 = vmatprep.subr.bf16.mxu0 %v14557_v19 }
 0x43e   :  { %v2654_v43 = vpop.f32.mrb[96].mxu1 }
 0x43f   :  { %v2927_v37 = vmul.f32 %v12521_v6, %v2654_v43  ;;  %v2656_v40 = vpop.f32.mrb[97].mxu1 }
 0x440   :  { %v2657_v38 = vpop.f32.mrb[98].mxu1 }
 0x441   :  { %v12614_v42 = vadd.f32 %v2927_v37, %v1291_v47  ;;  %v2928_v3 = vmul.f32 %v12521_v6, %v2657_v38  ;;  %v3367_v50 = vpack.c.bf16 %v2657_v38, %v2654_v43  ;;  %v2659_v41 = vpop.f32.mrb[99].mxu1 }
 0x443   :  { %v12619_v26 = vadd.f32 %v2928_v3, %v1292_v48  ;;  %4048 = vmatpush1.bf16.msra.mxu0 %v3367_v50 }
 0x444   :  { %4049 = vmatprep.subr.bf16.mxu0 %v14557_v19 }
 0x446   :  { %v2662_v0 = vpop.f32.mrb[100].mxu1 }
 0x447   :  { %v2929_v51 = vmul.f32 %v12521_v6, %v2662_v0  ;;  %v2664_v27 = vpop.f32.mrb[101].mxu1 }
 0x448   :  { %v2665_v36 = vpop.f32.mrb[102].mxu1 }
 0x449   :  { %v12625_v29 = vadd.f32 %v2929_v51, %v1293_v60  ;;  %v2930_v43 = vmul.f32 %v12521_v6, %v2665_v36  ;;  %v3368_v47 = vpack.c.bf16 %v2665_v36, %v2662_v0  ;;  %v2667_v37 = vpop.f32.mrb[103].mxu1 }
 0x44b   :  { %v12630_v40 = vadd.f32 %v2930_v43, %v1294_v61  ;;  %4050 = vmatpush1.bf16.msra.mxu0 %v3368_v47 }
 0x44c   :  { %4051 = vmatprep.subr.bf16.mxu0 %v14557_v19 }
 0x44e   :  { %v2670_v38 = vpop.f32.mrb[104].mxu1 }
 0x44f   :  { %v2931_v48 = vmul.f32 %v12521_v6, %v2670_v38  ;;  %v2672_v3 = vpop.f32.mrb[105].mxu1 }
 0x450   :  { %v2673_v50 = vpop.f32.mrb[106].mxu1 }
 0x451   :  { %v12636_v41 = vadd.f32 %v2931_v48, %v1295_v57  ;;  %v2932_v0 = vmul.f32 %v12521_v6, %v2673_v50  ;;  %v3369_v60 = vpack.c.bf16 %v2673_v50, %v2670_v38  ;;  %v2675_v51 = vpop.f32.mrb[107].mxu1 }
 0x453   :  { %v12641_v27 = vadd.f32 %v2932_v0, %v1296_v58  ;;  %4052 = vmatpush1.bf16.msra.mxu0 %v3369_v60 }
 0x454   :  { %4053 = vmatprep.subr.bf16.mxu0 %v14557_v19 }
 0x456   :  { %v2678_v36 = vpop.f32.mrb[108].mxu1 }
 0x457   :  { %v2933_v61 = vmul.f32 %v12521_v6, %v2678_v36  ;;  %v2680_v43 = vpop.f32.mrb[109].mxu1 }
 0x458   :  { %v2681_v47 = vpop.f32.mrb[110].mxu1 }
 0x459   :  { %v12647_v37 = vadd.f32 %v2933_v61, %v1297_v7  ;;  %v2934_v38 = vmul.f32 %v12521_v6, %v2681_v47  ;;  %v3370_v57 = vpack.c.bf16 %v2681_v47, %v2678_v36  ;;  %v2683_v48 = vpop.f32.mrb[111].mxu1 }
 0x45b   :  { %v12652_v3 = vadd.f32 %v2934_v38, %v1298_v8  ;;  %4054 = vmatpush1.bf16.msra.mxu0 %v3370_v57 }
 0x45c   :  { %4055 = vmatprep.subr.bf16.mxu0 %v14557_v19 }
 0x45e   :  { %v2686_v50 = vpop.f32.mrb[112].mxu1 }
 0x45f   :  { %v2935_v58 = vmul.f32 %v12521_v6, %v2686_v50  ;;  %v2688_v0 = vpop.f32.mrb[113].mxu1 }
 0x460   :  { %v2689_v60 = vpop.f32.mrb[114].mxu1 }
 0x461   :  { %v12658_v51 = vadd.f32 %v2935_v58, %v1299_v4  ;;  %v2936_v36 = vmul.f32 %v12521_v6, %v2689_v60  ;;  %v3371_v7 = vpack.c.bf16 %v2689_v60, %v2686_v50  ;;  %v2691_v61 = vpop.f32.mrb[115].mxu1 }
 0x463   :  { %v12663_v43 = vadd.f32 %v2936_v36, %v1300_v5  ;;  %4056 = vmatpush1.bf16.msra.mxu0 %v3371_v7 }
 0x464   :  { %4057 = vmatprep.subr.bf16.mxu0 %v14557_v19 }
 0x466   :  { %v2694_v47 = vpop.f32.mrb[116].mxu1 }
 0x467   :  { %v2937_v8 = vmul.f32 %v12521_v6, %v2694_v47  ;;  %v2696_v38 = vpop.f32.mrb[117].mxu1 }
 0x468   :  { %v2697_v57 = vpop.f32.mrb[118].mxu1 }
 0x469   :  { %v12669_v48 = vadd.f32 %v2937_v8, %v1301_v21  ;;  %v2938_v50 = vmul.f32 %v12521_v6, %v2697_v57  ;;  %v3372_v4 = vpack.c.bf16 %v2697_v57, %v2694_v47  ;;  %v2699_v58 = vpop.f32.mrb[119].mxu1 }
 0x46b   :  { %v12674_v0 = vadd.f32 %v2938_v50, %v1302_v22  ;;  %4058 = vmatpush1.bf16.msra.mxu0 %v3372_v4 }
 0x46c   :  { %4059 = vmatprep.subr.bf16.mxu0 %v14557_v19 }
 0x46e   :  { %v2702_v60 = vpop.f32.mrb[120].mxu1 }
 0x46f   :  { %v2939_v5 = vmul.f32 %v12521_v6, %v2702_v60  ;;  %v2704_v36 = vpop.f32.mrb[121].mxu1 }
 0x470   :  { %v2705_v7 = vpop.f32.mrb[122].mxu1  ;;  %v11020_v36 = vld [vmem:[#allocation8] ss:$16 sps:$4 sm:$0xff]  }
 0x471   :  { %v12680_v61 = vadd.f32 %v2939_v5, %v1303_v15  ;;  %v2940_v47 = vmul.f32 %v12521_v6, %v2705_v7  ;;  %v3373_v21 = vpack.c.bf16 %v2705_v7, %v2702_v60  ;;  %v2707_v8 = vpop.f32.mrb[123].mxu1 }
 0x473   :  { %v12685_v38 = vadd.f32 %v2940_v47, %v1304_v16  ;;  %4060 = vmatpush1.bf16.msra.mxu0 %v3373_v21  ;;  %v11023_v16 = vld [vmem:[#allocation8 + $0x24] ss:$16 sps:$4 sm:$0xff]   ;;  %v1307_v47 = vmul.f32 %v12519_v2, %v12378_v49 }
 0x474   :  { %4061 = vmatprep.subr.bf16.mxu0 %v14557_v19 }
 0x476   :  { %v2710_v57 = vpop.f32.mrb[124].mxu1 }
 0x477   :  { %v2941_v22 = vmul.f32 %v12521_v6, %v2710_v57  ;;  %v2712_v50 = vpop.f32.mrb[125].mxu1 }
 0x478   :  { %v2713_v4 = vpop.f32.mrb[126].mxu1 }
 0x479   :  { %v12691_v58 = vadd.f32 %v2941_v22, %v1305_v35  ;;  %v2942_v60 = vmul.f32 %v12521_v6, %v2713_v4  ;;  %v3374_v15 = vpack.c.bf16 %v2713_v4, %v2710_v57  ;;  %v2715_v5 = vpop.f32.mrb[127].mxu1  ;;  %v1308_v57 = vmul.f32 %v12519_v2, %v12384_v59 }
 0x47a   :  { %v1309_v5 = vmul.f32 %v12519_v2, %v12375_v45 }
 0x47b   :  { %v12696_v7 = vadd.f32 %v2942_v60, %v1306_v39  ;;  %4062 = vmatpush1.bf16.msra.mxu0 %v3374_v15  ;;  %v11025_v39 = vld [vmem:[#allocation8 + $0x20] ss:$16 sps:$4 sm:$0xff]   ;;  %v11026_v15 = vld [vmem:[#allocation8 + $0x44] ss:$16 sps:$4 sm:$0xff]  }
 0x47c   :  { %4320 = vmatprep.subr.bf16.mxu0 %v14557_v19 }
 0x47e   :  { %v2718_v32 = vpop.f32.mrb[128].mxu1  ;;  %4064 = vmatmul.mubr.bf16.vlgmr.msra.gmra.mrb[64].mxu0 %v11020_v36 }
 0x47f   :  { %v2943_v21 = vmul.f32 %v12521_v6, %v2718_v32  ;;  %v2720_v8 = vpop.f32.mrb[129].mxu1  ;;  %4071 = vmatprep.mubr.bf16.mxu0 %v11023_v16 }
 0x480   :  { %v2721_v33 = vpop.f32.mrb[130].mxu1 }
 0x481   :  { %v12702_v35 = vadd.f32 %v2943_v21, %v1307_v47  ;;  %v2944_v22 = vmul.f32 %v12521_v6, %v2721_v33  ;;  %v3375_v50 = vpack.c.bf16 %v2721_v33, %v2718_v32  ;;  %v2723_v4 = vpop.f32.mrb[131].mxu1  ;;  %v1310_v32 = vmul.f32 %v12519_v2, %v12381_v54 }
 0x482   :  { %v1311_v4 = vmul.f32 %v12519_v2, %v12394_v11 }
 0x483   :  { %v12707_v60 = vadd.f32 %v2944_v22, %v1308_v57  ;;  %4321 = vmatpush1.bf16.msra.mxu0 %v3375_v50  ;;  %v11028_v57 = vld [vmem:[#allocation8 + $0x40] ss:$16 sps:$4 sm:$0xff]   ;;  %v11029_v50 = vld [vmem:[#allocation8 + $0x64] ss:$16 sps:$4 sm:$0xff]  }
 0x484   :  { %4322 = vmatprep.subr.bf16.mxu0 %v14557_v19 }
 0x486   :  { %v2726_v49 = vpop.f32.mrb[132].mxu1  ;;  %4072 = vmatmul.mubr.bf16.gmra.mrb[68].mxu0 %v11025_v39 }
 0x487   :  { %v2945_v36 = vmul.f32 %v12521_v6, %v2726_v49  ;;  %v2728_v16 = vpop.f32.mrb[133].mxu1  ;;  %4079 = vmatprep.mubr.bf16.mxu0 %v11026_v15 }
 0x488   :  { %v2729_v59 = vpop.f32.mrb[134].mxu1 }
 0x489   :  { %v12713_v47 = vadd.f32 %v2945_v36, %v1309_v5  ;;  %v2946_v21 = vmul.f32 %v12521_v6, %v2729_v59  ;;  %v3376_v8 = vpack.c.bf16 %v2729_v59, %v2726_v49  ;;  %v2731_v33 = vpop.f32.mrb[135].mxu1  ;;  %v1312_v49 = vmul.f32 %v12519_v2, %v12403_v25 }
 0x48a   :  { %v1313_v33 = vmul.f32 %v12519_v2, %v12397_v23 }
 0x48b   :  { %v12718_v22 = vadd.f32 %v2946_v21, %v1310_v32  ;;  %4323 = vmatpush1.bf16.msra.mxu0 %v3376_v8  ;;  %v11031_v32 = vld [vmem:[#allocation8 + $0x60] ss:$16 sps:$4 sm:$0xff]   ;;  %v11032_v8 = vld [vmem:[#allocation8 + $0x84] ss:$16 sps:$4 sm:$0xff]  }
 0x48c   :  { %4324 = vmatprep.subr.bf16.mxu0 %v14557_v19 }
 0x48e   :  { %v2734_v45 = vpop.f32.mrb[136].mxu1  ;;  %4080 = vmatmul.mubr.bf16.gmra.mrb[72].mxu0 %v11028_v57 }
 0x48f   :  { %v2947_v39 = vmul.f32 %v12521_v6, %v2734_v45  ;;  %v2736_v15 = vpop.f32.mrb[137].mxu1  ;;  %4087 = vmatprep.mubr.bf16.mxu0 %v11029_v50 }
 0x490   :  { %v2737_v54 = vpop.f32.mrb[138].mxu1 }
 0x491   :  { %v12724_v5 = vadd.f32 %v2947_v39, %v1311_v4  ;;  %v2948_v36 = vmul.f32 %v12521_v6, %v2737_v54  ;;  %v3377_v16 = vpack.c.bf16 %v2737_v54, %v2734_v45  ;;  %v2739_v59 = vpop.f32.mrb[139].mxu1  ;;  %v1314_v45 = vmul.f32 %v12519_v2, %v12400_v24 }
 0x492   :  { %v1315_v59 = vmul.f32 %v12519_v2, %v12410_v44 }
 0x493   :  { %v12729_v21 = vadd.f32 %v2948_v36, %v1312_v49  ;;  %4325 = vmatpush1.bf16.msra.mxu0 %v3377_v16  ;;  %v11034_v49 = vld [vmem:[#allocation8 + $0x80] ss:$16 sps:$4 sm:$0xff]   ;;  %v11035_v16 = vld [vmem:[#allocation8 + $0xa4] ss:$16 sps:$4 sm:$0xff]  }
 0x494   :  { %4326 = vmatprep.subr.bf16.mxu0 %v14557_v19 }
 0x496   :  { %v2742_v11 = vpop.f32.mrb[140].mxu1  ;;  %4088 = vmatmul.mubr.bf16.gmra.mrb[76].mxu0 %v11031_v32 }
 0x497   :  { %v2949_v57 = vmul.f32 %v12521_v6, %v2742_v11  ;;  %v2744_v50 = vpop.f32.mrb[141].mxu1  ;;  %4095 = vmatprep.mubr.bf16.mxu0 %v11032_v8 }
 0x498   :  { %v2745_v25 = vpop.f32.mrb[142].mxu1 }
 0x499   :  { %v12735_v4 = vadd.f32 %v2949_v57, %v1313_v33  ;;  %v2950_v39 = vmul.f32 %v12521_v6, %v2745_v25  ;;  %v3378_v15 = vpack.c.bf16 %v2745_v25, %v2742_v11  ;;  %v2747_v54 = vpop.f32.mrb[143].mxu1  ;;  %v1316_v11 = vmul.f32 %v12519_v2, %v12420_v63 }
 0x49a   :  { %v1317_v54 = vmul.f32 %v12519_v2, %v12414_v55 }
 0x49b   :  { %v12740_v36 = vadd.f32 %v2950_v39, %v1314_v45  ;;  %4327 = vmatpush1.bf16.msra.mxu0 %v3378_v15  ;;  %v11037_v45 = vld [vmem:[#allocation8 + $0xa0] ss:$16 sps:$4 sm:$0xff]   ;;  %v11038_v15 = vld [vmem:[#allocation8 + $0xc4] ss:$16 sps:$4 sm:$0xff]  }
 0x49c   :  { %4328 = vmatprep.subr.bf16.mxu0 %v14557_v19 }
 0x49e   :  { %v2750_v23 = vpop.f32.mrb[144].mxu1  ;;  %4096 = vmatmul.mubr.bf16.gmra.mrb[80].mxu0 %v11034_v49 }
 0x49f   :  { %v2951_v32 = vmul.f32 %v12521_v6, %v2750_v23  ;;  %v2752_v8 = vpop.f32.mrb[145].mxu1  ;;  %4103 = vmatprep.mubr.bf16.mxu0 %v11035_v16 }
 0x4a0   :  { %v2753_v24 = vpop.f32.mrb[146].mxu1 }
 0x4a1   :  { %v12746_v33 = vadd.f32 %v2951_v32, %v1315_v59  ;;  %v2952_v57 = vmul.f32 %v12521_v6, %v2753_v24  ;;  %v3379_v50 = vpack.c.bf16 %v2753_v24, %v2750_v23  ;;  %v2755_v25 = vpop.f32.mrb[147].mxu1  ;;  %v1318_v23 = vmul.f32 %v12519_v2, %v12417_v56 }
 0x4a2   :  { %v1319_v25 = vmul.f32 %v12519_v2, %v12428_v9 }
 0x4a3   :  { %v12751_v39 = vadd.f32 %v2952_v57, %v1316_v11  ;;  %4329 = vmatpush1.bf16.msra.mxu0 %v3379_v50  ;;  %v11040_v11 = vld [vmem:[#allocation8 + $0xc0] ss:$16 sps:$4 sm:$0xff]   ;;  %v11041_v50 = vld [vmem:[#allocation8 + $0xe4] ss:$16 sps:$4 sm:$0xff]  }
 0x4a4   :  { %4330 = vmatprep.subr.bf16.mxu0 %v14557_v19 }
 0x4a6   :  { %v2758_v44 = vpop.f32.mrb[148].mxu1  ;;  %4104 = vmatmul.mubr.bf16.gmra.mrb[84].mxu0 %v11037_v45 }
 0x4a7   :  { %v2953_v49 = vmul.f32 %v12521_v6, %v2758_v44  ;;  %v2760_v16 = vpop.f32.mrb[149].mxu1  ;;  %4111 = vmatprep.mubr.bf16.mxu0 %v11038_v15 }
 0x4a8   :  { %v2761_v63 = vpop.f32.mrb[150].mxu1 }
 0x4a9   :  { %v12757_v59 = vadd.f32 %v2953_v49, %v1317_v54  ;;  %v2954_v32 = vmul.f32 %v12521_v6, %v2761_v63  ;;  %v3380_v8 = vpack.c.bf16 %v2761_v63, %v2758_v44  ;;  %v2763_v24 = vpop.f32.mrb[151].mxu1  ;;  %v1320_v44 = vmul.f32 %v12519_v2, %v12438_v31 }
 0x4aa   :  { %v14558_v24 = vld [vmem:[#allocation13_spill] sm:$0xff] }
 0x4ab   :  { %v12762_v57 = vadd.f32 %v2954_v32, %v1318_v23  ;;  %4331 = vmatpush1.bf16.msra.mxu0 %v3380_v8  ;;  %v11043_v23 = vld [vmem:[#allocation8 + $0xe0] ss:$16 sps:$4 sm:$0xff]   ;;  %v11044_v8 = vld [vmem:[#allocation8 + $0x104] ss:$16 sps:$4 sm:$0xff]  }
 0x4ac   :  { %4332 = vmatprep.subr.bf16.mxu0 %v14557_v19 }
 0x4ae   :  { %v2766_v55 = vpop.f32.mrb[152].mxu1  ;;  %4112 = vmatmul.mubr.bf16.gmra.mrb[88].mxu0 %v11040_v11  ;;  %v1321_v11 = vmul.f32 %v12519_v2, %v14558_v24 }
 0x4af   :  { %v2955_v45 = vmul.f32 %v12521_v6, %v2766_v55  ;;  %v2768_v15 = vpop.f32.mrb[153].mxu1  ;;  %4119 = vmatprep.mubr.bf16.mxu0 %v11041_v50 }
 0x4b0   :  { %v2769_v56 = vpop.f32.mrb[154].mxu1 }
 0x4b1   :  { %v12768_v54 = vadd.f32 %v2955_v45, %v1319_v25  ;;  %v2956_v49 = vmul.f32 %v12521_v6, %v2769_v56  ;;  %v3381_v16 = vpack.c.bf16 %v2769_v56, %v2766_v55  ;;  %v2771_v63 = vpop.f32.mrb[155].mxu1  ;;  %v14560_v55 = vld [vmem:[#allocation14_spill] sm:$0xff] }
 0x4b2   :  { %v1322_v15 = vmul.f32 %v12519_v2, %v14560_v55 }
 0x4b3   :  { %v12773_v32 = vadd.f32 %v2956_v49, %v1320_v44  ;;  %4333 = vmatpush1.bf16.msra.mxu0 %v3381_v16  ;;  %v11046_v16 = vld [vmem:[#allocation8 + $0x100] ss:$16 sps:$4 sm:$0xff]  }
 0x4b4   :  { %4334 = vmatprep.subr.bf16.mxu0 %v14557_v19 }
 0x4b6   :  { %v2774_v9 = vpop.f32.mrb[156].mxu1  ;;  %4120 = vmatmul.mubr.bf16.gmra.mrb[92].mxu0 %v11043_v23  ;;  %v11047_v23 = vld [vmem:[#allocation8 + $0x124] ss:$16 sps:$4 sm:$0xff]  }
 0x4b7   :  { %v2957_v50 = vmul.f32 %v12521_v6, %v2774_v9  ;;  %v2776_v25 = vpop.f32.mrb[157].mxu1  ;;  %4127 = vmatprep.mubr.bf16.mxu0 %v11044_v8  ;;  %v14562_v8 = vld [vmem:[#allocation15_spill] sm:$0xff] }
 0x4b8   :  { %v2777_v31 = vpop.f32.mrb[158].mxu1 }
 0x4b9   :  { %v12779_v45 = vadd.f32 %v2957_v50, %v1321_v11  ;;  %v2958_v56 = vmul.f32 %v12521_v6, %v2777_v31  ;;  %v3382_v44 = vpack.c.bf16 %v2777_v31, %v2774_v9  ;;  %v2779_v49 = vpop.f32.mrb[159].mxu1  ;;  %v1323_v11 = vmul.f32 %v12519_v2, %v14562_v8  ;;  %v14564_v9 = vld [vmem:[#allocation18_spill] sm:$0xff] }
 0x4ba   :  { %v1324_v31 = vmul.f32 %v12519_v2, %v14564_v9  ;;  %v11049_v49 = vld [vmem:[#allocation8 + $0x120] ss:$16 sps:$4 sm:$0xff]  }
 0x4bb   :  { %14559 = vst [vmem:[#allocation13_spill] sm:$0xff] %v12779_v45  ;;  %v12784_v63 = vadd.f32 %v2958_v56, %v1322_v15  ;;  %4335 = vmatpush1.bf16.msra.mxu0 %v3382_v44 }
 0x4bc   :  { %4336 = vmatprep.subr.bf16.mxu0 %v14557_v19 }
 0x4bd   :  { %14561 = vst [vmem:[#allocation14_spill] sm:$0xff] %v12784_v63 }
 0x4be   :  { %v2782_v24 = vpop.f32.mrb[160].mxu1  ;;  %4128 = vmatmul.mubr.bf16.gmra.mrb[96].mxu0 %v11046_v16  ;;  %v11050_v16 = vld [vmem:[#allocation8 + $0x144] ss:$16 sps:$4 sm:$0xff]  }
 0x4bf   :  { %v2959_v50 = vmul.f32 %v12521_v6, %v2782_v24  ;;  %v2784_v25 = vpop.f32.mrb[161].mxu1  ;;  %4135 = vmatprep.mubr.bf16.mxu0 %v11047_v23  ;;  %v14566_v23 = vld [vmem:[#allocation16_spill] sm:$0xff] }
 0x4c0   :  { %v2785_v55 = vpop.f32.mrb[162].mxu1 }
 0x4c1   :  { %v12790_v45 = vadd.f32 %v2959_v50, %v1323_v11  ;;  %v2960_v15 = vmul.f32 %v12521_v6, %v2785_v55  ;;  %v3383_v56 = vpack.c.bf16 %v2785_v55, %v2782_v24  ;;  %v2787_v44 = vpop.f32.mrb[163].mxu1  ;;  %v1325_v11 = vmul.f32 %v12519_v2, %v14566_v23  ;;  %v14568_v24 = vld [vmem:[#allocation17_spill] sm:$0xff] }
 0x4c2   :  { %v1326_v55 = vmul.f32 %v12519_v2, %v14568_v24  ;;  %v11052_v44 = vld [vmem:[#allocation8 + $0x140] ss:$16 sps:$4 sm:$0xff]  }
 0x4c3   :  { %14563 = vst [vmem:[#allocation15_spill] sm:$0xff] %v12790_v45  ;;  %v12795_v63 = vadd.f32 %v2960_v15, %v1324_v31  ;;  %4337 = vmatpush1.bf16.msra.mxu0 %v3383_v56 }
 0x4c4   :  { %4338 = vmatprep.subr.bf16.mxu0 %v14557_v19 }
 0x4c5   :  { %14565 = vst [vmem:[#allocation18_spill] sm:$0xff] %v12795_v63 }
 0x4c6   :  { %v2790_v8 = vpop.f32.mrb[164].mxu1  ;;  %4136 = vmatmul.mubr.bf16.gmra.mrb[100].mxu0 %v11049_v49  ;;  %v11053_v49 = vld [vmem:[#allocation8 + $0x164] ss:$16 sps:$4 sm:$0xff]  }
 0x4c7   :  { %v2961_v50 = vmul.f32 %v12521_v6, %v2790_v8  ;;  %v2792_v25 = vpop.f32.mrb[165].mxu1  ;;  %4143 = vmatprep.mubr.bf16.mxu0 %v11050_v16  ;;  %v14570_v16 = vld [vmem:[#allocation19_spill] sm:$0xff] }
 0x4c8   :  { %v2793_v9 = vpop.f32.mrb[166].mxu1 }
 0x4c9   :  { %v12801_v45 = vadd.f32 %v2961_v50, %v1325_v11  ;;  %v2962_v31 = vmul.f32 %v12521_v6, %v2793_v9  ;;  %v3384_v15 = vpack.c.bf16 %v2793_v9, %v2790_v8  ;;  %v2795_v56 = vpop.f32.mrb[167].mxu1  ;;  %v1327_v11 = vmul.f32 %v12519_v2, %v14570_v16  ;;  %v14572_v8 = vld [vmem:[#allocation22_spill] sm:$0xff] }
 0x4ca   :  { %v1328_v9 = vmul.f32 %v12519_v2, %v14572_v8  ;;  %v11055_v56 = vld [vmem:[#allocation8 + $0x160] ss:$16 sps:$4 sm:$0xff]  }
 0x4cb   :  { %14567 = vst [vmem:[#allocation16_spill] sm:$0xff] %v12801_v45  ;;  %v12806_v63 = vadd.f32 %v2962_v31, %v1326_v55  ;;  %4339 = vmatpush1.bf16.msra.mxu0 %v3384_v15 }
 0x4cc   :  { %4340 = vmatprep.subr.bf16.mxu0 %v14557_v19 }
 0x4cd   :  { %14569 = vst [vmem:[#allocation17_spill] sm:$0xff] %v12806_v63 }
 0x4ce   :  { %v2798_v23 = vpop.f32.mrb[168].mxu1  ;;  %4144 = vmatmul.mubr.bf16.gmra.mrb[104].mxu0 %v11052_v44  ;;  %v11056_v44 = vld [vmem:[#allocation8 + $0x184] ss:$16 sps:$4 sm:$0xff]  }
 0x4cf   :  { %v2963_v50 = vmul.f32 %v12521_v6, %v2798_v23  ;;  %v2800_v25 = vpop.f32.mrb[169].mxu1  ;;  %4151 = vmatprep.mubr.bf16.mxu0 %v11053_v49  ;;  %v14574_v49 = vld [vmem:[#allocation20_spill] sm:$0xff] }
 0x4d0   :  { %v2801_v24 = vpop.f32.mrb[170].mxu1 }
 0x4d1   :  { %v12812_v45 = vadd.f32 %v2963_v50, %v1327_v11  ;;  %v2964_v55 = vmul.f32 %v12521_v6, %v2801_v24  ;;  %v3385_v31 = vpack.c.bf16 %v2801_v24, %v2798_v23  ;;  %v2803_v15 = vpop.f32.mrb[171].mxu1  ;;  %v1329_v11 = vmul.f32 %v12519_v2, %v14574_v49  ;;  %v14576_v23 = vld [vmem:[#allocation21_spill] sm:$0xff] }
 0x4d2   :  { %v1330_v24 = vmul.f32 %v12519_v2, %v14576_v23  ;;  %v11058_v15 = vld [vmem:[#allocation8 + $0x180] ss:$16 sps:$4 sm:$0xff]  }
 0x4d3   :  { %14571 = vst [vmem:[#allocation19_spill] sm:$0xff] %v12812_v45  ;;  %v12817_v63 = vadd.f32 %v2964_v55, %v1328_v9  ;;  %4341 = vmatpush1.bf16.msra.mxu0 %v3385_v31 }
 0x4d4   :  { %4342 = vmatprep.subr.bf16.mxu0 %v14557_v19 }
 0x4d5   :  { %14573 = vst [vmem:[#allocation22_spill] sm:$0xff] %v12817_v63 }
 0x4d6   :  { %v2806_v16 = vpop.f32.mrb[172].mxu1  ;;  %4152 = vmatmul.mubr.bf16.gmra.mrb[108].mxu0 %v11055_v56  ;;  %v11059_v56 = vld [vmem:[#allocation8 + $0x1a4] ss:$16 sps:$4 sm:$0xff]  }
 0x4d7   :  { %v2965_v50 = vmul.f32 %v12521_v6, %v2806_v16  ;;  %v2808_v25 = vpop.f32.mrb[173].mxu1  ;;  %4159 = vmatprep.mubr.bf16.mxu0 %v11056_v44  ;;  %v14578_v44 = vld [vmem:[#allocation23_spill] sm:$0xff] }
 0x4d8   :  { %v2809_v8 = vpop.f32.mrb[174].mxu1 }
 0x4d9   :  { %v12823_v45 = vadd.f32 %v2965_v50, %v1329_v11  ;;  %v2966_v9 = vmul.f32 %v12521_v6, %v2809_v8  ;;  %v3386_v55 = vpack.c.bf16 %v2809_v8, %v2806_v16  ;;  %v2811_v31 = vpop.f32.mrb[175].mxu1  ;;  %v1331_v11 = vmul.f32 %v12519_v2, %v14578_v44  ;;  %v14580_v16 = vld [vmem:[#allocation26_spill] sm:$0xff] }
 0x4da   :  { %v1332_v8 = vmul.f32 %v12519_v2, %v14580_v16  ;;  %v11061_v31 = vld [vmem:[#allocation8 + $0x1a0] ss:$16 sps:$4 sm:$0xff]  }
 0x4db   :  { %14575 = vst [vmem:[#allocation20_spill] sm:$0xff] %v12823_v45  ;;  %v12828_v63 = vadd.f32 %v2966_v9, %v1330_v24  ;;  %4343 = vmatpush1.bf16.msra.mxu0 %v3386_v55 }
 0x4dc   :  { %4344 = vmatprep.subr.bf16.mxu0 %v14557_v19 }
 0x4dd   :  { %14577 = vst [vmem:[#allocation21_spill] sm:$0xff] %v12828_v63 }
 0x4de   :  { %v2814_v49 = vpop.f32.mrb[176].mxu1  ;;  %4160 = vmatmul.mubr.bf16.gmra.mrb[112].mxu0 %v11058_v15  ;;  %v11062_v15 = vld [vmem:[#allocation8 + $0x1c4] ss:$16 sps:$4 sm:$0xff]  }
 0x4df   :  { %v2967_v50 = vmul.f32 %v12521_v6, %v2814_v49  ;;  %v2816_v25 = vpop.f32.mrb[177].mxu1  ;;  %4167 = vmatprep.mubr.bf16.mxu0 %v11059_v56  ;;  %v14582_v56 = vld [vmem:[#allocation24_spill] sm:$0xff] }
 0x4e0   :  { %v2817_v23 = vpop.f32.mrb[178].mxu1 }
 0x4e1   :  { %v12834_v45 = vadd.f32 %v2967_v50, %v1331_v11  ;;  %v2968_v24 = vmul.f32 %v12521_v6, %v2817_v23  ;;  %v3387_v9 = vpack.c.bf16 %v2817_v23, %v2814_v49  ;;  %v2819_v55 = vpop.f32.mrb[179].mxu1  ;;  %v1333_v11 = vmul.f32 %v12519_v2, %v14582_v56  ;;  %v14584_v49 = vld [vmem:[#allocation25_spill] sm:$0xff] }
 0x4e2   :  { %v1334_v23 = vmul.f32 %v12519_v2, %v14584_v49  ;;  %v11064_v55 = vld [vmem:[#allocation8 + $0x1c0] ss:$16 sps:$4 sm:$0xff]  }
 0x4e3   :  { %14579 = vst [vmem:[#allocation23_spill] sm:$0xff] %v12834_v45  ;;  %v12839_v63 = vadd.f32 %v2968_v24, %v1332_v8  ;;  %4345 = vmatpush1.bf16.msra.mxu0 %v3387_v9 }
 0x4e4   :  { %4346 = vmatprep.subr.bf16.mxu0 %v14557_v19 }
 0x4e5   :  { %14581 = vst [vmem:[#allocation26_spill] sm:$0xff] %v12839_v63 }
 0x4e6   :  { %v2822_v44 = vpop.f32.mrb[180].mxu1  ;;  %4168 = vmatmul.mubr.bf16.gmra.mrb[116].mxu0 %v11061_v31  ;;  %v11065_v31 = vld [vmem:[#allocation8 + $0x1e4] ss:$16 sps:$4 sm:$0xff]  }
 0x4e7   :  { %v2969_v50 = vmul.f32 %v12521_v6, %v2822_v44  ;;  %v2824_v25 = vpop.f32.mrb[181].mxu1  ;;  %4175 = vmatprep.mubr.bf16.mxu0 %v11062_v15  ;;  %v14586_v15 = vld [vmem:[#allocation27_spill] sm:$0xff] }
 0x4e8   :  { %v2825_v16 = vpop.f32.mrb[182].mxu1 }
 0x4e9   :  { %v12845_v45 = vadd.f32 %v2969_v50, %v1333_v11  ;;  %v2970_v8 = vmul.f32 %v12521_v6, %v2825_v16  ;;  %v3388_v24 = vpack.c.bf16 %v2825_v16, %v2822_v44  ;;  %v2827_v9 = vpop.f32.mrb[183].mxu1  ;;  %v1335_v11 = vmul.f32 %v12519_v2, %v14586_v15  ;;  %v14588_v44 = vld [vmem:[#allocation30_spill] sm:$0xff] }
 0x4ea   :  { %v1336_v16 = vmul.f32 %v12519_v2, %v14588_v44  ;;  %v11067_v9 = vld [vmem:[#allocation8 + $0x1e0] ss:$16 sps:$4 sm:$0xff]  }
 0x4eb   :  { %14583 = vst [vmem:[#allocation24_spill] sm:$0xff] %v12845_v45  ;;  %v12850_v63 = vadd.f32 %v2970_v8, %v1334_v23  ;;  %4347 = vmatpush1.bf16.msra.mxu0 %v3388_v24 }
 0x4ec   :  { %4348 = vmatprep.subr.bf16.mxu0 %v14557_v19 }
 0x4ed   :  { %14585 = vst [vmem:[#allocation25_spill] sm:$0xff] %v12850_v63 }
 0x4ee   :  { %v2830_v56 = vpop.f32.mrb[184].mxu1  ;;  %4176 = vmatmul.mubr.bf16.gmra.mrb[120].mxu0 %v11064_v55  ;;  %v11068_v55 = vld [vmem:[#allocation8 + $0x204] ss:$16 sps:$4 sm:$0xff]  }
 0x4ef   :  { %v2971_v50 = vmul.f32 %v12521_v6, %v2830_v56  ;;  %v2832_v25 = vpop.f32.mrb[185].mxu1  ;;  %4183 = vmatprep.mubr.bf16.mxu0 %v11065_v31  ;;  %v14590_v31 = vld [vmem:[#allocation28_spill] sm:$0xff] }
 0x4f0   :  { %v2833_v49 = vpop.f32.mrb[186].mxu1 }
 0x4f1   :  { %v12856_v45 = vadd.f32 %v2971_v50, %v1335_v11  ;;  %v2972_v23 = vmul.f32 %v12521_v6, %v2833_v49  ;;  %v3389_v8 = vpack.c.bf16 %v2833_v49, %v2830_v56  ;;  %v2835_v24 = vpop.f32.mrb[187].mxu1  ;;  %v1337_v11 = vmul.f32 %v12519_v2, %v14590_v31  ;;  %v14591_v56 = vld [vmem:[#allocation29_spill] sm:$0xff] }
 0x4f2   :  { %v1338_v49 = vmul.f32 %v12519_v2, %v14591_v56  ;;  %v11070_v24 = vld [vmem:[#allocation8 + $0x200] ss:$16 sps:$4 sm:$0xff]   ;;  %v11074_v31 = vld [vmem:[#allocation8 + $0x244] ss:$16 sps:$4 sm:$0xff]  }
 0x4f3   :  { %14587 = vst [vmem:[#allocation27_spill] sm:$0xff] %v12856_v45  ;;  %v12861_v63 = vadd.f32 %v2972_v23, %v1336_v16  ;;  %4349 = vmatpush1.bf16.msra.mxu0 %v3389_v8  ;;  %v11079_v2 = vld [vmem:[#allocation8 + $0x260] ss:$16 sps:$4 sm:$0xff]   ;;  %v11086_v56 = vld [vmem:[#allocation8 + $0x2c4] ss:$16 sps:$4 sm:$0xff]  }
 0x4f4   :  { %4350 = vmatprep.subr.bf16.mxu0 %v14557_v19 }
 0x4f5   :  { %14589 = vst [vmem:[#allocation30_spill] sm:$0xff] %v12861_v63 }
 0x4f6   :  { %v2838_v15 = vpop.f32.mrb[188].mxu1  ;;  %4184 = vmatmul.mubr.bf16.gmra.mrb[124].mxu0 %v11067_v9  ;;  %v11071_v9 = vld [vmem:[#allocation8 + $0x224] ss:$16 sps:$4 sm:$0xff]  }
 0x4f7   :  { %v2973_v50 = vmul.f32 %v12521_v6, %v2838_v15  ;;  %v2840_v25 = vpop.f32.mrb[189].mxu1  ;;  %4191 = vmatprep.mubr.bf16.mxu0 %v11068_v55  ;;  %v11073_v55 = vld [vmem:[#allocation8 + $0x220] ss:$16 sps:$4 sm:$0xff]  }
 0x4f8   :  { %v2841_v44 = vpop.f32.mrb[190].mxu1  ;;  %v11083_v25 = vld [vmem:[#allocation8 + $0x2a4] ss:$16 sps:$4 sm:$0xff]  }
 0x4f9   :  { %v12867_v45 = vadd.f32 %v2973_v50, %v1337_v11  ;;  %v2974_v16 = vmul.f32 %v12521_v6, %v2841_v44  ;;  %v3390_v23 = vpack.c.bf16 %v2841_v44, %v2838_v15  ;;  %v2843_v8 = vpop.f32.mrb[191].mxu1  ;;  %v11076_v11 = vld [vmem:[#allocation8 + $0x240] ss:$16 sps:$4 sm:$0xff]   ;;  %v11077_v50 = vld [vmem:[#allocation8 + $0x264] ss:$16 sps:$4 sm:$0xff]  }
 0x4fa   :  { %v11080_v6 = vld [vmem:[#allocation8 + $0x284] ss:$16 sps:$4 sm:$0xff]   ;;  %v11082_v15 = vld [vmem:[#allocation8 + $0x280] ss:$16 sps:$4 sm:$0xff]  }
 0x4fb   :  { %v12872_v63 = vadd.f32 %v2974_v16, %v1338_v49  ;;  %4351 = vmatpush1.bf16.msra.mxu0 %v3390_v23  ;;  %v11085_v44 = vld [vmem:[#allocation8 + $0x2a0] ss:$16 sps:$4 sm:$0xff]   ;;  %v11089_v16 = vld [vmem:[#allocation8 + $0x2e4] ss:$16 sps:$4 sm:$0xff]  }
 0x4fc   :  { %7559 = vmatprep.subr.bf16.mxu0 %v14557_v19  ;;  %v11088_v49 = vld [vmem:[#allocation8 + $0x2c0] ss:$16 sps:$4 sm:$0xff]   ;;  %v11092_v8 = vld [vmem:[#allocation8 + $0x304] ss:$16 sps:$4 sm:$0xff]  }
 0x4fd   :  { %14592 = vst [vmem:[#allocation28_spill] sm:$0xff] %v12872_v63  ;;  %v11091_v23 = vld [vmem:[#allocation8 + $0x2e0] ss:$16 sps:$4 sm:$0xff]  }
 0x4fe   :  { %4192 = vmatmul.mubr.bf16.gmra.mrb[128].mxu0 %v11070_v24  ;;  %v11094_v24 = vld [vmem:[#allocation8 + $0x300] ss:$16 sps:$4 sm:$0xff]  }
 0x4ff   :  { %4199 = vmatprep.mubr.bf16.mxu0 %v11071_v9  ;;  %v11095_v9 = vld [vmem:[#allocation8 + $0x324] ss:$16 sps:$4 sm:$0xff]  }
 0x506   :  { %4200 = vmatmul.mubr.bf16.gmra.mrb[132].mxu0 %v11073_v55  ;;  %v11097_v55 = vld [vmem:[#allocation8 + $0x320] ss:$16 sps:$4 sm:$0xff]  }
 0x507   :  { %4207 = vmatprep.mubr.bf16.mxu0 %v11074_v31  ;;  %v11098_v31 = vld [vmem:[#allocation8 + $0x344] ss:$16 sps:$4 sm:$0xff]  }
 0x50e   :  { %4208 = vmatmul.mubr.bf16.gmra.mrb[136].mxu0 %v11076_v11  ;;  %v11100_v11 = vld [vmem:[#allocation8 + $0x340] ss:$16 sps:$4 sm:$0xff]  }
 0x50f   :  { %4215 = vmatprep.mubr.bf16.mxu0 %v11077_v50  ;;  %v11101_v50 = vld [vmem:[#allocation8 + $0x364] ss:$16 sps:$4 sm:$0xff]  }
 0x516   :  { %4216 = vmatmul.mubr.bf16.gmra.mrb[140].mxu0 %v11079_v2  ;;  %v11103_v2 = vld [vmem:[#allocation8 + $0x360] ss:$16 sps:$4 sm:$0xff]  }
 0x517   :  { %4223 = vmatprep.mubr.bf16.mxu0 %v11080_v6  ;;  %v11104_v6 = vld [vmem:[#allocation8 + $0x384] ss:$16 sps:$4 sm:$0xff]  }
 0x51e   :  { %4224 = vmatmul.mubr.bf16.gmra.mrb[144].mxu0 %v11082_v15  ;;  %v11106_v15 = vld [vmem:[#allocation8 + $0x380] ss:$16 sps:$4 sm:$0xff]  }
 0x51f   :  { %4231 = vmatprep.mubr.bf16.mxu0 %v11083_v25  ;;  %v11107_v25 = vld [vmem:[#allocation8 + $0x3a4] ss:$16 sps:$4 sm:$0xff]  }
 0x526   :  { %4232 = vmatmul.mubr.bf16.gmra.mrb[148].mxu0 %v11085_v44  ;;  %v11109_v44 = vld [vmem:[#allocation8 + $0x3a0] ss:$16 sps:$4 sm:$0xff]  }
 0x527   :  { %4239 = vmatprep.mubr.bf16.mxu0 %v11086_v56  ;;  %v11110_v56 = vld [vmem:[#allocation8 + $0x3c4] ss:$16 sps:$4 sm:$0xff]  }
 0x52e   :  { %4240 = vmatmul.mubr.bf16.gmra.mrb[152].mxu0 %v11088_v49  ;;  %v11112_v49 = vld [vmem:[#allocation8 + $0x3c0] ss:$16 sps:$4 sm:$0xff]  }
 0x52f   :  { %4247 = vmatprep.mubr.bf16.mxu0 %v11089_v16  ;;  %v11113_v16 = vld [vmem:[#allocation8 + $0x3e4] ss:$16 sps:$4 sm:$0xff]  }
 0x536   :  { %4248 = vmatmul.mubr.bf16.gmra.mrb[156].mxu0 %v11091_v23  ;;  %v11115_v23 = vld [vmem:[#allocation8 + $0x3e0] ss:$16 sps:$4 sm:$0xff]  }
 0x537   :  { %4255 = vmatprep.mubr.bf16.mxu0 %v11092_v8  ;;  %v11118_v8 = vld [vmem:[#allocation8 + $0xc] ss:$16 sps:$4 sm:$0xff]  }
 0x53e   :  { %4256 = vmatmul.mubr.bf16.gmra.mrb[160].mxu0 %v11094_v24  ;;  %v11116_v24 = vld [vmem:[#allocation8 + $0x8] ss:$16 sps:$4 sm:$0xff]  }
 0x53f   :  { %4263 = vmatprep.mubr.bf16.mxu0 %v11095_v9  ;;  %v11119_v9 = vld [vmem:[#allocation8 + $0x2c] ss:$16 sps:$4 sm:$0xff]  }
 0x546   :  { %4264 = vmatmul.mubr.bf16.gmra.mrb[164].mxu0 %v11097_v55  ;;  %v11121_v55 = vld [vmem:[#allocation8 + $0x28] ss:$16 sps:$4 sm:$0xff]  }
 0x547   :  { %4271 = vmatprep.mubr.bf16.mxu0 %v11098_v31  ;;  %v11122_v31 = vld [vmem:[#allocation8 + $0x4c] ss:$16 sps:$4 sm:$0xff]  }
 0x54e   :  { %4272 = vmatmul.mubr.bf16.gmra.mrb[168].mxu0 %v11100_v11  ;;  %v11124_v11 = vld [vmem:[#allocation8 + $0x48] ss:$16 sps:$4 sm:$0xff]  }
 0x54f   :  { %4279 = vmatprep.mubr.bf16.mxu0 %v11101_v50  ;;  %v11125_v50 = vld [vmem:[#allocation8 + $0x6c] ss:$16 sps:$4 sm:$0xff]  }
 0x556   :  { %4280 = vmatmul.mubr.bf16.gmra.mrb[172].mxu0 %v11103_v2  ;;  %v11127_v2 = vld [vmem:[#allocation8 + $0x68] ss:$16 sps:$4 sm:$0xff]  }
 0x557   :  { %4287 = vmatprep.mubr.bf16.mxu0 %v11104_v6  ;;  %v11128_v6 = vld [vmem:[#allocation8 + $0x8c] ss:$16 sps:$4 sm:$0xff]  }
 0x55e   :  { %4288 = vmatmul.mubr.bf16.gmra.mrb[176].mxu0 %v11106_v15  ;;  %v11130_v15 = vld [vmem:[#allocation8 + $0x88] ss:$16 sps:$4 sm:$0xff]  }
 0x55f   :  { %4295 = vmatprep.mubr.bf16.mxu0 %v11107_v25  ;;  %v11131_v25 = vld [vmem:[#allocation8 + $0xac] ss:$16 sps:$4 sm:$0xff]  }
 0x566   :  { %4296 = vmatmul.mubr.bf16.gmra.mrb[180].mxu0 %v11109_v44  ;;  %v11133_v44 = vld [vmem:[#allocation8 + $0xa8] ss:$16 sps:$4 sm:$0xff]  }
 0x567   :  { %4303 = vmatprep.mubr.bf16.mxu0 %v11110_v56  ;;  %v11134_v56 = vld [vmem:[#allocation8 + $0xcc] ss:$16 sps:$4 sm:$0xff]  }
 0x56e   :  { %4304 = vmatmul.mubr.bf16.gmra.mrb[184].mxu0 %v11112_v49  ;;  %v11136_v49 = vld [vmem:[#allocation8 + $0xc8] ss:$16 sps:$4 sm:$0xff]  }
 0x56f   :  { %4311 = vmatprep.mubr.bf16.mxu0 %v11113_v16  ;;  %v11137_v16 = vld [vmem:[#allocation8 + $0xec] ss:$16 sps:$4 sm:$0xff]  }
 0x576   :  { %4312 = vmatmul.mubr.bf16.gmra.mrb[188].mxu0 %v11115_v23  ;;  %v11139_v23 = vld [vmem:[#allocation8 + $0xe8] ss:$16 sps:$4 sm:$0xff]  }
 0x577   :  { %4352 = vmatprep.mubr.bf16.mxu0 %v11118_v8  ;;  %v11140_v8 = vld [vmem:[#allocation8 + $0x10c] ss:$16 sps:$4 sm:$0xff]  }
 0x57e   :  { %4353 = vmatmul.mubr.bf16.vlgmr.msra.gmra.mrb[64].mxu0 %v11116_v24  ;;  %v11142_v24 = vld [vmem:[#allocation8 + $0x108] ss:$16 sps:$4 sm:$0xff]  }
 0x57f   :  { %4360 = vmatprep.mubr.bf16.mxu0 %v11119_v9  ;;  %v11143_v9 = vld [vmem:[#allocation8 + $0x12c] ss:$16 sps:$4 sm:$0xff]  }
 0x586   :  { %4361 = vmatmul.mubr.bf16.gmra.mrb[68].mxu0 %v11121_v55  ;;  %v11145_v55 = vld [vmem:[#allocation8 + $0x128] ss:$16 sps:$4 sm:$0xff]  }
 0x587   :  { %4368 = vmatprep.mubr.bf16.mxu0 %v11122_v31  ;;  %v11146_v31 = vld [vmem:[#allocation8 + $0x14c] ss:$16 sps:$4 sm:$0xff]  }
 0x58e   :  { %4369 = vmatmul.mubr.bf16.gmra.mrb[72].mxu0 %v11124_v11  ;;  %v11148_v11 = vld [vmem:[#allocation8 + $0x148] ss:$16 sps:$4 sm:$0xff]  }
 0x58f   :  { %4376 = vmatprep.mubr.bf16.mxu0 %v11125_v50  ;;  %v11149_v50 = vld [vmem:[#allocation8 + $0x16c] ss:$16 sps:$4 sm:$0xff]  }
 0x596   :  { %4377 = vmatmul.mubr.bf16.gmra.mrb[76].mxu0 %v11127_v2  ;;  %v11151_v2 = vld [vmem:[#allocation8 + $0x168] ss:$16 sps:$4 sm:$0xff]  }
 0x597   :  { %4384 = vmatprep.mubr.bf16.mxu0 %v11128_v6  ;;  %v11152_v6 = vld [vmem:[#allocation8 + $0x18c] ss:$16 sps:$4 sm:$0xff]  }
 0x59e   :  { %4385 = vmatmul.mubr.bf16.gmra.mrb[80].mxu0 %v11130_v15  ;;  %v11154_v15 = vld [vmem:[#allocation8 + $0x188] ss:$16 sps:$4 sm:$0xff]  }
 0x59f   :  { %4392 = vmatprep.mubr.bf16.mxu0 %v11131_v25  ;;  %v11155_v25 = vld [vmem:[#allocation8 + $0x1ac] ss:$16 sps:$4 sm:$0xff]  }
 0x5a6   :  { %4393 = vmatmul.mubr.bf16.gmra.mrb[84].mxu0 %v11133_v44  ;;  %v11157_v44 = vld [vmem:[#allocation8 + $0x1a8] ss:$16 sps:$4 sm:$0xff]  }
 0x5a7   :  { %4400 = vmatprep.mubr.bf16.mxu0 %v11134_v56  ;;  %v11158_v56 = vld [vmem:[#allocation8 + $0x1cc] ss:$16 sps:$4 sm:$0xff]  }
 0x5ae   :  { %4401 = vmatmul.mubr.bf16.gmra.mrb[88].mxu0 %v11136_v49  ;;  %v11160_v49 = vld [vmem:[#allocation8 + $0x1c8] ss:$16 sps:$4 sm:$0xff]  }
 0x5af   :  { %4408 = vmatprep.mubr.bf16.mxu0 %v11137_v16  ;;  %v11161_v16 = vld [vmem:[#allocation8 + $0x1ec] ss:$16 sps:$4 sm:$0xff]  }
 0x5b6   :  { %4409 = vmatmul.mubr.bf16.gmra.mrb[92].mxu0 %v11139_v23  ;;  %v11163_v23 = vld [vmem:[#allocation8 + $0x1e8] ss:$16 sps:$4 sm:$0xff]  }
 0x5b7   :  { %4416 = vmatprep.mubr.bf16.mxu0 %v11140_v8  ;;  %v11164_v8 = vld [vmem:[#allocation8 + $0x20c] ss:$16 sps:$4 sm:$0xff]  }
 0x5be   :  { %4417 = vmatmul.mubr.bf16.gmra.mrb[96].mxu0 %v11142_v24  ;;  %v11166_v24 = vld [vmem:[#allocation8 + $0x208] ss:$16 sps:$4 sm:$0xff]  }
 0x5bf   :  { %4424 = vmatprep.mubr.bf16.mxu0 %v11143_v9  ;;  %v11167_v9 = vld [vmem:[#allocation8 + $0x22c] ss:$16 sps:$4 sm:$0xff]  }
 0x5c6   :  { %4425 = vmatmul.mubr.bf16.gmra.mrb[100].mxu0 %v11145_v55  ;;  %v11169_v55 = vld [vmem:[#allocation8 + $0x228] ss:$16 sps:$4 sm:$0xff]  }
 0x5c7   :  { %4432 = vmatprep.mubr.bf16.mxu0 %v11146_v31  ;;  %v11170_v31 = vld [vmem:[#allocation8 + $0x24c] ss:$16 sps:$4 sm:$0xff]  }
 0x5ce   :  { %4433 = vmatmul.mubr.bf16.gmra.mrb[104].mxu0 %v11148_v11  ;;  %v11172_v11 = vld [vmem:[#allocation8 + $0x248] ss:$16 sps:$4 sm:$0xff]  }
 0x5cf   :  { %4440 = vmatprep.mubr.bf16.mxu0 %v11149_v50  ;;  %v11173_v50 = vld [vmem:[#allocation8 + $0x26c] ss:$16 sps:$4 sm:$0xff]  }
 0x5d6   :  { %4441 = vmatmul.mubr.bf16.gmra.mrb[108].mxu0 %v11151_v2  ;;  %v11175_v2 = vld [vmem:[#allocation8 + $0x268] ss:$16 sps:$4 sm:$0xff]  }
 0x5d7   :  { %4448 = vmatprep.mubr.bf16.mxu0 %v11152_v6  ;;  %v11176_v6 = vld [vmem:[#allocation8 + $0x28c] ss:$16 sps:$4 sm:$0xff]  }
 0x5de   :  { %4449 = vmatmul.mubr.bf16.gmra.mrb[112].mxu0 %v11154_v15  ;;  %v11178_v15 = vld [vmem:[#allocation8 + $0x288] ss:$16 sps:$4 sm:$0xff]  }
 0x5df   :  { %4456 = vmatprep.mubr.bf16.mxu0 %v11155_v25  ;;  %v11179_v25 = vld [vmem:[#allocation8 + $0x2ac] ss:$16 sps:$4 sm:$0xff]  }
 0x5e6   :  { %4457 = vmatmul.mubr.bf16.gmra.mrb[116].mxu0 %v11157_v44  ;;  %v11181_v44 = vld [vmem:[#allocation8 + $0x2a8] ss:$16 sps:$4 sm:$0xff]  }
 0x5e7   :  { %4464 = vmatprep.mubr.bf16.mxu0 %v11158_v56  ;;  %v11182_v56 = vld [vmem:[#allocation8 + $0x2cc] ss:$16 sps:$4 sm:$0xff]  }
 0x5ee   :  { %4465 = vmatmul.mubr.bf16.gmra.mrb[120].mxu0 %v11160_v49  ;;  %v11184_v49 = vld [vmem:[#allocation8 + $0x2c8] ss:$16 sps:$4 sm:$0xff]  }
 0x5ef   :  { %4472 = vmatprep.mubr.bf16.mxu0 %v11161_v16  ;;  %v11185_v16 = vld [vmem:[#allocation8 + $0x2ec] ss:$16 sps:$4 sm:$0xff]  }
 0x5f6   :  { %4473 = vmatmul.mubr.bf16.gmra.mrb[124].mxu0 %v11163_v23  ;;  %v11187_v23 = vld [vmem:[#allocation8 + $0x2e8] ss:$16 sps:$4 sm:$0xff]  }
 0x5f7   :  { %4480 = vmatprep.mubr.bf16.mxu0 %v11164_v8  ;;  %v11188_v8 = vld [vmem:[#allocation8 + $0x30c] ss:$16 sps:$4 sm:$0xff]  }
 0x5fe   :  { %4481 = vmatmul.mubr.bf16.gmra.mrb[128].mxu0 %v11166_v24  ;;  %v11190_v24 = vld [vmem:[#allocation8 + $0x308] ss:$16 sps:$4 sm:$0xff]  }
 0x5ff   :  { %4488 = vmatprep.mubr.bf16.mxu0 %v11167_v9  ;;  %v11191_v9 = vld [vmem:[#allocation8 + $0x32c] ss:$16 sps:$4 sm:$0xff]  }
 0x606   :  { %4489 = vmatmul.mubr.bf16.gmra.mrb[132].mxu0 %v11169_v55  ;;  %v11193_v55 = vld [vmem:[#allocation8 + $0x328] ss:$16 sps:$4 sm:$0xff]  }
 0x607   :  { %4496 = vmatprep.mubr.bf16.mxu0 %v11170_v31  ;;  %v11194_v31 = vld [vmem:[#allocation8 + $0x34c] ss:$16 sps:$4 sm:$0xff]  }
 0x60e   :  { %4497 = vmatmul.mubr.bf16.gmra.mrb[136].mxu0 %v11172_v11  ;;  %v11196_v11 = vld [vmem:[#allocation8 + $0x348] ss:$16 sps:$4 sm:$0xff]  }
 0x60f   :  { %4504 = vmatprep.mubr.bf16.mxu0 %v11173_v50  ;;  %v11197_v50 = vld [vmem:[#allocation8 + $0x36c] ss:$16 sps:$4 sm:$0xff]  }
 0x616   :  { %4505 = vmatmul.mubr.bf16.gmra.mrb[140].mxu0 %v11175_v2  ;;  %v11214_v2 = vld [vmem:[#allocation8 + $0x4] ss:$16 sps:$4 sm:$0xff]  }
 0x617   :  { %4512 = vmatprep.mubr.bf16.mxu0 %v11176_v6  ;;  %v12875_v6 = vstv %s9801_s19  ;;  %5827 = vmatprep.mubr.bf16.mxu1 %v11214_v2 }
 0x61e   :  { %4513 = vmatmul.mubr.bf16.gmra.mrb[144].mxu0 %v11178_v15 }
 0x61f   :  { %4520 = vmatprep.mubr.bf16.mxu0 %v11179_v25 }
 0x626   :  { %4521 = vmatmul.mubr.bf16.gmra.mrb[148].mxu0 %v11181_v44 }
 0x627   :  { %4528 = vmatprep.mubr.bf16.mxu0 %v11182_v56  ;;  %v11199_v56 = vld [vmem:[#allocation8 + $0x368] ss:$16 sps:$4 sm:$0xff]  }
 0x62e   :  { %4529 = vmatmul.mubr.bf16.gmra.mrb[152].mxu0 %v11184_v49 }
 0x62f   :  { %4536 = vmatprep.mubr.bf16.mxu0 %v11185_v16  ;;  %v11200_v16 = vld [vmem:[#allocation8 + $0x38c] ss:$16 sps:$4 sm:$0xff]  }
 0x636   :  { %4537 = vmatmul.mubr.bf16.gmra.mrb[156].mxu0 %v11187_v23  ;;  %v14593_v23 = vld [vmem:[#allocation31_spill] sm:$0xff] }
 0x637   :  { %4544 = vmatprep.mubr.bf16.mxu0 %v11188_v8 }
 0x63e   :  { %4545 = vmatmul.mubr.bf16.gmra.mrb[160].mxu0 %v11190_v24 }
 0x63f   :  { %4552 = vmatprep.mubr.bf16.mxu0 %v11191_v9 }
 0x646   :  { %4553 = vmatmul.mubr.bf16.gmra.mrb[164].mxu0 %v11193_v55 }
 0x647   :  { %4560 = vmatprep.mubr.bf16.mxu0 %v11194_v31 }
 0x64e   :  { %4561 = vmatmul.mubr.bf16.gmra.mrb[168].mxu0 %v11196_v11 }
 0x64f   :  { %4568 = vmatprep.mubr.bf16.mxu0 %v11197_v50 }
 0x651   :  { %v4354_v15 = vpop.f32.mrb[64].mxu0 }
 0x652   :  { %v4675_v25 = vmul.f32 %v12875_v6, %v4354_v15  ;;  %v4356_v44 = vpop.f32.mrb[65].mxu0 }
 0x653   :  { %v4357_v49 = vpop.f32.mrb[66].mxu0  ;;  %v11202_v44 = vld [vmem:[#allocation8 + $0x388] ss:$16 sps:$4 sm:$0xff]  }
 0x654   :  { %v12879_v8 = vadd.f32 %v4675_v25, %v14593_v23  ;;  %v4676_v24 = vmul.f32 %v12875_v6, %v4357_v49  ;;  %v5123_v9 = vpack.c.bf16 %v4357_v49, %v4354_v15  ;;  %v4359_v55 = vpop.f32.mrb[67].mxu0  ;;  %v11203_v25 = vld [vmem:[#allocation8 + $0x3ac] ss:$16 sps:$4 sm:$0xff]  }
 0x655   :  { %v11205_v55 = vld [vmem:[#allocation8 + $0x3a8] ss:$16 sps:$4 sm:$0xff]  }
 0x656   :  { %v12883_v31 = vadd.f32 %v4676_v24, %v12531_v14  ;;  %4569 = vmatmul.mubr.bf16.gmra.mrb[172].mxu0 %v11199_v56  ;;  %5796 = vmatpush1.bf16.msra.mxu1 %v5123_v9 }
 0x657   :  { %4576 = vmatprep.mubr.bf16.mxu0 %v11200_v16  ;;  %5797 = vmatprep.subr.bf16.mxu1 %v14557_v19 }
 0x659   :  { %v4362_v11 = vpop.f32.mrb[68].mxu0 }
 0x65a   :  { %v4677_v50 = vmul.f32 %v12875_v6, %v4362_v11  ;;  %v4364_v2 = vpop.f32.mrb[69].mxu0 }
 0x65b   :  { %v4365_v63 = vpop.f32.mrb[70].mxu0 }
 0x65c   :  { %v12888_v23 = vadd.f32 %v4677_v50, %v12537_v18  ;;  %v4678_v15 = vmul.f32 %v12875_v6, %v4365_v63  ;;  %v5124_v49 = vpack.c.bf16 %v4365_v63, %v4362_v11  ;;  %v4367_v14 = vpop.f32.mrb[71].mxu0  ;;  %v11206_v18 = vld [vmem:[#allocation8 + $0x3cc] ss:$16 sps:$4 sm:$0xff]  }
 0x65d   :  { %v11208_v14 = vld [vmem:[#allocation8 + $0x3c8] ss:$16 sps:$4 sm:$0xff]  }
 0x65e   :  { %v12892_v56 = vadd.f32 %v4678_v15, %v12542_v62  ;;  %4577 = vmatmul.mubr.bf16.gmra.mrb[176].mxu0 %v11202_v44  ;;  %5798 = vmatpush1.bf16.msra.mxu1 %v5124_v49 }
 0x65f   :  { %4584 = vmatprep.mubr.bf16.mxu0 %v11203_v25  ;;  %5799 = vmatprep.subr.bf16.mxu1 %v14557_v19 }
 0x661   :  { %v4370_v16 = vpop.f32.mrb[72].mxu0 }
 0x662   :  { %v4679_v24 = vmul.f32 %v12875_v6, %v4370_v16  ;;  %v4372_v9 = vpop.f32.mrb[73].mxu0 }
 0x663   :  { %v4373_v2 = vpop.f32.mrb[74].mxu0 }
 0x664   :  { %v12897_v50 = vadd.f32 %v4679_v24, %v12548_v12  ;;  %v4680_v63 = vmul.f32 %v12875_v6, %v4373_v2  ;;  %v5125_v11 = vpack.c.bf16 %v4373_v2, %v4370_v16  ;;  %v4375_v62 = vpop.f32.mrb[75].mxu0  ;;  %v11209_v12 = vld [vmem:[#allocation8 + $0x3ec] ss:$16 sps:$4 sm:$0xff]  }
 0x665   :  { %v11211_v62 = vld [vmem:[#allocation8 + $0x3e8] ss:$16 sps:$4 sm:$0xff]  }
 0x666   :  { %v12901_v44 = vadd.f32 %v4680_v63, %v12553_v46  ;;  %4585 = vmatmul.mubr.bf16.gmra.mrb[180].mxu0 %v11205_v55  ;;  %5800 = vmatpush1.bf16.msra.mxu1 %v5125_v11 }
 0x667   :  { %4592 = vmatprep.mubr.bf16.mxu0 %v11206_v18  ;;  %5801 = vmatprep.subr.bf16.mxu1 %v14557_v19 }
 0x669   :  { %v4378_v25 = vpop.f32.mrb[76].mxu0 }
 0x66a   :  { %v4681_v15 = vmul.f32 %v12875_v6, %v4378_v25  ;;  %v4380_v49 = vpop.f32.mrb[77].mxu0 }
 0x66b   :  { %v4381_v9 = vpop.f32.mrb[78].mxu0 }
 0x66c   :  { %v12906_v24 = vadd.f32 %v4681_v15, %v12559_v34  ;;  %v4682_v16 = vmul.f32 %v12875_v6, %v4381_v9  ;;  %v5126_v2 = vpack.c.bf16 %v4381_v9, %v4378_v25  ;;  %v4383_v46 = vpop.f32.mrb[79].mxu0 }
 0x66e   :  { %v12910_v55 = vadd.f32 %v4682_v16, %v12564_v52  ;;  %4593 = vmatmul.mubr.bf16.gmra.mrb[184].mxu0 %v11208_v14  ;;  %5802 = vmatpush1.bf16.msra.mxu1 %v5126_v2 }
 0x66f   :  { %4600 = vmatprep.mubr.bf16.mxu0 %v11209_v12  ;;  %5803 = vmatprep.subr.bf16.mxu1 %v14557_v19 }
 0x671   :  { %v4386_v18 = vpop.f32.mrb[80].mxu0 }
 0x672   :  { %v4683_v63 = vmul.f32 %v12875_v6, %v4386_v18  ;;  %v4388_v11 = vpop.f32.mrb[81].mxu0 }
 0x673   :  { %v4389_v49 = vpop.f32.mrb[82].mxu0 }
 0x674   :  { %v12915_v34 = vadd.f32 %v4683_v63, %v12570_v28  ;;  %v4684_v25 = vmul.f32 %v12875_v6, %v4389_v49  ;;  %v5127_v15 = vpack.c.bf16 %v4389_v49, %v4386_v18  ;;  %v4391_v9 = vpop.f32.mrb[83].mxu0 }
 0x676   :  { %v12919_v52 = vadd.f32 %v4684_v25, %v12575_v53  ;;  %4601 = vmatmul.mubr.bf16.gmra.mrb[188].mxu0 %v11211_v62  ;;  %5804 = vmatpush1.bf16.msra.mxu1 %v5127_v15 }
 0x677   :  { %5805 = vmatprep.subr.bf16.mxu1 %v14557_v19 }
 0x679   :  { %v4394_v14 = vpop.f32.mrb[84].mxu0 }
 0x67a   :  { %v4685_v12 = vmul.f32 %v12875_v6, %v4394_v14  ;;  %v4396_v16 = vpop.f32.mrb[85].mxu0 }
 0x67b   :  { %v4397_v2 = vpop.f32.mrb[86].mxu0 }
 0x67c   :  { %v12924_v46 = vadd.f32 %v4685_v12, %v12581_v10  ;;  %v4686_v28 = vmul.f32 %v12875_v6, %v4397_v2  ;;  %v5128_v63 = vpack.c.bf16 %v4397_v2, %v4394_v14  ;;  %v4399_v18 = vpop.f32.mrb[87].mxu0 }
 0x67e   :  { %v12928_v11 = vadd.f32 %v4686_v28, %v12586_v1  ;;  %5806 = vmatpush1.bf16.msra.mxu1 %v5128_v63 }
 0x67f   :  { %5807 = vmatprep.subr.bf16.mxu1 %v14557_v19 }
 0x681   :  { %v4402_v53 = vpop.f32.mrb[88].mxu0 }
 0x682   :  { %v4687_v62 = vmul.f32 %v12875_v6, %v4402_v53  ;;  %v4404_v49 = vpop.f32.mrb[89].mxu0 }
 0x683   :  { %v4405_v25 = vpop.f32.mrb[90].mxu0 }
 0x684   :  { %v12933_v15 = vadd.f32 %v4687_v62, %v12592_v30  ;;  %v4688_v10 = vmul.f32 %v12875_v6, %v4405_v25  ;;  %v5129_v9 = vpack.c.bf16 %v4405_v25, %v4402_v53  ;;  %v4407_v12 = vpop.f32.mrb[91].mxu0 }
 0x686   :  { %v12937_v14 = vadd.f32 %v4688_v10, %v12597_v17  ;;  %5808 = vmatpush1.bf16.msra.mxu1 %v5129_v9 }
 0x687   :  { %5809 = vmatprep.subr.bf16.mxu1 %v14557_v19 }
 0x689   :  { %v4410_v1 = vpop.f32.mrb[92].mxu0 }
 0x68a   :  { %v4689_v16 = vmul.f32 %v12875_v6, %v4410_v1  ;;  %v4412_v2 = vpop.f32.mrb[93].mxu0 }
 0x68b   :  { %v4413_v28 = vpop.f32.mrb[94].mxu0 }
 0x68c   :  { %v12942_v63 = vadd.f32 %v4689_v16, %v12603_v20  ;;  %v4690_v30 = vmul.f32 %v12875_v6, %v4413_v28  ;;  %v5130_v18 = vpack.c.bf16 %v4413_v28, %v4410_v1  ;;  %v4415_v62 = vpop.f32.mrb[95].mxu0 }
 0x68e   :  { %v12946_v53 = vadd.f32 %v4690_v30, %v12608_v13  ;;  %5810 = vmatpush1.bf16.msra.mxu1 %v5130_v18 }
 0x68f   :  { %5811 = vmatprep.subr.bf16.mxu1 %v14557_v19 }
 0x691   :  { %v4418_v17 = vpop.f32.mrb[96].mxu0 }
 0x692   :  { %v4691_v49 = vmul.f32 %v12875_v6, %v4418_v17  ;;  %v4420_v25 = vpop.f32.mrb[97].mxu0 }
 0x693   :  { %v4421_v10 = vpop.f32.mrb[98].mxu0 }
 0x694   :  { %v12951_v9 = vadd.f32 %v4691_v49, %v12614_v42  ;;  %v4692_v20 = vmul.f32 %v12875_v6, %v4421_v10  ;;  %v5131_v12 = vpack.c.bf16 %v4421_v10, %v4418_v17  ;;  %v4423_v16 = vpop.f32.mrb[99].mxu0 }
 0x696   :  { %v12955_v1 = vadd.f32 %v4692_v20, %v12619_v26  ;;  %5812 = vmatpush1.bf16.msra.mxu1 %v5131_v12 }
 0x697   :  { %5813 = vmatprep.subr.bf16.mxu1 %v14557_v19 }
 0x699   :  { %v4426_v13 = vpop.f32.mrb[100].mxu0 }
 0x69a   :  { %v4693_v2 = vmul.f32 %v12875_v6, %v4426_v13  ;;  %v4428_v28 = vpop.f32.mrb[101].mxu0 }
 0x69b   :  { %v4429_v30 = vpop.f32.mrb[102].mxu0 }
 0x69c   :  { %v12960_v18 = vadd.f32 %v4693_v2, %v12625_v29  ;;  %v4694_v42 = vmul.f32 %v12875_v6, %v4429_v30  ;;  %v5132_v62 = vpack.c.bf16 %v4429_v30, %v4426_v13  ;;  %v4431_v49 = vpop.f32.mrb[103].mxu0 }
 0x69e   :  { %v12964_v17 = vadd.f32 %v4694_v42, %v12630_v40  ;;  %5814 = vmatpush1.bf16.msra.mxu1 %v5132_v62 }
 0x69f   :  { %5815 = vmatprep.subr.bf16.mxu1 %v14557_v19 }
 0x6a1   :  { %v4434_v26 = vpop.f32.mrb[104].mxu0 }
 0x6a2   :  { %v4695_v25 = vmul.f32 %v12875_v6, %v4434_v26  ;;  %v4436_v10 = vpop.f32.mrb[105].mxu0 }
 0x6a3   :  { %v4437_v20 = vpop.f32.mrb[106].mxu0 }
 0x6a4   :  { %v12969_v12 = vadd.f32 %v4695_v25, %v12636_v41  ;;  %v4696_v29 = vmul.f32 %v12875_v6, %v4437_v20  ;;  %v5133_v16 = vpack.c.bf16 %v4437_v20, %v4434_v26  ;;  %v4439_v2 = vpop.f32.mrb[107].mxu0 }
 0x6a6   :  { %v12973_v13 = vadd.f32 %v4696_v29, %v12641_v27  ;;  %5816 = vmatpush1.bf16.msra.mxu1 %v5133_v16 }
 0x6a7   :  { %5817 = vmatprep.subr.bf16.mxu1 %v14557_v19 }
 0x6a9   :  { %v4442_v40 = vpop.f32.mrb[108].mxu0 }
 0x6aa   :  { %v4697_v28 = vmul.f32 %v12875_v6, %v4442_v40  ;;  %v4444_v30 = vpop.f32.mrb[109].mxu0 }
 0x6ab   :  { %v4445_v42 = vpop.f32.mrb[110].mxu0 }
 0x6ac   :  { %v12978_v62 = vadd.f32 %v4697_v28, %v12647_v37  ;;  %v4698_v41 = vmul.f32 %v12875_v6, %v4445_v42  ;;  %v5134_v49 = vpack.c.bf16 %v4445_v42, %v4442_v40  ;;  %v4447_v25 = vpop.f32.mrb[111].mxu0 }
 0x6ae   :  { %v12982_v26 = vadd.f32 %v4698_v41, %v12652_v3  ;;  %5818 = vmatpush1.bf16.msra.mxu1 %v5134_v49 }
 0x6af   :  { %5819 = vmatprep.subr.bf16.mxu1 %v14557_v19 }
 0x6b1   :  { %v4450_v27 = vpop.f32.mrb[112].mxu0 }
 0x6b2   :  { %v4699_v10 = vmul.f32 %v12875_v6, %v4450_v27  ;;  %v4452_v20 = vpop.f32.mrb[113].mxu0 }
 0x6b3   :  { %v4453_v29 = vpop.f32.mrb[114].mxu0 }
 0x6b4   :  { %v12987_v16 = vadd.f32 %v4699_v10, %v12658_v51  ;;  %v4700_v37 = vmul.f32 %v12875_v6, %v4453_v29  ;;  %v5135_v2 = vpack.c.bf16 %v4453_v29, %v4450_v27  ;;  %v4455_v28 = vpop.f32.mrb[115].mxu0 }
 0x6b6   :  { %v12991_v40 = vadd.f32 %v4700_v37, %v12663_v43  ;;  %5820 = vmatpush1.bf16.msra.mxu1 %v5135_v2 }
 0x6b7   :  { %5821 = vmatprep.subr.bf16.mxu1 %v14557_v19 }
 0x6b9   :  { %v4458_v3 = vpop.f32.mrb[116].mxu0 }
 0x6ba   :  { %v4701_v30 = vmul.f32 %v12875_v6, %v4458_v3  ;;  %v4460_v42 = vpop.f32.mrb[117].mxu0 }
 0x6bb   :  { %v4461_v41 = vpop.f32.mrb[118].mxu0 }
 0x6bc   :  { %v12996_v49 = vadd.f32 %v4701_v30, %v12669_v48  ;;  %v4702_v51 = vmul.f32 %v12875_v6, %v4461_v41  ;;  %v5136_v25 = vpack.c.bf16 %v4461_v41, %v4458_v3  ;;  %v4463_v10 = vpop.f32.mrb[119].mxu0 }
 0x6be   :  { %v13000_v27 = vadd.f32 %v4702_v51, %v12674_v0  ;;  %5822 = vmatpush1.bf16.msra.mxu1 %v5136_v25 }
 0x6bf   :  { %5823 = vmatprep.subr.bf16.mxu1 %v14557_v19 }
 0x6c1   :  { %v4466_v43 = vpop.f32.mrb[120].mxu0 }
 0x6c2   :  { %v4703_v20 = vmul.f32 %v12875_v6, %v4466_v43  ;;  %v4468_v29 = vpop.f32.mrb[121].mxu0 }
 0x6c3   :  { %v4469_v37 = vpop.f32.mrb[122].mxu0 }
 0x6c4   :  { %v13005_v2 = vadd.f32 %v4703_v20, %v12680_v61  ;;  %v4704_v48 = vmul.f32 %v12875_v6, %v4469_v37  ;;  %v5137_v28 = vpack.c.bf16 %v4469_v37, %v4466_v43  ;;  %v4471_v30 = vpop.f32.mrb[123].mxu0  ;;  %v11212_v43 = vld [vmem:[#allocation8] ss:$16 sps:$4 sm:$0xff]  }
 0x6c6   :  { %v13009_v3 = vadd.f32 %v4704_v48, %v12685_v38  ;;  %5824 = vmatpush1.bf16.msra.mxu1 %v5137_v28  ;;  %v11215_v38 = vld [vmem:[#allocation8 + $0x24] ss:$16 sps:$4 sm:$0xff]  }
 0x6c7   :  { %5825 = vmatprep.subr.bf16.mxu1 %v14557_v19 }
 0x6c9   :  { %v4474_v0 = vpop.f32.mrb[124].mxu0 }
 0x6ca   :  { %v4705_v42 = vmul.f32 %v12875_v6, %v4474_v0  ;;  %v4476_v41 = vpop.f32.mrb[125].mxu0 }
 0x6cb   :  { %v4477_v51 = vpop.f32.mrb[126].mxu0 }
 0x6cc   :  { %v13014_v25 = vadd.f32 %v4705_v42, %v12691_v58  ;;  %v4706_v61 = vmul.f32 %v12875_v6, %v4477_v51  ;;  %v5138_v10 = vpack.c.bf16 %v4477_v51, %v4474_v0  ;;  %v4479_v20 = vpop.f32.mrb[127].mxu0 }
 0x6ce   :  { %v13018_v29 = vadd.f32 %v4706_v61, %v12696_v7  ;;  %5826 = vmatpush1.bf16.msra.mxu1 %v5138_v10  ;;  %v11217_v7 = vld [vmem:[#allocation8 + $0x20] ss:$16 sps:$4 sm:$0xff]   ;;  %v11218_v61 = vld [vmem:[#allocation8 + $0x44] ss:$16 sps:$4 sm:$0xff]  }
 0x6cf   :  { %6084 = vmatprep.subr.bf16.mxu1 %v14557_v19 }
 0x6d1   :  { %v4482_v37 = vpop.f32.mrb[128].mxu0  ;;  %5828 = vmatmul.mubr.bf16.vlgmr.msra.gmra.mrb[192].mxu1 %v11212_v43 }
 0x6d2   :  { %v4707_v48 = vmul.f32 %v12875_v6, %v4482_v37  ;;  %v4484_v28 = vpop.f32.mrb[129].mxu0  ;;  %5835 = vmatprep.mubr.bf16.mxu1 %v11215_v38 }
 0x6d3   :  { %v4485_v58 = vpop.f32.mrb[130].mxu0 }
 0x6d4   :  { %v13023_v30 = vadd.f32 %v4707_v48, %v12702_v35  ;;  %v4708_v0 = vmul.f32 %v12875_v6, %v4485_v58  ;;  %v5139_v42 = vpack.c.bf16 %v4485_v58, %v4482_v37  ;;  %v4487_v41 = vpop.f32.mrb[131].mxu0 }
 0x6d6   :  { %v13027_v51 = vadd.f32 %v4708_v0, %v12707_v60  ;;  %6085 = vmatpush1.bf16.msra.mxu1 %v5139_v42  ;;  %v11220_v60 = vld [vmem:[#allocation8 + $0x40] ss:$16 sps:$4 sm:$0xff]   ;;  %v11221_v0 = vld [vmem:[#allocation8 + $0x64] ss:$16 sps:$4 sm:$0xff]  }
 0x6d7   :  { %6086 = vmatprep.subr.bf16.mxu1 %v14557_v19 }
 0x6d9   :  { %v4490_v10 = vpop.f32.mrb[132].mxu0  ;;  %5836 = vmatmul.mubr.bf16.gmra.mrb[196].mxu1 %v11217_v7 }
 0x6da   :  { %v4709_v20 = vmul.f32 %v12875_v6, %v4490_v10  ;;  %v4492_v43 = vpop.f32.mrb[133].mxu0  ;;  %5843 = vmatprep.mubr.bf16.mxu1 %v11218_v61 }
 0x6db   :  { %v4493_v35 = vpop.f32.mrb[134].mxu0 }
 0x6dc   :  { %v13032_v38 = vadd.f32 %v4709_v20, %v12713_v47  ;;  %v4710_v37 = vmul.f32 %v12875_v6, %v4493_v35  ;;  %v5140_v48 = vpack.c.bf16 %v4493_v35, %v4490_v10  ;;  %v4495_v28 = vpop.f32.mrb[135].mxu0 }
 0x6de   :  { %v13036_v58 = vadd.f32 %v4710_v37, %v12718_v22  ;;  %6087 = vmatpush1.bf16.msra.mxu1 %v5140_v48  ;;  %v11223_v22 = vld [vmem:[#allocation8 + $0x60] ss:$16 sps:$4 sm:$0xff]   ;;  %v11224_v37 = vld [vmem:[#allocation8 + $0x84] ss:$16 sps:$4 sm:$0xff]  }
 0x6df   :  { %6088 = vmatprep.subr.bf16.mxu1 %v14557_v19 }
 0x6e1   :  { %v4498_v42 = vpop.f32.mrb[136].mxu0  ;;  %5844 = vmatmul.mubr.bf16.gmra.mrb[200].mxu1 %v11220_v60 }
 0x6e2   :  { %v4711_v41 = vmul.f32 %v12875_v6, %v4498_v42  ;;  %v4500_v7 = vpop.f32.mrb[137].mxu0  ;;  %5851 = vmatprep.mubr.bf16.mxu1 %v11221_v0 }
 0x6e3   :  { %v4501_v47 = vpop.f32.mrb[138].mxu0 }
 0x6e4   :  { %v13041_v61 = vadd.f32 %v4711_v41, %v12724_v5  ;;  %v4712_v10 = vmul.f32 %v12875_v6, %v4501_v47  ;;  %v5141_v20 = vpack.c.bf16 %v4501_v47, %v4498_v42  ;;  %v4503_v43 = vpop.f32.mrb[139].mxu0 }
 0x6e6   :  { %v13045_v35 = vadd.f32 %v4712_v10, %v12729_v21  ;;  %6089 = vmatpush1.bf16.msra.mxu1 %v5141_v20  ;;  %v11226_v21 = vld [vmem:[#allocation8 + $0x80] ss:$16 sps:$4 sm:$0xff]   ;;  %v11227_v10 = vld [vmem:[#allocation8 + $0xa4] ss:$16 sps:$4 sm:$0xff]  }
 0x6e7   :  { %6090 = vmatprep.subr.bf16.mxu1 %v14557_v19 }
 0x6e9   :  { %v4506_v48 = vpop.f32.mrb[140].mxu0  ;;  %5852 = vmatmul.mubr.bf16.gmra.mrb[204].mxu1 %v11223_v22 }
 0x6ea   :  { %v4713_v28 = vmul.f32 %v12875_v6, %v4506_v48  ;;  %v4508_v60 = vpop.f32.mrb[141].mxu0  ;;  %5859 = vmatprep.mubr.bf16.mxu1 %v11224_v37 }
 0x6eb   :  { %v4509_v5 = vpop.f32.mrb[142].mxu0 }
 0x6ec   :  { %v13050_v0 = vadd.f32 %v4713_v28, %v12735_v4  ;;  %v4714_v42 = vmul.f32 %v12875_v6, %v4509_v5  ;;  %v5142_v41 = vpack.c.bf16 %v4509_v5, %v4506_v48  ;;  %v4511_v7 = vpop.f32.mrb[143].mxu0 }
 0x6ee   :  { %v13054_v47 = vadd.f32 %v4714_v42, %v12740_v36  ;;  %6091 = vmatpush1.bf16.msra.mxu1 %v5142_v41  ;;  %v11229_v36 = vld [vmem:[#allocation8 + $0xa0] ss:$16 sps:$4 sm:$0xff]   ;;  %v11230_v42 = vld [vmem:[#allocation8 + $0xc4] ss:$16 sps:$4 sm:$0xff]  }
 0x6ef   :  { %6092 = vmatprep.subr.bf16.mxu1 %v14557_v19 }
 0x6f1   :  { %v4514_v20 = vpop.f32.mrb[144].mxu0  ;;  %5860 = vmatmul.mubr.bf16.gmra.mrb[208].mxu1 %v11226_v21 }
 0x6f2   :  { %v4715_v43 = vmul.f32 %v12875_v6, %v4514_v20  ;;  %v4516_v22 = vpop.f32.mrb[145].mxu0  ;;  %5867 = vmatprep.mubr.bf16.mxu1 %v11227_v10 }
 0x6f3   :  { %v4517_v4 = vpop.f32.mrb[146].mxu0 }
 0x6f4   :  { %v13059_v37 = vadd.f32 %v4715_v43, %v12746_v33  ;;  %v4716_v48 = vmul.f32 %v12875_v6, %v4517_v4  ;;  %v5143_v28 = vpack.c.bf16 %v4517_v4, %v4514_v20  ;;  %v4519_v60 = vpop.f32.mrb[147].mxu0 }
 0x6f6   :  { %v13063_v5 = vadd.f32 %v4716_v48, %v12751_v39  ;;  %6093 = vmatpush1.bf16.msra.mxu1 %v5143_v28  ;;  %v11232_v39 = vld [vmem:[#allocation8 + $0xc0] ss:$16 sps:$4 sm:$0xff]   ;;  %v11233_v48 = vld [vmem:[#allocation8 + $0xe4] ss:$16 sps:$4 sm:$0xff]  }
 0x6f7   :  { %6094 = vmatprep.subr.bf16.mxu1 %v14557_v19 }
 0x6f9   :  { %v4522_v41 = vpop.f32.mrb[148].mxu0  ;;  %5868 = vmatmul.mubr.bf16.gmra.mrb[212].mxu1 %v11229_v36 }
 0x6fa   :  { %v4717_v7 = vmul.f32 %v12875_v6, %v4522_v41  ;;  %v4524_v21 = vpop.f32.mrb[149].mxu0  ;;  %5875 = vmatprep.mubr.bf16.mxu1 %v11230_v42 }
 0x6fb   :  { %v4525_v33 = vpop.f32.mrb[150].mxu0 }
 0x6fc   :  { %v13068_v10 = vadd.f32 %v4717_v7, %v12757_v59  ;;  %v4718_v20 = vmul.f32 %v12875_v6, %v4525_v33  ;;  %v5144_v43 = vpack.c.bf16 %v4525_v33, %v4522_v41  ;;  %v4527_v22 = vpop.f32.mrb[151].mxu0 }
 0x6fe   :  { %v13072_v4 = vadd.f32 %v4718_v20, %v12762_v57  ;;  %6095 = vmatpush1.bf16.msra.mxu1 %v5144_v43  ;;  %v11235_v57 = vld [vmem:[#allocation8 + $0xe0] ss:$16 sps:$4 sm:$0xff]   ;;  %v11236_v20 = vld [vmem:[#allocation8 + $0x104] ss:$16 sps:$4 sm:$0xff]  }
 0x6ff   :  { %6096 = vmatprep.subr.bf16.mxu1 %v14557_v19 }
 0x701   :  { %v4530_v28 = vpop.f32.mrb[152].mxu0  ;;  %5876 = vmatmul.mubr.bf16.gmra.mrb[216].mxu1 %v11232_v39 }
 0x702   :  { %v4719_v60 = vmul.f32 %v12875_v6, %v4530_v28  ;;  %v4532_v36 = vpop.f32.mrb[153].mxu0  ;;  %5883 = vmatprep.mubr.bf16.mxu1 %v11233_v48  ;;  %v14594_v48 = vld [vmem:[#allocation13_spill] sm:$0xff] }
 0x703   :  { %v4533_v59 = vpop.f32.mrb[154].mxu0 }
 0x704   :  { %v13077_v42 = vadd.f32 %v4719_v60, %v12768_v54  ;;  %v4720_v41 = vmul.f32 %v12875_v6, %v4533_v59  ;;  %v5145_v7 = vpack.c.bf16 %v4533_v59, %v4530_v28  ;;  %v4535_v21 = vpop.f32.mrb[155].mxu0 }
 0x705   :  { %v11239_v21 = vld [vmem:[#allocation8 + $0x124] ss:$16 sps:$4 sm:$0xff]  }
 0x706   :  { %v13081_v33 = vadd.f32 %v4720_v41, %v12773_v32  ;;  %6097 = vmatpush1.bf16.msra.mxu1 %v5145_v7  ;;  %v11238_v32 = vld [vmem:[#allocation8 + $0x100] ss:$16 sps:$4 sm:$0xff]   ;;  %v14596_v41 = vld [vmem:[#allocation14_spill] sm:$0xff] }
 0x707   :  { %6098 = vmatprep.subr.bf16.mxu1 %v14557_v19 }
 0x709   :  { %v4538_v43 = vpop.f32.mrb[156].mxu0  ;;  %5884 = vmatmul.mubr.bf16.gmra.mrb[220].mxu1 %v11235_v57 }
 0x70a   :  { %v4721_v22 = vmul.f32 %v12875_v6, %v4538_v43  ;;  %v4540_v39 = vpop.f32.mrb[157].mxu0  ;;  %5891 = vmatprep.mubr.bf16.mxu1 %v11236_v20 }
 0x70b   :  { %v4541_v54 = vpop.f32.mrb[158].mxu0 }
 0x70c   :  { %v13086_v60 = vadd.f32 %v4721_v22, %v14594_v48  ;;  %v4722_v28 = vmul.f32 %v12875_v6, %v4541_v54  ;;  %v5146_v36 = vpack.c.bf16 %v4541_v54, %v4538_v43  ;;  %v4543_v59 = vpop.f32.mrb[159].mxu0  ;;  %v14598_v48 = vld [vmem:[#allocation15_spill] sm:$0xff] }
 0x70e   :  { %14595 = vst [vmem:[#allocation29_spill] sm:$0xff] %v13086_v60  ;;  %v13090_v7 = vadd.f32 %v4722_v28, %v14596_v41  ;;  %6099 = vmatpush1.bf16.msra.mxu1 %v5146_v36  ;;  %v11241_v28 = vld [vmem:[#allocation8 + $0x120] ss:$16 sps:$4 sm:$0xff]   ;;  %v14600_v41 = vld [vmem:[#allocation18_spill] sm:$0xff] }
 0x70f   :  { %6100 = vmatprep.subr.bf16.mxu1 %v14557_v19 }
 0x710   :  { %14597 = vst [vmem:[#allocation31_spill] sm:$0xff] %v13090_v7  ;;  %v11242_v7 = vld [vmem:[#allocation8 + $0x144] ss:$16 sps:$4 sm:$0xff]  }
 0x711   :  { %v4546_v57 = vpop.f32.mrb[160].mxu0  ;;  %5892 = vmatmul.mubr.bf16.gmra.mrb[224].mxu1 %v11238_v32 }
 0x712   :  { %v4723_v20 = vmul.f32 %v12875_v6, %v4546_v57  ;;  %v4548_v39 = vpop.f32.mrb[161].mxu0  ;;  %5899 = vmatprep.mubr.bf16.mxu1 %v11239_v21 }
 0x713   :  { %v4549_v22 = vpop.f32.mrb[162].mxu0 }
 0x714   :  { %v13095_v60 = vadd.f32 %v4723_v20, %v14598_v48  ;;  %v4724_v43 = vmul.f32 %v12875_v6, %v4549_v22  ;;  %v5147_v54 = vpack.c.bf16 %v4549_v22, %v4546_v57  ;;  %v4551_v59 = vpop.f32.mrb[163].mxu0  ;;  %v14602_v48 = vld [vmem:[#allocation16_spill] sm:$0xff] }
 0x716   :  { %14599 = vst [vmem:[#allocation13_spill] sm:$0xff] %v13095_v60  ;;  %v13099_v36 = vadd.f32 %v4724_v43, %v14600_v41  ;;  %6101 = vmatpush1.bf16.msra.mxu1 %v5147_v54  ;;  %v11244_v43 = vld [vmem:[#allocation8 + $0x140] ss:$16 sps:$4 sm:$0xff]  }
 0x717   :  { %6102 = vmatprep.subr.bf16.mxu1 %v14557_v19  ;;  %v14604_v41 = vld [vmem:[#allocation17_spill] sm:$0xff] }
 0x718   :  { %14601 = vst [vmem:[#allocation14_spill] sm:$0xff] %v13099_v36  ;;  %v11245_v36 = vld [vmem:[#allocation8 + $0x164] ss:$16 sps:$4 sm:$0xff]  }
 0x719   :  { %v4554_v32 = vpop.f32.mrb[164].mxu0  ;;  %5900 = vmatmul.mubr.bf16.gmra.mrb[228].mxu1 %v11241_v28 }
 0x71a   :  { %v4725_v21 = vmul.f32 %v12875_v6, %v4554_v32  ;;  %v4556_v39 = vpop.f32.mrb[165].mxu0  ;;  %5907 = vmatprep.mubr.bf16.mxu1 %v11242_v7 }
 0x71b   :  { %v4557_v20 = vpop.f32.mrb[166].mxu0 }
 0x71c   :  { %v13104_v60 = vadd.f32 %v4725_v21, %v14602_v48  ;;  %v4726_v57 = vmul.f32 %v12875_v6, %v4557_v20  ;;  %v5148_v22 = vpack.c.bf16 %v4557_v20, %v4554_v32  ;;  %v4559_v59 = vpop.f32.mrb[167].mxu0  ;;  %v14606_v48 = vld [vmem:[#allocation19_spill] sm:$0xff] }
 0x71e   :  { %14603 = vst [vmem:[#allocation15_spill] sm:$0xff] %v13104_v60  ;;  %v13108_v54 = vadd.f32 %v4726_v57, %v14604_v41  ;;  %6103 = vmatpush1.bf16.msra.mxu1 %v5148_v22  ;;  %v11247_v57 = vld [vmem:[#allocation8 + $0x160] ss:$16 sps:$4 sm:$0xff]   ;;  %v14608_v41 = vld [vmem:[#allocation22_spill] sm:$0xff] }
 0x71f   :  { %6104 = vmatprep.subr.bf16.mxu1 %v14557_v19 }
 0x720   :  { %14605 = vst [vmem:[#allocation18_spill] sm:$0xff] %v13108_v54  ;;  %v11248_v54 = vld [vmem:[#allocation8 + $0x184] ss:$16 sps:$4 sm:$0xff]  }
 0x721   :  { %v4562_v28 = vpop.f32.mrb[168].mxu0  ;;  %5908 = vmatmul.mubr.bf16.gmra.mrb[232].mxu1 %v11244_v43 }
 0x722   :  { %v4727_v7 = vmul.f32 %v12875_v6, %v4562_v28  ;;  %v4564_v39 = vpop.f32.mrb[169].mxu0  ;;  %5915 = vmatprep.mubr.bf16.mxu1 %v11245_v36 }
 0x723   :  { %v4565_v21 = vpop.f32.mrb[170].mxu0 }
 0x724   :  { %v13113_v60 = vadd.f32 %v4727_v7, %v14606_v48  ;;  %v4728_v32 = vmul.f32 %v12875_v6, %v4565_v21  ;;  %v5149_v20 = vpack.c.bf16 %v4565_v21, %v4562_v28  ;;  %v4567_v59 = vpop.f32.mrb[171].mxu0  ;;  %v14610_v48 = vld [vmem:[#allocation20_spill] sm:$0xff] }
 0x726   :  { %14607 = vst [vmem:[#allocation16_spill] sm:$0xff] %v13113_v60  ;;  %v13117_v22 = vadd.f32 %v4728_v32, %v14608_v41  ;;  %6105 = vmatpush1.bf16.msra.mxu1 %v5149_v20  ;;  %v11250_v32 = vld [vmem:[#allocation8 + $0x180] ss:$16 sps:$4 sm:$0xff]  }
 0x727   :  { %6106 = vmatprep.subr.bf16.mxu1 %v14557_v19  ;;  %v14612_v41 = vld [vmem:[#allocation21_spill] sm:$0xff] }
 0x728   :  { %14609 = vst [vmem:[#allocation17_spill] sm:$0xff] %v13117_v22  ;;  %v11251_v22 = vld [vmem:[#allocation8 + $0x1a4] ss:$16 sps:$4 sm:$0xff]  }
 0x729   :  { %v4570_v43 = vpop.f32.mrb[172].mxu0  ;;  %5916 = vmatmul.mubr.bf16.gmra.mrb[236].mxu1 %v11247_v57 }
 0x72a   :  { %v4729_v36 = vmul.f32 %v12875_v6, %v4570_v43  ;;  %v4572_v39 = vpop.f32.mrb[173].mxu0  ;;  %5923 = vmatprep.mubr.bf16.mxu1 %v11248_v54 }
 0x72b   :  { %v4573_v7 = vpop.f32.mrb[174].mxu0 }
 0x72c   :  { %v13122_v60 = vadd.f32 %v4729_v36, %v14610_v48  ;;  %v4730_v28 = vmul.f32 %v12875_v6, %v4573_v7  ;;  %v5150_v21 = vpack.c.bf16 %v4573_v7, %v4570_v43  ;;  %v4575_v59 = vpop.f32.mrb[175].mxu0  ;;  %v14614_v48 = vld [vmem:[#allocation23_spill] sm:$0xff] }
 0x72e   :  { %14611 = vst [vmem:[#allocation19_spill] sm:$0xff] %v13122_v60  ;;  %v13126_v20 = vadd.f32 %v4730_v28, %v14612_v41  ;;  %6107 = vmatpush1.bf16.msra.mxu1 %v5150_v21  ;;  %v11253_v28 = vld [vmem:[#allocation8 + $0x1a0] ss:$16 sps:$4 sm:$0xff]   ;;  %v14616_v41 = vld [vmem:[#allocation26_spill] sm:$0xff] }
 0x72f   :  { %6108 = vmatprep.subr.bf16.mxu1 %v14557_v19 }
 0x730   :  { %14613 = vst [vmem:[#allocation22_spill] sm:$0xff] %v13126_v20  ;;  %v11254_v20 = vld [vmem:[#allocation8 + $0x1c4] ss:$16 sps:$4 sm:$0xff]  }
 0x731   :  { %v4578_v57 = vpop.f32.mrb[176].mxu0  ;;  %5924 = vmatmul.mubr.bf16.gmra.mrb[240].mxu1 %v11250_v32 }
 0x732   :  { %v4731_v54 = vmul.f32 %v12875_v6, %v4578_v57  ;;  %v4580_v39 = vpop.f32.mrb[177].mxu0  ;;  %5931 = vmatprep.mubr.bf16.mxu1 %v11251_v22 }
 0x733   :  { %v4581_v36 = vpop.f32.mrb[178].mxu0 }
 0x734   :  { %v13131_v60 = vadd.f32 %v4731_v54, %v14614_v48  ;;  %v4732_v43 = vmul.f32 %v12875_v6, %v4581_v36  ;;  %v5151_v7 = vpack.c.bf16 %v4581_v36, %v4578_v57  ;;  %v4583_v59 = vpop.f32.mrb[179].mxu0  ;;  %v14618_v48 = vld [vmem:[#allocation24_spill] sm:$0xff] }
 0x736   :  { %14615 = vst [vmem:[#allocation20_spill] sm:$0xff] %v13131_v60  ;;  %v13135_v21 = vadd.f32 %v4732_v43, %v14616_v41  ;;  %6109 = vmatpush1.bf16.msra.mxu1 %v5151_v7  ;;  %v11256_v43 = vld [vmem:[#allocation8 + $0x1c0] ss:$16 sps:$4 sm:$0xff]  }
 0x737   :  { %6110 = vmatprep.subr.bf16.mxu1 %v14557_v19  ;;  %v14620_v41 = vld [vmem:[#allocation25_spill] sm:$0xff] }
 0x738   :  { %14617 = vst [vmem:[#allocation21_spill] sm:$0xff] %v13135_v21  ;;  %v11257_v21 = vld [vmem:[#allocation8 + $0x1e4] ss:$16 sps:$4 sm:$0xff]  }
 0x739   :  { %v4586_v32 = vpop.f32.mrb[180].mxu0  ;;  %5932 = vmatmul.mubr.bf16.gmra.mrb[244].mxu1 %v11253_v28 }
 0x73a   :  { %v4733_v22 = vmul.f32 %v12875_v6, %v4586_v32  ;;  %v4588_v39 = vpop.f32.mrb[181].mxu0  ;;  %5939 = vmatprep.mubr.bf16.mxu1 %v11254_v20 }
 0x73b   :  { %v4589_v54 = vpop.f32.mrb[182].mxu0 }
 0x73c   :  { %v13140_v60 = vadd.f32 %v4733_v22, %v14618_v48  ;;  %v4734_v57 = vmul.f32 %v12875_v6, %v4589_v54  ;;  %v5152_v36 = vpack.c.bf16 %v4589_v54, %v4586_v32  ;;  %v4591_v59 = vpop.f32.mrb[183].mxu0  ;;  %v14622_v48 = vld [vmem:[#allocation27_spill] sm:$0xff] }
 0x73e   :  { %14619 = vst [vmem:[#allocation23_spill] sm:$0xff] %v13140_v60  ;;  %v13144_v7 = vadd.f32 %v4734_v57, %v14620_v41  ;;  %6111 = vmatpush1.bf16.msra.mxu1 %v5152_v36  ;;  %v11259_v57 = vld [vmem:[#allocation8 + $0x1e0] ss:$16 sps:$4 sm:$0xff]   ;;  %v14624_v41 = vld [vmem:[#allocation30_spill] sm:$0xff] }
 0x73f   :  { %6112 = vmatprep.subr.bf16.mxu1 %v14557_v19 }
 0x740   :  { %14621 = vst [vmem:[#allocation26_spill] sm:$0xff] %v13144_v7  ;;  %v11262_v7 = vld [vmem:[#allocation8 + $0x204] ss:$16 sps:$4 sm:$0xff]  }
 0x741   :  { %v4594_v28 = vpop.f32.mrb[184].mxu0  ;;  %5940 = vmatmul.mubr.bf16.gmra.mrb[248].mxu1 %v11256_v43 }
 0x742   :  { %v4735_v20 = vmul.f32 %v12875_v6, %v4594_v28  ;;  %v4596_v39 = vpop.f32.mrb[185].mxu0  ;;  %5947 = vmatprep.mubr.bf16.mxu1 %v11257_v21 }
 0x743   :  { %v4597_v22 = vpop.f32.mrb[186].mxu0 }
 0x744   :  { %v13149_v60 = vadd.f32 %v4735_v20, %v14622_v48  ;;  %v4736_v32 = vmul.f32 %v12875_v6, %v4597_v22  ;;  %v5153_v54 = vpack.c.bf16 %v4597_v22, %v4594_v28  ;;  %v4599_v59 = vpop.f32.mrb[187].mxu0 }
 0x746   :  { %14623 = vst [vmem:[#allocation24_spill] sm:$0xff] %v13149_v60  ;;  %v13153_v36 = vadd.f32 %v4736_v32, %v14624_v41  ;;  %6113 = vmatpush1.bf16.msra.mxu1 %v5153_v54  ;;  %v11260_v32 = vld [vmem:[#allocation8 + $0x200] ss:$16 sps:$4 sm:$0xff]   ;;  %v14626_v41 = vld [vmem:[#allocation28_spill] sm:$0xff]  ;;  %v11268_v60 = vld [vmem:[#allocation8 + $0x244] ss:$16 sps:$4 sm:$0xff]  }
 0x747   :  { %6114 = vmatprep.subr.bf16.mxu1 %v14557_v19 }
 0x748   :  { %14625 = vst [vmem:[#allocation25_spill] sm:$0xff] %v13153_v36  ;;  %v11265_v36 = vld [vmem:[#allocation8 + $0x224] ss:$16 sps:$4 sm:$0xff]  }
 0x749   :  { %v4602_v43 = vpop.f32.mrb[188].mxu0  ;;  %5948 = vmatmul.mubr.bf16.gmra.mrb[252].mxu1 %v11259_v57  ;;  %v11263_v57 = vld [vmem:[#allocation8 + $0x220] ss:$16 sps:$4 sm:$0xff]  }
 0x74a   :  { %v4737_v21 = vmul.f32 %v12875_v6, %v4602_v43  ;;  %v4604_v39 = vpop.f32.mrb[189].mxu0  ;;  %5955 = vmatprep.mubr.bf16.mxu1 %v11262_v7  ;;  %v11266_v7 = vld [vmem:[#allocation8 + $0x240] ss:$16 sps:$4 sm:$0xff]  }
 0x74b   :  { %v4605_v20 = vpop.f32.mrb[190].mxu0  ;;  %v11271_v39 = vld [vmem:[#allocation8 + $0x264] ss:$16 sps:$4 sm:$0xff]  }
 0x74c   :  { %v13158_v48 = vadd.f32 %v4737_v21, %v12867_v45  ;;  %v4738_v28 = vmul.f32 %v12875_v6, %v4605_v20  ;;  %v5154_v22 = vpack.c.bf16 %v4605_v20, %v4602_v43  ;;  %v4607_v59 = vpop.f32.mrb[191].mxu0  ;;  %v11269_v45 = vld [vmem:[#allocation8 + $0x260] ss:$16 sps:$4 sm:$0xff]   ;;  %v11274_v6 = vld [vmem:[#allocation8 + $0x284] ss:$16 sps:$4 sm:$0xff]  }
 0x74d   :  { %v11272_v43 = vld [vmem:[#allocation8 + $0x280] ss:$16 sps:$4 sm:$0xff]   ;;  %v11277_v21 = vld [vmem:[#allocation8 + $0x2a4] ss:$16 sps:$4 sm:$0xff]  }
 0x74e   :  { %v13162_v54 = vadd.f32 %v4738_v28, %v14626_v41  ;;  %6115 = vmatpush1.bf16.msra.mxu1 %v5154_v22  ;;  %v11275_v20 = vld [vmem:[#allocation8 + $0x2a0] ss:$16 sps:$4 sm:$0xff]   ;;  %v11280_v28 = vld [vmem:[#allocation8 + $0x2c4] ss:$16 sps:$4 sm:$0xff]  }
 0x74f   :  { %v11283_v22 = vld [vmem:[#allocation8 + $0x2e4] ss:$16 sps:$4 sm:$0xff]  }
 0x750   :  { %14627 = vst [vmem:[#allocation27_spill] sm:$0xff] %v13162_v54  ;;  %v11286_v59 = vld [vmem:[#allocation8 + $0x304] ss:$16 sps:$4 sm:$0xff]  }
 0x751   :  { %5956 = vmatmul.mubr.bf16.gmra.mrb[0].mxu1 %v11260_v32  ;;  %v11284_v32 = vld [vmem:[#allocation8 + $0x300] ss:$16 sps:$4 sm:$0xff]   ;;  %v11289_v41 = vld [vmem:[#allocation8 + $0x324] ss:$16 sps:$4 sm:$0xff]  }
 0x752   :  { %5963 = vmatprep.mubr.bf16.mxu1 %v11265_v36  ;;  %v11278_v36 = vld [vmem:[#allocation8 + $0x2c0] ss:$16 sps:$4 sm:$0xff]  }
 0x759   :  { %5964 = vmatmul.mubr.bf16.gmra.mrb[4].mxu1 %v11263_v57  ;;  %v11287_v57 = vld [vmem:[#allocation8 + $0x320] ss:$16 sps:$4 sm:$0xff]  }
 0x75a   :  { %5971 = vmatprep.mubr.bf16.mxu1 %v11268_v60  ;;  %v11281_v60 = vld [vmem:[#allocation8 + $0x2e0] ss:$16 sps:$4 sm:$0xff]  }
 0x761   :  { %5972 = vmatmul.mubr.bf16.gmra.mrb[8].mxu1 %v11266_v7  ;;  %v11292_v7 = vld [vmem:[#allocation8 + $0x344] ss:$16 sps:$4 sm:$0xff]  }
 0x762   :  { %5979 = vmatprep.mubr.bf16.mxu1 %v11271_v39  ;;  %v11290_v39 = vld [vmem:[#allocation8 + $0x340] ss:$16 sps:$4 sm:$0xff]  }
 0x769   :  { %5980 = vmatmul.mubr.bf16.gmra.mrb[12].mxu1 %v11269_v45  ;;  %v11295_v45 = vld [vmem:[#allocation8 + $0x364] ss:$16 sps:$4 sm:$0xff]  }
 0x76a   :  { %5987 = vmatprep.mubr.bf16.mxu1 %v11274_v6  ;;  %v11293_v6 = vld [vmem:[#allocation8 + $0x360] ss:$16 sps:$4 sm:$0xff]  }
 0x771   :  { %5988 = vmatmul.mubr.bf16.gmra.mrb[16].mxu1 %v11272_v43  ;;  %v11298_v43 = vld [vmem:[#allocation8 + $0x384] ss:$16 sps:$4 sm:$0xff]  }
 0x772   :  { %5995 = vmatprep.mubr.bf16.mxu1 %v11277_v21  ;;  %v11296_v21 = vld [vmem:[#allocation8 + $0x380] ss:$16 sps:$4 sm:$0xff]  }
 0x779   :  { %5996 = vmatmul.mubr.bf16.gmra.mrb[20].mxu1 %v11275_v20  ;;  %v11301_v20 = vld [vmem:[#allocation8 + $0x3a4] ss:$16 sps:$4 sm:$0xff]  }
 0x77a   :  { %6003 = vmatprep.mubr.bf16.mxu1 %v11280_v28  ;;  %v11299_v28 = vld [vmem:[#allocation8 + $0x3a0] ss:$16 sps:$4 sm:$0xff]  }
 0x781   :  { %6004 = vmatmul.mubr.bf16.gmra.mrb[24].mxu1 %v11278_v36  ;;  %v11304_v36 = vld [vmem:[#allocation8 + $0x3c4] ss:$16 sps:$4 sm:$0xff]  }
 0x782   :  { %6011 = vmatprep.mubr.bf16.mxu1 %v11283_v22  ;;  %v11302_v22 = vld [vmem:[#allocation8 + $0x3c0] ss:$16 sps:$4 sm:$0xff]  }
 0x789   :  { %6012 = vmatmul.mubr.bf16.gmra.mrb[28].mxu1 %v11281_v60  ;;  %v11307_v60 = vld [vmem:[#allocation8 + $0x3e4] ss:$16 sps:$4 sm:$0xff]  }
 0x78a   :  { %6019 = vmatprep.mubr.bf16.mxu1 %v11286_v59  ;;  %v11305_v59 = vld [vmem:[#allocation8 + $0x3e0] ss:$16 sps:$4 sm:$0xff]  }
 0x791   :  { %6020 = vmatmul.mubr.bf16.gmra.mrb[32].mxu1 %v11284_v32  ;;  %v11310_v32 = vld [vmem:[#allocation8 + $0xc] ss:$16 sps:$4 sm:$0xff]  }
 0x792   :  { %6027 = vmatprep.mubr.bf16.mxu1 %v11289_v41  ;;  %v11308_v41 = vld [vmem:[#allocation8 + $0x8] ss:$16 sps:$4 sm:$0xff]  }
 0x799   :  { %6028 = vmatmul.mubr.bf16.gmra.mrb[36].mxu1 %v11287_v57  ;;  %v11311_v57 = vld [vmem:[#allocation8 + $0x2c] ss:$16 sps:$4 sm:$0xff]  }
 0x79a   :  { %6035 = vmatprep.mubr.bf16.mxu1 %v11292_v7  ;;  %v11313_v7 = vld [vmem:[#allocation8 + $0x28] ss:$16 sps:$4 sm:$0xff]  }
 0x7a1   :  { %6036 = vmatmul.mubr.bf16.gmra.mrb[40].mxu1 %v11290_v39  ;;  %v11314_v39 = vld [vmem:[#allocation8 + $0x4c] ss:$16 sps:$4 sm:$0xff]  }
 0x7a2   :  { %6043 = vmatprep.mubr.bf16.mxu1 %v11295_v45  ;;  %v11316_v45 = vld [vmem:[#allocation8 + $0x48] ss:$16 sps:$4 sm:$0xff]  }
 0x7a9   :  { %6044 = vmatmul.mubr.bf16.gmra.mrb[44].mxu1 %v11293_v6  ;;  %v11317_v6 = vld [vmem:[#allocation8 + $0x6c] ss:$16 sps:$4 sm:$0xff]  }
 0x7aa   :  { %6051 = vmatprep.mubr.bf16.mxu1 %v11298_v43  ;;  %v11319_v43 = vld [vmem:[#allocation8 + $0x68] ss:$16 sps:$4 sm:$0xff]  }
 0x7b1   :  { %6052 = vmatmul.mubr.bf16.gmra.mrb[48].mxu1 %v11296_v21  ;;  %v11320_v21 = vld [vmem:[#allocation8 + $0x8c] ss:$16 sps:$4 sm:$0xff]  }
 0x7b2   :  { %6059 = vmatprep.mubr.bf16.mxu1 %v11301_v20  ;;  %v11322_v20 = vld [vmem:[#allocation8 + $0x88] ss:$16 sps:$4 sm:$0xff]  }
 0x7b9   :  { %6060 = vmatmul.mubr.bf16.gmra.mrb[52].mxu1 %v11299_v28  ;;  %v11323_v28 = vld [vmem:[#allocation8 + $0xac] ss:$16 sps:$4 sm:$0xff]  }
 0x7ba   :  { %6067 = vmatprep.mubr.bf16.mxu1 %v11304_v36  ;;  %v11325_v36 = vld [vmem:[#allocation8 + $0xa8] ss:$16 sps:$4 sm:$0xff]  }
 0x7c1   :  { %6068 = vmatmul.mubr.bf16.gmra.mrb[56].mxu1 %v11302_v22  ;;  %v11326_v22 = vld [vmem:[#allocation8 + $0xcc] ss:$16 sps:$4 sm:$0xff]  }
 0x7c2   :  { %6075 = vmatprep.mubr.bf16.mxu1 %v11307_v60  ;;  %v11328_v60 = vld [vmem:[#allocation8 + $0xc8] ss:$16 sps:$4 sm:$0xff]  }
 0x7c9   :  { %6076 = vmatmul.mubr.bf16.gmra.mrb[60].mxu1 %v11305_v59  ;;  %v11329_v59 = vld [vmem:[#allocation8 + $0xec] ss:$16 sps:$4 sm:$0xff]  }
 0x7ca   :  { %6116 = vmatprep.mubr.bf16.mxu1 %v11310_v32  ;;  %v11331_v32 = vld [vmem:[#allocation8 + $0xe8] ss:$16 sps:$4 sm:$0xff]  }
 0x7d1   :  { %6117 = vmatmul.mubr.bf16.vlgmr.msra.gmra.mrb[192].mxu1 %v11308_v41  ;;  %v11332_v41 = vld [vmem:[#allocation8 + $0x10c] ss:$16 sps:$4 sm:$0xff]  }
 0x7d2   :  { %6124 = vmatprep.mubr.bf16.mxu1 %v11311_v57  ;;  %v11334_v57 = vld [vmem:[#allocation8 + $0x108] ss:$16 sps:$4 sm:$0xff]  }
 0x7d9   :  { %6125 = vmatmul.mubr.bf16.gmra.mrb[196].mxu1 %v11313_v7  ;;  %v11335_v7 = vld [vmem:[#allocation8 + $0x12c] ss:$16 sps:$4 sm:$0xff]  }
 0x7da   :  { %6132 = vmatprep.mubr.bf16.mxu1 %v11314_v39  ;;  %v11337_v39 = vld [vmem:[#allocation8 + $0x128] ss:$16 sps:$4 sm:$0xff]  }
 0x7e1   :  { %6133 = vmatmul.mubr.bf16.gmra.mrb[200].mxu1 %v11316_v45  ;;  %v11338_v45 = vld [vmem:[#allocation8 + $0x14c] ss:$16 sps:$4 sm:$0xff]  }
 0x7e2   :  { %6140 = vmatprep.mubr.bf16.mxu1 %v11317_v6  ;;  %v11340_v6 = vld [vmem:[#allocation8 + $0x148] ss:$16 sps:$4 sm:$0xff]  }
 0x7e9   :  { %6141 = vmatmul.mubr.bf16.gmra.mrb[204].mxu1 %v11319_v43  ;;  %v11341_v43 = vld [vmem:[#allocation8 + $0x16c] ss:$16 sps:$4 sm:$0xff]  }
 0x7ea   :  { %6148 = vmatprep.mubr.bf16.mxu1 %v11320_v21  ;;  %v11343_v21 = vld [vmem:[#allocation8 + $0x168] ss:$16 sps:$4 sm:$0xff]  }
 0x7f1   :  { %6149 = vmatmul.mubr.bf16.gmra.mrb[208].mxu1 %v11322_v20  ;;  %v11344_v20 = vld [vmem:[#allocation8 + $0x18c] ss:$16 sps:$4 sm:$0xff]  }
 0x7f2   :  { %6156 = vmatprep.mubr.bf16.mxu1 %v11323_v28  ;;  %v11346_v28 = vld [vmem:[#allocation8 + $0x188] ss:$16 sps:$4 sm:$0xff]  }
 0x7f9   :  { %6157 = vmatmul.mubr.bf16.gmra.mrb[212].mxu1 %v11325_v36  ;;  %v11347_v36 = vld [vmem:[#allocation8 + $0x1ac] ss:$16 sps:$4 sm:$0xff]  }
 0x7fa   :  { %6164 = vmatprep.mubr.bf16.mxu1 %v11326_v22  ;;  %v11349_v22 = vld [vmem:[#allocation8 + $0x1a8] ss:$16 sps:$4 sm:$0xff]  }
 0x801   :  { %6165 = vmatmul.mubr.bf16.gmra.mrb[216].mxu1 %v11328_v60  ;;  %v11350_v60 = vld [vmem:[#allocation8 + $0x1cc] ss:$16 sps:$4 sm:$0xff]  }
 0x802   :  { %6172 = vmatprep.mubr.bf16.mxu1 %v11329_v59  ;;  %v11352_v59 = vld [vmem:[#allocation8 + $0x1c8] ss:$16 sps:$4 sm:$0xff]  }
 0x809   :  { %6173 = vmatmul.mubr.bf16.gmra.mrb[220].mxu1 %v11331_v32  ;;  %v11353_v32 = vld [vmem:[#allocation8 + $0x1ec] ss:$16 sps:$4 sm:$0xff]  }
 0x80a   :  { %6180 = vmatprep.mubr.bf16.mxu1 %v11332_v41  ;;  %v11355_v41 = vld [vmem:[#allocation8 + $0x1e8] ss:$16 sps:$4 sm:$0xff]  }
 0x811   :  { %6181 = vmatmul.mubr.bf16.gmra.mrb[224].mxu1 %v11334_v57  ;;  %v11358_v57 = vld [vmem:[#allocation8 + $0x20c] ss:$16 sps:$4 sm:$0xff]  }
 0x812   :  { %6188 = vmatprep.mubr.bf16.mxu1 %v11335_v7  ;;  %v11356_v7 = vld [vmem:[#allocation8 + $0x208] ss:$16 sps:$4 sm:$0xff]  }
 0x819   :  { %6189 = vmatmul.mubr.bf16.gmra.mrb[228].mxu1 %v11337_v39  ;;  %v11361_v39 = vld [vmem:[#allocation8 + $0x22c] ss:$16 sps:$4 sm:$0xff]  }
 0x81a   :  { %6196 = vmatprep.mubr.bf16.mxu1 %v11338_v45  ;;  %v11359_v45 = vld [vmem:[#allocation8 + $0x228] ss:$16 sps:$4 sm:$0xff]  }
 0x821   :  { %6197 = vmatmul.mubr.bf16.gmra.mrb[232].mxu1 %v11340_v6  ;;  %v11364_v6 = vld [vmem:[#allocation8 + $0x24c] ss:$16 sps:$4 sm:$0xff]  }
 0x822   :  { %6204 = vmatprep.mubr.bf16.mxu1 %v11341_v43  ;;  %v11362_v43 = vld [vmem:[#allocation8 + $0x248] ss:$16 sps:$4 sm:$0xff]  }
 0x829   :  { %6205 = vmatmul.mubr.bf16.gmra.mrb[236].mxu1 %v11343_v21  ;;  %v11367_v21 = vld [vmem:[#allocation8 + $0x26c] ss:$16 sps:$4 sm:$0xff]  }
 0x82a   :  { %6212 = vmatprep.mubr.bf16.mxu1 %v11344_v20  ;;  %v11365_v20 = vld [vmem:[#allocation8 + $0x268] ss:$16 sps:$4 sm:$0xff]  }
 0x831   :  { %6213 = vmatmul.mubr.bf16.gmra.mrb[240].mxu1 %v11346_v28  ;;  %v11370_v28 = vld [vmem:[#allocation8 + $0x28c] ss:$16 sps:$4 sm:$0xff]  }
 0x832   :  { %6220 = vmatprep.mubr.bf16.mxu1 %v11347_v36  ;;  %v11368_v36 = vld [vmem:[#allocation8 + $0x288] ss:$16 sps:$4 sm:$0xff]  }
 0x839   :  { %6221 = vmatmul.mubr.bf16.gmra.mrb[244].mxu1 %v11349_v22  ;;  %v11373_v22 = vld [vmem:[#allocation8 + $0x2ac] ss:$16 sps:$4 sm:$0xff]  }
 0x83a   :  { %6228 = vmatprep.mubr.bf16.mxu1 %v11350_v60  ;;  %v11371_v60 = vld [vmem:[#allocation8 + $0x2a8] ss:$16 sps:$4 sm:$0xff]  }
 0x841   :  { %6229 = vmatmul.mubr.bf16.gmra.mrb[248].mxu1 %v11352_v59  ;;  %v11376_v59 = vld [vmem:[#allocation8 + $0x2cc] ss:$16 sps:$4 sm:$0xff]  }
 0x842   :  { %6236 = vmatprep.mubr.bf16.mxu1 %v11353_v32  ;;  %v11374_v32 = vld [vmem:[#allocation8 + $0x2c8] ss:$16 sps:$4 sm:$0xff]  }
 0x849   :  { %6237 = vmatmul.mubr.bf16.gmra.mrb[252].mxu1 %v11355_v41  ;;  %v11379_v41 = vld [vmem:[#allocation8 + $0x2ec] ss:$16 sps:$4 sm:$0xff]  }
 0x84a   :  { %6244 = vmatprep.mubr.bf16.mxu1 %v11358_v57  ;;  %v11377_v57 = vld [vmem:[#allocation8 + $0x2e8] ss:$16 sps:$4 sm:$0xff]  }
 0x851   :  { %6245 = vmatmul.mubr.bf16.gmra.mrb[0].mxu1 %v11356_v7  ;;  %v11382_v7 = vld [vmem:[#allocation8 + $0x30c] ss:$16 sps:$4 sm:$0xff]  }
 0x852   :  { %6252 = vmatprep.mubr.bf16.mxu1 %v11361_v39  ;;  %v11380_v39 = vld [vmem:[#allocation8 + $0x308] ss:$16 sps:$4 sm:$0xff]  }
 0x859   :  { %6253 = vmatmul.mubr.bf16.gmra.mrb[4].mxu1 %v11359_v45  ;;  %v11385_v45 = vld [vmem:[#allocation8 + $0x32c] ss:$16 sps:$4 sm:$0xff]  }
 0x85a   :  { %6260 = vmatprep.mubr.bf16.mxu1 %v11364_v6  ;;  %v11383_v6 = vld [vmem:[#allocation8 + $0x328] ss:$16 sps:$4 sm:$0xff]  }
 0x861   :  { %6261 = vmatmul.mubr.bf16.gmra.mrb[8].mxu1 %v11362_v43  ;;  %v11388_v43 = vld [vmem:[#allocation8 + $0x34c] ss:$16 sps:$4 sm:$0xff]  }
 0x862   :  { %6268 = vmatprep.mubr.bf16.mxu1 %v11367_v21  ;;  %v11386_v21 = vld [vmem:[#allocation8 + $0x348] ss:$16 sps:$4 sm:$0xff]  }
 0x869   :  { %6269 = vmatmul.mubr.bf16.gmra.mrb[12].mxu1 %v11365_v20  ;;  %v11391_v20 = vld [vmem:[#allocation8 + $0x36c] ss:$16 sps:$4 sm:$0xff]  }
 0x86a   :  { %6276 = vmatprep.mubr.bf16.mxu1 %v11370_v28  ;;  %v11406_v28 = vld [vmem:[#allocation8 + $0x4] ss:$16 sps:$4 sm:$0xff]  }
 0x86b   :  { %7591 = vmatprep.mubr.bf16.mxu0 %v11406_v28 }
 0x871   :  { %6277 = vmatmul.mubr.bf16.gmra.mrb[16].mxu1 %v11368_v36  ;;  %v13164_v36 = vstv %s9930_s20 }
 0x872   :  { %6284 = vmatprep.mubr.bf16.mxu1 %v11373_v22 }
 0x879   :  { %6285 = vmatmul.mubr.bf16.gmra.mrb[20].mxu1 %v11371_v60 }
 0x87a   :  { %6292 = vmatprep.mubr.bf16.mxu1 %v11376_v59 }
 0x881   :  { %6293 = vmatmul.mubr.bf16.gmra.mrb[24].mxu1 %v11374_v32  ;;  %v11389_v32 = vld [vmem:[#allocation8 + $0x368] ss:$16 sps:$4 sm:$0xff]  }
 0x882   :  { %6300 = vmatprep.mubr.bf16.mxu1 %v11379_v41 }
 0x889   :  { %6301 = vmatmul.mubr.bf16.gmra.mrb[28].mxu1 %v11377_v57  ;;  %v11394_v57 = vld [vmem:[#allocation8 + $0x38c] ss:$16 sps:$4 sm:$0xff]  }
 0x88a   :  { %6308 = vmatprep.mubr.bf16.mxu1 %v11382_v7 }
 0x891   :  { %6309 = vmatmul.mubr.bf16.gmra.mrb[32].mxu1 %v11380_v39 }
 0x892   :  { %6316 = vmatprep.mubr.bf16.mxu1 %v11385_v45 }
 0x899   :  { %6317 = vmatmul.mubr.bf16.gmra.mrb[36].mxu1 %v11383_v6 }
 0x89a   :  { %6324 = vmatprep.mubr.bf16.mxu1 %v11388_v43 }
 0x8a1   :  { %6325 = vmatmul.mubr.bf16.gmra.mrb[40].mxu1 %v11386_v21 }
 0x8a2   :  { %6332 = vmatprep.mubr.bf16.mxu1 %v11391_v20 }
 0x8a4   :  { %v6118_v22 = vpop.f32.mrb[192].mxu1 }
 0x8a5   :  { %v6439_v60 = vmul.f32 %v13164_v36, %v6118_v22  ;;  %v6120_v59 = vpop.f32.mrb[193].mxu1 }
 0x8a6   :  { %v6121_v41 = vpop.f32.mrb[194].mxu1  ;;  %v11392_v59 = vld [vmem:[#allocation8 + $0x388] ss:$16 sps:$4 sm:$0xff]  }
 0x8a7   :  { %v13168_v7 = vadd.f32 %v6439_v60, %v12879_v8  ;;  %v6440_v39 = vmul.f32 %v13164_v36, %v6121_v41  ;;  %v6887_v45 = vpack.c.bf16 %v6121_v41, %v6118_v22  ;;  %v6123_v6 = vpop.f32.mrb[195].mxu1  ;;  %v11397_v8 = vld [vmem:[#allocation8 + $0x3ac] ss:$16 sps:$4 sm:$0xff]  }
 0x8a8   :  { %v11395_v6 = vld [vmem:[#allocation8 + $0x3a8] ss:$16 sps:$4 sm:$0xff]  }
 0x8a9   :  { %v13172_v43 = vadd.f32 %v6440_v39, %v12883_v31  ;;  %6333 = vmatmul.mubr.bf16.gmra.mrb[44].mxu1 %v11389_v32  ;;  %7560 = vmatpush1.bf16.msra.mxu0 %v6887_v45 }
 0x8aa   :  { %6340 = vmatprep.mubr.bf16.mxu1 %v11394_v57  ;;  %7561 = vmatprep.subr.bf16.mxu0 %v14557_v19 }
 0x8ac   :  { %v6126_v21 = vpop.f32.mrb[196].mxu1 }
 0x8ad   :  { %v6441_v20 = vmul.f32 %v13164_v36, %v6126_v21  ;;  %v6128_v28 = vpop.f32.mrb[197].mxu1 }
 0x8ae   :  { %v6129_v54 = vpop.f32.mrb[198].mxu1 }
 0x8af   :  { %v13177_v60 = vadd.f32 %v6441_v20, %v12888_v23  ;;  %v6442_v22 = vmul.f32 %v13164_v36, %v6129_v54  ;;  %v6888_v41 = vpack.c.bf16 %v6129_v54, %v6126_v21  ;;  %v6131_v31 = vpop.f32.mrb[199].mxu1  ;;  %v11400_v23 = vld [vmem:[#allocation8 + $0x3cc] ss:$16 sps:$4 sm:$0xff]  }
 0x8b0   :  { %v11398_v31 = vld [vmem:[#allocation8 + $0x3c8] ss:$16 sps:$4 sm:$0xff]  }
 0x8b1   :  { %v13181_v32 = vadd.f32 %v6442_v22, %v12892_v56  ;;  %6341 = vmatmul.mubr.bf16.gmra.mrb[48].mxu1 %v11392_v59  ;;  %7562 = vmatpush1.bf16.msra.mxu0 %v6888_v41 }
 0x8b2   :  { %6348 = vmatprep.mubr.bf16.mxu1 %v11397_v8  ;;  %7563 = vmatprep.subr.bf16.mxu0 %v14557_v19 }
 0x8b4   :  { %v6134_v57 = vpop.f32.mrb[200].mxu1 }
 0x8b5   :  { %v6443_v39 = vmul.f32 %v13164_v36, %v6134_v57  ;;  %v6136_v45 = vpop.f32.mrb[201].mxu1 }
 0x8b6   :  { %v6137_v28 = vpop.f32.mrb[202].mxu1 }
 0x8b7   :  { %v13186_v20 = vadd.f32 %v6443_v39, %v12897_v50  ;;  %v6444_v54 = vmul.f32 %v13164_v36, %v6137_v28  ;;  %v6889_v21 = vpack.c.bf16 %v6137_v28, %v6134_v57  ;;  %v6139_v56 = vpop.f32.mrb[203].mxu1  ;;  %v11403_v50 = vld [vmem:[#allocation8 + $0x3ec] ss:$16 sps:$4 sm:$0xff]  }
 0x8b8   :  { %v11401_v56 = vld [vmem:[#allocation8 + $0x3e8] ss:$16 sps:$4 sm:$0xff]  }
 0x8b9   :  { %v13190_v59 = vadd.f32 %v6444_v54, %v12901_v44  ;;  %6349 = vmatmul.mubr.bf16.gmra.mrb[52].mxu1 %v11395_v6  ;;  %7564 = vmatpush1.bf16.msra.mxu0 %v6889_v21 }
 0x8ba   :  { %6356 = vmatprep.mubr.bf16.mxu1 %v11400_v23  ;;  %7565 = vmatprep.subr.bf16.mxu0 %v14557_v19 }
 0x8bc   :  { %v6142_v8 = vpop.f32.mrb[204].mxu1 }
 0x8bd   :  { %v6445_v22 = vmul.f32 %v13164_v36, %v6142_v8  ;;  %v6144_v41 = vpop.f32.mrb[205].mxu1 }
 0x8be   :  { %v6145_v45 = vpop.f32.mrb[206].mxu1 }
 0x8bf   :  { %v13195_v39 = vadd.f32 %v6445_v22, %v12906_v24  ;;  %v6446_v57 = vmul.f32 %v13164_v36, %v6145_v45  ;;  %v6890_v28 = vpack.c.bf16 %v6145_v45, %v6142_v8  ;;  %v6147_v44 = vpop.f32.mrb[207].mxu1 }
 0x8c1   :  { %v13199_v6 = vadd.f32 %v6446_v57, %v12910_v55  ;;  %6357 = vmatmul.mubr.bf16.gmra.mrb[56].mxu1 %v11398_v31  ;;  %7566 = vmatpush1.bf16.msra.mxu0 %v6890_v28 }
 0x8c2   :  { %6364 = vmatprep.mubr.bf16.mxu1 %v11403_v50  ;;  %7567 = vmatprep.subr.bf16.mxu0 %v14557_v19 }
 0x8c4   :  { %v6150_v23 = vpop.f32.mrb[208].mxu1 }
 0x8c5   :  { %v6447_v54 = vmul.f32 %v13164_v36, %v6150_v23  ;;  %v6152_v21 = vpop.f32.mrb[209].mxu1 }
 0x8c6   :  { %v6153_v41 = vpop.f32.mrb[210].mxu1 }
 0x8c7   :  { %v13204_v24 = vadd.f32 %v6447_v54, %v12915_v34  ;;  %v6448_v8 = vmul.f32 %v13164_v36, %v6153_v41  ;;  %v6891_v22 = vpack.c.bf16 %v6153_v41, %v6150_v23  ;;  %v6155_v45 = vpop.f32.mrb[211].mxu1 }
 0x8c9   :  { %v13208_v55 = vadd.f32 %v6448_v8, %v12919_v52  ;;  %6365 = vmatmul.mubr.bf16.gmra.mrb[60].mxu1 %v11401_v56  ;;  %7568 = vmatpush1.bf16.msra.mxu0 %v6891_v22 }
 0x8ca   :  { %7569 = vmatprep.subr.bf16.mxu0 %v14557_v19 }
 0x8cc   :  { %v6158_v31 = vpop.f32.mrb[212].mxu1 }
 0x8cd   :  { %v6449_v50 = vmul.f32 %v13164_v36, %v6158_v31  ;;  %v6160_v57 = vpop.f32.mrb[213].mxu1 }
 0x8ce   :  { %v6161_v28 = vpop.f32.mrb[214].mxu1 }
 0x8cf   :  { %v13213_v44 = vadd.f32 %v6449_v50, %v12924_v46  ;;  %v6450_v34 = vmul.f32 %v13164_v36, %v6161_v28  ;;  %v6892_v54 = vpack.c.bf16 %v6161_v28, %v6158_v31  ;;  %v6163_v23 = vpop.f32.mrb[215].mxu1 }
 0x8d1   :  { %v13217_v21 = vadd.f32 %v6450_v34, %v12928_v11  ;;  %7570 = vmatpush1.bf16.msra.mxu0 %v6892_v54 }
 0x8d2   :  { %7571 = vmatprep.subr.bf16.mxu0 %v14557_v19 }
 0x8d4   :  { %v6166_v52 = vpop.f32.mrb[216].mxu1 }
 0x8d5   :  { %v6451_v56 = vmul.f32 %v13164_v36, %v6166_v52  ;;  %v6168_v41 = vpop.f32.mrb[217].mxu1 }
 0x8d6   :  { %v6169_v8 = vpop.f32.mrb[218].mxu1 }
 0x8d7   :  { %v13222_v22 = vadd.f32 %v6451_v56, %v12933_v15  ;;  %v6452_v46 = vmul.f32 %v13164_v36, %v6169_v8  ;;  %v6893_v45 = vpack.c.bf16 %v6169_v8, %v6166_v52  ;;  %v6171_v50 = vpop.f32.mrb[219].mxu1 }
 0x8d9   :  { %v13226_v31 = vadd.f32 %v6452_v46, %v12937_v14  ;;  %7572 = vmatpush1.bf16.msra.mxu0 %v6893_v45 }
 0x8da   :  { %7573 = vmatprep.subr.bf16.mxu0 %v14557_v19 }
 0x8dc   :  { %v6174_v11 = vpop.f32.mrb[220].mxu1 }
 0x8dd   :  { %v6453_v57 = vmul.f32 %v13164_v36, %v6174_v11  ;;  %v6176_v28 = vpop.f32.mrb[221].mxu1 }
 0x8de   :  { %v6177_v34 = vpop.f32.mrb[222].mxu1 }
 0x8df   :  { %v13231_v54 = vadd.f32 %v6453_v57, %v12942_v63  ;;  %v6454_v15 = vmul.f32 %v13164_v36, %v6177_v34  ;;  %v6894_v23 = vpack.c.bf16 %v6177_v34, %v6174_v11  ;;  %v6179_v56 = vpop.f32.mrb[223].mxu1 }
 0x8e1   :  { %v13235_v52 = vadd.f32 %v6454_v15, %v12946_v53  ;;  %7574 = vmatpush1.bf16.msra.mxu0 %v6894_v23 }
 0x8e2   :  { %7575 = vmatprep.subr.bf16.mxu0 %v14557_v19 }
 0x8e4   :  { %v6182_v14 = vpop.f32.mrb[224].mxu1 }
 0x8e5   :  { %v6455_v41 = vmul.f32 %v13164_v36, %v6182_v14  ;;  %v6184_v8 = vpop.f32.mrb[225].mxu1 }
 0x8e6   :  { %v6185_v46 = vpop.f32.mrb[226].mxu1 }
 0x8e7   :  { %v13240_v45 = vadd.f32 %v6455_v41, %v12951_v9  ;;  %v6456_v63 = vmul.f32 %v13164_v36, %v6185_v46  ;;  %v6895_v50 = vpack.c.bf16 %v6185_v46, %v6182_v14  ;;  %v6187_v57 = vpop.f32.mrb[227].mxu1 }
 0x8e9   :  { %v13244_v11 = vadd.f32 %v6456_v63, %v12955_v1  ;;  %7576 = vmatpush1.bf16.msra.mxu0 %v6895_v50 }
 0x8ea   :  { %7577 = vmatprep.subr.bf16.mxu0 %v14557_v19 }
 0x8ec   :  { %v6190_v53 = vpop.f32.mrb[228].mxu1 }
 0x8ed   :  { %v6457_v28 = vmul.f32 %v13164_v36, %v6190_v53  ;;  %v6192_v34 = vpop.f32.mrb[229].mxu1 }
 0x8ee   :  { %v6193_v15 = vpop.f32.mrb[230].mxu1 }
 0x8ef   :  { %v13249_v23 = vadd.f32 %v6457_v28, %v12960_v18  ;;  %v6458_v9 = vmul.f32 %v13164_v36, %v6193_v15  ;;  %v6896_v56 = vpack.c.bf16 %v6193_v15, %v6190_v53  ;;  %v6195_v41 = vpop.f32.mrb[231].mxu1 }
 0x8f1   :  { %v13253_v14 = vadd.f32 %v6458_v9, %v12964_v17  ;;  %7578 = vmatpush1.bf16.msra.mxu0 %v6896_v56 }
 0x8f2   :  { %7579 = vmatprep.subr.bf16.mxu0 %v14557_v19 }
 0x8f4   :  { %v6198_v1 = vpop.f32.mrb[232].mxu1 }
 0x8f5   :  { %v6459_v8 = vmul.f32 %v13164_v36, %v6198_v1  ;;  %v6200_v46 = vpop.f32.mrb[233].mxu1 }
 0x8f6   :  { %v6201_v63 = vpop.f32.mrb[234].mxu1 }
 0x8f7   :  { %v13258_v50 = vadd.f32 %v6459_v8, %v12969_v12  ;;  %v6460_v18 = vmul.f32 %v13164_v36, %v6201_v63  ;;  %v6897_v57 = vpack.c.bf16 %v6201_v63, %v6198_v1  ;;  %v6203_v28 = vpop.f32.mrb[235].mxu1 }
 0x8f9   :  { %v13262_v53 = vadd.f32 %v6460_v18, %v12973_v13  ;;  %7580 = vmatpush1.bf16.msra.mxu0 %v6897_v57 }
 0x8fa   :  { %7581 = vmatprep.subr.bf16.mxu0 %v14557_v19 }
 0x8fc   :  { %v6206_v17 = vpop.f32.mrb[236].mxu1 }
 0x8fd   :  { %v6461_v34 = vmul.f32 %v13164_v36, %v6206_v17  ;;  %v6208_v15 = vpop.f32.mrb[237].mxu1 }
 0x8fe   :  { %v6209_v9 = vpop.f32.mrb[238].mxu1 }
 0x8ff   :  { %v13267_v56 = vadd.f32 %v6461_v34, %v12978_v62  ;;  %v6462_v12 = vmul.f32 %v13164_v36, %v6209_v9  ;;  %v6898_v41 = vpack.c.bf16 %v6209_v9, %v6206_v17  ;;  %v6211_v8 = vpop.f32.mrb[239].mxu1 }
 0x901   :  { %v13271_v1 = vadd.f32 %v6462_v12, %v12982_v26  ;;  %7582 = vmatpush1.bf16.msra.mxu0 %v6898_v41 }
 0x902   :  { %7583 = vmatprep.subr.bf16.mxu0 %v14557_v19 }
 0x904   :  { %v6214_v13 = vpop.f32.mrb[240].mxu1 }
 0x905   :  { %v6463_v46 = vmul.f32 %v13164_v36, %v6214_v13  ;;  %v6216_v63 = vpop.f32.mrb[241].mxu1 }
 0x906   :  { %v6217_v18 = vpop.f32.mrb[242].mxu1 }
 0x907   :  { %v13276_v57 = vadd.f32 %v6463_v46, %v12987_v16  ;;  %v6464_v62 = vmul.f32 %v13164_v36, %v6217_v18  ;;  %v6899_v28 = vpack.c.bf16 %v6217_v18, %v6214_v13  ;;  %v6219_v34 = vpop.f32.mrb[243].mxu1 }
 0x909   :  { %v13280_v17 = vadd.f32 %v6464_v62, %v12991_v40  ;;  %7584 = vmatpush1.bf16.msra.mxu0 %v6899_v28 }
 0x90a   :  { %7585 = vmatprep.subr.bf16.mxu0 %v14557_v19 }
 0x90c   :  { %v6222_v26 = vpop.f32.mrb[244].mxu1 }
 0x90d   :  { %v6465_v15 = vmul.f32 %v13164_v36, %v6222_v26  ;;  %v6224_v9 = vpop.f32.mrb[245].mxu1 }
 0x90e   :  { %v6225_v12 = vpop.f32.mrb[246].mxu1 }
 0x90f   :  { %v13285_v41 = vadd.f32 %v6465_v15, %v12996_v49  ;;  %v6466_v16 = vmul.f32 %v13164_v36, %v6225_v12  ;;  %v6900_v8 = vpack.c.bf16 %v6225_v12, %v6222_v26  ;;  %v6227_v46 = vpop.f32.mrb[247].mxu1 }
 0x911   :  { %v13289_v13 = vadd.f32 %v6466_v16, %v13000_v27  ;;  %7586 = vmatpush1.bf16.msra.mxu0 %v6900_v8 }
 0x912   :  { %7587 = vmatprep.subr.bf16.mxu0 %v14557_v19 }
 0x914   :  { %v6230_v40 = vpop.f32.mrb[248].mxu1 }
 0x915   :  { %v6467_v63 = vmul.f32 %v13164_v36, %v6230_v40  ;;  %v6232_v18 = vpop.f32.mrb[249].mxu1 }
 0x916   :  { %v6233_v62 = vpop.f32.mrb[250].mxu1 }
 0x917   :  { %v13294_v28 = vadd.f32 %v6467_v63, %v13005_v2  ;;  %v6468_v49 = vmul.f32 %v13164_v36, %v6233_v62  ;;  %v6901_v34 = vpack.c.bf16 %v6233_v62, %v6230_v40  ;;  %v6235_v15 = vpop.f32.mrb[251].mxu1  ;;  %v11404_v40 = vld [vmem:[#allocation8] ss:$16 sps:$4 sm:$0xff]  }
 0x919   :  { %v13298_v26 = vadd.f32 %v6468_v49, %v13009_v3  ;;  %7588 = vmatpush1.bf16.msra.mxu0 %v6901_v34  ;;  %v11407_v3 = vld [vmem:[#allocation8 + $0x24] ss:$16 sps:$4 sm:$0xff]  }
 0x91a   :  { %7589 = vmatprep.subr.bf16.mxu0 %v14557_v19 }
 0x91c   :  { %v6238_v27 = vpop.f32.mrb[252].mxu1 }
 0x91d   :  { %v6469_v9 = vmul.f32 %v13164_v36, %v6238_v27  ;;  %v6240_v12 = vpop.f32.mrb[253].mxu1 }
 0x91e   :  { %v6241_v16 = vpop.f32.mrb[254].mxu1 }
 0x91f   :  { %v13303_v8 = vadd.f32 %v6469_v9, %v13014_v25  ;;  %v6470_v2 = vmul.f32 %v13164_v36, %v6241_v16  ;;  %v6902_v46 = vpack.c.bf16 %v6241_v16, %v6238_v27  ;;  %v6243_v63 = vpop.f32.mrb[255].mxu1 }
 0x921   :  { %v13307_v18 = vadd.f32 %v6470_v2, %v13018_v29  ;;  %7590 = vmatpush1.bf16.msra.mxu0 %v6902_v46  ;;  %v11409_v29 = vld [vmem:[#allocation8 + $0x20] ss:$16 sps:$4 sm:$0xff]   ;;  %v11410_v2 = vld [vmem:[#allocation8 + $0x44] ss:$16 sps:$4 sm:$0xff]  }
 0x922   :  { %7848 = vmatprep.subr.bf16.mxu0 %v14557_v19 }
 0x924   :  { %v6246_v62 = vpop.f32.mrb[0].mxu1  ;;  %7592 = vmatmul.mubr.bf16.vlgmr.msra.gmra.mrb[192].mxu0 %v11404_v40 }
 0x925   :  { %v6471_v49 = vmul.f32 %v13164_v36, %v6246_v62  ;;  %v6248_v34 = vpop.f32.mrb[1].mxu1  ;;  %7599 = vmatprep.mubr.bf16.mxu0 %v11407_v3 }
 0x926   :  { %v6249_v25 = vpop.f32.mrb[2].mxu1 }
 0x927   :  { %v13312_v15 = vadd.f32 %v6471_v49, %v13023_v30  ;;  %v6472_v27 = vmul.f32 %v13164_v36, %v6249_v25  ;;  %v6903_v9 = vpack.c.bf16 %v6249_v25, %v6246_v62  ;;  %v6251_v12 = vpop.f32.mrb[3].mxu1 }
 0x929   :  { %v13316_v16 = vadd.f32 %v6472_v27, %v13027_v51  ;;  %7849 = vmatpush1.bf16.msra.mxu0 %v6903_v9  ;;  %v11412_v51 = vld [vmem:[#allocation8 + $0x40] ss:$16 sps:$4 sm:$0xff]   ;;  %v11413_v27 = vld [vmem:[#allocation8 + $0x64] ss:$16 sps:$4 sm:$0xff]  }
 0x92a   :  { %7850 = vmatprep.subr.bf16.mxu0 %v14557_v19 }
 0x92c   :  { %v6254_v46 = vpop.f32.mrb[4].mxu1  ;;  %7600 = vmatmul.mubr.bf16.gmra.mrb[196].mxu0 %v11409_v29 }
 0x92d   :  { %v6473_v63 = vmul.f32 %v13164_v36, %v6254_v46  ;;  %v6256_v40 = vpop.f32.mrb[5].mxu1  ;;  %7607 = vmatprep.mubr.bf16.mxu0 %v11410_v2 }
 0x92e   :  { %v6257_v30 = vpop.f32.mrb[6].mxu1 }
 0x92f   :  { %v13321_v3 = vadd.f32 %v6473_v63, %v13032_v38  ;;  %v6474_v62 = vmul.f32 %v13164_v36, %v6257_v30  ;;  %v6904_v49 = vpack.c.bf16 %v6257_v30, %v6254_v46  ;;  %v6259_v34 = vpop.f32.mrb[7].mxu1 }
 0x931   :  { %v13325_v25 = vadd.f32 %v6474_v62, %v13036_v58  ;;  %7851 = vmatpush1.bf16.msra.mxu0 %v6904_v49  ;;  %v11415_v58 = vld [vmem:[#allocation8 + $0x60] ss:$16 sps:$4 sm:$0xff]   ;;  %v11416_v62 = vld [vmem:[#allocation8 + $0x84] ss:$16 sps:$4 sm:$0xff]  }
 0x932   :  { %7852 = vmatprep.subr.bf16.mxu0 %v14557_v19 }
 0x934   :  { %v6262_v9 = vpop.f32.mrb[8].mxu1  ;;  %7608 = vmatmul.mubr.bf16.gmra.mrb[200].mxu0 %v11412_v51 }
 0x935   :  { %v6475_v12 = vmul.f32 %v13164_v36, %v6262_v9  ;;  %v6264_v29 = vpop.f32.mrb[9].mxu1  ;;  %7615 = vmatprep.mubr.bf16.mxu0 %v11413_v27 }
 0x936   :  { %v6265_v38 = vpop.f32.mrb[10].mxu1 }
 0x937   :  { %v13330_v2 = vadd.f32 %v6475_v12, %v13041_v61  ;;  %v6476_v46 = vmul.f32 %v13164_v36, %v6265_v38  ;;  %v6905_v63 = vpack.c.bf16 %v6265_v38, %v6262_v9  ;;  %v6267_v40 = vpop.f32.mrb[11].mxu1 }
 0x939   :  { %v13334_v30 = vadd.f32 %v6476_v46, %v13045_v35  ;;  %7853 = vmatpush1.bf16.msra.mxu0 %v6905_v63  ;;  %v11418_v35 = vld [vmem:[#allocation8 + $0x80] ss:$16 sps:$4 sm:$0xff]   ;;  %v11419_v46 = vld [vmem:[#allocation8 + $0xa4] ss:$16 sps:$4 sm:$0xff]  }
 0x93a   :  { %7854 = vmatprep.subr.bf16.mxu0 %v14557_v19 }
 0x93c   :  { %v6270_v49 = vpop.f32.mrb[12].mxu1  ;;  %7616 = vmatmul.mubr.bf16.gmra.mrb[204].mxu0 %v11415_v58 }
 0x93d   :  { %v6477_v34 = vmul.f32 %v13164_v36, %v6270_v49  ;;  %v6272_v51 = vpop.f32.mrb[13].mxu1  ;;  %7623 = vmatprep.mubr.bf16.mxu0 %v11416_v62 }
 0x93e   :  { %v6273_v61 = vpop.f32.mrb[14].mxu1 }
 0x93f   :  { %v13339_v27 = vadd.f32 %v6477_v34, %v13050_v0  ;;  %v6478_v9 = vmul.f32 %v13164_v36, %v6273_v61  ;;  %v6906_v12 = vpack.c.bf16 %v6273_v61, %v6270_v49  ;;  %v6275_v29 = vpop.f32.mrb[15].mxu1 }
 0x941   :  { %v13343_v38 = vadd.f32 %v6478_v9, %v13054_v47  ;;  %7855 = vmatpush1.bf16.msra.mxu0 %v6906_v12  ;;  %v11421_v47 = vld [vmem:[#allocation8 + $0xa0] ss:$16 sps:$4 sm:$0xff]   ;;  %v11422_v9 = vld [vmem:[#allocation8 + $0xc4] ss:$16 sps:$4 sm:$0xff]  }
 0x942   :  { %7856 = vmatprep.subr.bf16.mxu0 %v14557_v19 }
 0x944   :  { %v6278_v63 = vpop.f32.mrb[16].mxu1  ;;  %7624 = vmatmul.mubr.bf16.gmra.mrb[208].mxu0 %v11418_v35 }
 0x945   :  { %v6479_v40 = vmul.f32 %v13164_v36, %v6278_v63  ;;  %v6280_v58 = vpop.f32.mrb[17].mxu1  ;;  %7631 = vmatprep.mubr.bf16.mxu0 %v11419_v46 }
 0x946   :  { %v6281_v0 = vpop.f32.mrb[18].mxu1 }
 0x947   :  { %v13348_v62 = vadd.f32 %v6479_v40, %v13059_v37  ;;  %v6480_v49 = vmul.f32 %v13164_v36, %v6281_v0  ;;  %v6907_v34 = vpack.c.bf16 %v6281_v0, %v6278_v63  ;;  %v6283_v51 = vpop.f32.mrb[19].mxu1 }
 0x949   :  { %v13352_v61 = vadd.f32 %v6480_v49, %v13063_v5  ;;  %7857 = vmatpush1.bf16.msra.mxu0 %v6907_v34  ;;  %v11424_v5 = vld [vmem:[#allocation8 + $0xc0] ss:$16 sps:$4 sm:$0xff]   ;;  %v11425_v49 = vld [vmem:[#allocation8 + $0xe4] ss:$16 sps:$4 sm:$0xff]  }
 0x94a   :  { %7858 = vmatprep.subr.bf16.mxu0 %v14557_v19 }
 0x94c   :  { %v6286_v12 = vpop.f32.mrb[20].mxu1  ;;  %7632 = vmatmul.mubr.bf16.gmra.mrb[212].mxu0 %v11421_v47 }
 0x94d   :  { %v6481_v29 = vmul.f32 %v13164_v36, %v6286_v12  ;;  %v6288_v35 = vpop.f32.mrb[21].mxu1  ;;  %7639 = vmatprep.mubr.bf16.mxu0 %v11422_v9 }
 0x94e   :  { %v6289_v37 = vpop.f32.mrb[22].mxu1 }
 0x94f   :  { %v13357_v46 = vadd.f32 %v6481_v29, %v13068_v10  ;;  %v6482_v63 = vmul.f32 %v13164_v36, %v6289_v37  ;;  %v6908_v40 = vpack.c.bf16 %v6289_v37, %v6286_v12  ;;  %v6291_v58 = vpop.f32.mrb[23].mxu1 }
 0x951   :  { %v13361_v0 = vadd.f32 %v6482_v63, %v13072_v4  ;;  %7859 = vmatpush1.bf16.msra.mxu0 %v6908_v40  ;;  %v11427_v4 = vld [vmem:[#allocation8 + $0xe0] ss:$16 sps:$4 sm:$0xff]   ;;  %v11428_v63 = vld [vmem:[#allocation8 + $0x104] ss:$16 sps:$4 sm:$0xff]  }
 0x952   :  { %7860 = vmatprep.subr.bf16.mxu0 %v14557_v19 }
 0x954   :  { %v6294_v34 = vpop.f32.mrb[24].mxu1  ;;  %7640 = vmatmul.mubr.bf16.gmra.mrb[216].mxu0 %v11424_v5 }
 0x955   :  { %v6483_v51 = vmul.f32 %v13164_v36, %v6294_v34  ;;  %v6296_v47 = vpop.f32.mrb[25].mxu1  ;;  %7647 = vmatprep.mubr.bf16.mxu0 %v11425_v49  ;;  %v14628_v49 = vld [vmem:[#allocation29_spill] sm:$0xff] }
 0x956   :  { %v6297_v10 = vpop.f32.mrb[26].mxu1 }
 0x957   :  { %v13366_v9 = vadd.f32 %v6483_v51, %v13077_v42  ;;  %v6484_v12 = vmul.f32 %v13164_v36, %v6297_v10  ;;  %v6909_v29 = vpack.c.bf16 %v6297_v10, %v6294_v34  ;;  %v6299_v35 = vpop.f32.mrb[27].mxu1 }
 0x958   :  { %v11431_v35 = vld [vmem:[#allocation8 + $0x124] ss:$16 sps:$4 sm:$0xff]  }
 0x959   :  { %v13370_v37 = vadd.f32 %v6484_v12, %v13081_v33  ;;  %7861 = vmatpush1.bf16.msra.mxu0 %v6909_v29  ;;  %v11430_v33 = vld [vmem:[#allocation8 + $0x100] ss:$16 sps:$4 sm:$0xff]  }
 0x95a   :  { %7862 = vmatprep.subr.bf16.mxu0 %v14557_v19  ;;  %v14630_v12 = vld [vmem:[#allocation31_spill] sm:$0xff] }
 0x95c   :  { %v6302_v40 = vpop.f32.mrb[28].mxu1  ;;  %7648 = vmatmul.mubr.bf16.gmra.mrb[220].mxu0 %v11427_v4 }
 0x95d   :  { %v6485_v58 = vmul.f32 %v13164_v36, %v6302_v40  ;;  %v6304_v5 = vpop.f32.mrb[29].mxu1  ;;  %7655 = vmatprep.mubr.bf16.mxu0 %v11428_v63 }
 0x95e   :  { %v6305_v42 = vpop.f32.mrb[30].mxu1 }
 0x95f   :  { %v13375_v51 = vadd.f32 %v6485_v58, %v14628_v49  ;;  %v6486_v34 = vmul.f32 %v13164_v36, %v6305_v42  ;;  %v6910_v47 = vpack.c.bf16 %v6305_v42, %v6302_v40  ;;  %v6307_v10 = vpop.f32.mrb[31].mxu1  ;;  %v14632_v49 = vld [vmem:[#allocation13_spill] sm:$0xff] }
 0x961   :  { %14629 = vst [vmem:[#allocation30_spill] sm:$0xff] %v13375_v51  ;;  %v13379_v29 = vadd.f32 %v6486_v34, %v14630_v12  ;;  %7863 = vmatpush1.bf16.msra.mxu0 %v6910_v47  ;;  %v11433_v34 = vld [vmem:[#allocation8 + $0x120] ss:$16 sps:$4 sm:$0xff]   ;;  %v14634_v12 = vld [vmem:[#allocation14_spill] sm:$0xff] }
 0x962   :  { %7864 = vmatprep.subr.bf16.mxu0 %v14557_v19 }
 0x963   :  { %14631 = vst [vmem:[#allocation28_spill] sm:$0xff] %v13379_v29  ;;  %v11434_v29 = vld [vmem:[#allocation8 + $0x144] ss:$16 sps:$4 sm:$0xff]  }
 0x964   :  { %v6310_v4 = vpop.f32.mrb[32].mxu1  ;;  %7656 = vmatmul.mubr.bf16.gmra.mrb[224].mxu0 %v11430_v33 }
 0x965   :  { %v6487_v63 = vmul.f32 %v13164_v36, %v6310_v4  ;;  %v6312_v5 = vpop.f32.mrb[33].mxu1  ;;  %7663 = vmatprep.mubr.bf16.mxu0 %v11431_v35 }
 0x966   :  { %v6313_v58 = vpop.f32.mrb[34].mxu1 }
 0x967   :  { %v13384_v51 = vadd.f32 %v6487_v63, %v14632_v49  ;;  %v6488_v40 = vmul.f32 %v13164_v36, %v6313_v58  ;;  %v6911_v42 = vpack.c.bf16 %v6313_v58, %v6310_v4  ;;  %v6315_v10 = vpop.f32.mrb[35].mxu1  ;;  %v14636_v49 = vld [vmem:[#allocation15_spill] sm:$0xff] }
 0x969   :  { %14633 = vst [vmem:[#allocation29_spill] sm:$0xff] %v13384_v51  ;;  %v13388_v47 = vadd.f32 %v6488_v40, %v14634_v12  ;;  %7865 = vmatpush1.bf16.msra.mxu0 %v6911_v42  ;;  %v11436_v40 = vld [vmem:[#allocation8 + $0x140] ss:$16 sps:$4 sm:$0xff]   ;;  %v14638_v12 = vld [vmem:[#allocation18_spill] sm:$0xff] }
 0x96a   :  { %7866 = vmatprep.subr.bf16.mxu0 %v14557_v19 }
 0x96b   :  { %14635 = vst [vmem:[#allocation31_spill] sm:$0xff] %v13388_v47  ;;  %v11437_v47 = vld [vmem:[#allocation8 + $0x164] ss:$16 sps:$4 sm:$0xff]  }
 0x96c   :  { %v6318_v33 = vpop.f32.mrb[36].mxu1  ;;  %7664 = vmatmul.mubr.bf16.gmra.mrb[228].mxu0 %v11433_v34 }
 0x96d   :  { %v6489_v35 = vmul.f32 %v13164_v36, %v6318_v33  ;;  %v6320_v5 = vpop.f32.mrb[37].mxu1  ;;  %7671 = vmatprep.mubr.bf16.mxu0 %v11434_v29 }
 0x96e   :  { %v6321_v63 = vpop.f32.mrb[38].mxu1 }
 0x96f   :  { %v13393_v51 = vadd.f32 %v6489_v35, %v14636_v49  ;;  %v6490_v4 = vmul.f32 %v13164_v36, %v6321_v63  ;;  %v6912_v58 = vpack.c.bf16 %v6321_v63, %v6318_v33  ;;  %v6323_v10 = vpop.f32.mrb[39].mxu1  ;;  %v14640_v49 = vld [vmem:[#allocation16_spill] sm:$0xff] }
 0x971   :  { %14637 = vst [vmem:[#allocation13_spill] sm:$0xff] %v13393_v51  ;;  %v13397_v42 = vadd.f32 %v6490_v4, %v14638_v12  ;;  %7867 = vmatpush1.bf16.msra.mxu0 %v6912_v58  ;;  %v11439_v4 = vld [vmem:[#allocation8 + $0x160] ss:$16 sps:$4 sm:$0xff]  }
 0x972   :  { %7868 = vmatprep.subr.bf16.mxu0 %v14557_v19  ;;  %v14642_v12 = vld [vmem:[#allocation17_spill] sm:$0xff] }
 0x973   :  { %14639 = vst [vmem:[#allocation14_spill] sm:$0xff] %v13397_v42  ;;  %v11440_v42 = vld [vmem:[#allocation8 + $0x184] ss:$16 sps:$4 sm:$0xff]  }
 0x974   :  { %v6326_v34 = vpop.f32.mrb[40].mxu1  ;;  %7672 = vmatmul.mubr.bf16.gmra.mrb[232].mxu0 %v11436_v40 }
 0x975   :  { %v6491_v29 = vmul.f32 %v13164_v36, %v6326_v34  ;;  %v6328_v5 = vpop.f32.mrb[41].mxu1  ;;  %7679 = vmatprep.mubr.bf16.mxu0 %v11437_v47 }
 0x976   :  { %v6329_v35 = vpop.f32.mrb[42].mxu1 }
 0x977   :  { %v13402_v51 = vadd.f32 %v6491_v29, %v14640_v49  ;;  %v6492_v33 = vmul.f32 %v13164_v36, %v6329_v35  ;;  %v6913_v63 = vpack.c.bf16 %v6329_v35, %v6326_v34  ;;  %v6331_v10 = vpop.f32.mrb[43].mxu1  ;;  %v14644_v49 = vld [vmem:[#allocation19_spill] sm:$0xff] }
 0x979   :  { %14641 = vst [vmem:[#allocation15_spill] sm:$0xff] %v13402_v51  ;;  %v13406_v58 = vadd.f32 %v6492_v33, %v14642_v12  ;;  %7869 = vmatpush1.bf16.msra.mxu0 %v6913_v63  ;;  %v11442_v33 = vld [vmem:[#allocation8 + $0x180] ss:$16 sps:$4 sm:$0xff]   ;;  %v14646_v12 = vld [vmem:[#allocation22_spill] sm:$0xff] }
 0x97a   :  { %7870 = vmatprep.subr.bf16.mxu0 %v14557_v19 }
 0x97b   :  { %14643 = vst [vmem:[#allocation18_spill] sm:$0xff] %v13406_v58  ;;  %v11443_v58 = vld [vmem:[#allocation8 + $0x1a4] ss:$16 sps:$4 sm:$0xff]  }
 0x97c   :  { %v6334_v40 = vpop.f32.mrb[44].mxu1  ;;  %7680 = vmatmul.mubr.bf16.gmra.mrb[236].mxu0 %v11439_v4 }
 0x97d   :  { %v6493_v47 = vmul.f32 %v13164_v36, %v6334_v40  ;;  %v6336_v5 = vpop.f32.mrb[45].mxu1  ;;  %7687 = vmatprep.mubr.bf16.mxu0 %v11440_v42 }
 0x97e   :  { %v6337_v29 = vpop.f32.mrb[46].mxu1 }
 0x97f   :  { %v13411_v51 = vadd.f32 %v6493_v47, %v14644_v49  ;;  %v6494_v34 = vmul.f32 %v13164_v36, %v6337_v29  ;;  %v6914_v35 = vpack.c.bf16 %v6337_v29, %v6334_v40  ;;  %v6339_v10 = vpop.f32.mrb[47].mxu1  ;;  %v14648_v49 = vld [vmem:[#allocation20_spill] sm:$0xff] }
 0x981   :  { %14645 = vst [vmem:[#allocation16_spill] sm:$0xff] %v13411_v51  ;;  %v13415_v63 = vadd.f32 %v6494_v34, %v14646_v12  ;;  %7871 = vmatpush1.bf16.msra.mxu0 %v6914_v35  ;;  %v11445_v34 = vld [vmem:[#allocation8 + $0x1a0] ss:$16 sps:$4 sm:$0xff]  }
 0x982   :  { %7872 = vmatprep.subr.bf16.mxu0 %v14557_v19  ;;  %v14650_v12 = vld [vmem:[#allocation21_spill] sm:$0xff] }
 0x983   :  { %14647 = vst [vmem:[#allocation17_spill] sm:$0xff] %v13415_v63  ;;  %v11446_v63 = vld [vmem:[#allocation8 + $0x1c4] ss:$16 sps:$4 sm:$0xff]  }
 0x984   :  { %v6342_v4 = vpop.f32.mrb[48].mxu1  ;;  %7688 = vmatmul.mubr.bf16.gmra.mrb[240].mxu0 %v11442_v33 }
 0x985   :  { %v6495_v42 = vmul.f32 %v13164_v36, %v6342_v4  ;;  %v6344_v5 = vpop.f32.mrb[49].mxu1  ;;  %7695 = vmatprep.mubr.bf16.mxu0 %v11443_v58 }
 0x986   :  { %v6345_v47 = vpop.f32.mrb[50].mxu1 }
 0x987   :  { %v13420_v51 = vadd.f32 %v6495_v42, %v14648_v49  ;;  %v6496_v40 = vmul.f32 %v13164_v36, %v6345_v47  ;;  %v6915_v29 = vpack.c.bf16 %v6345_v47, %v6342_v4  ;;  %v6347_v10 = vpop.f32.mrb[51].mxu1  ;;  %v14652_v49 = vld [vmem:[#allocation23_spill] sm:$0xff] }
 0x989   :  { %14649 = vst [vmem:[#allocation19_spill] sm:$0xff] %v13420_v51  ;;  %v13424_v35 = vadd.f32 %v6496_v40, %v14650_v12  ;;  %7873 = vmatpush1.bf16.msra.mxu0 %v6915_v29  ;;  %v11448_v40 = vld [vmem:[#allocation8 + $0x1c0] ss:$16 sps:$4 sm:$0xff]   ;;  %v14654_v12 = vld [vmem:[#allocation26_spill] sm:$0xff] }
 0x98a   :  { %7874 = vmatprep.subr.bf16.mxu0 %v14557_v19 }
 0x98b   :  { %14651 = vst [vmem:[#allocation22_spill] sm:$0xff] %v13424_v35  ;;  %v11449_v35 = vld [vmem:[#allocation8 + $0x1e4] ss:$16 sps:$4 sm:$0xff]  }
 0x98c   :  { %v6350_v33 = vpop.f32.mrb[52].mxu1  ;;  %7696 = vmatmul.mubr.bf16.gmra.mrb[244].mxu0 %v11445_v34 }
 0x98d   :  { %v6497_v58 = vmul.f32 %v13164_v36, %v6350_v33  ;;  %v6352_v5 = vpop.f32.mrb[53].mxu1  ;;  %7703 = vmatprep.mubr.bf16.mxu0 %v11446_v63 }
 0x98e   :  { %v6353_v42 = vpop.f32.mrb[54].mxu1 }
 0x98f   :  { %v13429_v51 = vadd.f32 %v6497_v58, %v14652_v49  ;;  %v6498_v4 = vmul.f32 %v13164_v36, %v6353_v42  ;;  %v6916_v47 = vpack.c.bf16 %v6353_v42, %v6350_v33  ;;  %v6355_v10 = vpop.f32.mrb[55].mxu1  ;;  %v14656_v49 = vld [vmem:[#allocation24_spill] sm:$0xff] }
 0x991   :  { %14653 = vst [vmem:[#allocation20_spill] sm:$0xff] %v13429_v51  ;;  %v13433_v29 = vadd.f32 %v6498_v4, %v14654_v12  ;;  %7875 = vmatpush1.bf16.msra.mxu0 %v6916_v47  ;;  %v11451_v4 = vld [vmem:[#allocation8 + $0x1e0] ss:$16 sps:$4 sm:$0xff]  }
 0x992   :  { %7876 = vmatprep.subr.bf16.mxu0 %v14557_v19  ;;  %v14657_v12 = vld [vmem:[#allocation25_spill] sm:$0xff] }
 0x993   :  { %14655 = vst [vmem:[#allocation21_spill] sm:$0xff] %v13433_v29  ;;  %v11454_v29 = vld [vmem:[#allocation8 + $0x204] ss:$16 sps:$4 sm:$0xff]  }
 0x994   :  { %v6358_v34 = vpop.f32.mrb[56].mxu1  ;;  %7704 = vmatmul.mubr.bf16.gmra.mrb[248].mxu0 %v11448_v40 }
 0x995   :  { %v6499_v63 = vmul.f32 %v13164_v36, %v6358_v34  ;;  %v6360_v5 = vpop.f32.mrb[57].mxu1  ;;  %7711 = vmatprep.mubr.bf16.mxu0 %v11449_v35 }
 0x996   :  { %v6361_v58 = vpop.f32.mrb[58].mxu1 }
 0x997   :  { %v13438_v51 = vadd.f32 %v6499_v63, %v14656_v49  ;;  %v6500_v33 = vmul.f32 %v13164_v36, %v6361_v58  ;;  %v6917_v42 = vpack.c.bf16 %v6361_v58, %v6358_v34  ;;  %v6363_v10 = vpop.f32.mrb[59].mxu1 }
 0x999   :  { %v13442_v47 = vadd.f32 %v6500_v33, %v14657_v12  ;;  %7877 = vmatpush1.bf16.msra.mxu0 %v6917_v42  ;;  %v11452_v33 = vld [vmem:[#allocation8 + $0x200] ss:$16 sps:$4 sm:$0xff]  }
 0x99a   :  { %7878 = vmatprep.subr.bf16.mxu0 %v14557_v19  ;;  %v14659_v12 = vld [vmem:[#allocation27_spill] sm:$0xff] }
 0x99b   :  { %14658 = vst [vmem:[#allocation23_spill] sm:$0xff] %v13442_v47  ;;  %v11457_v19 = vld [vmem:[#allocation8 + $0x224] ss:$16 sps:$4 sm:$0xff]  }
 0x99c   :  { %v6366_v40 = vpop.f32.mrb[60].mxu1  ;;  %7712 = vmatmul.mubr.bf16.gmra.mrb[252].mxu0 %v11451_v4  ;;  %v11455_v4 = vld [vmem:[#allocation8 + $0x220] ss:$16 sps:$4 sm:$0xff]   ;;  %v11460_v47 = vld [vmem:[#allocation8 + $0x244] ss:$16 sps:$4 sm:$0xff]  }
 0x99d   :  { %v6501_v35 = vmul.f32 %v13164_v36, %v6366_v40  ;;  %v6368_v5 = vpop.f32.mrb[61].mxu1  ;;  %7719 = vmatprep.mubr.bf16.mxu0 %v11454_v29  ;;  %v11458_v29 = vld [vmem:[#allocation8 + $0x240] ss:$16 sps:$4 sm:$0xff]  }
 0x99e   :  { %v6369_v63 = vpop.f32.mrb[62].mxu1  ;;  %v11463_v5 = vld [vmem:[#allocation8 + $0x264] ss:$16 sps:$4 sm:$0xff]  }
 0x99f   :  { %v13447_v49 = vadd.f32 %v6501_v35, %v13158_v48  ;;  %v6502_v34 = vmul.f32 %v13164_v36, %v6369_v63  ;;  %v6918_v58 = vpack.c.bf16 %v6369_v63, %v6366_v40  ;;  %v6371_v10 = vpop.f32.mrb[63].mxu1  ;;  %v11461_v48 = vld [vmem:[#allocation8 + $0x260] ss:$16 sps:$4 sm:$0xff]   ;;  %v11466_v36 = vld [vmem:[#allocation8 + $0x284] ss:$16 sps:$4 sm:$0xff]  }
 0x9a0   :  { %v11464_v40 = vld [vmem:[#allocation8 + $0x280] ss:$16 sps:$4 sm:$0xff]   ;;  %v11469_v35 = vld [vmem:[#allocation8 + $0x2a4] ss:$16 sps:$4 sm:$0xff]  }
 0x9a1   :  { %v13451_v42 = vadd.f32 %v6502_v34, %v14659_v12  ;;  %7879 = vmatpush1.bf16.msra.mxu0 %v6918_v58  ;;  %v11467_v63 = vld [vmem:[#allocation8 + $0x2a0] ss:$16 sps:$4 sm:$0xff]   ;;  %v11472_v34 = vld [vmem:[#allocation8 + $0x2c4] ss:$16 sps:$4 sm:$0xff]  }
 0x9a2   :  { %v11470_v58 = vld [vmem:[#allocation8 + $0x2c0] ss:$16 sps:$4 sm:$0xff]   ;;  %v11475_v10 = vld [vmem:[#allocation8 + $0x2e4] ss:$16 sps:$4 sm:$0xff]  }
 0x9a3   :  { %v11476_v12 = vld [vmem:[#allocation8 + $0x300] ss:$16 sps:$4 sm:$0xff]  }
 0x9a4   :  { %7720 = vmatmul.mubr.bf16.gmra.mrb[0].mxu0 %v11452_v33  ;;  %v11478_v33 = vld [vmem:[#allocation8 + $0x304] ss:$16 sps:$4 sm:$0xff]  }
 0x9a5   :  { %7727 = vmatprep.mubr.bf16.mxu0 %v11457_v19  ;;  %v11481_v19 = vld [vmem:[#allocation8 + $0x324] ss:$16 sps:$4 sm:$0xff]  }
 0x9ac   :  { %7728 = vmatmul.mubr.bf16.gmra.mrb[4].mxu0 %v11455_v4  ;;  %v11479_v4 = vld [vmem:[#allocation8 + $0x320] ss:$16 sps:$4 sm:$0xff]  }
 0x9ad   :  { %7735 = vmatprep.mubr.bf16.mxu0 %v11460_v47  ;;  %v11473_v47 = vld [vmem:[#allocation8 + $0x2e0] ss:$16 sps:$4 sm:$0xff]  }
 0x9b4   :  { %7736 = vmatmul.mubr.bf16.gmra.mrb[8].mxu0 %v11458_v29  ;;  %v11484_v29 = vld [vmem:[#allocation8 + $0x344] ss:$16 sps:$4 sm:$0xff]  }
 0x9b5   :  { %7743 = vmatprep.mubr.bf16.mxu0 %v11463_v5  ;;  %v11482_v5 = vld [vmem:[#allocation8 + $0x340] ss:$16 sps:$4 sm:$0xff]  }
 0x9bc   :  { %7744 = vmatmul.mubr.bf16.gmra.mrb[12].mxu0 %v11461_v48  ;;  %v11487_v48 = vld [vmem:[#allocation8 + $0x364] ss:$16 sps:$4 sm:$0xff]  }
 0x9bd   :  { %7751 = vmatprep.mubr.bf16.mxu0 %v11466_v36  ;;  %v11485_v36 = vld [vmem:[#allocation8 + $0x360] ss:$16 sps:$4 sm:$0xff]  }
 0x9c4   :  { %7752 = vmatmul.mubr.bf16.gmra.mrb[16].mxu0 %v11464_v40  ;;  %v11490_v40 = vld [vmem:[#allocation8 + $0x384] ss:$16 sps:$4 sm:$0xff]  }
 0x9c5   :  { %7759 = vmatprep.mubr.bf16.mxu0 %v11469_v35  ;;  %v11488_v35 = vld [vmem:[#allocation8 + $0x380] ss:$16 sps:$4 sm:$0xff]  }
 0x9cc   :  { %7760 = vmatmul.mubr.bf16.gmra.mrb[20].mxu0 %v11467_v63  ;;  %v11493_v63 = vld [vmem:[#allocation8 + $0x3a4] ss:$16 sps:$4 sm:$0xff]  }
 0x9cd   :  { %7767 = vmatprep.mubr.bf16.mxu0 %v11472_v34  ;;  %v11491_v34 = vld [vmem:[#allocation8 + $0x3a0] ss:$16 sps:$4 sm:$0xff]  }
 0x9d4   :  { %7768 = vmatmul.mubr.bf16.gmra.mrb[24].mxu0 %v11470_v58  ;;  %v11496_v58 = vld [vmem:[#allocation8 + $0x3c4] ss:$16 sps:$4 sm:$0xff]  }
 0x9d5   :  { %7775 = vmatprep.mubr.bf16.mxu0 %v11475_v10  ;;  %v11494_v10 = vld [vmem:[#allocation8 + $0x3c0] ss:$16 sps:$4 sm:$0xff]  }
 0x9dc   :  { %7776 = vmatmul.mubr.bf16.gmra.mrb[28].mxu0 %v11473_v47  ;;  %v11499_v47 = vld [vmem:[#allocation8 + $0x3e4] ss:$16 sps:$4 sm:$0xff]  }
 0x9dd   :  { %7783 = vmatprep.mubr.bf16.mxu0 %v11478_v33  ;;  %v11497_v33 = vld [vmem:[#allocation8 + $0x3e0] ss:$16 sps:$4 sm:$0xff]  }
 0x9e4   :  { %7784 = vmatmul.mubr.bf16.gmra.mrb[32].mxu0 %v11476_v12  ;;  %v11502_v12 = vld [vmem:[#allocation8 + $0xc] ss:$16 sps:$4 sm:$0xff]  }
 0x9e5   :  { %7791 = vmatprep.mubr.bf16.mxu0 %v11481_v19  ;;  %v11500_v19 = vld [vmem:[#allocation8 + $0x8] ss:$16 sps:$4 sm:$0xff]  }
 0x9ec   :  { %7792 = vmatmul.mubr.bf16.gmra.mrb[36].mxu0 %v11479_v4  ;;  %v11503_v4 = vld [vmem:[#allocation8 + $0x2c] ss:$16 sps:$4 sm:$0xff]  }
 0x9ed   :  { %7799 = vmatprep.mubr.bf16.mxu0 %v11484_v29  ;;  %v11505_v29 = vld [vmem:[#allocation8 + $0x28] ss:$16 sps:$4 sm:$0xff]  }
 0x9f4   :  { %7800 = vmatmul.mubr.bf16.gmra.mrb[40].mxu0 %v11482_v5  ;;  %v11506_v5 = vld [vmem:[#allocation8 + $0x4c] ss:$16 sps:$4 sm:$0xff]  }
 0x9f5   :  { %7807 = vmatprep.mubr.bf16.mxu0 %v11487_v48  ;;  %v11508_v48 = vld [vmem:[#allocation8 + $0x48] ss:$16 sps:$4 sm:$0xff]  }
 0x9fc   :  { %7808 = vmatmul.mubr.bf16.gmra.mrb[44].mxu0 %v11485_v36  ;;  %v11509_v36 = vld [vmem:[#allocation8 + $0x6c] ss:$16 sps:$4 sm:$0xff]  }
 0x9fd   :  { %7815 = vmatprep.mubr.bf16.mxu0 %v11490_v40  ;;  %v11511_v40 = vld [vmem:[#allocation8 + $0x68] ss:$16 sps:$4 sm:$0xff]  }
 0xa04   :  { %7816 = vmatmul.mubr.bf16.gmra.mrb[48].mxu0 %v11488_v35  ;;  %v11512_v35 = vld [vmem:[#allocation8 + $0x8c] ss:$16 sps:$4 sm:$0xff]  }
 0xa05   :  { %7823 = vmatprep.mubr.bf16.mxu0 %v11493_v63  ;;  %v11514_v63 = vld [vmem:[#allocation8 + $0x88] ss:$16 sps:$4 sm:$0xff]  }
 0xa0c   :  { %7824 = vmatmul.mubr.bf16.gmra.mrb[52].mxu0 %v11491_v34  ;;  %v11515_v34 = vld [vmem:[#allocation8 + $0xac] ss:$16 sps:$4 sm:$0xff]  }
 0xa0d   :  { %7831 = vmatprep.mubr.bf16.mxu0 %v11496_v58  ;;  %v11517_v58 = vld [vmem:[#allocation8 + $0xa8] ss:$16 sps:$4 sm:$0xff]  }
 0xa14   :  { %7832 = vmatmul.mubr.bf16.gmra.mrb[56].mxu0 %v11494_v10  ;;  %v11518_v10 = vld [vmem:[#allocation8 + $0xcc] ss:$16 sps:$4 sm:$0xff]  }
 0xa15   :  { %7839 = vmatprep.mubr.bf16.mxu0 %v11499_v47  ;;  %v11520_v47 = vld [vmem:[#allocation8 + $0xc8] ss:$16 sps:$4 sm:$0xff]  }
 0xa1c   :  { %7840 = vmatmul.mubr.bf16.gmra.mrb[60].mxu0 %v11497_v33  ;;  %v11521_v33 = vld [vmem:[#allocation8 + $0xec] ss:$16 sps:$4 sm:$0xff]  }
 0xa1d   :  { %7880 = vmatprep.mubr.bf16.mxu0 %v11502_v12  ;;  %v11523_v12 = vld [vmem:[#allocation8 + $0xe8] ss:$16 sps:$4 sm:$0xff]  }
 0xa24   :  { %7881 = vmatmul.mubr.bf16.vlgmr.msra.gmra.mrb[192].mxu0 %v11500_v19  ;;  %v11524_v19 = vld [vmem:[#allocation8 + $0x10c] ss:$16 sps:$4 sm:$0xff]  }
 0xa25   :  { %7888 = vmatprep.mubr.bf16.mxu0 %v11503_v4  ;;  %v11526_v4 = vld [vmem:[#allocation8 + $0x108] ss:$16 sps:$4 sm:$0xff]  }
 0xa2c   :  { %7889 = vmatmul.mubr.bf16.gmra.mrb[196].mxu0 %v11505_v29  ;;  %v11527_v29 = vld [vmem:[#allocation8 + $0x12c] ss:$16 sps:$4 sm:$0xff]  }
 0xa2d   :  { %7896 = vmatprep.mubr.bf16.mxu0 %v11506_v5  ;;  %v11529_v5 = vld [vmem:[#allocation8 + $0x128] ss:$16 sps:$4 sm:$0xff]  }
 0xa34   :  { %7897 = vmatmul.mubr.bf16.gmra.mrb[200].mxu0 %v11508_v48  ;;  %v11530_v48 = vld [vmem:[#allocation8 + $0x14c] ss:$16 sps:$4 sm:$0xff]  }
 0xa35   :  { %7904 = vmatprep.mubr.bf16.mxu0 %v11509_v36  ;;  %v11532_v36 = vld [vmem:[#allocation8 + $0x148] ss:$16 sps:$4 sm:$0xff]  }
 0xa3c   :  { %7905 = vmatmul.mubr.bf16.gmra.mrb[204].mxu0 %v11511_v40  ;;  %v11533_v40 = vld [vmem:[#allocation8 + $0x16c] ss:$16 sps:$4 sm:$0xff]  }
 0xa3d   :  { %7912 = vmatprep.mubr.bf16.mxu0 %v11512_v35  ;;  %v11535_v35 = vld [vmem:[#allocation8 + $0x168] ss:$16 sps:$4 sm:$0xff]  }
 0xa44   :  { %7913 = vmatmul.mubr.bf16.gmra.mrb[208].mxu0 %v11514_v63  ;;  %v11536_v63 = vld [vmem:[#allocation8 + $0x18c] ss:$16 sps:$4 sm:$0xff]  }
 0xa45   :  { %7920 = vmatprep.mubr.bf16.mxu0 %v11515_v34  ;;  %v11538_v34 = vld [vmem:[#allocation8 + $0x188] ss:$16 sps:$4 sm:$0xff]  }
 0xa4c   :  { %7921 = vmatmul.mubr.bf16.gmra.mrb[212].mxu0 %v11517_v58  ;;  %v11539_v58 = vld [vmem:[#allocation8 + $0x1ac] ss:$16 sps:$4 sm:$0xff]  }
 0xa4d   :  { %7928 = vmatprep.mubr.bf16.mxu0 %v11518_v10  ;;  %v11541_v10 = vld [vmem:[#allocation8 + $0x1a8] ss:$16 sps:$4 sm:$0xff]  }
 0xa54   :  { %7929 = vmatmul.mubr.bf16.gmra.mrb[216].mxu0 %v11520_v47  ;;  %v11542_v47 = vld [vmem:[#allocation8 + $0x1cc] ss:$16 sps:$4 sm:$0xff]  }
 0xa55   :  { %7936 = vmatprep.mubr.bf16.mxu0 %v11521_v33  ;;  %v11544_v33 = vld [vmem:[#allocation8 + $0x1c8] ss:$16 sps:$4 sm:$0xff]  }
 0xa5c   :  { %7937 = vmatmul.mubr.bf16.gmra.mrb[220].mxu0 %v11523_v12  ;;  %v11545_v12 = vld [vmem:[#allocation8 + $0x1ec] ss:$16 sps:$4 sm:$0xff]  }
 0xa5d   :  { %7944 = vmatprep.mubr.bf16.mxu0 %v11524_v19  ;;  %v11547_v19 = vld [vmem:[#allocation8 + $0x1e8] ss:$16 sps:$4 sm:$0xff]  }
 0xa64   :  { %7945 = vmatmul.mubr.bf16.gmra.mrb[224].mxu0 %v11526_v4  ;;  %v11550_v4 = vld [vmem:[#allocation8 + $0x20c] ss:$16 sps:$4 sm:$0xff]  }
 0xa65   :  { %7952 = vmatprep.mubr.bf16.mxu0 %v11527_v29  ;;  %v11548_v29 = vld [vmem:[#allocation8 + $0x208] ss:$16 sps:$4 sm:$0xff]  }
 0xa6c   :  { %7953 = vmatmul.mubr.bf16.gmra.mrb[228].mxu0 %v11529_v5  ;;  %v11553_v5 = vld [vmem:[#allocation8 + $0x22c] ss:$16 sps:$4 sm:$0xff]  }
 0xa6d   :  { %7960 = vmatprep.mubr.bf16.mxu0 %v11530_v48  ;;  %v11551_v48 = vld [vmem:[#allocation8 + $0x228] ss:$16 sps:$4 sm:$0xff]  }
 0xa74   :  { %7961 = vmatmul.mubr.bf16.gmra.mrb[232].mxu0 %v11532_v36  ;;  %v11556_v36 = vld [vmem:[#allocation8 + $0x24c] ss:$16 sps:$4 sm:$0xff]  }
 0xa75   :  { %7968 = vmatprep.mubr.bf16.mxu0 %v11533_v40  ;;  %v11554_v40 = vld [vmem:[#allocation8 + $0x248] ss:$16 sps:$4 sm:$0xff]  }
 0xa7c   :  { %7969 = vmatmul.mubr.bf16.gmra.mrb[236].mxu0 %v11535_v35  ;;  %v11559_v35 = vld [vmem:[#allocation8 + $0x26c] ss:$16 sps:$4 sm:$0xff]  }
 0xa7d   :  { %7976 = vmatprep.mubr.bf16.mxu0 %v11536_v63  ;;  %v11557_v63 = vld [vmem:[#allocation8 + $0x268] ss:$16 sps:$4 sm:$0xff]  }
 0xa84   :  { %7977 = vmatmul.mubr.bf16.gmra.mrb[240].mxu0 %v11538_v34  ;;  %v11562_v34 = vld [vmem:[#allocation8 + $0x28c] ss:$16 sps:$4 sm:$0xff]  }
 0xa85   :  { %7984 = vmatprep.mubr.bf16.mxu0 %v11539_v58  ;;  %v11560_v58 = vld [vmem:[#allocation8 + $0x288] ss:$16 sps:$4 sm:$0xff]  }
 0xa8c   :  { %7985 = vmatmul.mubr.bf16.gmra.mrb[244].mxu0 %v11541_v10  ;;  %v11565_v10 = vld [vmem:[#allocation8 + $0x2ac] ss:$16 sps:$4 sm:$0xff]  }
 0xa8d   :  { %7992 = vmatprep.mubr.bf16.mxu0 %v11542_v47  ;;  %v11563_v47 = vld [vmem:[#allocation8 + $0x2a8] ss:$16 sps:$4 sm:$0xff]  }
 0xa94   :  { %7993 = vmatmul.mubr.bf16.gmra.mrb[248].mxu0 %v11544_v33  ;;  %v11568_v33 = vld [vmem:[#allocation8 + $0x2cc] ss:$16 sps:$4 sm:$0xff]  }
 0xa95   :  { %8000 = vmatprep.mubr.bf16.mxu0 %v11545_v12  ;;  %v11566_v12 = vld [vmem:[#allocation8 + $0x2c8] ss:$16 sps:$4 sm:$0xff]  }
 0xa9c   :  { %8001 = vmatmul.mubr.bf16.gmra.mrb[252].mxu0 %v11547_v19  ;;  %v11571_v19 = vld [vmem:[#allocation8 + $0x2ec] ss:$16 sps:$4 sm:$0xff]  }
 0xa9d   :  { %8008 = vmatprep.mubr.bf16.mxu0 %v11550_v4  ;;  %v11569_v4 = vld [vmem:[#allocation8 + $0x2e8] ss:$16 sps:$4 sm:$0xff]  }
 0xaa4   :  { %8009 = vmatmul.mubr.bf16.gmra.mrb[0].mxu0 %v11548_v29  ;;  %v11574_v29 = vld [vmem:[#allocation8 + $0x30c] ss:$16 sps:$4 sm:$0xff]  }
 0xaa5   :  { %8016 = vmatprep.mubr.bf16.mxu0 %v11553_v5  ;;  %v11572_v5 = vld [vmem:[#allocation8 + $0x308] ss:$16 sps:$4 sm:$0xff]  }
 0xaac   :  { %8017 = vmatmul.mubr.bf16.gmra.mrb[4].mxu0 %v11551_v48  ;;  %v11577_v48 = vld [vmem:[#allocation8 + $0x32c] ss:$16 sps:$4 sm:$0xff]  }
 0xaad   :  { %8024 = vmatprep.mubr.bf16.mxu0 %v11556_v36  ;;  %v11575_v36 = vld [vmem:[#allocation8 + $0x328] ss:$16 sps:$4 sm:$0xff]  }
 0xab4   :  { %8025 = vmatmul.mubr.bf16.gmra.mrb[8].mxu0 %v11554_v40  ;;  %v11580_v40 = vld [vmem:[#allocation8 + $0x34c] ss:$16 sps:$4 sm:$0xff]  }
 0xab5   :  { %8032 = vmatprep.mubr.bf16.mxu0 %v11559_v35  ;;  %v11578_v35 = vld [vmem:[#allocation8 + $0x348] ss:$16 sps:$4 sm:$0xff]  }
 0xabc   :  { %8033 = vmatmul.mubr.bf16.gmra.mrb[12].mxu0 %v11557_v63  ;;  %v11583_v63 = vld [vmem:[#allocation8 + $0x36c] ss:$16 sps:$4 sm:$0xff]  }
 0xabd   :  { %8040 = vmatprep.mubr.bf16.mxu0 %v11562_v34  ;;  %v8523_v34 = vlaneseq }
 0xac4   :  { %8041 = vmatmul.mubr.bf16.gmra.mrb[16].mxu0 %v11560_v58  ;;  %v13453_v58 = vstv %s10059_s21 }
 0xac5   :  { %8048 = vmatprep.mubr.bf16.mxu0 %v11565_v10  ;;  %v13455_v10 = vand.u32 127, %v8523_v34 }
 0xac7   :  { %vm8525_vm2 = vcmp.lt.s32.totalorder %v13455_v10, 8 }
 0xacc   :  { %8049 = vmatmul.mubr.bf16.gmra.mrb[20].mxu0 %v11563_v47 }
 0xacd   :  { %8056 = vmatprep.mubr.bf16.mxu0 %v11568_v33 }
 0xad4   :  { %8057 = vmatmul.mubr.bf16.gmra.mrb[24].mxu0 %v11566_v12 }
 0xad5   :  { %8064 = vmatprep.mubr.bf16.mxu0 %v11571_v19  ;;  %v11581_v19 = vld [vmem:[#allocation8 + $0x368] ss:$16 sps:$4 sm:$0xff]  }
 0xadc   :  { %8065 = vmatmul.mubr.bf16.gmra.mrb[28].mxu0 %v11569_v4 }
 0xadd   :  { %8072 = vmatprep.mubr.bf16.mxu0 %v11574_v29  ;;  %v11586_v29 = vld [vmem:[#allocation8 + $0x38c] ss:$16 sps:$4 sm:$0xff]  }
 0xae4   :  { %8073 = vmatmul.mubr.bf16.gmra.mrb[32].mxu0 %v11572_v5 }
 0xae5   :  { %8080 = vmatprep.mubr.bf16.mxu0 %v11577_v48 }
 0xaec   :  { %8081 = vmatmul.mubr.bf16.gmra.mrb[36].mxu0 %v11575_v36 }
 0xaed   :  { %8088 = vmatprep.mubr.bf16.mxu0 %v11580_v40 }
 0xaf4   :  { %8089 = vmatmul.mubr.bf16.gmra.mrb[40].mxu0 %v11578_v35 }
 0xaf5   :  { %8096 = vmatprep.mubr.bf16.mxu0 %v11583_v63 }
 0xaf7   :  { %v7882_v47 = vpop.f32.mrb[192].mxu0 }
 0xaf8   :  { %v8203_v33 = vmul.f32 %v13453_v58, %v7882_v47  ;;  %v7884_v12 = vpop.f32.mrb[193].mxu0 }
 0xaf9   :  { %v7885_v4 = vpop.f32.mrb[194].mxu0 }
 0xafa   :  { %v8204_v5 = vmul.f32 %v13453_v58, %v7885_v4  ;;  %v7887_v48 = vpop.f32.mrb[195].mxu0  ;;  %v8267_v36 = vadd.f32 %v8203_v33, %v13168_v7  ;;  %v11584_v4 = vld [vmem:[#allocation8 + $0x388] ss:$16 sps:$4 sm:$0xff]   ;;  %v11589_v33 = vld [vmem:[#allocation8 + $0x3ac] ss:$16 sps:$4 sm:$0xff]  }
 0xafc   :  { %8097 = vmatmul.mubr.bf16.gmra.mrb[44].mxu0 %v11581_v19  ;;  %v13463_v40 = vsel %vm8525_vm2, %v8267_v36, -inf  ;;  %v8268_v35 = vadd.f32 %v8204_v5, %v13172_v43 }
 0xafd   :  { %8590 = vmax.xlane.f32.xlu0 %v13463_v40  ;;  %8104 = vmatprep.mubr.bf16.mxu0 %v11586_v29 }
 0xafe   :  { %v13470_v12 = vsel %vm8525_vm2, %v8268_v35, -inf }
 0xaff   :  { %v7890_v63 = vpop.f32.mrb[196].mxu0 }
 0xb00   :  { %v8205_v34 = vmul.f32 %v13453_v58, %v7890_v63  ;;  %v7892_v47 = vpop.f32.mrb[197].mxu0 }
 0xb01   :  { %v7893_v7 = vpop.f32.mrb[198].mxu0  ;;  %8592 = vmax.xlane.f32.xlu0 %v13470_v12 }
 0xb02   :  { %v8206_v19 = vmul.f32 %v13453_v58, %v7893_v7  ;;  %v7895_v48 = vpop.f32.mrb[199].mxu0  ;;  %v8269_v43 = vadd.f32 %v8205_v34, %v13177_v60  ;;  %v11587_v7 = vld [vmem:[#allocation8 + $0x3a8] ss:$16 sps:$4 sm:$0xff]   ;;  %v11592_v34 = vld [vmem:[#allocation8 + $0x3cc] ss:$16 sps:$4 sm:$0xff]  }
 0xb04   :  { %8105 = vmatmul.mubr.bf16.gmra.mrb[48].mxu0 %v11584_v4  ;;  %v13477_v29 = vsel %vm8525_vm2, %v8269_v43, -inf  ;;  %v8270_v5 = vadd.f32 %v8206_v19, %v13181_v32 }
 0xb05   :  { %8594 = vmax.xlane.f32.xlu1 %v13477_v29  ;;  %8112 = vmatprep.mubr.bf16.mxu0 %v11589_v33 }
 0xb06   :  { %v13484_v47 = vsel %vm8525_vm2, %v8270_v5, -inf }
 0xb07   :  { %v7898_v36 = vpop.f32.mrb[200].mxu0 }
 0xb08   :  { %v8207_v35 = vmul.f32 %v13453_v58, %v7898_v36  ;;  %v7900_v63 = vpop.f32.mrb[201].mxu0 }
 0xb09   :  { %8596 = vmax.xlane.f32.xlu1 %v13484_v47  ;;  %v7901_v60 = vpop.f32.mrb[202].mxu0 }
 0xb0a   :  { %v8208_v4 = vmul.f32 %v13453_v58, %v7901_v60  ;;  %v7903_v48 = vpop.f32.mrb[203].mxu0  ;;  %v8271_v32 = vadd.f32 %v8207_v35, %v13186_v20  ;;  %v11590_v35 = vld [vmem:[#allocation8 + $0x3c8] ss:$16 sps:$4 sm:$0xff]  }
 0xb0c   :  { %8113 = vmatmul.mubr.bf16.gmra.mrb[52].mxu0 %v11587_v7  ;;  %v13491_v33 = vsel %vm8525_vm2, %v8271_v32, -inf  ;;  %v8272_v19 = vadd.f32 %v8208_v4, %v13190_v59  ;;  %v11595_v7 = vld [vmem:[#allocation8 + $0x3ec] ss:$16 sps:$4 sm:$0xff]  }
 0xb0d   :  { %8598 = vmax.xlane.f32.xlu0 %v13491_v33  ;;  %8120 = vmatprep.mubr.bf16.mxu0 %v11592_v34 }
 0xb0e   :  { %v13497_v43 = vsel %vm8525_vm2, %v8272_v19, -inf }
 0xb0f   :  { %8600 = vmax.xlane.f32.xlu1 %v13497_v43  ;;  %v7906_v5 = vpop.f32.mrb[204].mxu0 }
 0xb10   :  { %v8209_v36 = vmul.f32 %v13453_v58, %v7906_v5  ;;  %v7908_v20 = vpop.f32.mrb[205].mxu0 }
 0xb11   :  { %v7909_v63 = vpop.f32.mrb[206].mxu0 }
 0xb12   :  { %v8210_v60 = vmul.f32 %v13453_v58, %v7909_v63  ;;  %v7911_v48 = vpop.f32.mrb[207].mxu0  ;;  %v8273_v59 = vadd.f32 %v8209_v36, %v13195_v39  ;;  %v11593_v36 = vld [vmem:[#allocation8 + $0x3e8] ss:$16 sps:$4 sm:$0xff]  }
 0xb14   :  { %8121 = vmatmul.mubr.bf16.gmra.mrb[56].mxu0 %v11590_v35  ;;  %v13505_v34 = vsel %vm8525_vm2, %v8273_v59, -inf  ;;  %v8274_v4 = vadd.f32 %v8210_v60, %v13199_v6 }
 0xb15   :  { %8602 = vmax.xlane.f32.xlu0 %v13505_v34  ;;  %8128 = vmatprep.mubr.bf16.mxu0 %v11595_v7 }
 0xb16   :  { %v13511_v32 = vsel %vm8525_vm2, %v8274_v4, -inf }
 0xb17   :  { %8604 = vmax.xlane.f32.xlu1 %v13511_v32  ;;  %v7914_v19 = vpop.f32.mrb[208].mxu0 }
 0xb18   :  { %v8211_v5 = vmul.f32 %v13453_v58, %v7914_v19  ;;  %v7916_v39 = vpop.f32.mrb[209].mxu0 }
 0xb19   :  { %v7917_v20 = vpop.f32.mrb[210].mxu0 }
 0xb1a   :  { %v8212_v35 = vmul.f32 %v13453_v58, %v7917_v20  ;;  %v7919_v63 = vpop.f32.mrb[211].mxu0  ;;  %v8275_v6 = vadd.f32 %v8211_v5, %v13204_v24 }
 0xb1c   :  { %8129 = vmatmul.mubr.bf16.gmra.mrb[60].mxu0 %v11593_v36  ;;  %v13519_v7 = vsel %vm8525_vm2, %v8275_v6, -inf  ;;  %v8276_v60 = vadd.f32 %v8212_v35, %v13208_v55 }
 0xb1d   :  { %8606 = vmax.xlane.f32.xlu0 %v13519_v7 }
 0xb1e   :  { %v13525_v48 = vsel %vm8525_vm2, %v8276_v60, -inf }
 0xb1f   :  { %8608 = vmax.xlane.f32.xlu1 %v13525_v48  ;;  %v7922_v59 = vpop.f32.mrb[212].mxu0 }
 0xb20   :  { %v8213_v4 = vmul.f32 %v13453_v58, %v7922_v59  ;;  %v7924_v19 = vpop.f32.mrb[213].mxu0 }
 0xb21   :  { %v7925_v24 = vpop.f32.mrb[214].mxu0 }
 0xb22   :  { %v8214_v5 = vmul.f32 %v13453_v58, %v7925_v24  ;;  %v7927_v39 = vpop.f32.mrb[215].mxu0  ;;  %v8277_v36 = vadd.f32 %v8213_v4, %v13213_v44 }
 0xb24   :  { %v13533_v55 = vsel %vm8525_vm2, %v8277_v36, -inf  ;;  %v8278_v20 = vadd.f32 %v8214_v5, %v13217_v21 }
 0xb25   :  { %8610 = vmax.xlane.f32.xlu0 %v13533_v55 }
 0xb26   :  { %v13539_v35 = vsel %vm8525_vm2, %v8278_v20, -inf }
 0xb27   :  { %8612 = vmax.xlane.f32.xlu1 %v13539_v35  ;;  %v7930_v63 = vpop.f32.mrb[216].mxu0 }
 0xb28   :  { %v8215_v6 = vmul.f32 %v13453_v58, %v7930_v63  ;;  %v7932_v60 = vpop.f32.mrb[217].mxu0 }
 0xb29   :  { %v7933_v59 = vpop.f32.mrb[218].mxu0 }
 0xb2a   :  { %v8216_v44 = vmul.f32 %v13453_v58, %v7933_v59  ;;  %v7935_v4 = vpop.f32.mrb[219].mxu0  ;;  %v8279_v19 = vadd.f32 %v8215_v6, %v13222_v22 }
 0xb2c   :  { %v13547_v21 = vsel %vm8525_vm2, %v8279_v19, -inf  ;;  %v8280_v24 = vadd.f32 %v8216_v44, %v13226_v31 }
 0xb2d   :  { %8614 = vmax.xlane.f32.xlu0 %v13547_v21 }
 0xb2e   :  { %v13553_v5 = vsel %vm8525_vm2, %v8280_v24, -inf }
 0xb2f   :  { %8616 = vmax.xlane.f32.xlu1 %v13553_v5  ;;  %v7938_v39 = vpop.f32.mrb[220].mxu0 }
 0xb30   :  { %v8217_v36 = vmul.f32 %v13453_v58, %v7938_v39  ;;  %v7940_v20 = vpop.f32.mrb[221].mxu0 }
 0xb31   :  { %v7941_v63 = vpop.f32.mrb[222].mxu0 }
 0xb32   :  { %v8218_v22 = vmul.f32 %v13453_v58, %v7941_v63  ;;  %v7943_v6 = vpop.f32.mrb[223].mxu0  ;;  %v8281_v60 = vadd.f32 %v8217_v36, %v13231_v54 }
 0xb34   :  { %v13561_v31 = vsel %vm8525_vm2, %v8281_v60, -inf  ;;  %v8282_v59 = vadd.f32 %v8218_v22, %v13235_v52 }
 0xb35   :  { %8618 = vmax.xlane.f32.xlu0 %v13561_v31 }
 0xb36   :  { %v13567_v44 = vsel %vm8525_vm2, %v8282_v59, -inf }
 0xb37   :  { %8620 = vmax.xlane.f32.xlu1 %v13567_v44  ;;  %v7946_v4 = vpop.f32.mrb[224].mxu0 }
 0xb38   :  { %v8219_v19 = vmul.f32 %v13453_v58, %v7946_v4  ;;  %v7948_v24 = vpop.f32.mrb[225].mxu0 }
 0xb39   :  { %v7949_v39 = vpop.f32.mrb[226].mxu0 }
 0xb3a   :  { %v8220_v54 = vmul.f32 %v13453_v58, %v7949_v39  ;;  %v7951_v36 = vpop.f32.mrb[227].mxu0  ;;  %v8283_v20 = vadd.f32 %v8219_v19, %v13240_v45 }
 0xb3c   :  { %v13575_v52 = vsel %vm8525_vm2, %v8283_v20, -inf  ;;  %v8284_v63 = vadd.f32 %v8220_v54, %v13244_v11 }
 0xb3d   :  { %8622 = vmax.xlane.f32.xlu0 %v13575_v52 }
 0xb3e   :  { %v13581_v22 = vsel %vm8525_vm2, %v8284_v63, -inf }
 0xb3f   :  { %8624 = vmax.xlane.f32.xlu1 %v13581_v22  ;;  %v7954_v6 = vpop.f32.mrb[228].mxu0 }
 0xb40   :  { %v8221_v60 = vmul.f32 %v13453_v58, %v7954_v6  ;;  %v7956_v59 = vpop.f32.mrb[229].mxu0 }
 0xb41   :  { %v7957_v4 = vpop.f32.mrb[230].mxu0 }
 0xb42   :  { %v8222_v45 = vmul.f32 %v13453_v58, %v7957_v4  ;;  %v7959_v19 = vpop.f32.mrb[231].mxu0  ;;  %v8285_v24 = vadd.f32 %v8221_v60, %v13249_v23 }
 0xb44   :  { %v13589_v11 = vsel %vm8525_vm2, %v8285_v24, -inf  ;;  %v8286_v39 = vadd.f32 %v8222_v45, %v13253_v14 }
 0xb45   :  { %8626 = vmax.xlane.f32.xlu0 %v13589_v11 }
 0xb46   :  { %v13595_v54 = vsel %vm8525_vm2, %v8286_v39, -inf }
 0xb47   :  { %8628 = vmax.xlane.f32.xlu1 %v13595_v54  ;;  %v7962_v36 = vpop.f32.mrb[232].mxu0 }
 0xb48   :  { %v8223_v20 = vmul.f32 %v13453_v58, %v7962_v36  ;;  %v7964_v63 = vpop.f32.mrb[233].mxu0 }
 0xb49   :  { %v7965_v6 = vpop.f32.mrb[234].mxu0 }
 0xb4a   :  { %v8224_v23 = vmul.f32 %v13453_v58, %v7965_v6  ;;  %v7967_v60 = vpop.f32.mrb[235].mxu0  ;;  %v8287_v59 = vadd.f32 %v8223_v20, %v13258_v50 }
 0xb4c   :  { %v13603_v14 = vsel %vm8525_vm2, %v8287_v59, -inf  ;;  %v8288_v4 = vadd.f32 %v8224_v23, %v13262_v53 }
 0xb4d   :  { %8630 = vmax.xlane.f32.xlu0 %v13603_v14 }
 0xb4e   :  { %v13609_v45 = vsel %vm8525_vm2, %v8288_v4, -inf }
 0xb4f   :  { %8632 = vmax.xlane.f32.xlu1 %v13609_v45  ;;  %v7970_v19 = vpop.f32.mrb[236].mxu0 }
 0xb50   :  { %v8225_v24 = vmul.f32 %v13453_v58, %v7970_v19  ;;  %v7972_v39 = vpop.f32.mrb[237].mxu0 }
 0xb51   :  { %v7973_v36 = vpop.f32.mrb[238].mxu0 }
 0xb52   :  { %v8226_v50 = vmul.f32 %v13453_v58, %v7973_v36  ;;  %v7975_v20 = vpop.f32.mrb[239].mxu0  ;;  %v8289_v63 = vadd.f32 %v8225_v24, %v13267_v56 }
 0xb54   :  { %v13617_v53 = vsel %vm8525_vm2, %v8289_v63, -inf  ;;  %v8290_v6 = vadd.f32 %v8226_v50, %v13271_v1 }
 0xb55   :  { %8634 = vmax.xlane.f32.xlu0 %v13617_v53 }
 0xb56   :  { %v13623_v23 = vsel %vm8525_vm2, %v8290_v6, -inf }
 0xb57   :  { %8636 = vmax.xlane.f32.xlu1 %v13623_v23  ;;  %v7978_v60 = vpop.f32.mrb[240].mxu0 }
 0xb58   :  { %v8227_v59 = vmul.f32 %v13453_v58, %v7978_v60  ;;  %v7980_v4 = vpop.f32.mrb[241].mxu0 }
 0xb59   :  { %v7981_v19 = vpop.f32.mrb[242].mxu0 }
 0xb5a   :  { %v8228_v56 = vmul.f32 %v13453_v58, %v7981_v19  ;;  %v7983_v24 = vpop.f32.mrb[243].mxu0  ;;  %v8291_v39 = vadd.f32 %v8227_v59, %v13276_v57 }
 0xb5c   :  { %v13631_v1 = vsel %vm8525_vm2, %v8291_v39, -inf  ;;  %v8292_v36 = vadd.f32 %v8228_v56, %v13280_v17 }
 0xb5d   :  { %8638 = vmax.xlane.f32.xlu0 %v13631_v1 }
 0xb5e   :  { %v13637_v50 = vsel %vm8525_vm2, %v8292_v36, -inf }
 0xb5f   :  { %8640 = vmax.xlane.f32.xlu1 %v13637_v50  ;;  %v7986_v20 = vpop.f32.mrb[244].mxu0 }
 0xb60   :  { %v8229_v63 = vmul.f32 %v13453_v58, %v7986_v20  ;;  %v7988_v6 = vpop.f32.mrb[245].mxu0 }
 0xb61   :  { %v7989_v60 = vpop.f32.mrb[246].mxu0 }
 0xb62   :  { %v8230_v57 = vmul.f32 %v13453_v58, %v7989_v60  ;;  %v7991_v59 = vpop.f32.mrb[247].mxu0  ;;  %v8293_v4 = vadd.f32 %v8229_v63, %v13285_v41 }
 0xb64   :  { %v13645_v17 = vsel %vm8525_vm2, %v8293_v4, -inf  ;;  %v8294_v19 = vadd.f32 %v8230_v57, %v13289_v13 }
 0xb65   :  { %8642 = vmax.xlane.f32.xlu0 %v13645_v17 }
 0xb66   :  { %v13651_v56 = vsel %vm8525_vm2, %v8294_v19, -inf }
 0xb67   :  { %8644 = vmax.xlane.f32.xlu1 %v13651_v56  ;;  %v7994_v24 = vpop.f32.mrb[248].mxu0 }
 0xb68   :  { %v8231_v39 = vmul.f32 %v13453_v58, %v7994_v24  ;;  %v7996_v36 = vpop.f32.mrb[249].mxu0 }
 0xb69   :  { %v7997_v20 = vpop.f32.mrb[250].mxu0 }
 0xb6a   :  { %v8232_v41 = vmul.f32 %v13453_v58, %v7997_v20  ;;  %v7999_v63 = vpop.f32.mrb[251].mxu0  ;;  %v8295_v6 = vadd.f32 %v8231_v39, %v13294_v28 }
 0xb6c   :  { %v13659_v13 = vsel %vm8525_vm2, %v8295_v6, -inf  ;;  %v8296_v60 = vadd.f32 %v8232_v41, %v13298_v26 }
 0xb6d   :  { %8646 = vmax.xlane.f32.xlu0 %v13659_v13 }
 0xb6e   :  { %v13665_v57 = vsel %vm8525_vm2, %v8296_v60, -inf }
 0xb6f   :  { %8648 = vmax.xlane.f32.xlu1 %v13665_v57  ;;  %v8002_v59 = vpop.f32.mrb[252].mxu0 }
 0xb70   :  { %v8233_v4 = vmul.f32 %v13453_v58, %v8002_v59  ;;  %v8004_v19 = vpop.f32.mrb[253].mxu0 }
 0xb71   :  { %v8005_v24 = vpop.f32.mrb[254].mxu0 }
 0xb72   :  { %v8234_v28 = vmul.f32 %v13453_v58, %v8005_v24  ;;  %v8007_v39 = vpop.f32.mrb[255].mxu0  ;;  %v8297_v36 = vadd.f32 %v8233_v4, %v13303_v8 }
 0xb74   :  { %v13673_v26 = vsel %vm8525_vm2, %v8297_v36, -inf  ;;  %v8298_v20 = vadd.f32 %v8234_v28, %v13307_v18 }
 0xb75   :  { %8650 = vmax.xlane.f32.xlu0 %v13673_v26 }
 0xb76   :  { %v13679_v41 = vsel %vm8525_vm2, %v8298_v20, -inf }
 0xb77   :  { %8652 = vmax.xlane.f32.xlu1 %v13679_v41  ;;  %v8010_v63 = vpop.f32.mrb[0].mxu0 }
 0xb78   :  { %v8235_v6 = vmul.f32 %v13453_v58, %v8010_v63  ;;  %v8012_v60 = vpop.f32.mrb[1].mxu0 }
 0xb79   :  { %v8013_v59 = vpop.f32.mrb[2].mxu0 }
 0xb7a   :  { %v8236_v8 = vmul.f32 %v13453_v58, %v8013_v59  ;;  %v8015_v4 = vpop.f32.mrb[3].mxu0  ;;  %v8299_v19 = vadd.f32 %v8235_v6, %v13312_v15 }
 0xb7c   :  { %v13687_v18 = vsel %vm8525_vm2, %v8299_v19, -inf  ;;  %v8300_v24 = vadd.f32 %v8236_v8, %v13316_v16 }
 0xb7d   :  { %8654 = vmax.xlane.f32.xlu0 %v13687_v18 }
 0xb7e   :  { %v13693_v28 = vsel %vm8525_vm2, %v8300_v24, -inf }
 0xb7f   :  { %8656 = vmax.xlane.f32.xlu1 %v13693_v28  ;;  %v8018_v39 = vpop.f32.mrb[4].mxu0 }
 0xb80   :  { %v8237_v36 = vmul.f32 %v13453_v58, %v8018_v39  ;;  %v8020_v20 = vpop.f32.mrb[5].mxu0 }
 0xb81   :  { %v8021_v63 = vpop.f32.mrb[6].mxu0 }
 0xb82   :  { %v8238_v15 = vmul.f32 %v13453_v58, %v8021_v63  ;;  %v8023_v6 = vpop.f32.mrb[7].mxu0  ;;  %v8301_v60 = vadd.f32 %v8237_v36, %v13321_v3 }
 0xb84   :  { %v13701_v16 = vsel %vm8525_vm2, %v8301_v60, -inf  ;;  %v8302_v59 = vadd.f32 %v8238_v15, %v13325_v25 }
 0xb85   :  { %8658 = vmax.xlane.f32.xlu0 %v13701_v16 }
 0xb86   :  { %v13707_v8 = vsel %vm8525_vm2, %v8302_v59, -inf }
 0xb87   :  { %8660 = vmax.xlane.f32.xlu1 %v13707_v8  ;;  %v8026_v4 = vpop.f32.mrb[8].mxu0 }
 0xb88   :  { %v8239_v19 = vmul.f32 %v13453_v58, %v8026_v4  ;;  %v8028_v24 = vpop.f32.mrb[9].mxu0 }
 0xb89   :  { %v8029_v39 = vpop.f32.mrb[10].mxu0 }
 0xb8a   :  { %v8240_v3 = vmul.f32 %v13453_v58, %v8029_v39  ;;  %v8031_v36 = vpop.f32.mrb[11].mxu0  ;;  %v8591_v20 = vpop.xlane.xlu0 %8590  ;;  %v8303_v63 = vadd.f32 %v8239_v19, %v13330_v2 }
 0xb8b   :  { %v13714_v25 = vsub.f32 %v13463_v40, %v8591_v20 }
 0xb8c   :  { %v13718_v15 = vsel %vm8525_vm2, %v8303_v63, -inf  ;;  %v8304_v6 = vadd.f32 %v8240_v3, %v13334_v30 }
 0xb8d   :  { %v8782_v60 = vmul.f32 1.442695, %v13714_v25  ;;  %8662 = vmax.xlane.f32.xlu0 %v13718_v15 }
 0xb8e   :  { %v8593_v59 = vpop.xlane.xlu0 %8592  ;;  %v13725_v4 = vsel %vm8525_vm2, %v8304_v6, -inf }
 0xb8f   :  { %11596 = vpow2.f32 %v8782_v60  ;;  %v13728_v2 = vsub.f32 %v13470_v12, %v8593_v59  ;;  %8664 = vmax.xlane.f32.xlu1 %v13725_v4  ;;  %v8034_v40 = vpop.f32.mrb[12].mxu0 }
 0xb90   :  { %v8241_v19 = vmul.f32 %v13453_v58, %v8034_v40  ;;  %v8036_v24 = vpop.f32.mrb[13].mxu0 }
 0xb91   :  { %v8784_v30 = vmul.f32 1.442695, %v13728_v2  ;;  %v8037_v39 = vpop.f32.mrb[14].mxu0 }
 0xb92   :  { %v8242_v3 = vmul.f32 %v13453_v58, %v8037_v39  ;;  %v8595_v36 = vpop.xlane.xlu1 %8594  ;;  %v8039_v20 = vpop.f32.mrb[15].mxu0  ;;  %v8305_v63 = vadd.f32 %v8241_v19, %v13339_v27 }
 0xb93   :  { %11598 = vpow2.f32 %v8784_v30  ;;  %v13736_v6 = vsub.f32 %v13477_v29, %v8595_v36 }
 0xb94   :  { %v13740_v12 = vsel %vm8525_vm2, %v8305_v63, -inf  ;;  %v8306_v60 = vadd.f32 %v8242_v3, %v13343_v38 }
 0xb95   :  { %v8786_v59 = vmul.f32 1.442695, %v13736_v6  ;;  %8666 = vmax.xlane.f32.xlu0 %v13740_v12 }
 0xb96   :  { %v8597_v40 = vpop.xlane.xlu1 %8596  ;;  %v13747_v24 = vsel %vm8525_vm2, %v8306_v60, -inf }
 0xb97   :  { %11600 = vpow2.f32 %v8786_v59  ;;  %v13750_v27 = vsub.f32 %v13484_v47, %v8597_v40  ;;  %8668 = vmax.xlane.f32.xlu1 %v13747_v24  ;;  %v8042_v29 = vpop.f32.mrb[16].mxu0 }
 0xb98   :  { %v8243_v19 = vmul.f32 %v13453_v58, %v8042_v29  ;;  %v8044_v30 = vpop.f32.mrb[17].mxu0 }
 0xb99   :  { %14660 = vst [vmem:[#allocation26_spill] sm:$0xff] %v13750_v27  ;;  %v11597_v38 = vpop.eup %11596  ;;  %v8788_v39 = vmul.f32 1.442695, %v13750_v27  ;;  %v8045_v3 = vpop.f32.mrb[18].mxu0 }
 0xb9a   :  { %v8244_v36 = vmul.f32 %v13453_v58, %v8045_v3  ;;  %v8047_v20 = vpop.f32.mrb[19].mxu0  ;;  %v8599_v63 = vpop.xlane.xlu0 %8598  ;;  %v8910_v60 = vsel %vm8525_vm2, %v11597_v38, 0.0  ;;  %v8307_v47 = vadd.f32 %v8243_v19, %v13348_v62 }
 0xb9b   :  { %11602 = vpow2.f32 %v8788_v39  ;;  %v13760_v59 = vsub.f32 %v13491_v33, %v8599_v63  ;;  %8974 = vadd.xlane.f32.xlu0 %v8910_v60 }
 0xb9c   :  { %v8601_v40 = vpop.xlane.xlu1 %8600  ;;  %v8308_v29 = vadd.f32 %v8244_v36, %v13352_v61  ;;  %v13769_v20 = vsel %vm8525_vm2, %v8307_v47, -inf }
 0xb9d   :  { %v11599_v30 = vpop.eup %11598  ;;  %v8790_v27 = vmul.f32 1.442695, %v13760_v59  ;;  %v13765_v3 = vsub.f32 %v13497_v43, %v8601_v40 }
 0xb9e   :  { %v8911_v62 = vsel %vm8525_vm2, %v11599_v30, 0.0 }
 0xb9f   :  { %11604 = vpow2.f32 %v8790_v27  ;;  %v8792_v33 = vmul.f32 1.442695, %v13765_v3  ;;  %v8050_v19 = vpop.f32.mrb[20].mxu0  ;;  %8670 = vmax.xlane.f32.xlu0 %v13769_v20  ;;  %8976 = vadd.xlane.f32.xlu1 %v8911_v62  ;;  %v13781_v27 = vsel %vm8525_vm2, %v8308_v29, -inf }
 0xba0   :  { %v8245_v61 = vmul.f32 %v13453_v58, %v8050_v19  ;;  %v8052_v38 = vpop.f32.mrb[21].mxu0 }
 0xba1   :  { %v11601_v39 = vpop.eup %11600  ;;  %11606 = vpow2.f32 %v8792_v33  ;;  %v8053_v43 = vpop.f32.mrb[22].mxu0 }
 0xba2   :  { %v8246_v36 = vmul.f32 %v13453_v58, %v8053_v43  ;;  %v8055_v63 = vpop.f32.mrb[23].mxu0  ;;  %v8603_v60 = vpop.xlane.xlu0 %8602  ;;  %v8912_v47 = vsel %vm8525_vm2, %v11601_v39, 0.0  ;;  %v8309_v40 = vadd.f32 %v8245_v61, %v13357_v46 }
 0xba3   :  { %v13785_v30 = vsub.f32 %v13505_v34, %v8603_v60  ;;  %8978 = vadd.xlane.f32.xlu0 %v8912_v47  ;;  %8672 = vmax.xlane.f32.xlu1 %v13781_v27 }
 0xba4   :  { %v8605_v62 = vpop.xlane.xlu1 %8604  ;;  %v8310_v33 = vadd.f32 %v8246_v36, %v13361_v0  ;;  %v13795_v29 = vsel %vm8525_vm2, %v8309_v40, -inf }
 0xba5   :  { %v11603_v19 = vpop.eup %11602  ;;  %v8794_v38 = vmul.f32 1.442695, %v13785_v30  ;;  %v13791_v39 = vsub.f32 %v13511_v32, %v8605_v62 }
 0xba6   :  { %v8913_v46 = vsel %vm8525_vm2, %v11603_v19, 0.0  ;;  %v13805_v40 = vsel %vm8525_vm2, %v8310_v33, -inf }
 0xba7   :  { %11608 = vpow2.f32 %v8794_v38  ;;  %v8796_v34 = vmul.f32 1.442695, %v13791_v39  ;;  %v8058_v61 = vpop.f32.mrb[24].mxu0  ;;  %8674 = vmax.xlane.f32.xlu0 %v13795_v29  ;;  %8980 = vadd.xlane.f32.xlu1 %v8913_v46 }
 0xba8   :  { %v8247_v0 = vmul.f32 %v13453_v58, %v8058_v61  ;;  %v8060_v43 = vpop.f32.mrb[25].mxu0 }
 0xba9   :  { %v11605_v36 = vpop.eup %11604  ;;  %11610 = vpow2.f32 %v8796_v34  ;;  %v8061_v32 = vpop.f32.mrb[26].mxu0 }
 0xbaa   :  { %v8248_v63 = vmul.f32 %v13453_v58, %v8061_v32  ;;  %v8063_v60 = vpop.f32.mrb[27].mxu0  ;;  %v8607_v47 = vpop.xlane.xlu0 %8606  ;;  %v8914_v62 = vsel %vm8525_vm2, %v11605_v36, 0.0  ;;  %v8311_v19 = vadd.f32 %v8247_v0, %v13366_v9 }
 0xbab   :  { %v11607_v38 = vpop.eup %11606  ;;  %v13811_v46 = vsub.f32 %v13519_v7, %v8607_v47  ;;  %8676 = vmax.xlane.f32.xlu1 %v13805_v40  ;;  %8982 = vadd.xlane.f32.xlu0 %v8914_v62 }
 0xbac   :  { %v8609_v34 = vpop.xlane.xlu1 %8608  ;;  %v8312_v61 = vadd.f32 %v8248_v63, %v13370_v37  ;;  %v8915_v36 = vsel %vm8525_vm2, %v11607_v38, 0.0  ;;  %v13823_v9 = vsel %vm8525_vm2, %v8311_v19, -inf }
 0xbad   :  { %v8798_v43 = vmul.f32 1.442695, %v13811_v46  ;;  %v13817_v33 = vsub.f32 %v13525_v48, %v8609_v34  ;;  %v14661_v34 = vld [vmem:[#allocation30_spill] sm:$0xff] }
 0xbae   :  { %v13831_v19 = vsel %vm8525_vm2, %v8312_v61, -inf }
 0xbaf   :  { %11612 = vpow2.f32 %v8798_v43  ;;  %v8800_v7 = vmul.f32 1.442695, %v13817_v33  ;;  %v8066_v0 = vpop.f32.mrb[28].mxu0  ;;  %8984 = vadd.xlane.f32.xlu1 %v8915_v36  ;;  %8678 = vmax.xlane.f32.xlu0 %v13823_v9 }
 0xbb0   :  { %v8249_v37 = vmul.f32 %v13453_v58, %v8066_v0  ;;  %v8068_v32 = vpop.f32.mrb[29].mxu0 }
 0xbb1   :  { %v11609_v63 = vpop.eup %11608  ;;  %11614 = vpow2.f32 %v8800_v7  ;;  %v8069_v48 = vpop.f32.mrb[30].mxu0  ;;  %v14663_v32 = vld [vmem:[#allocation28_spill] sm:$0xff] }
 0xbb2   :  { %v8250_v60 = vmul.f32 %v13453_v58, %v8069_v48  ;;  %v8071_v47 = vpop.f32.mrb[31].mxu0  ;;  %v8611_v62 = vpop.xlane.xlu0 %8610  ;;  %v8916_v38 = vsel %vm8525_vm2, %v11609_v63, 0.0  ;;  %v8313_v43 = vadd.f32 %v8249_v37, %v14661_v34 }
 0xbb3   :  { %v11611_v36 = vpop.eup %11610  ;;  %v13837_v0 = vsub.f32 %v13533_v55, %v8611_v62  ;;  %8680 = vmax.xlane.f32.xlu1 %v13831_v19  ;;  %8986 = vadd.xlane.f32.xlu0 %v8916_v38 }
 0xbb4   :  { %v8613_v7 = vpop.xlane.xlu1 %8612  ;;  %v8314_v48 = vadd.f32 %v8250_v60, %v14663_v32  ;;  %v8917_v63 = vsel %vm8525_vm2, %v11611_v36, 0.0  ;;  %v13849_v37 = vsel %vm8525_vm2, %v8313_v43, -inf }
 0xbb5   :  { %14662 = vst [vmem:[#allocation24_spill] sm:$0xff] %v13837_v0  ;;  %v8802_v47 = vmul.f32 1.442695, %v13837_v0  ;;  %v13843_v61 = vsub.f32 %v13539_v35, %v8613_v7 }
 0xbb6   :  { %v13857_v43 = vsel %vm8525_vm2, %v8314_v48, -inf }
 0xbb7   :  { %14664 = vst [vmem:[#allocation25_spill] sm:$0xff] %v13843_v61  ;;  %11616 = vpow2.f32 %v8802_v47  ;;  %v8804_v55 = vmul.f32 1.442695, %v13843_v61  ;;  %v8074_v62 = vpop.f32.mrb[32].mxu0  ;;  %8988 = vadd.xlane.f32.xlu1 %v8917_v63  ;;  %8682 = vmax.xlane.f32.xlu0 %v13849_v37  ;;  %v14665_v63 = vld [vmem:[#allocation29_spill] sm:$0xff] }
 0xbb8   :  { %v8251_v60 = vmul.f32 %v13453_v58, %v8074_v62  ;;  %v8076_v38 = vpop.f32.mrb[33].mxu0 }
 0xbb9   :  { %v11613_v34 = vpop.eup %11612  ;;  %11618 = vpow2.f32 %v8804_v55  ;;  %v8077_v35 = vpop.f32.mrb[34].mxu0  ;;  %v14667_v38 = vld [vmem:[#allocation31_spill] sm:$0xff] }
 0xbba   :  { %v8252_v7 = vmul.f32 %v13453_v58, %v8077_v35  ;;  %v8079_v36 = vpop.f32.mrb[35].mxu0  ;;  %v8615_v32 = vpop.xlane.xlu0 %8614  ;;  %v8918_v47 = vsel %vm8525_vm2, %v11613_v34, 0.0  ;;  %v8315_v61 = vadd.f32 %v8251_v60, %v14665_v63 }
 0xbbb   :  { %v11615_v0 = vpop.eup %11614  ;;  %v13863_v62 = vsub.f32 %v13547_v21, %v8615_v32  ;;  %8684 = vmax.xlane.f32.xlu1 %v13857_v43  ;;  %8990 = vadd.xlane.f32.xlu0 %v8918_v47 }
 0xbbc   :  { %v8617_v55 = vpop.xlane.xlu1 %8616  ;;  %v8316_v35 = vadd.f32 %v8252_v7, %v14667_v38  ;;  %v8919_v34 = vsel %vm8525_vm2, %v11615_v0, 0.0  ;;  %v13875_v60 = vsel %vm8525_vm2, %v8315_v61, -inf }
 0xbbd   :  { %14666 = vst [vmem:[#allocation27_spill] sm:$0xff] %v13863_v62  ;;  %v8806_v36 = vmul.f32 1.442695, %v13863_v62  ;;  %v13869_v48 = vsub.f32 %v13553_v5, %v8617_v55 }
 0xbbe   :  { %v13883_v61 = vsel %vm8525_vm2, %v8316_v35, -inf }
 0xbbf   :  { %14668 = vst [vmem:[#allocation30_spill] sm:$0xff] %v13869_v48  ;;  %11620 = vpow2.f32 %v8806_v36  ;;  %v8808_v21 = vmul.f32 1.442695, %v13869_v48  ;;  %v8082_v32 = vpop.f32.mrb[36].mxu0  ;;  %8992 = vadd.xlane.f32.xlu1 %v8919_v34  ;;  %8686 = vmax.xlane.f32.xlu0 %v13875_v60  ;;  %v14669_v34 = vld [vmem:[#allocation13_spill] sm:$0xff] }
 0xbc0   :  { %v8253_v7 = vmul.f32 %v13453_v58, %v8082_v32  ;;  %v8084_v47 = vpop.f32.mrb[37].mxu0 }
 0xbc1   :  { %v11617_v63 = vpop.eup %11616  ;;  %11622 = vpow2.f32 %v8808_v21  ;;  %v8085_v5 = vpop.f32.mrb[38].mxu0  ;;  %v14671_v47 = vld [vmem:[#allocation14_spill] sm:$0xff] }
 0xbc2   :  { %v8254_v55 = vmul.f32 %v13453_v58, %v8085_v5  ;;  %v8087_v0 = vpop.f32.mrb[39].mxu0  ;;  %v8619_v38 = vpop.xlane.xlu0 %8618  ;;  %v8920_v36 = vsel %vm8525_vm2, %v11617_v63, 0.0  ;;  %v8317_v48 = vadd.f32 %v8253_v7, %v14669_v34 }
 0xbc3   :  { %v11619_v62 = vpop.eup %11618  ;;  %v13889_v32 = vsub.f32 %v13561_v31, %v8619_v38  ;;  %8688 = vmax.xlane.f32.xlu1 %v13883_v61  ;;  %8994 = vadd.xlane.f32.xlu0 %v8920_v36 }
 0xbc4   :  { %v8621_v21 = vpop.xlane.xlu1 %8620  ;;  %v8318_v5 = vadd.f32 %v8254_v55, %v14671_v47  ;;  %v8921_v63 = vsel %vm8525_vm2, %v11619_v62, 0.0  ;;  %v13901_v7 = vsel %vm8525_vm2, %v8317_v48, -inf }
 0xbc5   :  { %14670 = vst [vmem:[#allocation28_spill] sm:$0xff] %v13889_v32  ;;  %v8810_v0 = vmul.f32 1.442695, %v13889_v32  ;;  %v13895_v35 = vsub.f32 %v13567_v44, %v8621_v21 }
 0xbc6   :  { %v13909_v48 = vsel %vm8525_vm2, %v8318_v5, -inf }
 0xbc7   :  { %14672 = vst [vmem:[#allocation29_spill] sm:$0xff] %v13895_v35  ;;  %11624 = vpow2.f32 %v8810_v0  ;;  %v8812_v31 = vmul.f32 1.442695, %v13895_v35  ;;  %v8090_v38 = vpop.f32.mrb[40].mxu0  ;;  %8996 = vadd.xlane.f32.xlu1 %v8921_v63  ;;  %8690 = vmax.xlane.f32.xlu0 %v13901_v7  ;;  %v14673_v63 = vld [vmem:[#allocation15_spill] sm:$0xff] }
 0xbc8   :  { %v8255_v55 = vmul.f32 %v13453_v58, %v8090_v38  ;;  %v8092_v36 = vpop.f32.mrb[41].mxu0 }
 0xbc9   :  { %v11621_v34 = vpop.eup %11620  ;;  %11626 = vpow2.f32 %v8812_v31  ;;  %v8093_v44 = vpop.f32.mrb[42].mxu0  ;;  %v14675_v36 = vld [vmem:[#allocation18_spill] sm:$0xff] }
 0xbca   :  { %v8256_v21 = vmul.f32 %v13453_v58, %v8093_v44  ;;  %v8095_v62 = vpop.f32.mrb[43].mxu0  ;;  %v8623_v47 = vpop.xlane.xlu0 %8622  ;;  %v8922_v0 = vsel %vm8525_vm2, %v11621_v34, 0.0  ;;  %v8319_v35 = vadd.f32 %v8255_v55, %v14673_v63 }
 0xbcb   :  { %v11623_v32 = vpop.eup %11622  ;;  %v13915_v38 = vsub.f32 %v13575_v52, %v8623_v47  ;;  %8692 = vmax.xlane.f32.xlu1 %v13909_v48  ;;  %8998 = vadd.xlane.f32.xlu0 %v8922_v0 }
 0xbcc   :  { %v8625_v31 = vpop.xlane.xlu1 %8624  ;;  %v8320_v44 = vadd.f32 %v8256_v21, %v14675_v36  ;;  %v8923_v34 = vsel %vm8525_vm2, %v11623_v32, 0.0  ;;  %v13927_v55 = vsel %vm8525_vm2, %v8319_v35, -inf }
 0xbcd   :  { %14674 = vst [vmem:[#allocation31_spill] sm:$0xff] %v13915_v38  ;;  %v8814_v62 = vmul.f32 1.442695, %v13915_v38  ;;  %v13921_v5 = vsub.f32 %v13581_v22, %v8625_v31 }
 0xbce   :  { %v13935_v35 = vsel %vm8525_vm2, %v8320_v44, -inf }
 0xbcf   :  { %14676 = vst [vmem:[#allocation13_spill] sm:$0xff] %v13921_v5  ;;  %11628 = vpow2.f32 %v8814_v62  ;;  %v8816_v52 = vmul.f32 1.442695, %v13921_v5  ;;  %v8098_v47 = vpop.f32.mrb[44].mxu0  ;;  %9000 = vadd.xlane.f32.xlu1 %v8923_v34  ;;  %8694 = vmax.xlane.f32.xlu0 %v13927_v55  ;;  %14677 = vst [vmem:[#allocation14_spill] sm:$0xff] %v13935_v35  ;;  %v14678_v34 = vld [vmem:[#allocation16_spill] sm:$0xff] }
 0xbd0   :  { %v8257_v21 = vmul.f32 %v13453_v58, %v8098_v47  ;;  %v8100_v0 = vpop.f32.mrb[45].mxu0 }
 0xbd1   :  { %v11625_v63 = vpop.eup %11624  ;;  %11630 = vpow2.f32 %v8816_v52  ;;  %v8101_v22 = vpop.f32.mrb[46].mxu0  ;;  %v14680_v0 = vld [vmem:[#allocation17_spill] sm:$0xff] }
 0xbd2   :  { %v8258_v31 = vmul.f32 %v13453_v58, %v8101_v22  ;;  %v8103_v32 = vpop.f32.mrb[47].mxu0  ;;  %v8627_v36 = vpop.xlane.xlu0 %8626  ;;  %v8924_v62 = vsel %vm8525_vm2, %v11625_v63, 0.0  ;;  %v8321_v5 = vadd.f32 %v8257_v21, %v14678_v34 }
 0xbd3   :  { %v11627_v38 = vpop.eup %11626  ;;  %v13941_v47 = vsub.f32 %v13589_v11, %v8627_v36  ;;  %8696 = vmax.xlane.f32.xlu1 %v13935_v35  ;;  %9002 = vadd.xlane.f32.xlu0 %v8924_v62 }
 0xbd4   :  { %v8629_v52 = vpop.xlane.xlu1 %8628  ;;  %v8322_v22 = vadd.f32 %v8258_v31, %v14680_v0  ;;  %v8925_v63 = vsel %vm8525_vm2, %v11627_v38, 0.0  ;;  %v13953_v21 = vsel %vm8525_vm2, %v8321_v5, -inf }
 0xbd5   :  { %14679 = vst [vmem:[#allocation15_spill] sm:$0xff] %v13941_v47  ;;  %v8818_v32 = vmul.f32 1.442695, %v13941_v47  ;;  %v13947_v44 = vsub.f32 %v13595_v54, %v8629_v52  ;;  %14682 = vst [vmem:[#allocation16_spill] sm:$0xff] %v13953_v21 }
 0xbd6   :  { %v13961_v5 = vsel %vm8525_vm2, %v8322_v22, -inf }
 0xbd7   :  { %14681 = vst [vmem:[#allocation18_spill] sm:$0xff] %v13947_v44  ;;  %11632 = vpow2.f32 %v8818_v32  ;;  %v8820_v11 = vmul.f32 1.442695, %v13947_v44  ;;  %v8106_v36 = vpop.f32.mrb[48].mxu0  ;;  %9004 = vadd.xlane.f32.xlu1 %v8925_v63  ;;  %8698 = vmax.xlane.f32.xlu0 %v13953_v21  ;;  %14683 = vst [vmem:[#allocation17_spill] sm:$0xff] %v13961_v5  ;;  %v14684_v32 = vld [vmem:[#allocation19_spill] sm:$0xff] }
 0xbd8   :  { %v8259_v31 = vmul.f32 %v13453_v58, %v8106_v36  ;;  %v8108_v62 = vpop.f32.mrb[49].mxu0  ;;  %v14685_v36 = vld [vmem:[#allocation22_spill] sm:$0xff] }
 0xbd9   :  { %v11629_v34 = vpop.eup %11628  ;;  %11634 = vpow2.f32 %v8820_v11  ;;  %v8109_v54 = vpop.f32.mrb[50].mxu0 }
 0xbda   :  { %v8260_v52 = vmul.f32 %v13453_v58, %v8109_v54  ;;  %v8111_v38 = vpop.f32.mrb[51].mxu0  ;;  %v8926_v0 = vsel %vm8525_vm2, %v11629_v34, 0.0  ;;  %v8323_v63 = vadd.f32 %v8259_v31, %v14684_v32  ;;  %v8631_v34 = vpop.xlane.xlu0 %8630 }
 0xbdb   :  { %v11631_v44 = vpop.eup %11630  ;;  %8700 = vmax.xlane.f32.xlu1 %v13961_v5  ;;  %9006 = vadd.xlane.f32.xlu0 %v8926_v0  ;;  %v13985_v21 = vsub.f32 %v13603_v14, %v8631_v34 }
 0xbdc   :  { %v8324_v62 = vadd.f32 %v8260_v52, %v14685_v36  ;;  %v8927_v11 = vsel %vm8525_vm2, %v11631_v44, 0.0  ;;  %v13972_v54 = vsel %vm8525_vm2, %v8323_v63, -inf  ;;  %v8633_v0 = vpop.xlane.xlu1 %8632 }
 0xbdd   :  { %14686 = vst [vmem:[#allocation19_spill] sm:$0xff] %v13972_v54  ;;  %v8822_v14 = vmul.f32 1.442695, %v13985_v21 }
 0xbde   :  { %v13979_v44 = vsel %vm8525_vm2, %v8324_v62, -inf }
 0xbdf   :  { %v8114_v22 = vpop.f32.mrb[52].mxu0  ;;  %9008 = vadd.xlane.f32.xlu1 %v8927_v11  ;;  %8702 = vmax.xlane.f32.xlu0 %v13972_v54  ;;  %v14687_v11 = vld [vmem:[#allocation20_spill] sm:$0xff]  ;;  %11636 = vpow2.f32 %v8822_v14 }
 0xbe0   :  { %v8261_v31 = vmul.f32 %v13453_v58, %v8114_v22  ;;  %v8116_v38 = vpop.f32.mrb[53].mxu0 }
 0xbe1   :  { %v11633_v32 = vpop.eup %11632  ;;  %v8117_v47 = vpop.f32.mrb[54].mxu0  ;;  %v14688_v38 = vld [vmem:[#allocation21_spill] sm:$0xff] }
 0xbe2   :  { %v8262_v52 = vmul.f32 %v13453_v58, %v8117_v47  ;;  %v8119_v36 = vpop.f32.mrb[55].mxu0  ;;  %v8928_v63 = vsel %vm8525_vm2, %v11633_v32, 0.0  ;;  %v8325_v5 = vadd.f32 %v8261_v31, %v14687_v11  ;;  %v8635_v22 = vpop.xlane.xlu0 %8634 }
 0xbe3   :  { %v11635_v54 = vpop.eup %11634  ;;  %8704 = vmax.xlane.f32.xlu1 %v13979_v44  ;;  %9010 = vadd.xlane.f32.xlu0 %v8928_v63  ;;  %v13990_v36 = vsub.f32 %v13609_v45, %v8633_v0  ;;  %v14000_v34 = vsub.f32 %v13617_v53, %v8635_v22 }
 0xbe4   :  { %v8326_v47 = vadd.f32 %v8262_v52, %v14688_v38  ;;  %v8637_v62 = vpop.xlane.xlu1 %8636  ;;  %v8929_v35 = vsel %vm8525_vm2, %v11635_v54, 0.0  ;;  %v13996_v31 = vsel %vm8525_vm2, %v8325_v5, -inf }
 0xbe5   :  { %v8824_v52 = vmul.f32 1.442695, %v13990_v36  ;;  %v14006_v54 = vsub.f32 %v13623_v23, %v8637_v62  ;;  %v8826_v22 = vmul.f32 1.442695, %v14000_v34 }
 0xbe6   :  { %v14011_v53 = vsel %vm8525_vm2, %v8326_v47, -inf }
 0xbe7   :  { %v8122_v32 = vpop.f32.mrb[56].mxu0  ;;  %9012 = vadd.xlane.f32.xlu1 %v8929_v35  ;;  %8706 = vmax.xlane.f32.xlu0 %v13996_v31  ;;  %11638 = vpow2.f32 %v8824_v52  ;;  %v8828_v47 = vmul.f32 1.442695, %v14006_v54 }
 0xbe8   :  { %v8263_v45 = vmul.f32 %v13453_v58, %v8122_v32  ;;  %v8124_v0 = vpop.f32.mrb[57].mxu0  ;;  %11640 = vpow2.f32 %v8826_v22 }
 0xbe9   :  { %v8125_v63 = vpop.f32.mrb[58].mxu0  ;;  %v14690_v0 = vld [vmem:[#allocation23_spill] sm:$0xff]  ;;  %11642 = vpow2.f32 %v8828_v47 }
 0xbea   :  { %v8264_v5 = vmul.f32 %v13453_v58, %v8125_v63  ;;  %v8127_v11 = vpop.f32.mrb[59].mxu0  ;;  %v8639_v38 = vpop.xlane.xlu0 %8638  ;;  %v8327_v35 = vadd.f32 %v8263_v45, %v13438_v51 }
 0xbeb   :  { %v14016_v32 = vsub.f32 %v13631_v1, %v8639_v38  ;;  %8708 = vmax.xlane.f32.xlu1 %v14011_v53 }
 0xbec   :  { %v8641_v23 = vpop.xlane.xlu1 %8640  ;;  %v14021_v62 = vsel %vm8525_vm2, %v8327_v35, -inf  ;;  %v8328_v63 = vadd.f32 %v8264_v5, %v14690_v0 }
 0xbed   :  { %14689 = vst [vmem:[#allocation22_spill] sm:$0xff] %v14016_v32  ;;  %v14026_v51 = vsub.f32 %v13637_v50, %v8641_v23  ;;  %8710 = vmax.xlane.f32.xlu0 %v14021_v62  ;;  %v8830_v14 = vmul.f32 1.442695, %v14016_v32 }
 0xbee   :  { %v14031_v1 = vsel %vm8525_vm2, %v8328_v63, -inf }
 0xbef   :  { %v8130_v45 = vpop.f32.mrb[60].mxu0  ;;  %8712 = vmax.xlane.f32.xlu1 %v14031_v1  ;;  %v8832_v11 = vmul.f32 1.442695, %v14026_v51  ;;  %11644 = vpow2.f32 %v8830_v14 }
 0xbf0   :  { %v8265_v5 = vmul.f32 %v13453_v58, %v8130_v45  ;;  %v8132_v52 = vpop.f32.mrb[61].mxu0  ;;  %v11637_v45 = vpop.eup %11636 }
 0xbf1   :  { %v8133_v50 = vpop.f32.mrb[62].mxu0  ;;  %11646 = vpow2.f32 %v8832_v11 }
 0xbf2   :  { %v8266_v38 = vmul.f32 %v13453_v58, %v8133_v50  ;;  %v8135_v35 = vpop.f32.mrb[63].mxu0  ;;  %v8643_v23 = vpop.xlane.xlu0 %8642  ;;  %v8329_v0 = vadd.f32 %v8265_v5, %v13447_v49 }
 0xbf3   :  { %v14040_v22 = vsub.f32 %v13645_v17, %v8643_v23  ;;  %v11639_v17 = vpop.eup %11638 }
 0xbf4   :  { %v8645_v63 = vpop.xlane.xlu1 %8644  ;;  %v14044_v32 = vsel %vm8525_vm2, %v8329_v0, -inf  ;;  %v8330_v47 = vadd.f32 %v8266_v38, %v13451_v42  ;;  %v8930_v42 = vsel %vm8525_vm2, %v11637_v45, 0.0  ;;  %v11641_v5 = vpop.eup %11640  ;;  %v8931_v11 = vsel %vm8525_vm2, %v11639_v17, 0.0 }
 0xbf5   :  { %v8834_v52 = vmul.f32 1.442695, %v14040_v22  ;;  %v14049_v58 = vsub.f32 %v13651_v56, %v8645_v63  ;;  %8714 = vmax.xlane.f32.xlu0 %v14044_v32  ;;  %v11643_v50 = vpop.eup %11642  ;;  %v8932_v23 = vsel %vm8525_vm2, %v11641_v5, 0.0 }
 0xbf6   :  { %v14054_v49 = vsel %vm8525_vm2, %v8330_v47, -inf  ;;  %v8933_v45 = vsel %vm8525_vm2, %v11643_v50, 0.0 }
 0xbf7   :  { %11648 = vpow2.f32 %v8834_v52  ;;  %v8836_v14 = vmul.f32 1.442695, %v14049_v58  ;;  %8716 = vmax.xlane.f32.xlu1 %v14054_v49 }
 0xbf9   :  { %11650 = vpow2.f32 %v8836_v14  ;;  %9014 = vadd.xlane.f32.xlu0 %v8930_v42  ;;  %v11645_v0 = vpop.eup %11644 }
 0xbfa   :  { %v8647_v56 = vpop.xlane.xlu0 %8646  ;;  %v8934_v17 = vsel %vm8525_vm2, %v11645_v0, 0.0 }
 0xbfb   :  { %v14063_v38 = vsub.f32 %v13659_v13, %v8647_v56  ;;  %9016 = vadd.xlane.f32.xlu1 %v8931_v11  ;;  %v11647_v52 = vpop.eup %11646 }
 0xbfc   :  { %v8649_v35 = vpop.xlane.xlu1 %8648 }
 0xbfd   :  { %v8838_v63 = vmul.f32 1.442695, %v14063_v38  ;;  %v14069_v47 = vsub.f32 %v13665_v57, %v8649_v35  ;;  %9018 = vadd.xlane.f32.xlu0 %v8932_v23  ;;  %v8935_v57 = vsel %vm8525_vm2, %v11647_v52, 0.0 }
 0xbff   :  { %11652 = vpow2.f32 %v8838_v63  ;;  %v8840_v13 = vmul.f32 1.442695, %v14069_v47  ;;  %9020 = vadd.xlane.f32.xlu1 %v8933_v45 }
 0xc01   :  { %v11649_v14 = vpop.eup %11648  ;;  %11654 = vpow2.f32 %v8840_v13  ;;  %9022 = vadd.xlane.f32.xlu0 %v8934_v17 }
 0xc02   :  { %v8651_v42 = vpop.xlane.xlu0 %8650  ;;  %v8936_v50 = vsel %vm8525_vm2, %v11649_v14, 0.0 }
 0xc03   :  { %v11651_v5 = vpop.eup %11650  ;;  %v14079_v56 = vsub.f32 %v13673_v26, %v8651_v42  ;;  %9024 = vadd.xlane.f32.xlu1 %v8935_v57 }
 0xc04   :  { %v8653_v11 = vpop.xlane.xlu1 %8652  ;;  %v8937_v0 = vsel %vm8525_vm2, %v11651_v5, 0.0 }
 0xc05   :  { %v8842_v35 = vmul.f32 1.442695, %v14079_v56  ;;  %v14085_v23 = vsub.f32 %v13679_v41, %v8653_v11  ;;  %9026 = vadd.xlane.f32.xlu0 %v8936_v50 }
 0xc07   :  { %11656 = vpow2.f32 %v8842_v35  ;;  %v8844_v63 = vmul.f32 1.442695, %v14085_v23  ;;  %9028 = vadd.xlane.f32.xlu1 %v8937_v0 }
 0xc09   :  { %v11653_v26 = vpop.eup %11652  ;;  %11658 = vpow2.f32 %v8844_v63 }
 0xc0a   :  { %v8655_v45 = vpop.xlane.xlu0 %8654  ;;  %v8938_v52 = vsel %vm8525_vm2, %v11653_v26, 0.0 }
 0xc0b   :  { %v11655_v13 = vpop.eup %11654  ;;  %v14093_v17 = vsub.f32 %v13687_v18, %v8655_v45  ;;  %9030 = vadd.xlane.f32.xlu0 %v8938_v52 }
 0xc0c   :  { %v8657_v41 = vpop.xlane.xlu1 %8656  ;;  %v8939_v14 = vsel %vm8525_vm2, %v11655_v13, 0.0 }
 0xc0d   :  { %v8846_v42 = vmul.f32 1.442695, %v14093_v17  ;;  %v14099_v57 = vsub.f32 %v13693_v28, %v8657_v41  ;;  %9032 = vadd.xlane.f32.xlu1 %v8939_v14 }
 0xc0f   :  { %11660 = vpow2.f32 %v8846_v42  ;;  %v8848_v5 = vmul.f32 1.442695, %v14099_v57 }
 0xc11   :  { %v11657_v11 = vpop.eup %11656  ;;  %11662 = vpow2.f32 %v8848_v5 }
 0xc12   :  { %v8659_v50 = vpop.xlane.xlu0 %8658  ;;  %v8940_v18 = vsel %vm8525_vm2, %v11657_v11, 0.0 }
 0xc13   :  { %v11659_v35 = vpop.eup %11658  ;;  %v14105_v0 = vsub.f32 %v13701_v16, %v8659_v50  ;;  %9034 = vadd.xlane.f32.xlu0 %v8940_v18 }
 0xc14   :  { %v8661_v63 = vpop.xlane.xlu1 %8660  ;;  %v8941_v28 = vsel %vm8525_vm2, %v11659_v35, 0.0 }
 0xc15   :  { %v8850_v26 = vmul.f32 1.442695, %v14105_v0  ;;  %v14111_v45 = vsub.f32 %v13707_v8, %v8661_v63  ;;  %9036 = vadd.xlane.f32.xlu1 %v8941_v28 }
 0xc17   :  { %11664 = vpow2.f32 %v8850_v26  ;;  %v8852_v52 = vmul.f32 1.442695, %v14111_v45 }
 0xc19   :  { %v11661_v13 = vpop.eup %11660  ;;  %11666 = vpow2.f32 %v8852_v52 }
 0xc1a   :  { %v8663_v41 = vpop.xlane.xlu0 %8662  ;;  %v8942_v16 = vsel %vm8525_vm2, %v11661_v13, 0.0 }
 0xc1b   :  { %v11663_v14 = vpop.eup %11662  ;;  %v14117_v42 = vsub.f32 %v13718_v15, %v8663_v41  ;;  %9038 = vadd.xlane.f32.xlu0 %v8942_v16 }
 0xc1c   :  { %v8665_v5 = vpop.xlane.xlu1 %8664  ;;  %v8943_v8 = vsel %vm8525_vm2, %v11663_v14, 0.0 }
 0xc1d   :  { %v8854_v11 = vmul.f32 1.442695, %v14117_v42  ;;  %v14123_v50 = vsub.f32 %v13725_v4, %v8665_v5  ;;  %9040 = vadd.xlane.f32.xlu1 %v8943_v8 }
 0xc1f   :  { %11668 = vpow2.f32 %v8854_v11  ;;  %v8856_v18 = vmul.f32 1.442695, %v14123_v50 }
 0xc21   :  { %v11665_v35 = vpop.eup %11664  ;;  %11670 = vpow2.f32 %v8856_v18 }
 0xc22   :  { %v8667_v63 = vpop.xlane.xlu0 %8666  ;;  %v8944_v15 = vsel %vm8525_vm2, %v11665_v35, 0.0 }
 0xc23   :  { %v11667_v28 = vpop.eup %11666  ;;  %v14129_v26 = vsub.f32 %v13740_v12, %v8667_v63  ;;  %9042 = vadd.xlane.f32.xlu0 %v8944_v15 }
 0xc24   :  { %v8669_v52 = vpop.xlane.xlu1 %8668  ;;  %v8945_v4 = vsel %vm8525_vm2, %v11667_v28, 0.0 }
 0xc25   :  { %v8858_v13 = vmul.f32 1.442695, %v14129_v26  ;;  %v14135_v41 = vsub.f32 %v13747_v24, %v8669_v52  ;;  %9044 = vadd.xlane.f32.xlu1 %v8945_v4 }
 0xc27   :  { %11672 = vpow2.f32 %v8858_v13  ;;  %v8860_v16 = vmul.f32 1.442695, %v14135_v41 }
 0xc28   :  { %v8975_v14 = vpop.xlane.xlu0 %8974 }
 0xc29   :  { %v11669_v5 = vpop.eup %11668  ;;  %11674 = vpow2.f32 %v8860_v16 }
 0xc2a   :  { %11676 = vlog2.f32 %v8975_v14  ;;  %v8946_v12 = vsel %vm8525_vm2, %v11669_v5, 0.0 }
 0xc2b   :  { %v11671_v8 = vpop.eup %11670  ;;  %9046 = vadd.xlane.f32.xlu0 %v8946_v12 }
 0xc2c   :  { %v8977_v11 = vpop.xlane.xlu1 %8976  ;;  %v8671_v18 = vpop.xlane.xlu0 %8670  ;;  %v8947_v35 = vsel %vm8525_vm2, %v11671_v8, 0.0 }
 0xc2d   :  { %11678 = vlog2.f32 %v8977_v11  ;;  %v14143_v24 = vsub.f32 %v13769_v20, %v8671_v18  ;;  %9048 = vadd.xlane.f32.xlu1 %v8947_v35 }
 0xc2f   :  { %v8862_v63 = vmul.f32 1.442695, %v14143_v24 }
 0xc30   :  { %v8673_v15 = vpop.xlane.xlu1 %8672  ;;  %v8979_v28 = vpop.xlane.xlu0 %8978 }
 0xc31   :  { %v11673_v52 = vpop.eup %11672  ;;  %11680 = vpow2.f32 %v8862_v63  ;;  %v14147_v4 = vsub.f32 %v13781_v27, %v8673_v15 }
 0xc32   :  { %11682 = vlog2.f32 %v8979_v28  ;;  %v8948_v13 = vsel %vm8525_vm2, %v11673_v52, 0.0 }
 0xc33   :  { %v11675_v16 = vpop.eup %11674  ;;  %v8864_v14 = vmul.f32 1.442695, %v14147_v4  ;;  %9050 = vadd.xlane.f32.xlu0 %v8948_v13 }
 0xc34   :  { %v11677_v20 = vpop.eup %11676  ;;  %v8981_v5 = vpop.xlane.xlu1 %8980  ;;  %v8949_v8 = vsel %vm8525_vm2, %v11675_v16, 0.0 }
 0xc35   :  { %v8675_v12 = vpop.xlane.xlu0 %8674  ;;  %v9103_v11 = vmul.f32 0.6931472, %v11677_v20  ;;  %11684 = vpow2.f32 %v8864_v14  ;;  %9052 = vadd.xlane.f32.xlu1 %v8949_v8 }
 0xc36   :  { %v14155_v18 = vsub.f32 %v13795_v29, %v8675_v12  ;;  %11686 = vlog2.f32 %v8981_v5 }
 0xc37   :  { %v11679_v27 = vpop.eup %11678  ;;  %v9230_v35 = vsub.f32 %v13714_v25, %v9103_v11 }
 0xc38   :  { %v8866_v63 = vmul.f32 1.442695, %v14155_v18  ;;  %v9105_v15 = vmul.f32 0.6931472, %v11679_v27  ;;  %v8677_v28 = vpop.xlane.xlu1 %8676 }
 0xc39   :  { %v8983_v52 = vpop.xlane.xlu0 %8982  ;;  %v9294_v13 = vsel %vm8525_vm2, %v9230_v35, 0.0  ;;  %v14162_v16 = vsub.f32 %v13805_v40, %v8677_v28 }
 0xc3a   :  { %11688 = vpow2.f32 %v8866_v63  ;;  %9358 = vst [vmem:[#allocation9] sm:$0xff] %v9294_v13  ;;  %v9231_v29 = vsub.f32 %v13728_v2, %v9105_v15 }
 0xc3b   :  { %11690 = vlog2.f32 %v8983_v52  ;;  %v11681_v14 = vpop.eup %11680  ;;  %v8868_v20 = vmul.f32 1.442695, %v14162_v16 }
 0xc3c   :  { %v11683_v25 = vpop.eup %11682  ;;  %v9295_v5 = vsel %vm8525_vm2, %v9231_v29, 0.0  ;;  %v8985_v12 = vpop.xlane.xlu1 %8984  ;;  %v8950_v11 = vsel %vm8525_vm2, %v11681_v14, 0.0 }
 0xc3d   :  { %v8679_v8 = vpop.xlane.xlu0 %8678  ;;  %9359 = vst [vmem:[#allocation9 + $0x8] sm:$0xff] %v9295_v5  ;;  %v9107_v27 = vmul.f32 0.6931472, %v11683_v25  ;;  %11692 = vpow2.f32 %v8868_v20  ;;  %9054 = vadd.xlane.f32.xlu0 %v8950_v11  ;;  %v14691_v20 = vld [vmem:[#allocation26_spill] sm:$0xff] }
 0xc3e   :  { %v14171_v40 = vsub.f32 %v13823_v9, %v8679_v8  ;;  %11694 = vlog2.f32 %v8985_v12 }
 0xc3f   :  { %v11685_v2 = vpop.eup %11684  ;;  %v9232_v35 = vsub.f32 %v13736_v6, %v9107_v27 }
 0xc40   :  { %v8870_v63 = vmul.f32 1.442695, %v14171_v40  ;;  %v11687_v15 = vpop.eup %11686  ;;  %v8681_v28 = vpop.xlane.xlu1 %8680  ;;  %v8951_v13 = vsel %vm8525_vm2, %v11685_v2, 0.0 }
 0xc41   :  { %v8987_v52 = vpop.xlane.xlu0 %8986  ;;  %v9296_v29 = vsel %vm8525_vm2, %v9232_v35, 0.0  ;;  %v9109_v14 = vmul.f32 0.6931472, %v11687_v15  ;;  %v14180_v9 = vsub.f32 %v13831_v19, %v8681_v28  ;;  %9056 = vadd.xlane.f32.xlu1 %v8951_v13 }
 0xc42   :  { %11696 = vpow2.f32 %v8870_v63  ;;  %9360 = vst [vmem:[#allocation9 + $0x10] sm:$0xff] %v9296_v29 }
 0xc43   :  { %11698 = vlog2.f32 %v8987_v52  ;;  %v9233_v25 = vsub.f32 %v14691_v20, %v9109_v14  ;;  %v8872_v5 = vmul.f32 1.442695, %v14180_v9 }
 0xc44   :  { %v11689_v6 = vpop.eup %11688  ;;  %v8989_v8 = vpop.xlane.xlu1 %8988 }
 0xc45   :  { %v11691_v12 = vpop.eup %11690  ;;  %v8683_v11 = vpop.xlane.xlu0 %8682  ;;  %v8952_v27 = vsel %vm8525_vm2, %v11689_v6, 0.0  ;;  %v9297_v2 = vsel %vm8525_vm2, %v9233_v25, 0.0  ;;  %11700 = vpow2.f32 %v8872_v5 }
 0xc46   :  { %v9111_v35 = vmul.f32 0.6931472, %v11691_v12  ;;  %v14189_v19 = vsub.f32 %v13849_v37, %v8683_v11  ;;  %9058 = vadd.xlane.f32.xlu0 %v8952_v27  ;;  %9361 = vst [vmem:[#allocation9 + $0x18] sm:$0xff] %v9297_v2  ;;  %11702 = vlog2.f32 %v8989_v8 }
 0xc47   :  { %v11693_v63 = vpop.eup %11692 }
 0xc48   :  { %v9234_v15 = vsub.f32 %v13760_v59, %v9111_v35  ;;  %v8874_v28 = vmul.f32 1.442695, %v14189_v19  ;;  %v11695_v52 = vpop.eup %11694  ;;  %v8685_v13 = vpop.xlane.xlu1 %8684  ;;  %v8953_v14 = vsel %vm8525_vm2, %v11693_v63, 0.0 }
 0xc49   :  { %v8991_v29 = vpop.xlane.xlu0 %8990  ;;  %v9113_v20 = vmul.f32 0.6931472, %v11695_v52  ;;  %v14198_v37 = vsub.f32 %v13857_v43, %v8685_v13  ;;  %9060 = vadd.xlane.f32.xlu1 %v8953_v14 }
 0xc4a   :  { %v9298_v6 = vsel %vm8525_vm2, %v9234_v15, 0.0  ;;  %11704 = vpow2.f32 %v8874_v28 }
 0xc4b   :  { %9362 = vst [vmem:[#allocation9 + $0x20] sm:$0xff] %v9298_v6  ;;  %11706 = vlog2.f32 %v8991_v29  ;;  %v9235_v25 = vsub.f32 %v13765_v3, %v9113_v20  ;;  %v8876_v5 = vmul.f32 1.442695, %v14198_v37 }
 0xc4c   :  { %v11697_v59 = vpop.eup %11696  ;;  %v8993_v8 = vpop.xlane.xlu1 %8992 }
 0xc4d   :  { %v11699_v12 = vpop.eup %11698  ;;  %v8687_v11 = vpop.xlane.xlu0 %8686  ;;  %v8954_v27 = vsel %vm8525_vm2, %v11697_v59, 0.0  ;;  %v9299_v2 = vsel %vm8525_vm2, %v9235_v25, 0.0  ;;  %11708 = vpow2.f32 %v8876_v5 }
 0xc4e   :  { %v9115_v35 = vmul.f32 0.6931472, %v11699_v12  ;;  %v14207_v43 = vsub.f32 %v13875_v60, %v8687_v11  ;;  %9062 = vadd.xlane.f32.xlu0 %v8954_v27  ;;  %9363 = vst [vmem:[#allocation9 + $0x28] sm:$0xff] %v9299_v2  ;;  %11710 = vlog2.f32 %v8993_v8 }
 0xc4f   :  { %v11701_v3 = vpop.eup %11700 }
 0xc50   :  { %v9236_v63 = vsub.f32 %v13785_v30, %v9115_v35  ;;  %v8878_v15 = vmul.f32 1.442695, %v14207_v43  ;;  %v11703_v28 = vpop.eup %11702  ;;  %v8689_v52 = vpop.xlane.xlu1 %8688  ;;  %v8955_v29 = vsel %vm8525_vm2, %v11701_v3, 0.0 }
 0xc51   :  { %v8995_v13 = vpop.xlane.xlu0 %8994  ;;  %v9117_v6 = vmul.f32 0.6931472, %v11703_v28  ;;  %v14216_v60 = vsub.f32 %v13883_v61, %v8689_v52  ;;  %9064 = vadd.xlane.f32.xlu1 %v8955_v29 }
 0xc52   :  { %v9300_v14 = vsel %vm8525_vm2, %v9236_v63, 0.0  ;;  %11712 = vpow2.f32 %v8878_v15 }
 0xc53   :  { %9364 = vst [vmem:[#allocation9 + $0x30] sm:$0xff] %v9300_v14  ;;  %11714 = vlog2.f32 %v8995_v13  ;;  %v9237_v20 = vsub.f32 %v13791_v39, %v9117_v6  ;;  %v8880_v59 = vmul.f32 1.442695, %v14216_v60 }
 0xc54   :  { %v11705_v30 = vpop.eup %11704  ;;  %v8997_v5 = vpop.xlane.xlu1 %8996 }
 0xc55   :  { %v11707_v25 = vpop.eup %11706  ;;  %v8691_v12 = vpop.xlane.xlu0 %8690  ;;  %v8956_v8 = vsel %vm8525_vm2, %v11705_v30, 0.0  ;;  %v9301_v11 = vsel %vm8525_vm2, %v9237_v20, 0.0  ;;  %11716 = vpow2.f32 %v8880_v59 }
 0xc56   :  { %v9119_v27 = vmul.f32 0.6931472, %v11707_v25  ;;  %v14225_v61 = vsub.f32 %v13901_v7, %v8691_v12  ;;  %9066 = vadd.xlane.f32.xlu0 %v8956_v8  ;;  %9365 = vst [vmem:[#allocation9 + $0x38] sm:$0xff] %v9301_v11  ;;  %11718 = vlog2.f32 %v8997_v5  ;;  %v14692_v12 = vld [vmem:[#allocation24_spill] sm:$0xff] }
 0xc57   :  { %v11709_v39 = vpop.eup %11708 }
 0xc58   :  { %v9238_v2 = vsub.f32 %v13811_v46, %v9119_v27  ;;  %v8882_v35 = vmul.f32 1.442695, %v14225_v61  ;;  %v11711_v3 = vpop.eup %11710  ;;  %v8693_v63 = vpop.xlane.xlu1 %8692  ;;  %v8957_v28 = vsel %vm8525_vm2, %v11709_v39, 0.0 }
 0xc59   :  { %v8999_v15 = vpop.xlane.xlu0 %8998  ;;  %v9121_v13 = vmul.f32 0.6931472, %v11711_v3  ;;  %v14234_v7 = vsub.f32 %v13909_v48, %v8693_v63  ;;  %9068 = vadd.xlane.f32.xlu1 %v8957_v28 }
 0xc5a   :  { %v9302_v52 = vsel %vm8525_vm2, %v9238_v2, 0.0  ;;  %11720 = vpow2.f32 %v8882_v35 }
 0xc5b   :  { %9366 = vst [vmem:[#allocation9 + $0x40] sm:$0xff] %v9302_v52  ;;  %11722 = vlog2.f32 %v8999_v15  ;;  %v9239_v29 = vsub.f32 %v13817_v33, %v9121_v13  ;;  %v8884_v14 = vmul.f32 1.442695, %v14234_v7  ;;  %v14694_v52 = vld [vmem:[#allocation25_spill] sm:$0xff] }
 0xc5c   :  { %v11713_v46 = vpop.eup %11712  ;;  %v9001_v30 = vpop.xlane.xlu1 %9000 }
 0xc5d   :  { %v11715_v6 = vpop.eup %11714  ;;  %v8695_v20 = vpop.xlane.xlu0 %8694  ;;  %v8958_v59 = vsel %vm8525_vm2, %v11713_v46, 0.0  ;;  %v9303_v25 = vsel %vm8525_vm2, %v9239_v29, 0.0  ;;  %11724 = vpow2.f32 %v8884_v14 }
 0xc5e   :  { %v9123_v5 = vmul.f32 0.6931472, %v11715_v6  ;;  %v14243_v48 = vsub.f32 %v13927_v55, %v8695_v20  ;;  %9070 = vadd.xlane.f32.xlu0 %v8958_v59  ;;  %9367 = vst [vmem:[#allocation9 + $0x48] sm:$0xff] %v9303_v25  ;;  %11726 = vlog2.f32 %v9001_v30  ;;  %v14693_v55 = vld [vmem:[#allocation14_spill] sm:$0xff]  ;;  %v14695_v25 = vld [vmem:[#allocation16_spill] sm:$0xff] }
 0xc5f   :  { %v11717_v33 = vpop.eup %11716 }
 0xc60   :  { %v9240_v8 = vsub.f32 %v14692_v12, %v9123_v5  ;;  %v8886_v11 = vmul.f32 1.442695, %v14243_v48  ;;  %v11719_v27 = vpop.eup %11718  ;;  %v8697_v39 = vpop.xlane.xlu1 %8696  ;;  %v8959_v35 = vsel %vm8525_vm2, %v11717_v33, 0.0  ;;  %v14696_v12 = vld [vmem:[#allocation27_spill] sm:$0xff] }
 0xc61   :  { %v9003_v2 = vpop.xlane.xlu0 %9002  ;;  %v9125_v63 = vmul.f32 0.6931472, %v11719_v27  ;;  %v14252_v15 = vsub.f32 %v14693_v55, %v8697_v39  ;;  %9072 = vadd.xlane.f32.xlu1 %v8959_v35  ;;  %v14697_v55 = vld [vmem:[#allocation17_spill] sm:$0xff] }
 0xc62   :  { %v9304_v3 = vsel %vm8525_vm2, %v9240_v8, 0.0  ;;  %11728 = vpow2.f32 %v8886_v11 }
 0xc63   :  { %9368 = vst [vmem:[#allocation9 + $0x50] sm:$0xff] %v9304_v3  ;;  %11730 = vlog2.f32 %v9003_v2  ;;  %v9241_v13 = vsub.f32 %v14694_v52, %v9125_v63  ;;  %v8888_v46 = vmul.f32 1.442695, %v14252_v15 }
 0xc64   :  { %v11721_v28 = vpop.eup %11720  ;;  %v9005_v14 = vpop.xlane.xlu1 %9004 }
 0xc65   :  { %v11723_v29 = vpop.eup %11722  ;;  %v8699_v6 = vpop.xlane.xlu0 %8698  ;;  %v8960_v30 = vsel %vm8525_vm2, %v11721_v28, 0.0  ;;  %v9305_v20 = vsel %vm8525_vm2, %v9241_v13, 0.0  ;;  %11732 = vpow2.f32 %v8888_v46  ;;  %v14698_v13 = vld [vmem:[#allocation30_spill] sm:$0xff] }
 0xc66   :  { %v9127_v59 = vmul.f32 0.6931472, %v11723_v29  ;;  %v14261_v5 = vsub.f32 %v14695_v25, %v8699_v6  ;;  %9074 = vadd.xlane.f32.xlu0 %v8960_v30  ;;  %9369 = vst [vmem:[#allocation9 + $0x58] sm:$0xff] %v9305_v20  ;;  %11734 = vlog2.f32 %v9005_v14 }
 0xc67   :  { %v11725_v33 = vpop.eup %11724 }
 0xc68   :  { %v9242_v8 = vsub.f32 %v14696_v12, %v9127_v59  ;;  %v8890_v11 = vmul.f32 1.442695, %v14261_v5  ;;  %v11727_v27 = vpop.eup %11726  ;;  %v8701_v39 = vpop.xlane.xlu1 %8700  ;;  %v8961_v35 = vsel %vm8525_vm2, %v11725_v33, 0.0  ;;  %v14699_v33 = vld [vmem:[#allocation19_spill] sm:$0xff] }
 0xc69   :  { %v9007_v2 = vpop.xlane.xlu0 %9006  ;;  %v9129_v63 = vmul.f32 0.6931472, %v11727_v27  ;;  %v14270_v28 = vsub.f32 %v14697_v55, %v8701_v39  ;;  %9076 = vadd.xlane.f32.xlu1 %v8961_v35 }
 0xc6a   :  { %v9306_v3 = vsel %vm8525_vm2, %v9242_v8, 0.0  ;;  %11736 = vpow2.f32 %v8890_v11  ;;  %v14700_v11 = vld [vmem:[#allocation28_spill] sm:$0xff] }
 0xc6b   :  { %9370 = vst [vmem:[#allocation9 + $0x60] sm:$0xff] %v9306_v3  ;;  %11738 = vlog2.f32 %v9007_v2  ;;  %v9243_v46 = vsub.f32 %v14698_v13, %v9129_v63  ;;  %v8892_v29 = vmul.f32 1.442695, %v14270_v28 }
 0xc6c   :  { %v11729_v52 = vpop.eup %11728  ;;  %v9009_v6 = vpop.xlane.xlu1 %9008 }
 0xc6d   :  { %v11731_v14 = vpop.eup %11730  ;;  %v8703_v30 = vpop.xlane.xlu0 %8702  ;;  %v8962_v20 = vsel %vm8525_vm2, %v11729_v52, 0.0  ;;  %v9307_v59 = vsel %vm8525_vm2, %v9243_v46, 0.0  ;;  %11740 = vpow2.f32 %v8892_v29  ;;  %v14701_v29 = vld [vmem:[#allocation29_spill] sm:$0xff] }
 0xc6e   :  { %v9131_v25 = vmul.f32 0.6931472, %v11731_v14  ;;  %v14279_v12 = vsub.f32 %v14699_v33, %v8703_v30  ;;  %9078 = vadd.xlane.f32.xlu0 %v8962_v20  ;;  %9371 = vst [vmem:[#allocation9 + $0x68] sm:$0xff] %v9307_v59  ;;  %11742 = vlog2.f32 %v9009_v6 }
 0xc6f   :  { %v11733_v8 = vpop.eup %11732 }
 0xc70   :  { %v9244_v27 = vsub.f32 %v14700_v11, %v9131_v25  ;;  %v8894_v39 = vmul.f32 1.442695, %v14279_v12  ;;  %v11735_v2 = vpop.eup %11734  ;;  %v8705_v35 = vpop.xlane.xlu1 %8704  ;;  %v8963_v63 = vsel %vm8525_vm2, %v11733_v8, 0.0 }
 0xc71   :  { %v9011_v3 = vpop.xlane.xlu0 %9010  ;;  %v9133_v52 = vmul.f32 0.6931472, %v11735_v2  ;;  %v14288_v13 = vsub.f32 %v13979_v44, %v8705_v35  ;;  %9080 = vadd.xlane.f32.xlu1 %v8963_v63 }
 0xc72   :  { %v9308_v55 = vsel %vm8525_vm2, %v9244_v27, 0.0  ;;  %11744 = vpow2.f32 %v8894_v39  ;;  %v14702_v27 = vld [vmem:[#allocation31_spill] sm:$0xff] }
 0xc73   :  { %9372 = vst [vmem:[#allocation9 + $0x70] sm:$0xff] %v9308_v55  ;;  %11746 = vlog2.f32 %v9011_v3  ;;  %v9245_v14 = vsub.f32 %v14701_v29, %v9133_v52  ;;  %v8896_v6 = vmul.f32 1.442695, %v14288_v13 }
 0xc74   :  { %v11737_v46 = vpop.eup %11736  ;;  %v9013_v20 = vpop.xlane.xlu1 %9012 }
 0xc75   :  { %v11739_v30 = vpop.eup %11738  ;;  %v8707_v59 = vpop.xlane.xlu0 %8706  ;;  %v8964_v25 = vsel %vm8525_vm2, %v11737_v46, 0.0  ;;  %v9309_v33 = vsel %vm8525_vm2, %v9245_v14, 0.0  ;;  %11748 = vpow2.f32 %v8896_v6  ;;  %v14703_v14 = vld [vmem:[#allocation13_spill] sm:$0xff] }
 0xc76   :  { %v9135_v8 = vmul.f32 0.6931472, %v11739_v30  ;;  %v14297_v44 = vsub.f32 %v13996_v31, %v8707_v59  ;;  %9082 = vadd.xlane.f32.xlu0 %v8964_v25  ;;  %9373 = vst [vmem:[#allocation9 + $0x78] sm:$0xff] %v9309_v33  ;;  %11750 = vlog2.f32 %v9013_v20 }
 0xc77   :  { %v11741_v11 = vpop.eup %11740 }
 0xc78   :  { %v9246_v39 = vsub.f32 %v14702_v27, %v9135_v8  ;;  %v8898_v2 = vmul.f32 1.442695, %v14297_v44  ;;  %v11743_v35 = vpop.eup %11742  ;;  %v8709_v3 = vpop.xlane.xlu1 %8708  ;;  %v8965_v63 = vsel %vm8525_vm2, %v11741_v11, 0.0 }
 0xc79   :  { %v9137_v52 = vmul.f32 0.6931472, %v11743_v35  ;;  %v14306_v31 = vsub.f32 %v14011_v53, %v8709_v3  ;;  %9084 = vadd.xlane.f32.xlu1 %v8965_v63 }
 0xc7a   :  { %v9310_v55 = vsel %vm8525_vm2, %v9246_v39, 0.0  ;;  %11752 = vpow2.f32 %v8898_v2  ;;  %v8711_v46 = vpop.xlane.xlu0 %8710 }
 0xc7b   :  { %9374 = vst [vmem:[#allocation9 + $0x80] sm:$0xff] %v9310_v55  ;;  %v9247_v6 = vsub.f32 %v14703_v14, %v9137_v52  ;;  %v8900_v30 = vmul.f32 1.442695, %v14306_v31  ;;  %v14311_v20 = vsub.f32 %v14021_v62, %v8711_v46  ;;  %v14704_v62 = vld [vmem:[#allocation15_spill] sm:$0xff] }
 0xc7c   :  { %v11745_v29 = vpop.eup %11744  ;;  %v8713_v25 = vpop.xlane.xlu1 %8712 }
 0xc7d   :  { %v11747_v59 = vpop.eup %11746  ;;  %v8966_v33 = vsel %vm8525_vm2, %v11745_v29, 0.0  ;;  %v9311_v53 = vsel %vm8525_vm2, %v9247_v6, 0.0  ;;  %11754 = vpow2.f32 %v8900_v30  ;;  %v8902_v11 = vmul.f32 1.442695, %v14311_v20  ;;  %v14705_v29 = vld [vmem:[#allocation18_spill] sm:$0xff] }
 0xc7e   :  { %v9139_v8 = vmul.f32 0.6931472, %v11747_v59  ;;  %9086 = vadd.xlane.f32.xlu0 %v8966_v33  ;;  %9375 = vst [vmem:[#allocation9 + $0x88] sm:$0xff] %v9311_v53  ;;  %v14319_v27 = vsub.f32 %v14031_v1, %v8713_v25 }
 0xc7f   :  { %v11749_v39 = vpop.eup %11748  ;;  %11756 = vpow2.f32 %v8902_v11 }
 0xc80   :  { %v9248_v2 = vsub.f32 %v14704_v62, %v9139_v8  ;;  %v11751_v35 = vpop.eup %11750  ;;  %v8904_v3 = vmul.f32 1.442695, %v14319_v27  ;;  %v8967_v63 = vsel %vm8525_vm2, %v11749_v39, 0.0 }
 0xc81   :  { %v9141_v52 = vmul.f32 0.6931472, %v11751_v35  ;;  %9088 = vadd.xlane.f32.xlu1 %v8967_v63 }
 0xc82   :  { %v9312_v55 = vsel %vm8525_vm2, %v9248_v2, 0.0  ;;  %11758 = vpow2.f32 %v8904_v3  ;;  %v8715_v46 = vpop.xlane.xlu0 %8714 }
 0xc83   :  { %9376 = vst [vmem:[#allocation9 + $0x90] sm:$0xff] %v9312_v55  ;;  %v9249_v14 = vsub.f32 %v14705_v29, %v9141_v52  ;;  %v14329_v6 = vsub.f32 %v14044_v32, %v8715_v46 }
 0xc84   :  { %v11753_v1 = vpop.eup %11752  ;;  %v8717_v30 = vpop.xlane.xlu1 %8716 }
 0xc85   :  { %v8968_v59 = vsel %vm8525_vm2, %v11753_v1, 0.0  ;;  %v9313_v25 = vsel %vm8525_vm2, %v9249_v14, 0.0  ;;  %v8906_v33 = vmul.f32 1.442695, %v14329_v6  ;;  %v14337_v53 = vsub.f32 %v14054_v49, %v8717_v30 }
 0xc86   :  { %9090 = vadd.xlane.f32.xlu0 %v8968_v59  ;;  %9377 = vst [vmem:[#allocation9 + $0x98] sm:$0xff] %v9313_v25  ;;  %v9015_v8 = vpop.xlane.xlu0 %9014 }
 0xc87   :  { %v11755_v11 = vpop.eup %11754  ;;  %11760 = vpow2.f32 %v8906_v33  ;;  %v8908_v32 = vmul.f32 1.442695, %v14337_v53 }
 0xc88   :  { %11762 = vlog2.f32 %v9015_v8  ;;  %v9017_v39 = vpop.xlane.xlu1 %9016  ;;  %v8969_v62 = vsel %vm8525_vm2, %v11755_v11, 0.0 }
 0xc89   :  { %v11757_v2 = vpop.eup %11756  ;;  %11764 = vpow2.f32 %v8908_v32  ;;  %9092 = vadd.xlane.f32.xlu1 %v8969_v62 }
 0xc8a   :  { %11766 = vlog2.f32 %v9017_v39  ;;  %v9019_v35 = vpop.xlane.xlu0 %9018  ;;  %v8970_v49 = vsel %vm8525_vm2, %v11757_v2, 0.0 }
 0xc8b   :  { %11768 = vlog2.f32 %v9019_v35  ;;  %9094 = vadd.xlane.f32.xlu0 %v8970_v49 }
 0xc8c   :  { %v11759_v3 = vpop.eup %11758  ;;  %v9021_v63 = vpop.xlane.xlu1 %9020 }
 0xc8d   :  { %11770 = vlog2.f32 %v9021_v63  ;;  %v8971_v55 = vsel %vm8525_vm2, %v11759_v3, 0.0 }
 0xc8e   :  { %9096 = vadd.xlane.f32.xlu1 %v8971_v55  ;;  %v9023_v52 = vpop.xlane.xlu0 %9022 }
 0xc8f   :  { %11772 = vlog2.f32 %v9023_v52 }
 0xc90   :  { %v9025_v46 = vpop.xlane.xlu1 %9024 }
 0xc91   :  { %v11761_v1 = vpop.eup %11760  ;;  %11774 = vlog2.f32 %v9025_v46 }
 0xc92   :  { %v11763_v29 = vpop.eup %11762  ;;  %v9027_v14 = vpop.xlane.xlu0 %9026  ;;  %v8972_v30 = vsel %vm8525_vm2, %v11761_v1, 0.0 }
 0xc93   :  { %v11765_v59 = vpop.eup %11764  ;;  %v9143_v25 = vmul.f32 0.6931472, %v11763_v29  ;;  %11776 = vlog2.f32 %v9027_v14  ;;  %9098 = vadd.xlane.f32.xlu0 %v8972_v30 }
 0xc94   :  { %v11767_v33 = vpop.eup %11766  ;;  %v9029_v8 = vpop.xlane.xlu1 %9028  ;;  %v8973_v11 = vsel %vm8525_vm2, %v11765_v59, 0.0 }
 0xc95   :  { %v11769_v32 = vpop.eup %11768  ;;  %v9250_v39 = vsub.f32 %v13985_v21, %v9143_v25  ;;  %v9145_v62 = vmul.f32 0.6931472, %v11767_v33  ;;  %11778 = vlog2.f32 %v9029_v8  ;;  %9100 = vadd.xlane.f32.xlu1 %v8973_v11 }
 0xc96   :  { %v9147_v2 = vmul.f32 0.6931472, %v11769_v32 }
 0xc97   :  { %v11771_v35 = vpop.eup %11770  ;;  %v9314_v49 = vsel %vm8525_vm2, %v9250_v39, 0.0  ;;  %v9251_v3 = vsub.f32 %v13990_v36, %v9145_v62 }
 0xc98   :  { %9378 = vst [vmem:[#allocation9 + $0xa0] sm:$0xff] %v9314_v49  ;;  %v9252_v63 = vsub.f32 %v14000_v34, %v9147_v2  ;;  %v9149_v55 = vmul.f32 0.6931472, %v11771_v35  ;;  %v9031_v52 = vpop.xlane.xlu0 %9030  ;;  %v14706_v34 = vld [vmem:[#allocation22_spill] sm:$0xff] }
 0xc99   :  { %v11773_v46 = vpop.eup %11772  ;;  %v9315_v1 = vsel %vm8525_vm2, %v9251_v3, 0.0  ;;  %11780 = vlog2.f32 %v9031_v52 }
 0xc9a   :  { %9379 = vst [vmem:[#allocation9 + $0xa8] sm:$0xff] %v9315_v1  ;;  %v9316_v21 = vsel %vm8525_vm2, %v9252_v63, 0.0  ;;  %v9253_v29 = vsub.f32 %v14006_v54, %v9149_v55  ;;  %v9151_v14 = vmul.f32 0.6931472, %v11773_v46  ;;  %v9033_v30 = vpop.xlane.xlu1 %9032 }
 0xc9b   :  { %v11775_v59 = vpop.eup %11774  ;;  %9380 = vst [vmem:[#allocation9 + $0xb0] sm:$0xff] %v9316_v21  ;;  %11782 = vlog2.f32 %v9033_v30 }
 0xc9c   :  { %v9317_v36 = vsel %vm8525_vm2, %v9253_v29, 0.0  ;;  %v9254_v25 = vsub.f32 %v14706_v34, %v9151_v14  ;;  %v9153_v33 = vmul.f32 0.6931472, %v11775_v59 }
 0xc9d   :  { %v11777_v8 = vpop.eup %11776  ;;  %9381 = vst [vmem:[#allocation9 + $0xb8] sm:$0xff] %v9317_v36 }
 0xc9e   :  { %v9318_v11 = vsel %vm8525_vm2, %v9254_v25, 0.0  ;;  %v9255_v32 = vsub.f32 %v14026_v51, %v9153_v33  ;;  %v9155_v39 = vmul.f32 0.6931472, %v11777_v8 }
 0xc9f   :  { %v11779_v54 = vpop.eup %11778  ;;  %9382 = vst [vmem:[#allocation9 + $0xc0] sm:$0xff] %v9318_v11 }
 0xca0   :  { %v9319_v62 = vsel %vm8525_vm2, %v9255_v32, 0.0  ;;  %v9256_v2 = vsub.f32 %v14040_v22, %v9155_v39  ;;  %v9157_v35 = vmul.f32 0.6931472, %v11779_v54  ;;  %v9035_v49 = vpop.xlane.xlu0 %9034 }
 0xca1   :  { %9383 = vst [vmem:[#allocation9 + $0xc8] sm:$0xff] %v9319_v62  ;;  %11784 = vlog2.f32 %v9035_v49 }
 0xca2   :  { %v9320_v3 = vsel %vm8525_vm2, %v9256_v2, 0.0  ;;  %v9257_v63 = vsub.f32 %v14049_v58, %v9157_v35  ;;  %v9037_v55 = vpop.xlane.xlu1 %9036 }
 0xca3   :  { %v11781_v52 = vpop.eup %11780  ;;  %9384 = vst [vmem:[#allocation9 + $0xd0] sm:$0xff] %v9320_v3  ;;  %11786 = vlog2.f32 %v9037_v55 }
 0xca4   :  { %v9321_v51 = vsel %vm8525_vm2, %v9257_v63, 0.0  ;;  %v9159_v46 = vmul.f32 0.6931472, %v11781_v52 }
 0xca5   :  { %v11783_v1 = vpop.eup %11782  ;;  %9385 = vst [vmem:[#allocation9 + $0xd8] sm:$0xff] %v9321_v51 }
 0xca6   :  { %v9258_v22 = vsub.f32 %v14063_v38, %v9159_v46  ;;  %v9161_v21 = vmul.f32 0.6931472, %v11783_v1 }
 0xca8   :  { %v9322_v29 = vsel %vm8525_vm2, %v9258_v22, 0.0  ;;  %v9259_v14 = vsub.f32 %v14069_v47, %v9161_v21  ;;  %v9039_v30 = vpop.xlane.xlu0 %9038 }
 0xca9   :  { %9386 = vst [vmem:[#allocation9 + $0xe0] sm:$0xff] %v9322_v29  ;;  %11788 = vlog2.f32 %v9039_v30 }
 0xcaa   :  { %v9323_v58 = vsel %vm8525_vm2, %v9259_v14, 0.0  ;;  %v9041_v59 = vpop.xlane.xlu1 %9040 }
 0xcab   :  { %v11785_v36 = vpop.eup %11784  ;;  %9387 = vst [vmem:[#allocation9 + $0xe8] sm:$0xff] %v9323_v58  ;;  %11790 = vlog2.f32 %v9041_v59 }
 0xcac   :  { %v9163_v34 = vmul.f32 0.6931472, %v11785_v36 }
 0xcad   :  { %v11787_v25 = vpop.eup %11786 }
 0xcae   :  { %v9260_v38 = vsub.f32 %v14079_v56, %v9163_v34  ;;  %v9165_v33 = vmul.f32 0.6931472, %v11787_v25 }
 0xcb0   :  { %v9324_v8 = vsel %vm8525_vm2, %v9260_v38, 0.0  ;;  %v9261_v47 = vsub.f32 %v14085_v23, %v9165_v33  ;;  %v9043_v11 = vpop.xlane.xlu0 %9042 }
 0xcb1   :  { %9388 = vst [vmem:[#allocation9 + $0xf0] sm:$0xff] %v9324_v8  ;;  %11792 = vlog2.f32 %v9043_v11 }
 0xcb2   :  { %v9325_v32 = vsel %vm8525_vm2, %v9261_v47, 0.0  ;;  %v9045_v39 = vpop.xlane.xlu1 %9044 }
 0xcb3   :  { %v11789_v54 = vpop.eup %11788  ;;  %9389 = vst [vmem:[#allocation9 + $0xf8] sm:$0xff] %v9325_v32  ;;  %11794 = vlog2.f32 %v9045_v39 }
 0xcb4   :  { %v9167_v62 = vmul.f32 0.6931472, %v11789_v54 }
 0xcb5   :  { %v11791_v2 = vpop.eup %11790 }
 0xcb6   :  { %v9262_v56 = vsub.f32 %v14093_v17, %v9167_v62  ;;  %v9169_v35 = vmul.f32 0.6931472, %v11791_v2 }
 0xcb8   :  { %v9326_v49 = vsel %vm8525_vm2, %v9262_v56, 0.0  ;;  %v9263_v23 = vsub.f32 %v14099_v57, %v9169_v35  ;;  %v9047_v3 = vpop.xlane.xlu0 %9046 }
 0xcb9   :  { %9390 = vst [vmem:[#allocation9 + $0x100] sm:$0xff] %v9326_v49  ;;  %11796 = vlog2.f32 %v9047_v3 }
 0xcba   :  { %v9327_v63 = vsel %vm8525_vm2, %v9263_v23, 0.0  ;;  %v9049_v55 = vpop.xlane.xlu1 %9048 }
 0xcbb   :  { %v11793_v52 = vpop.eup %11792  ;;  %9391 = vst [vmem:[#allocation9 + $0x108] sm:$0xff] %v9327_v63  ;;  %11798 = vlog2.f32 %v9049_v55 }
 0xcbc   :  { %v9171_v51 = vmul.f32 0.6931472, %v11793_v52 }
 0xcbd   :  { %v11795_v46 = vpop.eup %11794 }
 0xcbe   :  { %v9264_v17 = vsub.f32 %v14105_v0, %v9171_v51  ;;  %v9173_v1 = vmul.f32 0.6931472, %v11795_v46 }
 0xcc0   :  { %v9328_v22 = vsel %vm8525_vm2, %v9264_v17, 0.0  ;;  %v9265_v57 = vsub.f32 %v14111_v45, %v9173_v1  ;;  %v9051_v21 = vpop.xlane.xlu0 %9050 }
 0xcc1   :  { %9392 = vst [vmem:[#allocation9 + $0x110] sm:$0xff] %v9328_v22  ;;  %11800 = vlog2.f32 %v9051_v21 }
 0xcc2   :  { %v9329_v29 = vsel %vm8525_vm2, %v9265_v57, 0.0  ;;  %v9053_v14 = vpop.xlane.xlu1 %9052 }
 0xcc3   :  { %v11797_v30 = vpop.eup %11796  ;;  %9393 = vst [vmem:[#allocation9 + $0x118] sm:$0xff] %v9329_v29  ;;  %11802 = vlog2.f32 %v9053_v14 }
 0xcc4   :  { %v9175_v58 = vmul.f32 0.6931472, %v11797_v30 }
 0xcc5   :  { %v11799_v59 = vpop.eup %11798 }
 0xcc6   :  { %v9266_v0 = vsub.f32 %v14117_v42, %v9175_v58  ;;  %v9177_v36 = vmul.f32 0.6931472, %v11799_v59 }
 0xcc8   :  { %v9330_v34 = vsel %vm8525_vm2, %v9266_v0, 0.0  ;;  %v9267_v45 = vsub.f32 %v14123_v50, %v9177_v36 }
 0xcc9   :  { %9394 = vst [vmem:[#allocation9 + $0x120] sm:$0xff] %v9330_v34 }
 0xcca   :  { %v9331_v25 = vsel %vm8525_vm2, %v9267_v45, 0.0  ;;  %v9055_v38 = vpop.xlane.xlu0 %9054 }
 0xccb   :  { %v11801_v33 = vpop.eup %11800  ;;  %9395 = vst [vmem:[#allocation9 + $0x128] sm:$0xff] %v9331_v25  ;;  %11804 = vlog2.f32 %v9055_v38 }
 0xccc   :  { %v9179_v8 = vmul.f32 0.6931472, %v11801_v33 }
 0xccd   :  { %v11803_v47 = vpop.eup %11802 }
 0xcce   :  { %v9268_v11 = vsub.f32 %v14129_v26, %v9179_v8  ;;  %v9181_v32 = vmul.f32 0.6931472, %v11803_v47  ;;  %v9057_v42 = vpop.xlane.xlu1 %9056 }
 0xccf   :  { %11806 = vlog2.f32 %v9057_v42 }
 0xcd0   :  { %v9332_v39 = vsel %vm8525_vm2, %v9268_v11, 0.0  ;;  %v9269_v50 = vsub.f32 %v14135_v41, %v9181_v32 }
 0xcd1   :  { %9396 = vst [vmem:[#allocation9 + $0x130] sm:$0xff] %v9332_v39 }
 0xcd2   :  { %v9333_v54 = vsel %vm8525_vm2, %v9269_v50, 0.0 }
 0xcd3   :  { %v9059_v62 = vpop.xlane.xlu0 %9058  ;;  %9397 = vst [vmem:[#allocation9 + $0x138] sm:$0xff] %v9333_v54 }
 0xcd4   :  { %11808 = vlog2.f32 %v9059_v62 }
 0xcd5   :  { %v11805_v2 = vpop.eup %11804 }
 0xcd6   :  { %v9183_v56 = vmul.f32 0.6931472, %v11805_v2  ;;  %v9061_v35 = vpop.xlane.xlu1 %9060 }
 0xcd7   :  { %11810 = vlog2.f32 %v9061_v35 }
 0xcd8   :  { %v9270_v26 = vsub.f32 %v14143_v24, %v9183_v56 }
 0xcd9   :  { %v11807_v49 = vpop.eup %11806 }
 0xcda   :  { %v9334_v23 = vsel %vm8525_vm2, %v9270_v26, 0.0  ;;  %v9185_v3 = vmul.f32 0.6931472, %v11807_v49 }
 0xcdb   :  { %v9063_v63 = vpop.xlane.xlu0 %9062  ;;  %9398 = vst [vmem:[#allocation9 + $0x140] sm:$0xff] %v9334_v23 }
 0xcdc   :  { %11812 = vlog2.f32 %v9063_v63  ;;  %v9271_v41 = vsub.f32 %v14147_v4, %v9185_v3 }
 0xcde   :  { %v11809_v55 = vpop.eup %11808  ;;  %v9335_v52 = vsel %vm8525_vm2, %v9271_v41, 0.0  ;;  %v9065_v46 = vpop.xlane.xlu1 %9064 }
 0xcdf   :  { %v9187_v51 = vmul.f32 0.6931472, %v11809_v55  ;;  %9399 = vst [vmem:[#allocation9 + $0x148] sm:$0xff] %v9335_v52  ;;  %11814 = vlog2.f32 %v9065_v46 }
 0xce1   :  { %v9272_v24 = vsub.f32 %v14155_v18, %v9187_v51  ;;  %v11811_v17 = vpop.eup %11810 }
 0xce2   :  { %v9189_v22 = vmul.f32 0.6931472, %v11811_v17 }
 0xce3   :  { %v9336_v1 = vsel %vm8525_vm2, %v9272_v24, 0.0  ;;  %v9067_v57 = vpop.xlane.xlu0 %9066 }
 0xce4   :  { %9400 = vst [vmem:[#allocation9 + $0x150] sm:$0xff] %v9336_v1  ;;  %11816 = vlog2.f32 %v9067_v57  ;;  %v9273_v4 = vsub.f32 %v14162_v16, %v9189_v22 }
 0xce6   :  { %v11813_v21 = vpop.eup %11812  ;;  %v9337_v29 = vsel %vm8525_vm2, %v9273_v4, 0.0  ;;  %v9069_v30 = vpop.xlane.xlu1 %9068 }
 0xce7   :  { %v9191_v14 = vmul.f32 0.6931472, %v11813_v21  ;;  %9401 = vst [vmem:[#allocation9 + $0x158] sm:$0xff] %v9337_v29  ;;  %11818 = vlog2.f32 %v9069_v30 }
 0xce9   :  { %v9274_v18 = vsub.f32 %v14171_v40, %v9191_v14  ;;  %v11815_v58 = vpop.eup %11814 }
 0xcea   :  { %v9193_v0 = vmul.f32 0.6931472, %v11815_v58 }
 0xceb   :  { %v9338_v59 = vsel %vm8525_vm2, %v9274_v18, 0.0  ;;  %v9071_v36 = vpop.xlane.xlu0 %9070 }
 0xcec   :  { %9402 = vst [vmem:[#allocation9 + $0x160] sm:$0xff] %v9338_v59  ;;  %11820 = vlog2.f32 %v9071_v36  ;;  %v9275_v16 = vsub.f32 %v14180_v9, %v9193_v0 }
 0xcee   :  { %v11817_v34 = vpop.eup %11816  ;;  %v9339_v45 = vsel %vm8525_vm2, %v9275_v16, 0.0  ;;  %v9073_v38 = vpop.xlane.xlu1 %9072 }
 0xcef   :  { %v9195_v25 = vmul.f32 0.6931472, %v11817_v34  ;;  %9403 = vst [vmem:[#allocation9 + $0x168] sm:$0xff] %v9339_v45  ;;  %11822 = vlog2.f32 %v9073_v38 }
 0xcf1   :  { %v9276_v40 = vsub.f32 %v14189_v19, %v9195_v25  ;;  %v11819_v33 = vpop.eup %11818 }
 0xcf2   :  { %v9197_v47 = vmul.f32 0.6931472, %v11819_v33 }
 0xcf3   :  { %v9340_v8 = vsel %vm8525_vm2, %v9276_v40, 0.0  ;;  %v9075_v11 = vpop.xlane.xlu0 %9074 }
 0xcf4   :  { %9404 = vst [vmem:[#allocation9 + $0x170] sm:$0xff] %v9340_v8  ;;  %11824 = vlog2.f32 %v9075_v11  ;;  %v9277_v9 = vsub.f32 %v14198_v37, %v9197_v47 }
 0xcf6   :  { %v11821_v32 = vpop.eup %11820  ;;  %v9341_v42 = vsel %vm8525_vm2, %v9277_v9, 0.0  ;;  %v9077_v50 = vpop.xlane.xlu1 %9076 }
 0xcf7   :  { %v9199_v39 = vmul.f32 0.6931472, %v11821_v32  ;;  %9405 = vst [vmem:[#allocation9 + $0x178] sm:$0xff] %v9341_v42  ;;  %11826 = vlog2.f32 %v9077_v50 }
 0xcf9   :  { %v9278_v19 = vsub.f32 %v14207_v43, %v9199_v39  ;;  %v11823_v54 = vpop.eup %11822 }
 0xcfa   :  { %v9201_v2 = vmul.f32 0.6931472, %v11823_v54 }
 0xcfb   :  { %v9342_v62 = vsel %vm8525_vm2, %v9278_v19, 0.0  ;;  %v9079_v56 = vpop.xlane.xlu0 %9078 }
 0xcfc   :  { %9406 = vst [vmem:[#allocation9 + $0x180] sm:$0xff] %v9342_v62  ;;  %11828 = vlog2.f32 %v9079_v56  ;;  %v9279_v37 = vsub.f32 %v14216_v60, %v9201_v2 }
 0xcfe   :  { %v11825_v35 = vpop.eup %11824  ;;  %v9343_v26 = vsel %vm8525_vm2, %v9279_v37, 0.0  ;;  %v9081_v23 = vpop.xlane.xlu1 %9080 }
 0xcff   :  { %v9203_v49 = vmul.f32 0.6931472, %v11825_v35  ;;  %9407 = vst [vmem:[#allocation9 + $0x188] sm:$0xff] %v9343_v26  ;;  %11830 = vlog2.f32 %v9081_v23 }
 0xd01   :  { %v9280_v43 = vsub.f32 %v14225_v61, %v9203_v49  ;;  %v11827_v3 = vpop.eup %11826 }
 0xd02   :  { %v9205_v41 = vmul.f32 0.6931472, %v11827_v3 }
 0xd03   :  { %v9344_v63 = vsel %vm8525_vm2, %v9280_v43, 0.0  ;;  %v9083_v55 = vpop.xlane.xlu0 %9082 }
 0xd04   :  { %9408 = vst [vmem:[#allocation9 + $0x190] sm:$0xff] %v9344_v63  ;;  %11832 = vlog2.f32 %v9083_v55  ;;  %v9281_v60 = vsub.f32 %v14234_v7, %v9205_v41 }
 0xd06   :  { %v11829_v52 = vpop.eup %11828  ;;  %v9345_v51 = vsel %vm8525_vm2, %v9281_v60, 0.0  ;;  %v9085_v24 = vpop.xlane.xlu1 %9084 }
 0xd07   :  { %v9207_v46 = vmul.f32 0.6931472, %v11829_v52  ;;  %9409 = vst [vmem:[#allocation9 + $0x198] sm:$0xff] %v9345_v51  ;;  %11834 = vlog2.f32 %v9085_v24 }
 0xd09   :  { %v9282_v61 = vsub.f32 %v14243_v48, %v9207_v46  ;;  %v11831_v17 = vpop.eup %11830 }
 0xd0a   :  { %v9209_v22 = vmul.f32 0.6931472, %v11831_v17 }
 0xd0b   :  { %v9346_v1 = vsel %vm8525_vm2, %v9282_v61, 0.0  ;;  %v9087_v57 = vpop.xlane.xlu0 %9086 }
 0xd0c   :  { %9410 = vst [vmem:[#allocation9 + $0x1a0] sm:$0xff] %v9346_v1  ;;  %11836 = vlog2.f32 %v9087_v57  ;;  %v9283_v7 = vsub.f32 %v14252_v15, %v9209_v22 }
 0xd0e   :  { %v11833_v4 = vpop.eup %11832  ;;  %v9347_v21 = vsel %vm8525_vm2, %v9283_v7, 0.0  ;;  %v9089_v14 = vpop.xlane.xlu1 %9088 }
 0xd0f   :  { %v9211_v29 = vmul.f32 0.6931472, %v11833_v4  ;;  %9411 = vst [vmem:[#allocation9 + $0x1a8] sm:$0xff] %v9347_v21  ;;  %11838 = vlog2.f32 %v9089_v14 }
 0xd11   :  { %v9284_v48 = vsub.f32 %v14261_v5, %v9211_v29  ;;  %v11835_v30 = vpop.eup %11834 }
 0xd12   :  { %v9213_v58 = vmul.f32 0.6931472, %v11835_v30 }
 0xd13   :  { %v9348_v18 = vsel %vm8525_vm2, %v9284_v48, 0.0  ;;  %v9091_v59 = vpop.xlane.xlu0 %9090 }
 0xd14   :  { %9412 = vst [vmem:[#allocation9 + $0x1b0] sm:$0xff] %v9348_v18  ;;  %11840 = vlog2.f32 %v9091_v59  ;;  %v9285_v15 = vsub.f32 %v14270_v28, %v9213_v58 }
 0xd16   :  { %v11837_v0 = vpop.eup %11836  ;;  %v9349_v36 = vsel %vm8525_vm2, %v9285_v15, 0.0  ;;  %v9093_v34 = vpop.xlane.xlu1 %9092 }
 0xd17   :  { %v9215_v16 = vmul.f32 0.6931472, %v11837_v0  ;;  %9413 = vst [vmem:[#allocation9 + $0x1b8] sm:$0xff] %v9349_v36  ;;  %11842 = vlog2.f32 %v9093_v34 }
 0xd18   :  { %v9095_v45 = vpop.xlane.xlu0 %9094 }
 0xd19   :  { %v9286_v5 = vsub.f32 %v14279_v12, %v9215_v16  ;;  %v11839_v25 = vpop.eup %11838  ;;  %11844 = vlog2.f32 %v9095_v45 }
 0xd1a   :  { %v9217_v40 = vmul.f32 0.6931472, %v11839_v25 }
 0xd1b   :  { %v9350_v38 = vsel %vm8525_vm2, %v9286_v5, 0.0  ;;  %v9097_v33 = vpop.xlane.xlu1 %9096 }
 0xd1c   :  { %9414 = vst [vmem:[#allocation9 + $0x1c0] sm:$0xff] %v9350_v38  ;;  %v9287_v28 = vsub.f32 %v14288_v13, %v9217_v40  ;;  %11846 = vlog2.f32 %v9097_v33 }
 0xd1e   :  { %v11841_v8 = vpop.eup %11840  ;;  %v9351_v47 = vsel %vm8525_vm2, %v9287_v28, 0.0 }
 0xd1f   :  { %v9219_v11 = vmul.f32 0.6931472, %v11841_v8  ;;  %9415 = vst [vmem:[#allocation9 + $0x1c8] sm:$0xff] %v9351_v47 }
 0xd20   :  { %v9099_v9 = vpop.xlane.xlu0 %9098 }
 0xd21   :  { %v9288_v12 = vsub.f32 %v14297_v44, %v9219_v11  ;;  %v11843_v32 = vpop.eup %11842  ;;  %11848 = vlog2.f32 %v9099_v9 }
 0xd22   :  { %v9221_v39 = vmul.f32 0.6931472, %v11843_v32  ;;  %v9101_v50 = vpop.xlane.xlu1 %9100 }
 0xd23   :  { %v9352_v42 = vsel %vm8525_vm2, %v9288_v12, 0.0  ;;  %v11845_v19 = vpop.eup %11844  ;;  %11850 = vlog2.f32 %v9101_v50 }
 0xd24   :  { %9416 = vst [vmem:[#allocation9 + $0x1d0] sm:$0xff] %v9352_v42  ;;  %v9289_v13 = vsub.f32 %v14306_v31, %v9221_v39  ;;  %v9223_v54 = vmul.f32 0.6931472, %v11845_v19 }
 0xd26   :  { %v11847_v62 = vpop.eup %11846  ;;  %v9353_v2 = vsel %vm8525_vm2, %v9289_v13, 0.0  ;;  %v9290_v44 = vsub.f32 %v14311_v20, %v9223_v54 }
 0xd27   :  { %9417 = vst [vmem:[#allocation9 + $0x1d8] sm:$0xff] %v9353_v2  ;;  %v9225_v56 = vmul.f32 0.6931472, %v11847_v62 }
 0xd28   :  { %v9354_v37 = vsel %vm8525_vm2, %v9290_v44, 0.0 }
 0xd29   :  { %9418 = vst [vmem:[#allocation9 + $0x1e0] sm:$0xff] %v9354_v37  ;;  %v9291_v35 = vsub.f32 %v14319_v27, %v9225_v56 }
 0xd2b   :  { %v11849_v26 = vpop.eup %11848  ;;  %v9355_v49 = vsel %vm8525_vm2, %v9291_v35, 0.0 }
 0xd2c   :  { %9419 = vst [vmem:[#allocation9 + $0x1e8] sm:$0xff] %v9355_v49  ;;  %v9227_v31 = vmul.f32 0.6931472, %v11849_v26 }
 0xd2d   :  { %v11851_v23 = vpop.eup %11850 }
 0xd2e   :  { %v9292_v43 = vsub.f32 %v14329_v6, %v9227_v31  ;;  %v9229_v3 = vmul.f32 0.6931472, %v11851_v23 }
 0xd30   :  { %v9356_v20 = vsel %vm8525_vm2, %v9292_v43, 0.0  ;;  %v9293_v63 = vsub.f32 %v14337_v53, %v9229_v3 }
 0xd31   :  { %9420 = vst [vmem:[#allocation9 + $0x1f0] sm:$0xff] %v9356_v20 }
 0xd32   :  { %v9357_v27 = vsel %vm8525_vm2, %v9293_v63, 0.0 }
 0xd33   :  { %9421 = vst [vmem:[#allocation9 + $0x1f8] sm:$0xff] %v9357_v27 }
 0xd34   :  { %11897 = shalt.err (!%p11894_p3)
}
 0xd35   :  { %s11898_s25 = scalar_lea.hbm %s14501_s7, 8192 }
 0xd36   :  { %p11899_p4 = scmp.ne.s32.totalorder %s14501_s7, %s11898_s25  ;;  %p11902_p5 = scmp.lt.u32.totalorder %s11898_s25, %s14501_s7 }
 0xd38   :  { %p11904_p6 = pnand %p11902_p5, %p11899_p4 }
 0xd3a   :  { %11907 = shalt.err (!%p11904_p6)
}
 0xd3b   :  { %s11920_s30 = smov 128   ;;  %s11921_s8 = smov 8  }
 0xd3c   :  { %9433 = dma.vmem_to_hbm [thread:$0]  %s9428_s23, 8192, %s14501_s7, [#allocation6], %s11920_s30, %s11920_s30, %s11921_s8  }
 0xd3d   :  { %11912 = dma.done.wait [#allocation6], 8192  }
 0xd3e   :  { %11913 = vsyncadd [#allocation6], 4294959104 }
 0xd3f   :  { %9437 = vsyncpa [#allocation5], 1 }
 0xd40   :  { %9438 = vsyncpa [#allocation6], 1 }
 0xd41   :  { %9439 = vsyncpa [#allocation7], 1 }

</bundles_post_ra>
